<compile_context>
chip_gen: v7x
topology: tpu7x:2x2x1
jax: 0.10.0
libtpu: 0.0.40
codegen_flags: <defaults>
</compile_context>

<pallas_src>
import functools

import numpy as np
import jax
import jax.numpy as jnp
from jax import lax
from jax.experimental import pallas as pl
from jax.experimental.pallas import tpu as pltpu

# ----------------------------- model dimensions ------------------------------
IMG = 64                  # input image H = W (stands in for 224)
H14, W14 = 4, 4           # "14x14" stage (IMG / 16)
H7, W7 = 2, 2             # "7x7"  stage (IMG / 32)
HW14 = H14 * W14
HW7 = H7 * W7
C14, C7 = 16, 32          # stub-backbone feature channels (136 / 384 in Eff_b3)
D14, D7 = 64, 128         # adap_conv14 / adap_conv7 output channels (1024 / 2048)
M = 8                     # config.attention_map_num
CLS = 5                   # config.class_num
BN_EPS = 1e-3
LEAKY_SLOPE = 0.01
LANE = 128                # lane-dense padding target for small output channel dims


# --------------------------- fused encoder kernel ----------------------------
def _fused_kernel(with_en):
    """One grid step = one batch element of the whole effiEncoder forward
    (stem projections, adap_conv14/7, attention module, WSLL + conv1d, cls head
    and -- on the 2nd pass -- the en_fc head).  Only lane-dense outputs are stored."""

    def kernel(ximg_ref, pool14_ref, pool7_ref, pool2_ref,
               w_s14_ref, b_s14_ref, w_s7_ref, b_s7_ref,
               w_a14_ref, b_a14_ref, w_a7_ref, b_a7_ref,
               w_tex_ref, w_sem_ref, w_1d_ref, b_1d_ref,
               w_cls_ref, b_cls_ref, *rest):
        if with_en:
            (fm_prev_ref, w_en1_ref, w_en2_ref, b_en_ref,
             att_ref, fm_ref, cls_ref, en_ref) = rest
        else:
            att_ref, fm_ref, cls_ref = rest

        bf16 = jnp.bfloat16
        # bf16 MXU operands (weights pre-cast in prepare_params), f32 accumulation.
        dot = lambda a, b: jnp.dot(a.astype(bf16), b.astype(bf16),
                                   preferred_element_type=jnp.float32)
        relu = lambda v: jnp.maximum(v, 0.0)
        leaky = lambda v: jnp.maximum(v, LEAKY_SLOPE * v)       # slope in (0, 1)

        # TODO(synk): deterministic patch-average stem + 1x1 projections stand in for
        # the timm 'tf_efficientnet_b3' features_only backbone (no clean Pallas port).
        ximg = ximg_ref[0]                                      # [IMG*IMG, 3] f32
        p14 = dot(pool14_ref[...], ximg)                        # [HW14, 3]
        p7 = dot(pool7_ref[...], ximg)                          # [HW7,  3]
        f14 = relu(dot(p14, w_s14_ref[...]) + b_s14_ref[...])   # [HW14, C14]
        f7 = relu(dot(p7, w_s7_ref[...]) + b_s7_ref[...])       # [HW7,  C7]

        # adap_conv14 / adap_conv7 (1x1 conv with bias, no activation)
        f14p = dot(f14, w_a14_ref[...]) + b_a14_ref[...]        # [HW14, D14]
        f7p = dot(f7, w_a7_ref[...]) + b_a7_ref[...]            # [HW7,  D7]

        # Multi_Stage_Attention_Module (BN scale folded into w_tex/w_sem); the 2x2
        # AvgPool of the texture map is the batch-free [HW7, HW14] pooling matmul.
        tex = relu(dot(f14p, w_tex_ref[...]))                   # [HW14, LANE]
        sem = relu(dot(f7p, w_sem_ref[...]))                    # [HW7,  LANE]
        att = sem + dot(pool2_ref[...], tex)                    # [HW7,  LANE] f32
        att_ref[0] = att

        # WSLL GAP + Conv1d over the M axis, reassociated and folded:
        #   fm[d] = sum_hw (sum_m att[hw,m] * w1d[m] / HW) * f7p[hw,d] + b1d
        # The per-row scale a[hw] is contracted directly against f7p over HW7
        # (a^T @ f7p on the MXU): no [HW, D7] broadcast temporary, no dense bsum.
        a = jnp.sum(att * w_1d_ref[...], axis=-1, keepdims=True)          # [HW7, 1]
        fm = lax.dot_general(a.astype(bf16), f7p.astype(bf16),
                             (((0,), (0,)), ((), ())),
                             preferred_element_type=jnp.float32)
        fm = fm + b_1d_ref[...]                                            # [1, D7]
        fm_ref[0] = fm

        # cls_head = Sequential(LeakyReLU, Linear(D7 -> CLS))  (weights lane-padded)
        lfm = leaky(fm)
        cls_ref[0] = dot(lfm, w_cls_ref[...]) + b_cls_ref[...]

        if with_en:
            # en_fc = Sequential(LeakyReLU, Linear(2*D7 -> CLS)) on concat(fm1, fm2);
            # the concat is split into two matmuls (LeakyReLU is elementwise).
            en_ref[0] = (dot(leaky(fm_prev_ref[0]), w_en1_ref[...])
                         + dot(lfm, w_en2_ref[...]) + b_en_ref[...])
    return kernel


_WEIGHT_NAMES = ("pool14", "pool7", "pool2",
                 "w_s14", "b_s14", "w_s7", "b_s7",
                 "w_a14", "b_a14", "w_a7", "b_a7",
                 "w_tex", "w_sem", "w_1d", "b_1d",
                 "w_cls", "b_cls")
_EN_WEIGHT_NAMES = ("w_en1", "w_en2", "b_en")


def _resident_spec(arr):
    # Full-array block with the SAME (0, 0) block index on every grid step: the
    # weight is DMA'd once and stays resident in VMEM across the batch grid.
    return pl.BlockSpec(arr.shape, lambda b: (0, 0))


def fused_encoder_call(prep, ximg, fm_prev=None):
    """Whole encoder pass as one pallas_call gridded over the batch axis.

    ximg: [B, IMG*IMG, 3] float32 channels-last flattened image."""
    with_en = fm_prev is not None
    B = ximg.shape[0]

    args = [ximg] + [prep[n] for n in _WEIGHT_NAMES]
    in_specs = ([pl.BlockSpec((1, IMG * IMG, 3), lambda b: (b, 0, 0))]
                + [_resident_spec(prep[n]) for n in _WEIGHT_NAMES])

    out_shapes = [
        jax.ShapeDtypeStruct((B, HW7, LANE), jnp.float32),    # attention maps (lane-padded)
        jax.ShapeDtypeStruct((B, 1, D7), jnp.float32),        # feature matrix
        jax.ShapeDtypeStruct((B, 1, LANE), jnp.float32),      # cls logits (lane-padded)
    ]
    out_specs = [
        pl.BlockSpec((1, HW7, LANE), lambda b: (b, 0, 0)),
        pl.BlockSpec((1, 1, D7), lambda b: (b, 0, 0)),
        pl.BlockSpec((1, 1, LANE), lambda b: (b, 0, 0)),
    ]
    if with_en:
        args += [fm_prev[:, None, :]] + [prep[n] for n in _EN_WEIGHT_NAMES]
        in_specs += ([pl.BlockSpec((1, 1, D7), lambda b: (b, 0, 0))]
                     + [_resident_spec(prep[n]) for n in _EN_WEIGHT_NAMES])
        out_shapes.append(jax.ShapeDtypeStruct((B, 1, LANE), jnp.float32))
        out_specs.append(pl.BlockSpec((1, 1, LANE), lambda b: (b, 0, 0)))

    # NOTE(prod): at production scale (D14=1024, D7=2048, HW7=49, HW14=196) keep this
    # structure but widen the batch tile (B_blk >= 6 rows per matmul) and re-derive
    # vmem_limit_bytes per generation (~100 MB of v5e/v6e's 128 MiB, <= 48 MB of
    # v7x's 64 MiB).  At toy dims the whole working set is < 1 MB, so 16 MiB is ample.
    return pl.pallas_call(
        _fused_kernel(with_en),
        grid=(B,),
        out_shape=tuple(out_shapes),
        in_specs=in_specs,
        out_specs=tuple(out_specs),
        compiler_params=pltpu.CompilerParams(
            dimension_semantics=("parallel",),
            vmem_limit_bytes=16 * 1024 * 1024,
        ),
    )(*args)


# -------------------------- parameter preparation ----------------------------
def _stem_pool_mats():
    """Batch-free constant pooling matrices.

    pool14 [HW14, IMG*IMG] / pool7 [HW7, IMG*IMG]: patch-average of the channels-last
    image down to the 14-/7-scale grids (stub backbone stem, done in-kernel).
    pool2  [HW7, HW14]: the Multi_Stage_Attention_Module 2x2 AvgPool as a matmul.
    All values (1/256, 1/1024, 0.25) are exactly representable in bf16."""
    def patch_pool(h_out, w_out):
        ph, pw = IMG // h_out, IMG // w_out
        mat = np.zeros((h_out * w_out, IMG * IMG), np.float32)
        for ho in range(h_out):
            for wo in range(w_out):
                q = ho * w_out + wo
                for dh in range(ph):
                    for dw in range(pw):
                        mat[q, (ho * ph + dh) * IMG + (wo * pw + dw)] = 1.0 / (ph * pw)
        return mat

    pool2 = np.zeros((HW7, HW14), np.float32)
    for ho in range(H7):
        for wo in range(W7):
            q = ho * W7 + wo
            for dh in range(2):
                for dw in range(2):
                    pool2[q, (2 * ho + dh) * W14 + (2 * wo + dw)] = 0.25
    return patch_pool(H14, W14), patch_pool(H7, W7), pool2


def prepare_params(params):
    """Fold BN scale / GAP factor / conv1d weight, pre-cast MXU operands to bf16
    (done once, not per call), lane-pad narrow output weights.  Batch-independent."""
    inv_std = (1.0 + BN_EPS) ** -0.5   # BN running mean=0, var=1, gamma=1, beta=0 (init)
    pool14, pool7, pool2 = _stem_pool_mats()
    bf = lambda w: jnp.asarray(w).astype(jnp.bfloat16)        # MXU operands
    pad_c = lambda w: jnp.pad(w, ((0, 0), (0, LANE - w.shape[1])))
    row = lambda v: v.reshape(1, -1)                           # biases stay f32 (VPU adds)
    return {
        "pool14": bf(pool14), "pool7": bf(pool7), "pool2": bf(pool2),
        "w_s14": bf(params["w_stem14"]), "b_s14": row(params["b_stem14"]),
        "w_s7": bf(params["w_stem7"]), "b_s7": row(params["b_stem7"]),
        "w_a14": bf(params["w_adap14"]), "b_a14": row(params["b_adap14"]),
        "w_a7": bf(params["w_adap7"]), "b_a7": row(params["b_adap7"]),
        "w_tex": bf(pad_c(params["w_att_tex"] * inv_std)),    # BN folded, lane-padded
        "w_sem": bf(pad_c(params["w_att_sem"] * inv_std)),
        "w_1d": pad_c(params["w_1d"] / float(HW7)),            # f32 (elementwise use)
        "b_1d": jnp.broadcast_to(params["b_1d"].reshape(1, 1), (1, D7)).astype(jnp.float32),
        "w_cls": bf(pad_c(params["w_cls"])),
        "b_cls": row(jnp.pad(params["b_cls"], (0, LANE - CLS))),
        "w_en1": bf(pad_c(params["w_en"][:D7])),
        "w_en2": bf(pad_c(params["w_en"][D7:])),
        "b_en": row(jnp.pad(params["b_en"], (0, LANE - CLS))),
    }


# --------------- bilinear resize as interpolation matmuls (XLA glue) ---------
def _interp_weights(start, crop, src_size, out_size):
    """Bilinear interpolation matrix W[out_size, src_size] resampling
    src[start:start+crop] to out_size points (PyTorch F.interpolate,
    mode='bilinear', align_corners=False).  start / crop may be traced scalars."""
    start_f = jnp.asarray(start).astype(jnp.float32)
    crop_f = jnp.asarray(crop).astype(jnp.float32)
    d = jnp.arange(out_size, dtype=jnp.float32)
    s = jnp.maximum((d + 0.5) * (crop_f / float(out_size)) - 0.5, 0.0)
    i0 = jnp.floor(s)
    i1 = jnp.minimum(i0 + 1.0, crop_f - 1.0)
    w1 = s - i0
    a0 = start_f + i0
    a1 = start_f + i1
    src = jnp.arange(src_size, dtype=jnp.float32)[None, :]
    return ((1.0 - w1)[:, None] * (src == a0[:, None]).astype(jnp.float32)
            + w1[:, None] * (src == a1[:, None]).astype(jnp.float32))


def gen_zoom_in(images_nhwc, atten_maps, att_thres_theta=0.5, padding_ratio=0.1):
    """gen_Zoom_in on channels-last images: threshold the upsampled mean attention
    map, bounding box (+pad), crop + bilinear resize back to full resolution.
    Gathers are replaced by interpolation matmuls; the data-dependent box stays in
    XLA.  The crop upper bound is exclusive (h_max / w_max), matching the PyTorch
    reference slicing images[..., H_min:H_max, W_min:W_max]."""
    B, imgH, imgW, _ = images_nhwc.shape
    ah, aw = atten_maps.shape[-2], atten_maps.shape[-1]
    wy_a = _interp_weights(0, ah, ah, imgH)     # [imgH, ah] (static)
    wx_a = _interp_weights(0, aw, aw, imgW)     # [imgW, aw]

    def per_batch(img, amap):
        theta = att_thres_theta * amap.max()
        up = wy_a @ amap @ wx_a.T               # bilinear upsample as matmuls
        mask = up >= theta
        row_any = jnp.any(mask, axis=1)
        col_any = jnp.any(mask, axis=0)
        has_any = jnp.any(row_any)
        cy, cx = imgH // 2, imgW // 2           # except-branch fallback: center pixel

        def bounds(any_vec, n, c):
            lo = jnp.argmax(any_vec)
            hi = n - 1 - jnp.argmax(any_vec[::-1])
            return jnp.where(has_any, lo, c), jnp.where(has_any, hi, c)

        hlo, hhi = bounds(row_any, imgH, cy)
        wlo, whi = bounds(col_any, imgW, cx)
        h_min = jnp.maximum(jnp.floor(hlo - padding_ratio * imgH).astype(jnp.int32), 0)
        h_max = jnp.minimum(jnp.floor(hhi + padding_ratio * imgH).astype(jnp.int32), imgH - 1)
        w_min = jnp.maximum(jnp.floor(wlo - padding_ratio * imgW).astype(jnp.int32), 0)
        w_max = jnp.minimum(jnp.floor(whi + padding_ratio * imgW).astype(jnp.int32), imgW - 1)
        wy = _interp_weights(h_min, h_max - h_min, imgH, imgH)   # [imgH, imgH]
        wx = _interp_weights(w_min, w_max - w_min, imgW, imgW)   # [imgW, imgW]
        # crop + resize == Wy @ img @ Wx^T per channel, output channels-last
        return jnp.einsum('ih,hwc,jw->ijc', wy, img, wx)

    return jax.vmap(per_batch)(images_nhwc, atten_maps)


# ----------------------------- effiEncoder path -------------------------------
def eff_back_forward(prep, x_nhwc, fm_prev=None):
    """effiEncoder.forward(x, return_cls_feat=True): one fused, batch-gridded pallas_call."""
    B = x_nhwc.shape[0]
    ximg = x_nhwc.reshape(B, IMG * IMG, 3)                     # channels-last, flat spatial
    outs = fused_encoder_call(prep, ximg, fm_prev)
    if fm_prev is None:
        att_pad, fm3, cls_pad = outs
        en_pred = None
    else:
        att_pad, fm3, cls_pad, en_pad = outs
        en_pred = en_pad[:, 0, :CLS]
    fm = fm3[:, 0, :]                                           # [B, D7]
    cls_pred = cls_pad[:, 0, :CLS]                              # [B, CLS]
    att_nchw = att_pad[:, :, :M].reshape(B, H7, W7, M).transpose(0, 3, 1, 2)
    return cls_pred, att_nchw, fm, en_pred


def effi_zoomin_forward(params, x, zoom_in=True):
    prep = prepare_params(params)
    x_nhwc = jnp.transpose(x, (0, 2, 3, 1)).astype(jnp.float32)  # single NCHW->NHWC relayout
    cls_pred, att_maps, fm, _ = eff_back_forward(prep, x_nhwc)
    if not zoom_in:
        return cls_pred, att_maps, fm
    atten = jnp.mean(att_maps, axis=1)                           # [B, H7, W7]
    crop_nhwc = gen_zoom_in(x_nhwc, atten)                       # [B, IMG, IMG, 3]
    cls_pred2, att_maps2, fm2, en_pred = eff_back_forward(prep, crop_nhwc, fm_prev=fm)
    return cls_pred, att_maps, fm, cls_pred2, att_maps2, fm2, en_pred


# ----------------------------- parameter init --------------------------------
def init_params(key):
    ks = jax.random.split(key, 12)
    n = lambda k, shape, std: std * jax.random.normal(k, shape, dtype=jnp.float32)
    return {
        "w_stem14": n(ks[0], (3, C14), 0.1),  "b_stem14": jnp.zeros((C14,), jnp.float32),
        "w_stem7":  n(ks[1], (3, C7), 0.1),   "b_stem7":  jnp.zeros((C7,), jnp.float32),
        "w_adap14": n(ks[2], (C14, D14), 0.1), "b_adap14": n(ks[3], (D14,), 0.02),
        "w_adap7":  n(ks[4], (C7, D7), 0.1),   "b_adap7":  n(ks[5], (D7,), 0.02),
        "w_att_tex": n(ks[6], (D14, M), 0.02),  # attention_texture conv (no bias, BN folded)
        "w_att_sem": n(ks[7], (D7, M), 0.02),   # attention_semantic conv
        "w_1d": n(ks[8], (1, M), 0.1), "b_1d": n(ks[9], (1, 1), 0.02),
        "w_cls": n(ks[10], (D7, CLS), 0.02), "b_cls": jnp.zeros((CLS,), jnp.float32),
        "w_en":  n(ks[11], (2 * D7, CLS), 0.02), "b_en": jnp.zeros((CLS,), jnp.float32),
    }


if __name__ == "__main__":
    key = jax.random.PRNGKey(0)
    kx, kp = jax.random.split(key)
    x = jax.random.normal(kx, (2, 3, IMG, IMG), dtype=jnp.float32)
    params = init_params(kp)

    fwd = jax.jit(functools.partial(effi_zoomin_forward, zoom_in=True))
    outs = jax.block_until_ready(fwd(params, x))

    cls_pred, att_maps, fm, cls_pred2, att_maps2, fm2, en_pred = outs
    assert cls_pred.shape == (2, CLS)
    assert att_maps.shape == (2, M, H7, W7)
    assert fm.shape == (2, D7)
    assert cls_pred2.shape == (2, CLS)
    assert att_maps2.shape == (2, M, H7, W7)
    assert fm2.shape == (2, D7)
    assert en_pred.shape == (2, CLS)
    assert all(bool(jnp.all(jnp.isfinite(o))) for o in
               (cls_pred, att_maps, fm, cls_pred2, att_maps2, fm2, en_pred))
    print("KERNEL_OK")
</pallas_src>

<mosaic_0001>
module attributes {stable_mosaic.version = 11 : i64} {
  func.func @kernel(%arg0: i32, %arg1: memref<1x4096x3xf32, #tpu.memory_space<vmem>>, %arg2: memref<16x4096xbf16, #tpu.memory_space<vmem>>, %arg3: memref<4x4096xbf16, #tpu.memory_space<vmem>>, %arg4: memref<4x16xbf16, #tpu.memory_space<vmem>>, %arg5: memref<3x16xbf16, #tpu.memory_space<vmem>>, %arg6: memref<1x16xf32, #tpu.memory_space<vmem>>, %arg7: memref<3x32xbf16, #tpu.memory_space<vmem>>, %arg8: memref<1x32xf32, #tpu.memory_space<vmem>>, %arg9: memref<16x64xbf16, #tpu.memory_space<vmem>>, %arg10: memref<1x64xf32, #tpu.memory_space<vmem>>, %arg11: memref<32x128xbf16, #tpu.memory_space<vmem>>, %arg12: memref<1x128xf32, #tpu.memory_space<vmem>>, %arg13: memref<64x128xbf16, #tpu.memory_space<vmem>>, %arg14: memref<128x128xbf16, #tpu.memory_space<vmem>>, %arg15: memref<1x128xf32, #tpu.memory_space<vmem>>, %arg16: memref<1x128xf32, #tpu.memory_space<vmem>>, %arg17: memref<128x128xbf16, #tpu.memory_space<vmem>>, %arg18: memref<1x128xf32, #tpu.memory_space<vmem>>, %arg19: memref<1x4x128xf32, #tpu.memory_space<vmem>>, %arg20: memref<1x1x128xf32, #tpu.memory_space<vmem>>, %arg21: memref<1x1x128xf32, #tpu.memory_space<vmem>>) attributes {dimension_semantics = [#tpu.dimension_semantics<parallel>], iteration_bounds = array<i64: 2>, scalar_prefetch = 0 : i64, scratch_operands = 0 : i64, tpu.core_type = #tpu.core_type<tc>, window_params = [{transform_indices = @transform_0, window_bounds = array<i64: 1, 4096, 3>}, {pipeline_mode = #tpu.pipeline_mode<synchronous>, transform_indices = @transform_1, window_bounds = array<i64: 16, 4096>}, {pipeline_mode = #tpu.pipeline_mode<synchronous>, transform_indices = @transform_2, window_bounds = array<i64: 4, 4096>}, {pipeline_mode = #tpu.pipeline_mode<synchronous>, transform_indices = @transform_3, window_bounds = array<i64: 4, 16>}, {pipeline_mode = #tpu.pipeline_mode<synchronous>, transform_indices = @transform_4, window_bounds = array<i64: 3, 16>}, {pipeline_mode = #tpu.pipeline_mode<synchronous>, transform_indices = @transform_5, window_bounds = array<i64: 1, 16>}, {pipeline_mode = #tpu.pipeline_mode<synchronous>, transform_indices = @transform_6, window_bounds = array<i64: 3, 32>}, {pipeline_mode = #tpu.pipeline_mode<synchronous>, transform_indices = @transform_7, window_bounds = array<i64: 1, 32>}, {pipeline_mode = #tpu.pipeline_mode<synchronous>, transform_indices = @transform_8, window_bounds = array<i64: 16, 64>}, {pipeline_mode = #tpu.pipeline_mode<synchronous>, transform_indices = @transform_9, window_bounds = array<i64: 1, 64>}, {pipeline_mode = #tpu.pipeline_mode<synchronous>, transform_indices = @transform_10, window_bounds = array<i64: 32, 128>}, {pipeline_mode = #tpu.pipeline_mode<synchronous>, transform_indices = @transform_11, window_bounds = array<i64: 1, 128>}, {pipeline_mode = #tpu.pipeline_mode<synchronous>, transform_indices = @transform_12, window_bounds = array<i64: 64, 128>}, {pipeline_mode = #tpu.pipeline_mode<synchronous>, transform_indices = @transform_13, window_bounds = array<i64: 128, 128>}, {pipeline_mode = #tpu.pipeline_mode<synchronous>, transform_indices = @transform_14, window_bounds = array<i64: 1, 128>}, {pipeline_mode = #tpu.pipeline_mode<synchronous>, transform_indices = @transform_15, window_bounds = array<i64: 1, 128>}, {pipeline_mode = #tpu.pipeline_mode<synchronous>, transform_indices = @transform_16, window_bounds = array<i64: 128, 128>}, {pipeline_mode = #tpu.pipeline_mode<synchronous>, transform_indices = @transform_17, window_bounds = array<i64: 1, 128>}, {transform_indices = @transform_18, window_bounds = array<i64: 1, 4, 128>}, {transform_indices = @transform_19, window_bounds = array<i64: 1, 1, 128>}, {transform_indices = @transform_20, window_bounds = array<i64: 1, 1, 128>}]} {
    %c0 = arith.constant 0 : index
    %c0_0 = arith.constant 0 : index
    %c0_1 = arith.constant 0 : index
    %0 = vector.load %arg1[%c0, %c0_0, %c0_1] : memref<1x4096x3xf32, #tpu.memory_space<vmem>>, vector<1x4096x3xf32>
    %1 = vector.shape_cast %0 : vector<1x4096x3xf32> to vector<4096x3xf32>
    %c0_2 = arith.constant 0 : index
    %c0_3 = arith.constant 0 : index
    %2 = vector.load %arg2[%c0_2, %c0_3] : memref<16x4096xbf16, #tpu.memory_space<vmem>>, vector<16x4096xbf16>
    %3 = arith.truncf %1 : vector<4096x3xf32> to vector<4096x3xbf16>
    %cst = arith.constant dense<0.000000e+00> : vector<16x3xf32>
    %4 = tpu.matmul %2, %3, %cst {dimension_numbers = #tpu.dot_dimension_numbers<[1], [0], [0], [1], [0, 0, 1, 1], [], []>} : vector<16x4096xbf16>, vector<4096x3xbf16>, vector<16x3xf32> -> vector<16x3xf32>
    %c0_4 = arith.constant 0 : index
    %c0_5 = arith.constant 0 : index
    %5 = vector.load %arg3[%c0_4, %c0_5] : memref<4x4096xbf16, #tpu.memory_space<vmem>>, vector<4x4096xbf16>
    %6 = arith.truncf %1 : vector<4096x3xf32> to vector<4096x3xbf16>
    %cst_6 = arith.constant dense<0.000000e+00> : vector<4x3xf32>
    %7 = tpu.matmul %5, %6, %cst_6 {dimension_numbers = #tpu.dot_dimension_numbers<[1], [0], [0], [1], [0, 0, 1, 1], [], []>} : vector<4x4096xbf16>, vector<4096x3xbf16>, vector<4x3xf32> -> vector<4x3xf32>
    %c0_7 = arith.constant 0 : index
    %c0_8 = arith.constant 0 : index
    %8 = vector.load %arg5[%c0_7, %c0_8] : memref<3x16xbf16, #tpu.memory_space<vmem>>, vector<3x16xbf16>
    %9 = arith.truncf %4 : vector<16x3xf32> to vector<16x3xbf16>
    %cst_9 = arith.constant dense<0.000000e+00> : vector<16x16xf32>
    %10 = tpu.matmul %9, %8, %cst_9 {dimension_numbers = #tpu.dot_dimension_numbers<[1], [0], [0], [1], [0, 0, 1, 1], [], []>} : vector<16x3xbf16>, vector<3x16xbf16>, vector<16x16xf32> -> vector<16x16xf32>
    %c0_10 = arith.constant 0 : index
    %c0_11 = arith.constant 0 : index
    %11 = vector.load %arg6[%c0_10, %c0_11] : memref<1x16xf32, #tpu.memory_space<vmem>>, vector<1x16xf32>
    %12 = vector.broadcast %11 : vector<1x16xf32> to vector<16x16xf32>
    %13 = arith.addf %10, %12 : vector<16x16xf32>
    %cst_12 = arith.constant 0.000000e+00 : f32
    %14 = vector.broadcast %cst_12 : f32 to vector<16x16xf32>
    %15 = arith.maximumf %13, %14 : vector<16x16xf32>
    %c0_13 = arith.constant 0 : index
    %c0_14 = arith.constant 0 : index
    %16 = vector.load %arg7[%c0_13, %c0_14] : memref<3x32xbf16, #tpu.memory_space<vmem>>, vector<3x32xbf16>
    %17 = arith.truncf %7 : vector<4x3xf32> to vector<4x3xbf16>
    %cst_15 = arith.constant dense<0.000000e+00> : vector<4x32xf32>
    %18 = tpu.matmul %17, %16, %cst_15 {dimension_numbers = #tpu.dot_dimension_numbers<[1], [0], [0], [1], [0, 0, 1, 1], [], []>} : vector<4x3xbf16>, vector<3x32xbf16>, vector<4x32xf32> -> vector<4x32xf32>
    %c0_16 = arith.constant 0 : index
    %c0_17 = arith.constant 0 : index
    %19 = vector.load %arg8[%c0_16, %c0_17] : memref<1x32xf32, #tpu.memory_space<vmem>>, vector<1x32xf32>
    %20 = vector.broadcast %19 : vector<1x32xf32> to vector<4x32xf32>
    %21 = arith.addf %18, %20 : vector<4x32xf32>
    %cst_18 = arith.constant 0.000000e+00 : f32
    %22 = vector.broadcast %cst_18 : f32 to vector<4x32xf32>
    %23 = arith.maximumf %21, %22 : vector<4x32xf32>
    %c0_19 = arith.constant 0 : index
    %c0_20 = arith.constant 0 : index
    %24 = vector.load %arg9[%c0_19, %c0_20] : memref<16x64xbf16, #tpu.memory_space<vmem>>, vector<16x64xbf16>
    %25 = arith.truncf %15 : vector<16x16xf32> to vector<16x16xbf16>
    %cst_21 = arith.constant dense<0.000000e+00> : vector<16x64xf32>
    %26 = tpu.matmul %25, %24, %cst_21 {dimension_numbers = #tpu.dot_dimension_numbers<[1], [0], [0], [1], [0, 0, 1, 1], [], []>} : vector<16x16xbf16>, vector<16x64xbf16>, vector<16x64xf32> -> vector<16x64xf32>
    %c0_22 = arith.constant 0 : index
    %c0_23 = arith.constant 0 : index
    %27 = vector.load %arg10[%c0_22, %c0_23] : memref<1x64xf32, #tpu.memory_space<vmem>>, vector<1x64xf32>
    %28 = vector.broadcast %27 : vector<1x64xf32> to vector<16x64xf32>
    %29 = arith.addf %26, %28 : vector<16x64xf32>
    %c0_24 = arith.constant 0 : index
    %c0_25 = arith.constant 0 : index
    %30 = vector.load %arg11[%c0_24, %c0_25] : memref<32x128xbf16, #tpu.memory_space<vmem>>, vector<32x128xbf16>
    %31 = arith.truncf %23 : vector<4x32xf32> to vector<4x32xbf16>
    %cst_26 = arith.constant dense<0.000000e+00> : vector<4x128xf32>
    %32 = tpu.matmul %31, %30, %cst_26 {dimension_numbers = #tpu.dot_dimension_numbers<[1], [0], [0], [1], [0, 0, 1, 1], [], []>} : vector<4x32xbf16>, vector<32x128xbf16>, vector<4x128xf32> -> vector<4x128xf32>
    %c0_27 = arith.constant 0 : index
    %c0_28 = arith.constant 0 : index
    %33 = vector.load %arg12[%c0_27, %c0_28] : memref<1x128xf32, #tpu.memory_space<vmem>>, vector<1x128xf32>
    %34 = vector.broadcast %33 : vector<1x128xf32> to vector<4x128xf32>
    %35 = arith.addf %32, %34 : vector<4x128xf32>
    %c0_29 = arith.constant 0 : index
    %c0_30 = arith.constant 0 : index
    %36 = vector.load %arg13[%c0_29, %c0_30] : memref<64x128xbf16, #tpu.memory_space<vmem>>, vector<64x128xbf16>
    %37 = arith.truncf %29 : vector<16x64xf32> to vector<16x64xbf16>
    %cst_31 = arith.constant dense<0.000000e+00> : vector<16x128xf32>
    %38 = tpu.matmul %37, %36, %cst_31 {dimension_numbers = #tpu.dot_dimension_numbers<[1], [0], [0], [1], [0, 0, 1, 1], [], []>} : vector<16x64xbf16>, vector<64x128xbf16>, vector<16x128xf32> -> vector<16x128xf32>
    %cst_32 = arith.constant 0.000000e+00 : f32
    %39 = vector.broadcast %cst_32 : f32 to vector<16x128xf32>
    %40 = arith.maximumf %38, %39 : vector<16x128xf32>
    %c0_33 = arith.constant 0 : index
    %c0_34 = arith.constant 0 : index
    %41 = vector.load %arg14[%c0_33, %c0_34] : memref<128x128xbf16, #tpu.memory_space<vmem>>, vector<128x128xbf16>
    %42 = arith.truncf %35 : vector<4x128xf32> to vector<4x128xbf16>
    %cst_35 = arith.constant dense<0.000000e+00> : vector<4x128xf32>
    %43 = tpu.matmul %42, %41, %cst_35 {dimension_numbers = #tpu.dot_dimension_numbers<[1], [0], [0], [1], [0, 0, 1, 1], [], []>} : vector<4x128xbf16>, vector<128x128xbf16>, vector<4x128xf32> -> vector<4x128xf32>
    %cst_36 = arith.constant 0.000000e+00 : f32
    %44 = vector.broadcast %cst_36 : f32 to vector<4x128xf32>
    %45 = arith.maximumf %43, %44 : vector<4x128xf32>
    %c0_37 = arith.constant 0 : index
    %c0_38 = arith.constant 0 : index
    %46 = vector.load %arg4[%c0_37, %c0_38] : memref<4x16xbf16, #tpu.memory_space<vmem>>, vector<4x16xbf16>
    %47 = arith.truncf %40 : vector<16x128xf32> to vector<16x128xbf16>
    %cst_39 = arith.constant dense<0.000000e+00> : vector<4x128xf32>
    %48 = tpu.matmul %46, %47, %cst_39 {dimension_numbers = #tpu.dot_dimension_numbers<[1], [0], [0], [1], [0, 0, 1, 1], [], []>} : vector<4x16xbf16>, vector<16x128xbf16>, vector<4x128xf32> -> vector<4x128xf32>
    %49 = arith.addf %45, %48 : vector<4x128xf32>
    %c0_40 = arith.constant 0 : index
    %c0_41 = arith.constant 0 : index
    %c0_42 = arith.constant 0 : index
    %50 = vector.load %arg19[%c0_40, %c0_41, %c0_42] : memref<1x4x128xf32, #tpu.memory_space<vmem>>, vector<1x4x128xf32>
    %51 = vector.shape_cast %50 : vector<1x4x128xf32> to vector<4x128xf32>
    %52 = vector.shape_cast %49 : vector<4x128xf32> to vector<1x4x128xf32>
    tpu.vector_store %arg19[%c0_40, %c0_41, %c0_42], %52 {strides = array<i32>} : memref<1x4x128xf32, #tpu.memory_space<vmem>>, vector<1x4x128xf32>,
    %c0_43 = arith.constant 0 : index
    %c0_44 = arith.constant 0 : index
    %53 = vector.load %arg15[%c0_43, %c0_44] : memref<1x128xf32, #tpu.memory_space<vmem>>, vector<1x128xf32>
    %54 = vector.broadcast %53 : vector<1x128xf32> to vector<4x128xf32>
    %55 = arith.mulf %49, %54 : vector<4x128xf32>
    %cst_45 = arith.constant dense<0.000000e+00> : vector<4xf32>
    %56 = vector.multi_reduction <add>, %55, %cst_45 [1] : vector<4x128xf32> to vector<4xf32>
    %57 = vector.shape_cast %56 : vector<4xf32> to vector<4x1xf32>
    %58 = arith.truncf %57 : vector<4x1xf32> to vector<4x1xbf16>
    %59 = arith.truncf %35 : vector<4x128xf32> to vector<4x128xbf16>
    %cst_46 = arith.constant dense<0.000000e+00> : vector<1x128xf32>
    %60 = tpu.matmul %58, %59, %cst_46 {dimension_numbers = #tpu.dot_dimension_numbers<[0], [0], [1], [1], [0, 1, 1, 1], [], []>} : vector<4x1xbf16>, vector<4x128xbf16>, vector<1x128xf32> -> vector<1x128xf32>
    %c0_47 = arith.constant 0 : index
    %c0_48 = arith.constant 0 : index
    %61 = vector.load %arg16[%c0_47, %c0_48] : memref<1x128xf32, #tpu.memory_space<vmem>>, vector<1x128xf32>
    %62 = arith.addf %60, %61 : vector<1x128xf32>
    %c0_49 = arith.constant 0 : index
    %c0_50 = arith.constant 0 : index
    %c0_51 = arith.constant 0 : index
    %63 = vector.load %arg20[%c0_49, %c0_50, %c0_51] : memref<1x1x128xf32, #tpu.memory_space<vmem>>, vector<1x1x128xf32>
    %64 = vector.shape_cast %63 : vector<1x1x128xf32> to vector<1x128xf32>
    %65 = vector.shape_cast %62 : vector<1x128xf32> to vector<1x1x128xf32>
    tpu.vector_store %arg20[%c0_49, %c0_50, %c0_51], %65 {strides = array<i32>} : memref<1x1x128xf32, #tpu.memory_space<vmem>>, vector<1x1x128xf32>,
    %cst_52 = arith.constant 0.00999999977 : f32
    %66 = vector.broadcast %cst_52 : f32 to vector<1x128xf32>
    %67 = arith.mulf %66, %62 : vector<1x128xf32>
    %68 = arith.maximumf %62, %67 : vector<1x128xf32>
    %c0_53 = arith.constant 0 : index
    %c0_54 = arith.constant 0 : index
    %69 = vector.load %arg17[%c0_53, %c0_54] : memref<128x128xbf16, #tpu.memory_space<vmem>>, vector<128x128xbf16>
    %70 = arith.truncf %68 : vector<1x128xf32> to vector<1x128xbf16>
    %cst_55 = arith.constant dense<0.000000e+00> : vector<1x128xf32>
    %71 = tpu.matmul %70, %69, %cst_55 {dimension_numbers = #tpu.dot_dimension_numbers<[1], [0], [0], [1], [0, 0, 1, 1], [], []>} : vector<1x128xbf16>, vector<128x128xbf16>, vector<1x128xf32> -> vector<1x128xf32>
    %c0_56 = arith.constant 0 : index
    %c0_57 = arith.constant 0 : index
    %72 = vector.load %arg18[%c0_56, %c0_57] : memref<1x128xf32, #tpu.memory_space<vmem>>, vector<1x128xf32>
    %73 = arith.addf %71, %72 : vector<1x128xf32>
    %c0_58 = arith.constant 0 : index
    %c0_59 = arith.constant 0 : index
    %c0_60 = arith.constant 0 : index
    %74 = vector.load %arg21[%c0_58, %c0_59, %c0_60] : memref<1x1x128xf32, #tpu.memory_space<vmem>>, vector<1x1x128xf32>
    %75 = vector.shape_cast %74 : vector<1x1x128xf32> to vector<1x128xf32>
    %76 = vector.shape_cast %73 : vector<1x128xf32> to vector<1x1x128xf32>
    tpu.vector_store %arg21[%c0_58, %c0_59, %c0_60], %76 {strides = array<i32>} : memref<1x1x128xf32, #tpu.memory_space<vmem>>, vector<1x1x128xf32>,
    return
  }
  func.func @transform_0(%arg0: i32) -> (i32, i32, i32) {
    %c0_i32 = arith.constant 0 : i32
    %c0_i32_0 = arith.constant 0 : i32
    %c0_i32_1 = arith.constant 0 : i32
    return %arg0, %c0_i32, %c0_i32_0 : i32, i32, i32
  }
  func.func @transform_1(%arg0: i32) -> (i32, i32) {
    %c0_i32 = arith.constant 0 : i32
    %c0_i32_0 = arith.constant 0 : i32
    %c0_i32_1 = arith.constant 0 : i32
    return %c0_i32, %c0_i32_0 : i32, i32
  }
  func.func @transform_2(%arg0: i32) -> (i32, i32) {
    %c0_i32 = arith.constant 0 : i32
    %c0_i32_0 = arith.constant 0 : i32
    %c0_i32_1 = arith.constant 0 : i32
    return %c0_i32, %c0_i32_0 : i32, i32
  }
  func.func @transform_3(%arg0: i32) -> (i32, i32) {
    %c0_i32 = arith.constant 0 : i32
    %c0_i32_0 = arith.constant 0 : i32
    %c0_i32_1 = arith.constant 0 : i32
    return %c0_i32, %c0_i32_0 : i32, i32
  }
  func.func @transform_4(%arg0: i32) -> (i32, i32) {
    %c0_i32 = arith.constant 0 : i32
    %c0_i32_0 = arith.constant 0 : i32
    %c0_i32_1 = arith.constant 0 : i32
    return %c0_i32, %c0_i32_0 : i32, i32
  }
  func.func @transform_5(%arg0: i32) -> (i32, i32) {
    %c0_i32 = arith.constant 0 : i32
    %c0_i32_0 = arith.constant 0 : i32
    %c0_i32_1 = arith.constant 0 : i32
    return %c0_i32, %c0_i32_0 : i32, i32
  }
  func.func @transform_6(%arg0: i32) -> (i32, i32) {
    %c0_i32 = arith.constant 0 : i32
    %c0_i32_0 = arith.constant 0 : i32
    %c0_i32_1 = arith.constant 0 : i32
    return %c0_i32, %c0_i32_0 : i32, i32
  }
  func.func @transform_7(%arg0: i32) -> (i32, i32) {
    %c0_i32 = arith.constant 0 : i32
    %c0_i32_0 = arith.constant 0 : i32
    %c0_i32_1 = arith.constant 0 : i32
    return %c0_i32, %c0_i32_0 : i32, i32
  }
  func.func @transform_8(%arg0: i32) -> (i32, i32) {
    %c0_i32 = arith.constant 0 : i32
    %c0_i32_0 = arith.constant 0 : i32
    %c0_i32_1 = arith.constant 0 : i32
    return %c0_i32, %c0_i32_0 : i32, i32
  }
  func.func @transform_9(%arg0: i32) -> (i32, i32) {
    %c0_i32 = arith.constant 0 : i32
    %c0_i32_0 = arith.constant 0 : i32
    %c0_i32_1 = arith.constant 0 : i32
    return %c0_i32, %c0_i32_0 : i32, i32
  }
  func.func @transform_10(%arg0: i32) -> (i32, i32) {
    %c0_i32 = arith.constant 0 : i32
    %c0_i32_0 = arith.constant 0 : i32
    %c0_i32_1 = arith.constant 0 : i32
    return %c0_i32, %c0_i32_0 : i32, i32
  }
  func.func @transform_11(%arg0: i32) -> (i32, i32) {
    %c0_i32 = arith.constant 0 : i32
    %c0_i32_0 = arith.constant 0 : i32
    %c0_i32_1 = arith.constant 0 : i32
    return %c0_i32, %c0_i32_0 : i32, i32
  }
  func.func @transform_12(%arg0: i32) -> (i32, i32) {
    %c0_i32 = arith.constant 0 : i32
    %c0_i32_0 = arith.constant 0 : i32
    %c0_i32_1 = arith.constant 0 : i32
    return %c0_i32, %c0_i32_0 : i32, i32
  }
  func.func @transform_13(%arg0: i32) -> (i32, i32) {
    %c0_i32 = arith.constant 0 : i32
    %c0_i32_0 = arith.constant 0 : i32
    %c0_i32_1 = arith.constant 0 : i32
    return %c0_i32, %c0_i32_0 : i32, i32
  }
  func.func @transform_14(%arg0: i32) -> (i32, i32) {
    %c0_i32 = arith.constant 0 : i32
    %c0_i32_0 = arith.constant 0 : i32
    %c0_i32_1 = arith.constant 0 : i32
    return %c0_i32, %c0_i32_0 : i32, i32
  }
  func.func @transform_15(%arg0: i32) -> (i32, i32) {
    %c0_i32 = arith.constant 0 : i32
    %c0_i32_0 = arith.constant 0 : i32
    %c0_i32_1 = arith.constant 0 : i32
    return %c0_i32, %c0_i32_0 : i32, i32
  }
  func.func @transform_16(%arg0: i32) -> (i32, i32) {
    %c0_i32 = arith.constant 0 : i32
    %c0_i32_0 = arith.constant 0 : i32
    %c0_i32_1 = arith.constant 0 : i32
    return %c0_i32, %c0_i32_0 : i32, i32
  }
  func.func @transform_17(%arg0: i32) -> (i32, i32) {
    %c0_i32 = arith.constant 0 : i32
    %c0_i32_0 = arith.constant 0 : i32
    %c0_i32_1 = arith.constant 0 : i32
    return %c0_i32, %c0_i32_0 : i32, i32
  }
  func.func @transform_18(%arg0: i32) -> (i32, i32, i32) {
    %c0_i32 = arith.constant 0 : i32
    %c0_i32_0 = arith.constant 0 : i32
    %c0_i32_1 = arith.constant 0 : i32
    return %arg0, %c0_i32, %c0_i32_0 : i32, i32, i32
  }
  func.func @transform_19(%arg0: i32) -> (i32, i32, i32) {
    %c0_i32 = arith.constant 0 : i32
    %c0_i32_0 = arith.constant 0 : i32
    %c0_i32_1 = arith.constant 0 : i32
    return %arg0, %c0_i32, %c0_i32_0 : i32, i32, i32
  }
  func.func @transform_20(%arg0: i32) -> (i32, i32, i32) {
    %c0_i32 = arith.constant 0 : i32
    %c0_i32_0 = arith.constant 0 : i32
    %c0_i32_1 = arith.constant 0 : i32
    return %arg0, %c0_i32, %c0_i32_0 : i32, i32, i32
  }
}

module attributes {stable_mosaic.version = 11 : i64} {
  func.func @kernel(%arg0: i32, %arg1: memref<1x4096x3xf32, #tpu.memory_space<vmem>>, %arg2: memref<16x4096xbf16, #tpu.memory_space<vmem>>, %arg3: memref<4x4096xbf16, #tpu.memory_space<vmem>>, %arg4: memref<4x16xbf16, #tpu.memory_space<vmem>>, %arg5: memref<3x16xbf16, #tpu.memory_space<vmem>>, %arg6: memref<1x16xf32, #tpu.memory_space<vmem>>, %arg7: memref<3x32xbf16, #tpu.memory_space<vmem>>, %arg8: memref<1x32xf32, #tpu.memory_space<vmem>>, %arg9: memref<16x64xbf16, #tpu.memory_space<vmem>>, %arg10: memref<1x64xf32, #tpu.memory_space<vmem>>, %arg11: memref<32x128xbf16, #tpu.memory_space<vmem>>, %arg12: memref<1x128xf32, #tpu.memory_space<vmem>>, %arg13: memref<64x128xbf16, #tpu.memory_space<vmem>>, %arg14: memref<128x128xbf16, #tpu.memory_space<vmem>>, %arg15: memref<1x128xf32, #tpu.memory_space<vmem>>, %arg16: memref<1x128xf32, #tpu.memory_space<vmem>>, %arg17: memref<128x128xbf16, #tpu.memory_space<vmem>>, %arg18: memref<1x128xf32, #tpu.memory_space<vmem>>, %arg19: memref<1x1x128xf32, #tpu.memory_space<vmem>>, %arg20: memref<128x128xbf16, #tpu.memory_space<vmem>>, %arg21: memref<128x128xbf16, #tpu.memory_space<vmem>>, %arg22: memref<1x128xf32, #tpu.memory_space<vmem>>, %arg23: memref<1x4x128xf32, #tpu.memory_space<vmem>>, %arg24: memref<1x1x128xf32, #tpu.memory_space<vmem>>, %arg25: memref<1x1x128xf32, #tpu.memory_space<vmem>>, %arg26: memref<1x1x128xf32, #tpu.memory_space<vmem>>) attributes {dimension_semantics = [#tpu.dimension_semantics<parallel>], iteration_bounds = array<i64: 2>, scalar_prefetch = 0 : i64, scratch_operands = 0 : i64, tpu.core_type = #tpu.core_type<tc>, window_params = [{transform_indices = @transform_0, window_bounds = array<i64: 1, 4096, 3>}, {pipeline_mode = #tpu.pipeline_mode<synchronous>, transform_indices = @transform_1, window_bounds = array<i64: 16, 4096>}, {pipeline_mode = #tpu.pipeline_mode<synchronous>, transform_indices = @transform_2, window_bounds = array<i64: 4, 4096>}, {pipeline_mode = #tpu.pipeline_mode<synchronous>, transform_indices = @transform_3, window_bounds = array<i64: 4, 16>}, {pipeline_mode = #tpu.pipeline_mode<synchronous>, transform_indices = @transform_4, window_bounds = array<i64: 3, 16>}, {pipeline_mode = #tpu.pipeline_mode<synchronous>, transform_indices = @transform_5, window_bounds = array<i64: 1, 16>}, {pipeline_mode = #tpu.pipeline_mode<synchronous>, transform_indices = @transform_6, window_bounds = array<i64: 3, 32>}, {pipeline_mode = #tpu.pipeline_mode<synchronous>, transform_indices = @transform_7, window_bounds = array<i64: 1, 32>}, {pipeline_mode = #tpu.pipeline_mode<synchronous>, transform_indices = @transform_8, window_bounds = array<i64: 16, 64>}, {pipeline_mode = #tpu.pipeline_mode<synchronous>, transform_indices = @transform_9, window_bounds = array<i64: 1, 64>}, {pipeline_mode = #tpu.pipeline_mode<synchronous>, transform_indices = @transform_10, window_bounds = array<i64: 32, 128>}, {pipeline_mode = #tpu.pipeline_mode<synchronous>, transform_indices = @transform_11, window_bounds = array<i64: 1, 128>}, {pipeline_mode = #tpu.pipeline_mode<synchronous>, transform_indices = @transform_12, window_bounds = array<i64: 64, 128>}, {pipeline_mode = #tpu.pipeline_mode<synchronous>, transform_indices = @transform_13, window_bounds = array<i64: 128, 128>}, {pipeline_mode = #tpu.pipeline_mode<synchronous>, transform_indices = @transform_14, window_bounds = array<i64: 1, 128>}, {pipeline_mode = #tpu.pipeline_mode<synchronous>, transform_indices = @transform_15, window_bounds = array<i64: 1, 128>}, {pipeline_mode = #tpu.pipeline_mode<synchronous>, transform_indices = @transform_16, window_bounds = array<i64: 128, 128>}, {pipeline_mode = #tpu.pipeline_mode<synchronous>, transform_indices = @transform_17, window_bounds = array<i64: 1, 128>}, {transform_indices = @transform_18, window_bounds = array<i64: 1, 1, 128>}, {pipeline_mode = #tpu.pipeline_mode<synchronous>, transform_indices = @transform_19, window_bounds = array<i64: 128, 128>}, {pipeline_mode = #tpu.pipeline_mode<synchronous>, transform_indices = @transform_20, window_bounds = array<i64: 128, 128>}, {pipeline_mode = #tpu.pipeline_mode<synchronous>, transform_indices = @transform_21, window_bounds = array<i64: 1, 128>}, {transform_indices = @transform_22, window_bounds = array<i64: 1, 4, 128>}, {transform_indices = @transform_23, window_bounds = array<i64: 1, 1, 128>}, {transform_indices = @transform_24, window_bounds = array<i64: 1, 1, 128>}, {transform_indices = @transform_25, window_bounds = array<i64: 1, 1, 128>}]} {
    %c0 = arith.constant 0 : index
    %c0_0 = arith.constant 0 : index
    %c0_1 = arith.constant 0 : index
    %0 = vector.load %arg1[%c0, %c0_0, %c0_1] : memref<1x4096x3xf32, #tpu.memory_space<vmem>>, vector<1x4096x3xf32>
    %1 = vector.shape_cast %0 : vector<1x4096x3xf32> to vector<4096x3xf32>
    %c0_2 = arith.constant 0 : index
    %c0_3 = arith.constant 0 : index
    %2 = vector.load %arg2[%c0_2, %c0_3] : memref<16x4096xbf16, #tpu.memory_space<vmem>>, vector<16x4096xbf16>
    %3 = arith.truncf %1 : vector<4096x3xf32> to vector<4096x3xbf16>
    %cst = arith.constant dense<0.000000e+00> : vector<16x3xf32>
    %4 = tpu.matmul %2, %3, %cst {dimension_numbers = #tpu.dot_dimension_numbers<[1], [0], [0], [1], [0, 0, 1, 1], [], []>} : vector<16x4096xbf16>, vector<4096x3xbf16>, vector<16x3xf32> -> vector<16x3xf32>
    %c0_4 = arith.constant 0 : index
    %c0_5 = arith.constant 0 : index
    %5 = vector.load %arg3[%c0_4, %c0_5] : memref<4x4096xbf16, #tpu.memory_space<vmem>>, vector<4x4096xbf16>
    %6 = arith.truncf %1 : vector<4096x3xf32> to vector<4096x3xbf16>
    %cst_6 = arith.constant dense<0.000000e+00> : vector<4x3xf32>
    %7 = tpu.matmul %5, %6, %cst_6 {dimension_numbers = #tpu.dot_dimension_numbers<[1], [0], [0], [1], [0, 0, 1, 1], [], []>} : vector<4x4096xbf16>, vector<4096x3xbf16>, vector<4x3xf32> -> vector<4x3xf32>
    %c0_7 = arith.constant 0 : index
    %c0_8 = arith.constant 0 : index
    %8 = vector.load %arg5[%c0_7, %c0_8] : memref<3x16xbf16, #tpu.memory_space<vmem>>, vector<3x16xbf16>
    %9 = arith.truncf %4 : vector<16x3xf32> to vector<16x3xbf16>
    %cst_9 = arith.constant dense<0.000000e+00> : vector<16x16xf32>
    %10 = tpu.matmul %9, %8, %cst_9 {dimension_numbers = #tpu.dot_dimension_numbers<[1], [0], [0], [1], [0, 0, 1, 1], [], []>} : vector<16x3xbf16>, vector<3x16xbf16>, vector<16x16xf32> -> vector<16x16xf32>
    %c0_10 = arith.constant 0 : index
    %c0_11 = arith.constant 0 : index
    %11 = vector.load %arg6[%c0_10, %c0_11] : memref<1x16xf32, #tpu.memory_space<vmem>>, vector<1x16xf32>
    %12 = vector.broadcast %11 : vector<1x16xf32> to vector<16x16xf32>
    %13 = arith.addf %10, %12 : vector<16x16xf32>
    %cst_12 = arith.constant 0.000000e+00 : f32
    %14 = vector.broadcast %cst_12 : f32 to vector<16x16xf32>
    %15 = arith.maximumf %13, %14 : vector<16x16xf32>
    %c0_13 = arith.constant 0 : index
    %c0_14 = arith.constant 0 : index
    %16 = vector.load %arg7[%c0_13, %c0_14] : memref<3x32xbf16, #tpu.memory_space<vmem>>, vector<3x32xbf16>
    %17 = arith.truncf %7 : vector<4x3xf32> to vector<4x3xbf16>
    %cst_15 = arith.constant dense<0.000000e+00> : vector<4x32xf32>
    %18 = tpu.matmul %17, %16, %cst_15 {dimension_numbers = #tpu.dot_dimension_numbers<[1], [0], [0], [1], [0, 0, 1, 1], [], []>} : vector<4x3xbf16>, vector<3x32xbf16>, vector<4x32xf32> -> vector<4x32xf32>
    %c0_16 = arith.constant 0 : index
    %c0_17 = arith.constant 0 : index
    %19 = vector.load %arg8[%c0_16, %c0_17] : memref<1x32xf32, #tpu.memory_space<vmem>>, vector<1x32xf32>
    %20 = vector.broadcast %19 : vector<1x32xf32> to vector<4x32xf32>
    %21 = arith.addf %18, %20 : vector<4x32xf32>
    %cst_18 = arith.constant 0.000000e+00 : f32
    %22 = vector.broadcast %cst_18 : f32 to vector<4x32xf32>
    %23 = arith.maximumf %21, %22 : vector<4x32xf32>
    %c0_19 = arith.constant 0 : index
    %c0_20 = arith.constant 0 : index
    %24 = vector.load %arg9[%c0_19, %c0_20] : memref<16x64xbf16, #tpu.memory_space<vmem>>, vector<16x64xbf16>
    %25 = arith.truncf %15 : vector<16x16xf32> to vector<16x16xbf16>
    %cst_21 = arith.constant dense<0.000000e+00> : vector<16x64xf32>
    %26 = tpu.matmul %25, %24, %cst_21 {dimension_numbers = #tpu.dot_dimension_numbers<[1], [0], [0], [1], [0, 0, 1, 1], [], []>} : vector<16x16xbf16>, vector<16x64xbf16>, vector<16x64xf32> -> vector<16x64xf32>
    %c0_22 = arith.constant 0 : index
    %c0_23 = arith.constant 0 : index
    %27 = vector.load %arg10[%c0_22, %c0_23] : memref<1x64xf32, #tpu.memory_space<vmem>>, vector<1x64xf32>
    %28 = vector.broadcast %27 : vector<1x64xf32> to vector<16x64xf32>
    %29 = arith.addf %26, %28 : vector<16x64xf32>
    %c0_24 = arith.constant 0 : index
    %c0_25 = arith.constant 0 : index
    %30 = vector.load %arg11[%c0_24, %c0_25] : memref<32x128xbf16, #tpu.memory_space<vmem>>, vector<32x128xbf16>
    %31 = arith.truncf %23 : vector<4x32xf32> to vector<4x32xbf16>
    %cst_26 = arith.constant dense<0.000000e+00> : vector<4x128xf32>
    %32 = tpu.matmul %31, %30, %cst_26 {dimension_numbers = #tpu.dot_dimension_numbers<[1], [0], [0], [1], [0, 0, 1, 1], [], []>} : vector<4x32xbf16>, vector<32x128xbf16>, vector<4x128xf32> -> vector<4x128xf32>
    %c0_27 = arith.constant 0 : index
    %c0_28 = arith.constant 0 : index
    %33 = vector.load %arg12[%c0_27, %c0_28] : memref<1x128xf32, #tpu.memory_space<vmem>>, vector<1x128xf32>
    %34 = vector.broadcast %33 : vector<1x128xf32> to vector<4x128xf32>
    %35 = arith.addf %32, %34 : vector<4x128xf32>
    %c0_29 = arith.constant 0 : index
    %c0_30 = arith.constant 0 : index
    %36 = vector.load %arg13[%c0_29, %c0_30] : memref<64x128xbf16, #tpu.memory_space<vmem>>, vector<64x128xbf16>
    %37 = arith.truncf %29 : vector<16x64xf32> to vector<16x64xbf16>
    %cst_31 = arith.constant dense<0.000000e+00> : vector<16x128xf32>
    %38 = tpu.matmul %37, %36, %cst_31 {dimension_numbers = #tpu.dot_dimension_numbers<[1], [0], [0], [1], [0, 0, 1, 1], [], []>} : vector<16x64xbf16>, vector<64x128xbf16>, vector<16x128xf32> -> vector<16x128xf32>
    %cst_32 = arith.constant 0.000000e+00 : f32
    %39 = vector.broadcast %cst_32 : f32 to vector<16x128xf32>
    %40 = arith.maximumf %38, %39 : vector<16x128xf32>
    %c0_33 = arith.constant 0 : index
    %c0_34 = arith.constant 0 : index
    %41 = vector.load %arg14[%c0_33, %c0_34] : memref<128x128xbf16, #tpu.memory_space<vmem>>, vector<128x128xbf16>
    %42 = arith.truncf %35 : vector<4x128xf32> to vector<4x128xbf16>
    %cst_35 = arith.constant dense<0.000000e+00> : vector<4x128xf32>
    %43 = tpu.matmul %42, %41, %cst_35 {dimension_numbers = #tpu.dot_dimension_numbers<[1], [0], [0], [1], [0, 0, 1, 1], [], []>} : vector<4x128xbf16>, vector<128x128xbf16>, vector<4x128xf32> -> vector<4x128xf32>
    %cst_36 = arith.constant 0.000000e+00 : f32
    %44 = vector.broadcast %cst_36 : f32 to vector<4x128xf32>
    %45 = arith.maximumf %43, %44 : vector<4x128xf32>
    %c0_37 = arith.constant 0 : index
    %c0_38 = arith.constant 0 : index
    %46 = vector.load %arg4[%c0_37, %c0_38] : memref<4x16xbf16, #tpu.memory_space<vmem>>, vector<4x16xbf16>
    %47 = arith.truncf %40 : vector<16x128xf32> to vector<16x128xbf16>
    %cst_39 = arith.constant dense<0.000000e+00> : vector<4x128xf32>
    %48 = tpu.matmul %46, %47, %cst_39 {dimension_numbers = #tpu.dot_dimension_numbers<[1], [0], [0], [1], [0, 0, 1, 1], [], []>} : vector<4x16xbf16>, vector<16x128xbf16>, vector<4x128xf32> -> vector<4x128xf32>
    %49 = arith.addf %45, %48 : vector<4x128xf32>
    %c0_40 = arith.constant 0 : index
    %c0_41 = arith.constant 0 : index
    %c0_42 = arith.constant 0 : index
    %50 = vector.load %arg23[%c0_40, %c0_41, %c0_42] : memref<1x4x128xf32, #tpu.memory_space<vmem>>, vector<1x4x128xf32>
    %51 = vector.shape_cast %50 : vector<1x4x128xf32> to vector<4x128xf32>
    %52 = vector.shape_cast %49 : vector<4x128xf32> to vector<1x4x128xf32>
    tpu.vector_store %arg23[%c0_40, %c0_41, %c0_42], %52 {strides = array<i32>} : memref<1x4x128xf32, #tpu.memory_space<vmem>>, vector<1x4x128xf32>,
    %c0_43 = arith.constant 0 : index
    %c0_44 = arith.constant 0 : index
    %53 = vector.load %arg15[%c0_43, %c0_44] : memref<1x128xf32, #tpu.memory_space<vmem>>, vector<1x128xf32>
    %54 = vector.broadcast %53 : vector<1x128xf32> to vector<4x128xf32>
    %55 = arith.mulf %49, %54 : vector<4x128xf32>
    %cst_45 = arith.constant dense<0.000000e+00> : vector<4xf32>
    %56 = vector.multi_reduction <add>, %55, %cst_45 [1] : vector<4x128xf32> to vector<4xf32>
    %57 = vector.shape_cast %56 : vector<4xf32> to vector<4x1xf32>
    %58 = arith.truncf %57 : vector<4x1xf32> to vector<4x1xbf16>
    %59 = arith.truncf %35 : vector<4x128xf32> to vector<4x128xbf16>
    %cst_46 = arith.constant dense<0.000000e+00> : vector<1x128xf32>
    %60 = tpu.matmul %58, %59, %cst_46 {dimension_numbers = #tpu.dot_dimension_numbers<[0], [0], [1], [1], [0, 1, 1, 1], [], []>} : vector<4x1xbf16>, vector<4x128xbf16>, vector<1x128xf32> -> vector<1x128xf32>
    %c0_47 = arith.constant 0 : index
    %c0_48 = arith.constant 0 : index
    %61 = vector.load %arg16[%c0_47, %c0_48] : memref<1x128xf32, #tpu.memory_space<vmem>>, vector<1x128xf32>
    %62 = arith.addf %60, %61 : vector<1x128xf32>
    %c0_49 = arith.constant 0 : index
    %c0_50 = arith.constant 0 : index
    %c0_51 = arith.constant 0 : index
    %63 = vector.load %arg24[%c0_49, %c0_50, %c0_51] : memref<1x1x128xf32, #tpu.memory_space<vmem>>, vector<1x1x128xf32>
    %64 = vector.shape_cast %63 : vector<1x1x128xf32> to vector<1x128xf32>
    %65 = vector.shape_cast %62 : vector<1x128xf32> to vector<1x1x128xf32>
    tpu.vector_store %arg24[%c0_49, %c0_50, %c0_51], %65 {strides = array<i32>} : memref<1x1x128xf32, #tpu.memory_space<vmem>>, vector<1x1x128xf32>,
    %cst_52 = arith.constant 0.00999999977 : f32
    %66 = vector.broadcast %cst_52 : f32 to vector<1x128xf32>
    %67 = arith.mulf %66, %62 : vector<1x128xf32>
    %68 = arith.maximumf %62, %67 : vector<1x128xf32>
    %c0_53 = arith.constant 0 : index
    %c0_54 = arith.constant 0 : index
    %69 = vector.load %arg17[%c0_53, %c0_54] : memref<128x128xbf16, #tpu.memory_space<vmem>>, vector<128x128xbf16>
    %70 = arith.truncf %68 : vector<1x128xf32> to vector<1x128xbf16>
    %cst_55 = arith.constant dense<0.000000e+00> : vector<1x128xf32>
    %71 = tpu.matmul %70, %69, %cst_55 {dimension_numbers = #tpu.dot_dimension_numbers<[1], [0], [0], [1], [0, 0, 1, 1], [], []>} : vector<1x128xbf16>, vector<128x128xbf16>, vector<1x128xf32> -> vector<1x128xf32>
    %c0_56 = arith.constant 0 : index
    %c0_57 = arith.constant 0 : index
    %72 = vector.load %arg18[%c0_56, %c0_57] : memref<1x128xf32, #tpu.memory_space<vmem>>, vector<1x128xf32>
    %73 = arith.addf %71, %72 : vector<1x128xf32>
    %c0_58 = arith.constant 0 : index
    %c0_59 = arith.constant 0 : index
    %c0_60 = arith.constant 0 : index
    %74 = vector.load %arg25[%c0_58, %c0_59, %c0_60] : memref<1x1x128xf32, #tpu.memory_space<vmem>>, vector<1x1x128xf32>
    %75 = vector.shape_cast %74 : vector<1x1x128xf32> to vector<1x128xf32>
    %76 = vector.shape_cast %73 : vector<1x128xf32> to vector<1x1x128xf32>
    tpu.vector_store %arg25[%c0_58, %c0_59, %c0_60], %76 {strides = array<i32>} : memref<1x1x128xf32, #tpu.memory_space<vmem>>, vector<1x1x128xf32>,
    %c0_61 = arith.constant 0 : index
    %c0_62 = arith.constant 0 : index
    %c0_63 = arith.constant 0 : index
    %77 = vector.load %arg19[%c0_61, %c0_62, %c0_63] : memref<1x1x128xf32, #tpu.memory_space<vmem>>, vector<1x1x128xf32>
    %78 = vector.shape_cast %77 : vector<1x1x128xf32> to vector<1x128xf32>
    %cst_64 = arith.constant 0.00999999977 : f32
    %79 = vector.broadcast %cst_64 : f32 to vector<1x128xf32>
    %80 = arith.mulf %79, %78 : vector<1x128xf32>
    %81 = arith.maximumf %78, %80 : vector<1x128xf32>
    %c0_65 = arith.constant 0 : index
    %c0_66 = arith.constant 0 : index
    %82 = vector.load %arg20[%c0_65, %c0_66] : memref<128x128xbf16, #tpu.memory_space<vmem>>, vector<128x128xbf16>
    %83 = arith.truncf %81 : vector<1x128xf32> to vector<1x128xbf16>
    %cst_67 = arith.constant dense<0.000000e+00> : vector<1x128xf32>
    %84 = tpu.matmul %83, %82, %cst_67 {dimension_numbers = #tpu.dot_dimension_numbers<[1], [0], [0], [1], [0, 0, 1, 1], [], []>} : vector<1x128xbf16>, vector<128x128xbf16>, vector<1x128xf32> -> vector<1x128xf32>
    %c0_68 = arith.constant 0 : index
    %c0_69 = arith.constant 0 : index
    %85 = vector.load %arg21[%c0_68, %c0_69] : memref<128x128xbf16, #tpu.memory_space<vmem>>, vector<128x128xbf16>
    %86 = arith.truncf %68 : vector<1x128xf32> to vector<1x128xbf16>
    %cst_70 = arith.constant dense<0.000000e+00> : vector<1x128xf32>
    %87 = tpu.matmul %86, %85, %cst_70 {dimension_numbers = #tpu.dot_dimension_numbers<[1], [0], [0], [1], [0, 0, 1, 1], [], []>} : vector<1x128xbf16>, vector<128x128xbf16>, vector<1x128xf32> -> vector<1x128xf32>
    %88 = arith.addf %84, %87 : vector<1x128xf32>
    %c0_71 = arith.constant 0 : index
    %c0_72 = arith.constant 0 : index
    %89 = vector.load %arg22[%c0_71, %c0_72] : memref<1x128xf32, #tpu.memory_space<vmem>>, vector<1x128xf32>
    %90 = arith.addf %88, %89 : vector<1x128xf32>
    %c0_73 = arith.constant 0 : index
    %c0_74 = arith.constant 0 : index
    %c0_75 = arith.constant 0 : index
    %91 = vector.load %arg26[%c0_73, %c0_74, %c0_75] : memref<1x1x128xf32, #tpu.memory_space<vmem>>, vector<1x1x128xf32>
    %92 = vector.shape_cast %91 : vector<1x1x128xf32> to vector<1x128xf32>
    %93 = vector.shape_cast %90 : vector<1x128xf32> to vector<1x1x128xf32>
    tpu.vector_store %arg26[%c0_73, %c0_74, %c0_75], %93 {strides = array<i32>} : memref<1x1x128xf32, #tpu.memory_space<vmem>>, vector<1x1x128xf32>,
    return
  }
  func.func @transform_0(%arg0: i32) -> (i32, i32, i32) {
    %c0_i32 = arith.constant 0 : i32
    %c0_i32_0 = arith.constant 0 : i32
    %c0_i32_1 = arith.constant 0 : i32
    return %arg0, %c0_i32, %c0_i32_0 : i32, i32, i32
  }
  func.func @transform_1(%arg0: i32) -> (i32, i32) {
    %c0_i32 = arith.constant 0 : i32
    %c0_i32_0 = arith.constant 0 : i32
    %c0_i32_1 = arith.constant 0 : i32
    return %c0_i32, %c0_i32_0 : i32, i32
  }
  func.func @transform_2(%arg0: i32) -> (i32, i32) {
    %c0_i32 = arith.constant 0 : i32
    %c0_i32_0 = arith.constant 0 : i32
    %c0_i32_1 = arith.constant 0 : i32
    return %c0_i32, %c0_i32_0 : i32, i32
  }
  func.func @transform_3(%arg0: i32) -> (i32, i32) {
    %c0_i32 = arith.constant 0 : i32
    %c0_i32_0 = arith.constant 0 : i32
    %c0_i32_1 = arith.constant 0 : i32
    return %c0_i32, %c0_i32_0 : i32, i32
  }
  func.func @transform_4(%arg0: i32) -> (i32, i32) {
    %c0_i32 = arith.constant 0 : i32
    %c0_i32_0 = arith.constant 0 : i32
    %c0_i32_1 = arith.constant 0 : i32
    return %c0_i32, %c0_i32_0 : i32, i32
  }
  func.func @transform_5(%arg0: i32) -> (i32, i32) {
    %c0_i32 = arith.constant 0 : i32
    %c0_i32_0 = arith.constant 0 : i32
    %c0_i32_1 = arith.constant 0 : i32
    return %c0_i32, %c0_i32_0 : i32, i32
  }
  func.func @transform_6(%arg0: i32) -> (i32, i32) {
    %c0_i32 = arith.constant 0 : i32
    %c0_i32_0 = arith.constant 0 : i32
    %c0_i32_1 = arith.constant 0 : i32
    return %c0_i32, %c0_i32_0 : i32, i32
  }
  func.func @transform_7(%arg0: i32) -> (i32, i32) {
    %c0_i32 = arith.constant 0 : i32
    %c0_i32_0 = arith.constant 0 : i32
    %c0_i32_1 = arith.constant 0 : i32
    return %c0_i32, %c0_i32_0 : i32, i32
  }
  func.func @transform_8(%arg0: i32) -> (i32, i32) {
    %c0_i32 = arith.constant 0 : i32
    %c0_i32_0 = arith.constant 0 : i32
    %c0_i32_1 = arith.constant 0 : i32
    return %c0_i32, %c0_i32_0 : i32, i32
  }
  func.func @transform_9(%arg0: i32) -> (i32, i32) {
    %c0_i32 = arith.constant 0 : i32
    %c0_i32_0 = arith.constant 0 : i32
    %c0_i32_1 = arith.constant 0 : i32
    return %c0_i32, %c0_i32_0 : i32, i32
  }
  func.func @transform_10(%arg0: i32) -> (i32, i32) {
    %c0_i32 = arith.constant 0 : i32
    %c0_i32_0 = arith.constant 0 : i32
    %c0_i32_1 = arith.constant 0 : i32
    return %c0_i32, %c0_i32_0 : i32, i32
  }
  func.func @transform_11(%arg0: i32) -> (i32, i32) {
    %c0_i32 = arith.constant 0 : i32
    %c0_i32_0 = arith.constant 0 : i32
    %c0_i32_1 = arith.constant 0 : i32
    return %c0_i32, %c0_i32_0 : i32, i32
  }
  func.func @transform_12(%arg0: i32) -> (i32, i32) {
    %c0_i32 = arith.constant 0 : i32
    %c0_i32_0 = arith.constant 0 : i32
    %c0_i32_1 = arith.constant 0 : i32
    return %c0_i32, %c0_i32_0 : i32, i32
  }
  func.func @transform_13(%arg0: i32) -> (i32, i32) {
    %c0_i32 = arith.constant 0 : i32
    %c0_i32_0 = arith.constant 0 : i32
    %c0_i32_1 = arith.constant 0 : i32
    return %c0_i32, %c0_i32_0 : i32, i32
  }
  func.func @transform_14(%arg0: i32) -> (i32, i32) {
    %c0_i32 = arith.constant 0 : i32
    %c0_i32_0 = arith.constant 0 : i32
    %c0_i32_1 = arith.constant 0 : i32
    return %c0_i32, %c0_i32_0 : i32, i32
  }
  func.func @transform_15(%arg0: i32) -> (i32, i32) {
    %c0_i32 = arith.constant 0 : i32
    %c0_i32_0 = arith.constant 0 : i32
    %c0_i32_1 = arith.constant 0 : i32
    return %c0_i32, %c0_i32_0 : i32, i32
  }
  func.func @transform_16(%arg0: i32) -> (i32, i32) {
    %c0_i32 = arith.constant 0 : i32
    %c0_i32_0 = arith.constant 0 : i32
    %c0_i32_1 = arith.constant 0 : i32
    return %c0_i32, %c0_i32_0 : i32, i32
  }
  func.func @transform_17(%arg0: i32) -> (i32, i32) {
    %c0_i32 = arith.constant 0 : i32
    %c0_i32_0 = arith.constant 0 : i32
    %c0_i32_1 = arith.constant 0 : i32
    return %c0_i32, %c0_i32_0 : i32, i32
  }
  func.func @transform_18(%arg0: i32) -> (i32, i32, i32) {
    %c0_i32 = arith.constant 0 : i32
    %c0_i32_0 = arith.constant 0 : i32
    %c0_i32_1 = arith.constant 0 : i32
    return %arg0, %c0_i32, %c0_i32_0 : i32, i32, i32
  }
  func.func @transform_19(%arg0: i32) -> (i32, i32) {
    %c0_i32 = arith.constant 0 : i32
    %c0_i32_0 = arith.constant 0 : i32
    %c0_i32_1 = arith.constant 0 : i32
    return %c0_i32, %c0_i32_0 : i32, i32
  }
  func.func @transform_20(%arg0: i32) -> (i32, i32) {
    %c0_i32 = arith.constant 0 : i32
    %c0_i32_0 = arith.constant 0 : i32
    %c0_i32_1 = arith.constant 0 : i32
    return %c0_i32, %c0_i32_0 : i32, i32
  }
  func.func @transform_21(%arg0: i32) -> (i32, i32) {
    %c0_i32 = arith.constant 0 : i32
    %c0_i32_0 = arith.constant 0 : i32
    %c0_i32_1 = arith.constant 0 : i32
    return %c0_i32, %c0_i32_0 : i32, i32
  }
  func.func @transform_22(%arg0: i32) -> (i32, i32, i32) {
    %c0_i32 = arith.constant 0 : i32
    %c0_i32_0 = arith.constant 0 : i32
    %c0_i32_1 = arith.constant 0 : i32
    return %arg0, %c0_i32, %c0_i32_0 : i32, i32, i32
  }
  func.func @transform_23(%arg0: i32) -> (i32, i32, i32) {
    %c0_i32 = arith.constant 0 : i32
    %c0_i32_0 = arith.constant 0 : i32
    %c0_i32_1 = arith.constant 0 : i32
    return %arg0, %c0_i32, %c0_i32_0 : i32, i32, i32
  }
  func.func @transform_24(%arg0: i32) -> (i32, i32, i32) {
    %c0_i32 = arith.constant 0 : i32
    %c0_i32_0 = arith.constant 0 : i32
    %c0_i32_1 = arith.constant 0 : i32
    return %arg0, %c0_i32, %c0_i32_0 : i32, i32, i32
  }
  func.func @transform_25(%arg0: i32) -> (i32, i32, i32) {
    %c0_i32 = arith.constant 0 : i32
    %c0_i32_0 = arith.constant 0 : i32
    %c0_i32_1 = arith.constant 0 : i32
    return %arg0, %c0_i32, %c0_i32_0 : i32, i32, i32
  }
}

</mosaic_0001>

<bundles_post_ra>
// kernel: effi_zoomin_forward.2
= control target key start
LH: loop header
LB: loop body
LE: loop exit
PB: predicated region body
PF: predicated region fallthrough
CT: control target
= control target key end

     0   :  { %s7190_s0 = inlined_call_operand.vmem [shape: f32[2,4096,3], index: 0, kind: input, shape index: {}]   ;;  %s7191_s1 = inlined_call_operand.vmem [shape: bf16[16,4096], index: 1, kind: input, shape index: {}]   ;;  %s7192_s2 = inlined_call_operand.vmem [shape: bf16[4,4096], index: 2, kind: input, shape index: {}]   ;;  %s7193_s3 = inlined_call_operand.vmem [shape: bf16[4,16], index: 3, kind: input, shape index: {}]   ;;  %s7194_s4 = inlined_call_operand.vmem [shape: bf16[3,16], index: 4, kind: input, shape index: {}]   ;;  %s7195_s5 = inlined_call_operand.vmem [shape: f32[1,16], index: 5, kind: input, shape index: {}]   ;;  %s7196_s6 = inlined_call_operand.vmem [shape: bf16[3,32], index: 6, kind: input, shape index: {}]   ;;  %s7197_s7 = inlined_call_operand.vmem [shape: f32[1,32], index: 7, kind: input, shape index: {}]   ;;  %s7198_s8 = inlined_call_operand.vmem [shape: bf16[16,64], index: 8, kind: input, shape index: {}]   ;;  %s7199_s9 = inlined_call_operand.vmem [shape: f32[1,64], index: 9, kind: input, shape index: {}]   ;;  %s7200_s10 = inlined_call_operand.vmem [shape: bf16[32,128], index: 10, kind: input, shape index: {}]   ;;  %s7201_s11 = inlined_call_operand.vmem [shape: f32[1,128], index: 11, kind: input, shape index: {}]   ;;  %s7202_s12 = inlined_call_operand.vmem [shape: bf16[64,128], index: 12, kind: input, shape index: {}]   ;;  %s7203_s13 = inlined_call_operand.vmem [shape: bf16[128,128], index: 13, kind: input, shape index: {}]   ;;  %s7204_s14 = inlined_call_operand.vmem [shape: f32[1,128], index: 14, kind: input, shape index: {}]   ;;  %s7205_s15 = inlined_call_operand.vmem [shape: f32[1,128], index: 15, kind: input, shape index: {}]   ;;  %s7206_s16 = inlined_call_operand.vmem [shape: bf16[128,128], index: 16, kind: input, shape index: {}]   ;;  %s7207_s17 = inlined_call_operand.vmem [shape: f32[1,128], index: 17, kind: input, shape index: {}]   ;;  %s7208_s18 = inlined_call_operand.vmem [shape: f32[2,4,128], index: 18, kind: output, shape index: {0}]   ;;  %s7209_s19 = inlined_call_operand.vmem [shape: f32[2,1,128], index: 19, kind: output, shape index: {1}]   ;;  %s7210_s20 = inlined_call_operand.hbm [shape: f32[2,1,128], index: 20, kind: output, shape index: {2}]  }
   0x1   :  { %7434 = sst [smem:[#allocation226_spill]] %s7190_s0 }
   0x2   :  { %7435 = sst [smem:[#allocation227_spill]] %s7191_s1 }
   0x3   :  { %7436 = sst [smem:[#allocation228_spill]] %s7192_s2 }
   0x4   :  { %7437 = sst [smem:[#allocation229_spill]] %s7193_s3 }
   0x5   :  { %7438 = sst [smem:[#allocation230_spill]] %s7194_s4 }
   0x6   :  { %7439 = sst [smem:[#allocation231_spill]] %s7195_s5 }
   0x7   :  { %7440 = sst [smem:[#allocation232_spill]] %s7196_s6 }
   0x8   :  { %7441 = sst [smem:[#allocation233_spill]] %s7197_s7 }
   0x9   :  { %26 = vsyncpa [#allocation3], 0 }
   0xa   :  { %28 = vsyncpa [#allocation3 + $0x1], 0  ;;  %s5036_s1 = smov 0   ;;  %s5038_s22 = smov 0  }
   0xb   :  { %s5040_s23 = smov 0   ;;  %s5042_s24 = smov 0  }
   0xc LB: > { %7442 = sst [smem:[#allocation5_spill]] %s4920_s23  ;;  %s5057_s2 = sadd.s32 4294967295, %s4924_s24   ;;  %s4924_s24 = sphi %s5042_s24, %s7891_s24   ;;  %s4920_s23 = sphi %s5040_s23, %s7893_s23   ;;  %s4916_s22 = sphi %s5038_s22, %s7895_s22   ;;  %s4912_s1 = sphi %s5036_s1, %s7894_s1  }
   0xd   : > { %s3879_s25 = sadd.s32 4294967294, %s4924_s24   ;;  %s5061_s3 = sadd.s32 1, %s4924_s24  }
   0xe   : > { %7443 = sst [smem:[#allocation6_spill]] %s5061_s3  ;;  %s476_s26 = sadd.s32 1, %s4920_s23 }
   0xf   : > { %s473_s27 = ssub.s32 %s4924_s24, %s5061_s3  ;;  %p486_p0 = scmp.ne.s32.totalorder %s4920_s23, %s4916_s22 }
  0x10   : > { %p474_p1 = scmp.eq.s32.totalorder %s473_s27, 0  ;;  %p487_p2 = scmp.eq.s32.totalorder %s5057_s2, 1 }
  0x11   : > { %p492_p3 = scmp.ne.s32.totalorder %s4916_s22, %s4912_s1  ;;  %p493_p4 = scmp.eq.s32.totalorder %s3879_s25, 1 }
  0x12   : > { %s5072_s28 = scalar_select %p474_p1, %s4920_s23, %s476_s26  }
  0x13   : > { %p5074_p5 = por %p487_p2, %p486_p0  ;;  %p5078_p6 = por %p493_p4, %p492_p3 }
  0x14   : > { %7444 = sst [smem:[#allocation7_spill]] %s5072_s28  ;;  %p3882_p7 = scmp.ge.s32.totalorder %s4924_s24, 1 }
  0x15   : > { %p570_p8 = scmp.lt.s32.totalorder %s4924_s24, 3 }
  0x17   : > { %p571_p9 = pnand %p3882_p7, %p570_p8 }
  0x19   : > { %574 = sbr.rel (%p571_p9) target bundleno = 2144 (0x860), region = 92 }
  0x20   : > { %p634_p10 = scmp.lt.s32.totalorder %s5057_s2, 1  ;;  %s7447_s21 = sld [smem:[#allocation227_spill]]  ;;  %vm3100_vm0 = vcmask 1040384   ;;  %vm3101_vm1 = vcmask 1041408   ;;  %vm4929_vm2 = vmmov 0   ;;  %vm3096_vm3 = vcmask 23552  }
  0x21   : > { %s7448_s26 = sld [smem:[#allocation226_spill]]  ;;  %s7667_s25 = sld [smem:[#allocation228_spill]]  ;;  %vm3222_vm4 = vcmask 130048   ;;  %vm3291_vm5 = vcmask 261120   ;;  %vm3368_vm6 = vcmask 523264   ;;  %vm3576_vm7 = vcmask 1043456  }
  0x22   : > { %s5108_s30 = scalar_select %p634_p10, %s5057_s2, 1  ;;  %vm3598_vm8 = vcmask 31744  }
  0x23   : > { %s7887_s6 = sld [smem:[#allocation232_spill]]  ;;  %s7888_s5 = sld [smem:[#allocation231_spill]] }
  0x24   : > { %s3956_s0 = sshll.u32 %s5108_s30, 12  ;;  %s7889_s7 = sld [smem:[#allocation233_spill]] }
  0x25   : > { %s7890_s3 = sld [smem:[#allocation229_spill]]  ;;  %s4930_s23 = smov [#allocation2]  }
  0x26   : > { %v5088_v0 = vld [vmem:[%s7447_s21] sm:$0xff]  ;;  %v5098_v2 = vld [vmem:[%s7447_s21 + $0x8] sm:$0xff] }
  0x27   : > { %v5093_v1 = vld [vmem:[%s7447_s21 + $0x80] sm:$0xff]  ;;  %v5105_v4 = vld [vmem:[%s7447_s21 + $0x88] sm:$0xff]  ;;  %s5116_s27 = scalar_lea.vmem %s7448_s26, %s3956_s0  ;;  %s7886_s0 = sld [smem:[#allocation230_spill]] }
  0x28   : > { %v3887_v3 = vcombine.high %v5088_v0, %v5093_v1  ;;  %v3889_v5 = vcombine.high %v5098_v2, %v5105_v4  ;;  %v663_v6 = vld [vmem:[%s5116_s27 + $0x80] sm:$0xff]  ;;  %v664_v7 = vld [vmem:[%s5116_s27 + $0x88] sm:$0xff]  ;;  %v665_v17 = vld [vmem:[%s5116_s27 + $0x90] sm:$0xff]  ;;  %s632_s26 = sand.u32 1, %s4916_s22  }
  0x29   : > { %v695_v8 = vld [vmem:[%s5116_s27 + $0x180] sm:$0xff]  ;;  %v5121_v9 = vpack.c.bf16 %v664_v7, %v663_v6  ;;  %v696_v10 = vld [vmem:[%s5116_s27 + $0x188] sm:$0xff]  ;;  %v666_v19 = vld [vmem:[%s5116_s27 + $0x98] sm:$0xff]  ;;  %s633_s28 = scalar_lea.vmem [#allocation2], %s632_s26 }
  0x2a   : > { %1639 = vmatprep.mubr.bf16.mxu0 %v3887_v3  ;;  %1680 = vmatprep.mubr.bf16.mxu1 %v3889_v5  ;;  %v647_v11 = vld [vmem:[%s5116_s27] sm:$0xff]  ;;  %v648_v12 = vld [vmem:[%s5116_s27 + $0x8] sm:$0xff]  ;;  %v5126_v13 = vpack.c.bf16 %v696_v10, %v695_v8  ;;  %v697_v20 = vld [vmem:[%s5116_s27 + $0x190] sm:$0xff]  ;;  %v5141_v22 = vpack.c.bf16 %v666_v19, %v665_v17 }
  0x2b   : > { %v5128_v14 = vpack.c.bf16 %v648_v12, %v647_v11  ;;  %v679_v15 = vld [vmem:[%s5116_s27 + $0x100] sm:$0xff]  ;;  %v680_v16 = vld [vmem:[%s5116_s27 + $0x108] sm:$0xff]  ;;  %3957 = vmatprep.subr.bf16.mxu0 %v5121_v9  ;;  %v698_v21 = vld [vmem:[%s5116_s27 + $0x198] sm:$0xff] }
  0x2c   : > { %v5134_v18 = vpack.c.bf16 %v680_v16, %v679_v15  ;;  %3979 = vmatprep.subr.bf16.mxu1 %v5126_v13  ;;  %v5143_v23 = vpack.c.bf16 %v698_v21, %v697_v20  ;;  %v649_v24 = vld [vmem:[%s5116_s27 + $0x10] sm:$0xff]  ;;  %v650_v25 = vld [vmem:[%s5116_s27 + $0x18] sm:$0xff]  ;;  %v667_v29 = vld [vmem:[%s5116_s27 + $0xa0] sm:$0xff] }
  0x2d   : > { %3958 = vmatpush3.bf16.msra.mxu0 %v5128_v14  ;;  %v681_v26 = vld [vmem:[%s5116_s27 + $0x110] sm:$0xff]  ;;  %v5149_v27 = vpack.c.bf16 %v650_v25, %v649_v24  ;;  %v682_v28 = vld [vmem:[%s5116_s27 + $0x118] sm:$0xff]  ;;  %v668_v30 = vld [vmem:[%s5116_s27 + $0xa8] sm:$0xff] }
  0x2e   : > { %3980 = vmatpush3.bf16.msra.mxu1 %v5134_v18  ;;  %3959 = vmatprep.subr.bf16.mxu0 %v5141_v22  ;;  %v5156_v31 = vpack.c.bf16 %v682_v28, %v681_v26  ;;  %v5158_v32 = vpack.c.bf16 %v668_v30, %v667_v29  ;;  %v699_v33 = vld [vmem:[%s5116_s27 + $0x1a0] sm:$0xff]  ;;  %v700_v34 = vld [vmem:[%s5116_s27 + $0x1a8] sm:$0xff]  ;;  %v669_v41 = vld [vmem:[%s5116_s27 + $0xb0] sm:$0xff] }
  0x2f   : > { %3981 = vmatprep.subr.bf16.mxu1 %v5143_v23  ;;  %v651_v35 = vld [vmem:[%s5116_s27 + $0x20] sm:$0xff]  ;;  %v5163_v36 = vpack.c.bf16 %v700_v34, %v699_v33  ;;  %v652_v37 = vld [vmem:[%s5116_s27 + $0x28] sm:$0xff]  ;;  %v670_v42 = vld [vmem:[%s5116_s27 + $0xb8] sm:$0xff] }
  0x30   : > { %v683_v38 = vld [vmem:[%s5116_s27 + $0x120] sm:$0xff]  ;;  %v684_v39 = vld [vmem:[%s5116_s27 + $0x128] sm:$0xff]  ;;  %v5169_v40 = vpack.c.bf16 %v652_v37, %v651_v35  ;;  %v701_v43 = vld [vmem:[%s5116_s27 + $0x1b0] sm:$0xff]  ;;  %v5178_v45 = vpack.c.bf16 %v670_v42, %v669_v41 }
  0x31   : > { %3960 = vmatpush3.bf16.msra.mxu0 %v5149_v27  ;;  %v5176_v44 = vpack.c.bf16 %v684_v39, %v683_v38  ;;  %v702_v46 = vld [vmem:[%s5116_s27 + $0x1b8] sm:$0xff]  ;;  %v653_v47 = vld [vmem:[%s5116_s27 + $0x30] sm:$0xff]  ;;  %v671_v52 = vld [vmem:[%s5116_s27 + $0xc0] sm:$0xff] }
  0x32   : > { %3982 = vmatpush3.bf16.msra.mxu1 %v5156_v31  ;;  %3961 = vmatprep.subr.bf16.mxu0 %v5158_v32  ;;  %v654_v48 = vld [vmem:[%s5116_s27 + $0x38] sm:$0xff]  ;;  %v5184_v49 = vpack.c.bf16 %v702_v46, %v701_v43  ;;  %v685_v50 = vld [vmem:[%s5116_s27 + $0x130] sm:$0xff]  ;;  %v672_v53 = vld [vmem:[%s5116_s27 + $0xc8] sm:$0xff] }
  0x33   : > { %3983 = vmatprep.subr.bf16.mxu1 %v5163_v36  ;;  %v686_v51 = vld [vmem:[%s5116_s27 + $0x138] sm:$0xff]  ;;  %v703_v54 = vld [vmem:[%s5116_s27 + $0x1c0] sm:$0xff]  ;;  %v704_v55 = vld [vmem:[%s5116_s27 + $0x1c8] sm:$0xff]  ;;  %v5193_v56 = vpack.c.bf16 %v654_v48, %v653_v47  ;;  %v5199_v58 = vpack.c.bf16 %v672_v53, %v671_v52 }
  0x34   : > { %v5197_v57 = vpack.c.bf16 %v686_v51, %v685_v50  ;;  %v655_v59 = vld [vmem:[%s5116_s27 + $0x40] sm:$0xff]  ;;  %v656_v60 = vld [vmem:[%s5116_s27 + $0x48] sm:$0xff]  ;;  %v5205_v62 = vpack.c.bf16 %v704_v55, %v703_v54  ;;  %v673_v3 = vld [vmem:[%s5116_s27 + $0xd0] sm:$0xff] }
  0x35   : > { %3962 = vmatpush3.bf16.msra.mxu0 %v5169_v40  ;;  %v687_v61 = vld [vmem:[%s5116_s27 + $0x140] sm:$0xff]  ;;  %v688_v63 = vld [vmem:[%s5116_s27 + $0x148] sm:$0xff]  ;;  %v674_v5 = vld [vmem:[%s5116_s27 + $0xd8] sm:$0xff]  ;;  %v5213_v8 = vpack.c.bf16 %v656_v60, %v655_v59 }
  0x36   : > { %3984 = vmatpush3.bf16.msra.mxu1 %v5176_v44  ;;  %3963 = vmatprep.subr.bf16.mxu0 %v5178_v45  ;;  %v705_v6 = vld [vmem:[%s5116_s27 + $0x1d0] sm:$0xff]  ;;  %v706_v7 = vld [vmem:[%s5116_s27 + $0x1d8] sm:$0xff]  ;;  %v5217_v10 = vpack.c.bf16 %v688_v63, %v687_v61  ;;  %v5219_v11 = vpack.c.bf16 %v674_v5, %v673_v3  ;;  %v675_v20 = vld [vmem:[%s5116_s27 + $0xe0] sm:$0xff] }
  0x37   : > { %3985 = vmatprep.subr.bf16.mxu1 %v5184_v49  ;;  %v657_v12 = vld [vmem:[%s5116_s27 + $0x50] sm:$0xff]  ;;  %v658_v15 = vld [vmem:[%s5116_s27 + $0x58] sm:$0xff]  ;;  %v5225_v17 = vpack.c.bf16 %v706_v7, %v705_v6  ;;  %v676_v21 = vld [vmem:[%s5116_s27 + $0xe8] sm:$0xff] }
  0x38   : > { %v689_v16 = vld [vmem:[%s5116_s27 + $0x150] sm:$0xff]  ;;  %v690_v19 = vld [vmem:[%s5116_s27 + $0x158] sm:$0xff]  ;;  %v707_v24 = vld [vmem:[%s5116_s27 + $0x1e0] sm:$0xff]  ;;  %v5233_v26 = vpack.c.bf16 %v658_v15, %v657_v12  ;;  %v5239_v29 = vpack.c.bf16 %v676_v21, %v675_v20  ;;  %v3886_v21 = vcombine.low %v5088_v0, %v5093_v1 }
  0x39   : > { %3964 = vmatpush3.bf16.msra.mxu0 %v5193_v56  ;;  %v708_v25 = vld [vmem:[%s5116_s27 + $0x1e8] sm:$0xff]  ;;  %v5237_v28 = vpack.c.bf16 %v690_v19, %v689_v16  ;;  %v659_v30 = vld [vmem:[%s5116_s27 + $0x60] sm:$0xff]  ;;  %v677_v38 = vld [vmem:[%s5116_s27 + $0xf0] sm:$0xff] }
  0x3a   : > { %3986 = vmatpush3.bf16.msra.mxu1 %v5197_v57  ;;  %3965 = vmatprep.subr.bf16.mxu0 %v5199_v58  ;;  %v660_v33 = vld [vmem:[%s5116_s27 + $0x68] sm:$0xff]  ;;  %v691_v34 = vld [vmem:[%s5116_s27 + $0x160] sm:$0xff]  ;;  %v5245_v35 = vpack.c.bf16 %v708_v25, %v707_v24  ;;  %v678_v39 = vld [vmem:[%s5116_s27 + $0xf8] sm:$0xff] }
  0x3b   : > { %3987 = vmatprep.subr.bf16.mxu1 %v5205_v62  ;;  %v692_v37 = vld [vmem:[%s5116_s27 + $0x168] sm:$0xff]  ;;  %v709_v41 = vld [vmem:[%s5116_s27 + $0x1f0] sm:$0xff]  ;;  %v710_v42 = vld [vmem:[%s5116_s27 + $0x1f8] sm:$0xff]  ;;  %v5253_v43 = vpack.c.bf16 %v660_v33, %v659_v30  ;;  %v5259_v47 = vpack.c.bf16 %v678_v39, %v677_v38  ;;  %v3888_v33 = vcombine.low %v5098_v2, %v5105_v4 }
  0x3c   : > { %v5257_v46 = vpack.c.bf16 %v692_v37, %v691_v34  ;;  %v661_v48 = vld [vmem:[%s5116_s27 + $0x70] sm:$0xff]  ;;  %v662_v50 = vld [vmem:[%s5116_s27 + $0x78] sm:$0xff]  ;;  %v5265_v52 = vpack.c.bf16 %v710_v42, %v709_v41  ;;  %v727_v54 = vld [vmem:[%s5116_s27 + $0x280] sm:$0xff] }
  0x3d   : > { %3966 = vmatpush3.bf16.msra.mxu0 %v5213_v8  ;;  %v693_v51 = vld [vmem:[%s5116_s27 + $0x170] sm:$0xff]  ;;  %v694_v53 = vld [vmem:[%s5116_s27 + $0x178] sm:$0xff]  ;;  %v728_v55 = vld [vmem:[%s5116_s27 + $0x288] sm:$0xff]  ;;  %v5273_v61 = vpack.c.bf16 %v662_v50, %v661_v48 }
  0x3e   : > { %3988 = vmatpush3.bf16.msra.mxu1 %v5217_v10  ;;  %3967 = vmatprep.subr.bf16.mxu0 %v5219_v11  ;;  %v759_v59 = vld [vmem:[%s5116_s27 + $0x380] sm:$0xff]  ;;  %v760_v60 = vld [vmem:[%s5116_s27 + $0x388] sm:$0xff]  ;;  %v5277_v63 = vpack.c.bf16 %v694_v53, %v693_v51  ;;  %v5279_v3 = vpack.c.bf16 %v728_v55, %v727_v54  ;;  %v5287_v12 = vld [vmem:[%s7447_s21 + $0x10] sm:$0xff] }
  0x3f   : > { %3989 = vmatprep.subr.bf16.mxu1 %v5225_v17  ;;  %7449 = vst [vmem:[#allocation8_spill] sm:$0xff] %v5273_v61  ;;  %v711_v5 = vld [vmem:[%s5116_s27 + $0x200] sm:$0xff]  ;;  %v712_v6 = vld [vmem:[%s5116_s27 + $0x208] sm:$0xff]  ;;  %v5290_v15 = vpack.c.bf16 %v760_v60, %v759_v59  ;;  %v729_v19 = vld [vmem:[%s5116_s27 + $0x290] sm:$0xff] }
  0x40   : > { %7450 = vst [vmem:[#allocation9_spill] sm:$0xff] %v5277_v63  ;;  %7451 = vst [vmem:[#allocation10_spill] sm:$0xff] %v5279_v3  ;;  %v743_v7 = vld [vmem:[%s5116_s27 + $0x300] sm:$0xff]  ;;  %v744_v16 = vld [vmem:[%s5116_s27 + $0x308] sm:$0xff]  ;;  %v5307_v34 = vpack.c.bf16 %v712_v6, %v711_v5 }
  0x41   : > { %3968 = vmatpush3.bf16.msra.mxu0 %v5233_v26  ;;  %7452 = vst [vmem:[#allocation11_spill] sm:$0xff] %v5290_v15  ;;  %v730_v20 = vld [vmem:[%s5116_s27 + $0x298] sm:$0xff]  ;;  %v761_v24 = vld [vmem:[%s5116_s27 + $0x390] sm:$0xff]  ;;  %v5321_v37 = vpack.c.bf16 %v744_v16, %v743_v7  ;;  %v731_v48 = vld [vmem:[%s5116_s27 + $0x2a0] sm:$0xff] }
  0x42   : > { %3990 = vmatpush3.bf16.msra.mxu1 %v5237_v28  ;;  %3969 = vmatprep.subr.bf16.mxu0 %v5239_v29  ;;  %v762_v25 = vld [vmem:[%s5116_s27 + $0x398] sm:$0xff]  ;;  %v5302_v30 = vld [vmem:[%s7447_s21 + $0x90] sm:$0xff]  ;;  %7453 = vst [vmem:[#allocation12_spill] sm:$0xff] %v5307_v34  ;;  %v5323_v2 = vpack.c.bf16 %v730_v20, %v729_v19  ;;  %v732_v50 = vld [vmem:[%s5116_s27 + $0x2a8] sm:$0xff] }
  0x43   : > { %3991 = vmatprep.subr.bf16.mxu1 %v5245_v35  ;;  %v5312_v0 = vld [vmem:[%s7447_s21 + $0x18] sm:$0xff]  ;;  %7454 = vst [vmem:[#allocation13_spill] sm:$0xff] %v5321_v37  ;;  %v713_v4 = vld [vmem:[%s5116_s27 + $0x210] sm:$0xff]  ;;  %v5329_v41 = vpack.c.bf16 %v762_v25, %v761_v24  ;;  %v3891_v51 = vcombine.high %v5287_v12, %v5302_v30  ;;  %v763_v53 = vld [vmem:[%s5116_s27 + $0x3a0] sm:$0xff]  ;;  %v5347_v5 = vpack.c.bf16 %v732_v50, %v731_v48 }
  0x44   : > { %v5317_v1 = vld [vmem:[%s7447_s21 + $0x98] sm:$0xff]  ;;  %7455 = vst [vmem:[#allocation14_spill] sm:$0xff] %v5323_v2  ;;  %v745_v39 = vld [vmem:[%s5116_s27 + $0x310] sm:$0xff]  ;;  %v764_v54 = vld [vmem:[%s5116_s27 + $0x3a8] sm:$0xff] }
  0x45   : > { %3970 = vmatpush3.bf16.msra.mxu0 %v5253_v43  ;;  %v714_v38 = vld [vmem:[%s5116_s27 + $0x218] sm:$0xff]  ;;  %7456 = vst [vmem:[#allocation15_spill] sm:$0xff] %v5329_v41  ;;  %v3893_v55 = vcombine.high %v5312_v0, %v5317_v1  ;;  %7459 = vst [vmem:[#allocation18_spill] sm:$0xff] %v5347_v5  ;;  %v715_v6 = vld [vmem:[%s5116_s27 + $0x220] sm:$0xff]  ;;  %v5353_v19 = vpack.c.bf16 %v764_v54, %v763_v53 }
  0x46   : > { %3992 = vmatpush3.bf16.msra.mxu1 %v5257_v46  ;;  %3971 = vmatprep.subr.bf16.mxu0 %v5259_v47  ;;  %v746_v42 = vld [vmem:[%s5116_s27 + $0x318] sm:$0xff]  ;;  %v5341_v59 = vpack.c.bf16 %v714_v38, %v713_v4  ;;  %v716_v7 = vld [vmem:[%s5116_s27 + $0x228] sm:$0xff]  ;;  %v747_v16 = vld [vmem:[%s5116_s27 + $0x320] sm:$0xff] }
  0x47   : > { %3993 = vmatprep.subr.bf16.mxu1 %v5265_v52  ;;  %v5345_v60 = vpack.c.bf16 %v746_v42, %v745_v39  ;;  %7460 = vst [vmem:[#allocation19_spill] sm:$0xff] %v5353_v19  ;;  %v748_v20 = vld [vmem:[%s5116_s27 + $0x328] sm:$0xff]  ;;  %v734_v24 = vld [vmem:[%s5116_s27 + $0x2b8] sm:$0xff]  ;;  %v765_v25 = vld [vmem:[%s5116_s27 + $0x3b0] sm:$0xff]  ;;  %v5361_v4 = vpack.c.bf16 %v716_v7, %v715_v6 }
  0x48   : > { %7457 = vst [vmem:[#allocation16_spill] sm:$0xff] %v5341_v59  ;;  %v5365_v38 = vpack.c.bf16 %v748_v20, %v747_v16  ;;  %v717_v42 = vld [vmem:[%s5116_s27 + $0x230] sm:$0xff]  ;;  %v718_v48 = vld [vmem:[%s5116_s27 + $0x238] sm:$0xff]  ;;  %v735_v54 = vld [vmem:[%s5116_s27 + $0x2c0] sm:$0xff] }
  0x49   : > { %3972 = vmatpush3.bf16.msra.mxu0 %v5273_v61  ;;  %7458 = vst [vmem:[#allocation17_spill] sm:$0xff] %v5345_v60  ;;  %7461 = vst [vmem:[#allocation20_spill] sm:$0xff] %v5361_v4  ;;  %v749_v50 = vld [vmem:[%s5116_s27 + $0x330] sm:$0xff]  ;;  %v750_v53 = vld [vmem:[%s5116_s27 + $0x338] sm:$0xff]  ;;  %v5381_v16 = vpack.c.bf16 %v718_v48, %v717_v42 }
  0x4a   : > { %3994 = vmatpush3.bf16.msra.mxu1 %v5277_v63  ;;  %4001 = vmatprep.subr.bf16.mxu0 %v5279_v3  ;;  %7462 = vst [vmem:[#allocation21_spill] sm:$0xff] %v5365_v38  ;;  %v767_v6 = vld [vmem:[%s5116_s27 + $0x3c0] sm:$0xff]  ;;  %v768_v7 = vld [vmem:[%s5116_s27 + $0x3c8] sm:$0xff]  ;;  %v5385_v20 = vpack.c.bf16 %v750_v53, %v749_v50  ;;  %v737_v48 = vld [vmem:[%s5116_s27 + $0x2d0] sm:$0xff] }
  0x4b   : > { %4023 = vmatprep.subr.bf16.mxu1 %v5290_v15  ;;  %7465 = vst [vmem:[#allocation24_spill] sm:$0xff] %v5381_v16  ;;  %v752_v42 = vld [vmem:[%s5116_s27 + $0x348] sm:$0xff]  ;;  %v769_v50 = vld [vmem:[%s5116_s27 + $0x3d0] sm:$0xff]  ;;  %v770_v53 = vld [vmem:[%s5116_s27 + $0x3d8] sm:$0xff] }
  0x4c   : > { %1640 = vmatmul.mubr.bf16.vlgmr.msra.gmra.mrb[0].mxu0 %v3886_v21  ;;  %v733_v21 = vld [vmem:[%s5116_s27 + $0x2b0] sm:$0xff]  ;;  %7466 = vst [vmem:[#allocation25_spill] sm:$0xff] %v5385_v20 }
  0x4d   : > { %1681 = vmatmul.mubr.bf16.vlgmr.msra.gmra.mrb[0].mxu1 %v3888_v33  ;;  %4002 = vmatpush3.bf16.msra.mxu0 %v5307_v34  ;;  %v766_v33 = vld [vmem:[%s5116_s27 + $0x3b8] sm:$0xff]  ;;  %v5367_v39 = vpack.c.bf16 %v734_v24, %v733_v21  ;;  %v719_v24 = vld [vmem:[%s5116_s27 + $0x240] sm:$0xff]  ;;  %v1141_v3 = vld [vmem:[%s5116_s27 + $0xf70] sm:$0xff] }
  0x4e   : > { %4024 = vmatpush3.bf16.msra.mxu1 %v5321_v37  ;;  %4003 = vmatprep.subr.bf16.mxu0 %v5323_v2  ;;  %v1110_v34 = vld [vmem:[%s5116_s27 + $0xe78] sm:$0xff] }
  0x4f   : > { %4025 = vmatprep.subr.bf16.mxu1 %v5329_v41  ;;  %1721 = vmatprep.mubr.bf16.mxu0 %v3891_v51  ;;  %7463 = vst [vmem:[#allocation22_spill] sm:$0xff] %v5367_v39  ;;  %v5373_v51 = vpack.c.bf16 %v766_v33, %v765_v25  ;;  %v720_v25 = vld [vmem:[%s5116_s27 + $0x248] sm:$0xff]  ;;  %v751_v33 = vld [vmem:[%s5116_s27 + $0x340] sm:$0xff] }
  0x50   : > { %1762 = vmatprep.mubr.bf16.mxu1 %v3893_v55  ;;  %v736_v55 = vld [vmem:[%s5116_s27 + $0x2c8] sm:$0xff] }
  0x51   : > { %4004 = vmatpush3.bf16.msra.mxu0 %v5341_v59  ;;  %7464 = vst [vmem:[#allocation23_spill] sm:$0xff] %v5373_v51  ;;  %v5387_v21 = vpack.c.bf16 %v736_v55, %v735_v54  ;;  %v5401_v54 = vpack.c.bf16 %v720_v25, %v719_v24  ;;  %v5405_v55 = vpack.c.bf16 %v752_v42, %v751_v33  ;;  %v754_v24 = vld [vmem:[%s5116_s27 + $0x358] sm:$0xff]  ;;  %v739_v25 = vld [vmem:[%s5116_s27 + $0x2e0] sm:$0xff]  ;;  %v980_v41 = vld [vmem:[%s5116_s27 + $0xa68] sm:$0xff] }
  0x52   : > { %4026 = vmatpush3.bf16.msra.mxu1 %v5345_v60  ;;  %4005 = vmatprep.subr.bf16.mxu0 %v5347_v5  ;;  %v771_v33 = vld [vmem:[%s5116_s27 + $0x3e0] sm:$0xff]  ;;  %v796_v60 = vld [vmem:[%s5116_s27 + $0x4a8] sm:$0xff] }
  0x53   : > { %4027 = vmatprep.subr.bf16.mxu1 %v5353_v19  ;;  %7467 = vst [vmem:[#allocation26_spill] sm:$0xff] %v5387_v21  ;;  %v5393_v19 = vpack.c.bf16 %v768_v7, %v767_v6  ;;  %7469 = vst [vmem:[#allocation28_spill] sm:$0xff] %v5401_v54  ;;  %v721_v7 = vld [vmem:[%s5116_s27 + $0x250] sm:$0xff]  ;;  %v795_v5 = vld [vmem:[%s5116_s27 + $0x4a0] sm:$0xff] }
  0x54   : > { %7470 = vst [vmem:[#allocation29_spill] sm:$0xff] %v5405_v55  ;;  %v1027_v59 = vld [vmem:[%s5116_s27 + $0xbe0] sm:$0xff] }
  0x55   : > { %4006 = vmatpush3.bf16.msra.mxu0 %v5361_v4  ;;  %7468 = vst [vmem:[#allocation27_spill] sm:$0xff] %v5393_v19  ;;  %v5413_v4 = vpack.c.bf16 %v770_v53, %v769_v50  ;;  %v723_v53 = vld [vmem:[%s5116_s27 + $0x260] sm:$0xff] }
  0x56   : > { %4028 = vmatpush3.bf16.msra.mxu1 %v5365_v38  ;;  %4007 = vmatprep.subr.bf16.mxu0 %v5367_v39  ;;  %v738_v38 = vld [vmem:[%s5116_s27 + $0x2d8] sm:$0xff]  ;;  %v753_v39 = vld [vmem:[%s5116_s27 + $0x350] sm:$0xff] }
  0x57   : > { %4029 = vmatprep.subr.bf16.mxu1 %v5373_v51  ;;  %v5407_v6 = vpack.c.bf16 %v738_v38, %v737_v48  ;;  %v722_v51 = vld [vmem:[%s5116_s27 + $0x258] sm:$0xff]  ;;  %7472 = vst [vmem:[#allocation31_spill] sm:$0xff] %v5413_v4  ;;  %v772_v38 = vld [vmem:[%s5116_s27 + $0x3e8] sm:$0xff]  ;;  %v5425_v48 = vpack.c.bf16 %v754_v24, %v753_v39  ;;  %v773_v39 = vld [vmem:[%s5116_s27 + $0x3f0] sm:$0xff] }
  0x58   : > { %v5421_v42 = vpack.c.bf16 %v722_v51, %v721_v7  ;;  %v756_v51 = vld [vmem:[%s5116_s27 + $0x368] sm:$0xff]  ;;  %v741_v7 = vld [vmem:[%s5116_s27 + $0x2f0] sm:$0xff] }
  0x59   : > { %4008 = vmatpush3.bf16.msra.mxu0 %v5381_v16  ;;  %7471 = vst [vmem:[#allocation30_spill] sm:$0xff] %v5407_v6  ;;  %7474 = vst [vmem:[#allocation33_spill] sm:$0xff] %v5425_v48  ;;  %v5433_v16 = vpack.c.bf16 %v772_v38, %v771_v33  ;;  %v725_v38 = vld [vmem:[%s5116_s27 + $0x270] sm:$0xff] }
  0x5a   : > { %4030 = vmatpush3.bf16.msra.mxu1 %v5385_v20  ;;  %4009 = vmatprep.subr.bf16.mxu0 %v5387_v21  ;;  %v740_v20 = vld [vmem:[%s5116_s27 + $0x2e8] sm:$0xff]  ;;  %7473 = vst [vmem:[#allocation32_spill] sm:$0xff] %v5421_v42  ;;  %v755_v21 = vld [vmem:[%s5116_s27 + $0x360] sm:$0xff] }
  0x5b   : > { %4031 = vmatprep.subr.bf16.mxu1 %v5393_v19  ;;  %v5427_v50 = vpack.c.bf16 %v740_v20, %v739_v25  ;;  %v724_v19 = vld [vmem:[%s5116_s27 + $0x268] sm:$0xff]  ;;  %7476 = vst [vmem:[#allocation35_spill] sm:$0xff] %v5433_v16  ;;  %v774_v20 = vld [vmem:[%s5116_s27 + $0x3f8] sm:$0xff]  ;;  %v5445_v25 = vpack.c.bf16 %v756_v51, %v755_v21 }
  0x5c   : > { %v5441_v24 = vpack.c.bf16 %v724_v19, %v723_v53  ;;  %v758_v19 = vld [vmem:[%s5116_s27 + $0x378] sm:$0xff]  ;;  %v791_v53 = vld [vmem:[%s5116_s27 + $0x480] sm:$0xff]  ;;  %v824_v21 = vld [vmem:[%s5116_s27 + $0x588] sm:$0xff] }
  0x5d   : > { %4010 = vmatpush3.bf16.msra.mxu0 %v5401_v54  ;;  %7475 = vst [vmem:[#allocation34_spill] sm:$0xff] %v5427_v50  ;;  %7478 = vst [vmem:[#allocation37_spill] sm:$0xff] %v5445_v25  ;;  %v5453_v54 = vpack.c.bf16 %v774_v20, %v773_v39  ;;  %v775_v39 = vld [vmem:[%s5116_s27 + $0x400] sm:$0xff]  ;;  %v776_v20 = vld [vmem:[%s5116_s27 + $0x408] sm:$0xff] }
  0x5e   : > { %4032 = vmatpush3.bf16.msra.mxu1 %v5405_v55  ;;  %4011 = vmatprep.subr.bf16.mxu0 %v5407_v6  ;;  %v742_v55 = vld [vmem:[%s5116_s27 + $0x2f8] sm:$0xff]  ;;  %7477 = vst [vmem:[#allocation36_spill] sm:$0xff] %v5441_v24  ;;  %v757_v6 = vld [vmem:[%s5116_s27 + $0x370] sm:$0xff] }
  0x5f   : > { %4033 = vmatprep.subr.bf16.mxu1 %v5413_v4  ;;  %v5447_v33 = vpack.c.bf16 %v742_v55, %v741_v7  ;;  %v726_v4 = vld [vmem:[%s5116_s27 + $0x278] sm:$0xff]  ;;  %7480 = vst [vmem:[#allocation39_spill] sm:$0xff] %v5453_v54  ;;  %v5465_v51 = vpack.c.bf16 %v758_v19, %v757_v6  ;;  %v825_v19 = vld [vmem:[%s5116_s27 + $0x590] sm:$0xff] }
  0x60   : > { %v5461_v55 = vpack.c.bf16 %v726_v4, %v725_v38  ;;  %v808_v38 = vld [vmem:[%s5116_s27 + $0x508] sm:$0xff]  ;;  %v794_v6 = vld [vmem:[%s5116_s27 + $0x498] sm:$0xff] }
  0x61   : > { %4012 = vmatpush3.bf16.msra.mxu0 %v5421_v42  ;;  %7479 = vst [vmem:[#allocation38_spill] sm:$0xff] %v5447_v33  ;;  %7482 = vst [vmem:[#allocation41_spill] sm:$0xff] %v5465_v51  ;;  %v5475_v42 = vld [vmem:[%s7447_s21 + $0x20] sm:$0xff] }
  0x62   : > { %4034 = vmatpush3.bf16.msra.mxu1 %v5425_v48  ;;  %4013 = vmatprep.subr.bf16.mxu0 %v5427_v50  ;;  %v792_v48 = vld [vmem:[%s5116_s27 + $0x488] sm:$0xff]  ;;  %v823_v50 = vld [vmem:[%s5116_s27 + $0x580] sm:$0xff]  ;;  %7481 = vst [vmem:[#allocation40_spill] sm:$0xff] %v5461_v55 }
  0x63   : > { %4035 = vmatprep.subr.bf16.mxu1 %v5433_v16  ;;  %v5467_v7 = vpack.c.bf16 %v792_v48, %v791_v53  ;;  %v807_v16 = vld [vmem:[%s5116_s27 + $0x500] sm:$0xff]  ;;  %v5478_v4 = vpack.c.bf16 %v824_v21, %v823_v50  ;;  %v3890_v48 = vcombine.low %v5287_v12, %v5302_v30  ;;  %v826_v53 = vld [vmem:[%s5116_s27 + $0x598] sm:$0xff]  ;;  %v3892_v50 = vcombine.low %v5312_v0, %v5317_v1  ;;  %v5500_v12 = vld [vmem:[%s7447_s21 + $0x28] sm:$0xff] }
  0x64   : > { %v5495_v21 = vpack.c.bf16 %v776_v20, %v775_v39  ;;  %v5505_v30 = vld [vmem:[%s7447_s21 + $0xa8] sm:$0xff]  ;;  %v777_v1 = vld [vmem:[%s5116_s27 + $0x410] sm:$0xff]  ;;  %v778_v39 = vld [vmem:[%s5116_s27 + $0x418] sm:$0xff] }
  0x65   : > { %4014 = vmatpush3.bf16.msra.mxu0 %v5441_v24  ;;  %7483 = vst [vmem:[#allocation42_spill] sm:$0xff] %v5467_v7  ;;  %7484 = vst [vmem:[#allocation43_spill] sm:$0xff] %v5478_v4  ;;  %v809_v20 = vld [vmem:[%s5116_s27 + $0x510] sm:$0xff]  ;;  %v810_v24 = vld [vmem:[%s5116_s27 + $0x518] sm:$0xff] }
  0x66   : > { %4036 = vmatpush3.bf16.msra.mxu1 %v5445_v25  ;;  %4015 = vmatprep.subr.bf16.mxu0 %v5447_v33  ;;  %v793_v25 = vld [vmem:[%s5116_s27 + $0x490] sm:$0xff]  ;;  %v5490_v33 = vld [vmem:[%s7447_s21 + $0xa0] sm:$0xff]  ;;  %7485 = vst [vmem:[#allocation44_spill] sm:$0xff] %v5495_v21 }
  0x67   : > { %4037 = vmatprep.subr.bf16.mxu1 %v5453_v54  ;;  %v5511_v0 = vpack.c.bf16 %v794_v6, %v793_v25  ;;  %v5517_v54 = vpack.c.bf16 %v826_v53, %v825_v19  ;;  %v828_v25 = vld [vmem:[%s5116_s27 + $0x5a8] sm:$0xff]  ;;  %v5529_v6 = vpack.c.bf16 %v778_v39, %v777_v1  ;;  %v5535_v19 = vpack.c.bf16 %v796_v60, %v795_v5  ;;  %v779_v53 = vld [vmem:[%s5116_s27 + $0x420] sm:$0xff]  ;;  %v797_v39 = vld [vmem:[%s5116_s27 + $0x4b0] sm:$0xff] }
  0x68   : > { %v812_v1 = vld [vmem:[%s5116_s27 + $0x528] sm:$0xff]  ;;  %v830_v60 = vld [vmem:[%s5116_s27 + $0x5b8] sm:$0xff] }
  0x69   : > { %4016 = vmatpush3.bf16.msra.mxu0 %v5461_v55  ;;  %v5509_v55 = vpack.c.bf16 %v808_v38, %v807_v16  ;;  %7487 = vst [vmem:[#allocation46_spill] sm:$0xff] %v5511_v0  ;;  %7488 = vst [vmem:[#allocation47_spill] sm:$0xff] %v5517_v54  ;;  %v827_v16 = vld [vmem:[%s5116_s27 + $0x5a0] sm:$0xff]  ;;  %v3897_v38 = vcombine.high %v5500_v12, %v5505_v30 }
  0x6a   : > { %4038 = vmatpush3.bf16.msra.mxu1 %v5465_v51  ;;  %4045 = vmatprep.subr.bf16.mxu0 %v5467_v7  ;;  %v3895_v7 = vcombine.high %v5475_v42, %v5490_v33  ;;  %7489 = vst [vmem:[#allocation48_spill] sm:$0xff] %v5529_v6  ;;  %7491 = vst [vmem:[#allocation50_spill] sm:$0xff] %v5535_v19  ;;  %v811_v51 = vld [vmem:[%s5116_s27 + $0x520] sm:$0xff] }
  0x6b   : > { %7486 = vst [vmem:[#allocation45_spill] sm:$0xff] %v5509_v55  ;;  %4067 = vmatprep.subr.bf16.mxu1 %v5478_v4  ;;  %v780_v4 = vld [vmem:[%s5116_s27 + $0x428] sm:$0xff] }
  0x6c   : > { %1722 = vmatmul.mubr.bf16.vlgmr.msra.gmra.mrb[4].mxu0 %v3890_v48  ;;  %v5533_v48 = vpack.c.bf16 %v810_v24, %v809_v20  ;;  %v829_v24 = vld [vmem:[%s5116_s27 + $0x5b0] sm:$0xff]  ;;  %v5549_v5 = vpack.c.bf16 %v780_v4, %v779_v53  ;;  %v5553_v20 = vpack.c.bf16 %v812_v1, %v811_v51  ;;  %v814_v4 = vld [vmem:[%s5116_s27 + $0x538] sm:$0xff]  ;;  %v799_v53 = vld [vmem:[%s5116_s27 + $0x4c0] sm:$0xff] }
  0x6d   : > { %1763 = vmatmul.mubr.bf16.vlgmr.msra.gmra.mrb[4].mxu1 %v3892_v50  ;;  %4046 = vmatpush3.bf16.msra.mxu0 %v5495_v21  ;;  %v5541_v50 = vpack.c.bf16 %v828_v25, %v827_v16  ;;  %v798_v21 = vld [vmem:[%s5116_s27 + $0x4b8] sm:$0xff]  ;;  %v831_v51 = vld [vmem:[%s5116_s27 + $0x5c0] sm:$0xff] }
  0x6e   : > { %4068 = vmatpush3.bf16.msra.mxu1 %v5509_v55  ;;  %4047 = vmatprep.subr.bf16.mxu0 %v5511_v0  ;;  %7490 = vst [vmem:[#allocation49_spill] sm:$0xff] %v5533_v48  ;;  %7493 = vst [vmem:[#allocation52_spill] sm:$0xff] %v5549_v5  ;;  %v5555_v16 = vpack.c.bf16 %v798_v21, %v797_v39  ;;  %v782_v25 = vld [vmem:[%s5116_s27 + $0x438] sm:$0xff]  ;;  %v832_v21 = vld [vmem:[%s5116_s27 + $0x5c8] sm:$0xff] }
  0x6f   : > { %4069 = vmatprep.subr.bf16.mxu1 %v5517_v54  ;;  %7492 = vst [vmem:[#allocation51_spill] sm:$0xff] %v5541_v50  ;;  %1803 = vmatprep.mubr.bf16.mxu0 %v3895_v7  ;;  %7494 = vst [vmem:[#allocation53_spill] sm:$0xff] %v5553_v20  ;;  %v781_v7 = vld [vmem:[%s5116_s27 + $0x430] sm:$0xff]  ;;  %v860_v55 = vld [vmem:[%s5116_s27 + $0x6a8] sm:$0xff] }
  0x70   : > { %1844 = vmatprep.mubr.bf16.mxu1 %v3897_v38  ;;  %7495 = vst [vmem:[#allocation54_spill] sm:$0xff] %v5555_v16  ;;  %v813_v54 = vld [vmem:[%s5116_s27 + $0x530] sm:$0xff]  ;;  %v5561_v38 = vpack.c.bf16 %v830_v60, %v829_v24  ;;  %v5569_v1 = vpack.c.bf16 %v782_v25, %v781_v7  ;;  %v783_v60 = vld [vmem:[%s5116_s27 + $0x440] sm:$0xff]  ;;  %v816_v7 = vld [vmem:[%s5116_s27 + $0x548] sm:$0xff] }
  0x71   : > { %4048 = vmatpush3.bf16.msra.mxu0 %v5529_v6  ;;  %v5573_v39 = vpack.c.bf16 %v814_v4, %v813_v54  ;;  %v5581_v6 = vpack.c.bf16 %v832_v21, %v831_v51  ;;  %v801_v25 = vld [vmem:[%s5116_s27 + $0x4d0] sm:$0xff] }
  0x72   : > { %4070 = vmatpush3.bf16.msra.mxu1 %v5533_v48  ;;  %4049 = vmatprep.subr.bf16.mxu0 %v5535_v19  ;;  %7496 = vst [vmem:[#allocation55_spill] sm:$0xff] %v5561_v38  ;;  %v800_v48 = vld [vmem:[%s5116_s27 + $0x4c8] sm:$0xff]  ;;  %7497 = vst [vmem:[#allocation56_spill] sm:$0xff] %v5569_v1  ;;  %v815_v19 = vld [vmem:[%s5116_s27 + $0x540] sm:$0xff] }
  0x73   : > { %4071 = vmatprep.subr.bf16.mxu1 %v5541_v50  ;;  %7498 = vst [vmem:[#allocation57_spill] sm:$0xff] %v5573_v39  ;;  %v5575_v24 = vpack.c.bf16 %v800_v48, %v799_v53  ;;  %v784_v50 = vld [vmem:[%s5116_s27 + $0x448] sm:$0xff]  ;;  %7500 = vst [vmem:[#allocation59_spill] sm:$0xff] %v5581_v6  ;;  %v833_v54 = vld [vmem:[%s5116_s27 + $0x5d0] sm:$0xff]  ;;  %v5593_v53 = vpack.c.bf16 %v816_v7, %v815_v19 }
  0x74   : > { %v834_v48 = vld [vmem:[%s5116_s27 + $0x5d8] sm:$0xff]  ;;  %v5589_v4 = vpack.c.bf16 %v784_v50, %v783_v60  ;;  %v785_v21 = vld [vmem:[%s5116_s27 + $0x450] sm:$0xff]  ;;  %v803_v60 = vld [vmem:[%s5116_s27 + $0x4e0] sm:$0xff] }
  0x75   : > { %4050 = vmatpush3.bf16.msra.mxu0 %v5549_v5  ;;  %7499 = vst [vmem:[#allocation58_spill] sm:$0xff] %v5575_v24  ;;  %7502 = vst [vmem:[#allocation61_spill] sm:$0xff] %v5593_v53  ;;  %v5601_v5 = vpack.c.bf16 %v834_v48, %v833_v54  ;;  %v818_v50 = vld [vmem:[%s5116_s27 + $0x558] sm:$0xff]  ;;  %v835_v19 = vld [vmem:[%s5116_s27 + $0x5e0] sm:$0xff] }
  0x76   : > { %4072 = vmatpush3.bf16.msra.mxu1 %v5553_v20  ;;  %4051 = vmatprep.subr.bf16.mxu0 %v5555_v16  ;;  %v802_v20 = vld [vmem:[%s5116_s27 + $0x4d8] sm:$0xff]  ;;  %7501 = vst [vmem:[#allocation60_spill] sm:$0xff] %v5589_v4  ;;  %v817_v16 = vld [vmem:[%s5116_s27 + $0x550] sm:$0xff]  ;;  %v787_v48 = vld [vmem:[%s5116_s27 + $0x460] sm:$0xff] }
  0x77   : > { %4073 = vmatprep.subr.bf16.mxu1 %v5561_v38  ;;  %v5595_v51 = vpack.c.bf16 %v802_v20, %v801_v25  ;;  %v786_v38 = vld [vmem:[%s5116_s27 + $0x458] sm:$0xff]  ;;  %7504 = vst [vmem:[#allocation63_spill] sm:$0xff] %v5601_v5  ;;  %v836_v20 = vld [vmem:[%s5116_s27 + $0x5e8] sm:$0xff]  ;;  %v5613_v25 = vpack.c.bf16 %v818_v50, %v817_v16  ;;  %v837_v16 = vld [vmem:[%s5116_s27 + $0x5f0] sm:$0xff] }
  0x78   : > { %v5609_v7 = vpack.c.bf16 %v786_v38, %v785_v21  ;;  %v820_v38 = vld [vmem:[%s5116_s27 + $0x568] sm:$0xff]  ;;  %v805_v21 = vld [vmem:[%s5116_s27 + $0x4f0] sm:$0xff] }
  0x79   : > { %4052 = vmatpush3.bf16.msra.mxu0 %v5569_v1  ;;  %7503 = vst [vmem:[#allocation62_spill] sm:$0xff] %v5595_v51  ;;  %7506 = vst [vmem:[#allocation65_spill] sm:$0xff] %v5613_v25  ;;  %v5621_v1 = vpack.c.bf16 %v836_v20, %v835_v19  ;;  %v789_v20 = vld [vmem:[%s5116_s27 + $0x470] sm:$0xff] }
  0x7a   : > { %4074 = vmatpush3.bf16.msra.mxu1 %v5573_v39  ;;  %4053 = vmatprep.subr.bf16.mxu0 %v5575_v24  ;;  %v804_v39 = vld [vmem:[%s5116_s27 + $0x4e8] sm:$0xff]  ;;  %7505 = vst [vmem:[#allocation64_spill] sm:$0xff] %v5609_v7  ;;  %v819_v24 = vld [vmem:[%s5116_s27 + $0x560] sm:$0xff] }
  0x7b   : > { %4075 = vmatprep.subr.bf16.mxu1 %v5581_v6  ;;  %v5615_v54 = vpack.c.bf16 %v804_v39, %v803_v60  ;;  %v788_v6 = vld [vmem:[%s5116_s27 + $0x468] sm:$0xff]  ;;  %7508 = vst [vmem:[#allocation67_spill] sm:$0xff] %v5621_v1  ;;  %v838_v39 = vld [vmem:[%s5116_s27 + $0x5f8] sm:$0xff]  ;;  %v5633_v60 = vpack.c.bf16 %v820_v38, %v819_v24  ;;  %v839_v38 = vld [vmem:[%s5116_s27 + $0x600] sm:$0xff] }
  0x7c   : > { %v5629_v50 = vpack.c.bf16 %v788_v6, %v787_v48  ;;  %v822_v6 = vld [vmem:[%s5116_s27 + $0x578] sm:$0xff]  ;;  %v855_v48 = vld [vmem:[%s5116_s27 + $0x680] sm:$0xff]  ;;  %v888_v24 = vld [vmem:[%s5116_s27 + $0x788] sm:$0xff] }
  0x7d   : > { %4054 = vmatpush3.bf16.msra.mxu0 %v5589_v4  ;;  %7507 = vst [vmem:[#allocation66_spill] sm:$0xff] %v5615_v54  ;;  %7510 = vst [vmem:[#allocation69_spill] sm:$0xff] %v5633_v60  ;;  %v872_v4 = vld [vmem:[%s5116_s27 + $0x708] sm:$0xff] }
  0x7e   : > { %4076 = vmatpush3.bf16.msra.mxu1 %v5593_v53  ;;  %4055 = vmatprep.subr.bf16.mxu0 %v5595_v51  ;;  %v806_v53 = vld [vmem:[%s5116_s27 + $0x4f8] sm:$0xff]  ;;  %7509 = vst [vmem:[#allocation68_spill] sm:$0xff] %v5629_v50  ;;  %v821_v51 = vld [vmem:[%s5116_s27 + $0x570] sm:$0xff] }
  0x7f   : > { %4077 = vmatprep.subr.bf16.mxu1 %v5601_v5  ;;  %v5635_v19 = vpack.c.bf16 %v806_v53, %v805_v21  ;;  %v790_v5 = vld [vmem:[%s5116_s27 + $0x478] sm:$0xff]  ;;  %v5654_v21 = vpack.c.bf16 %v822_v6, %v821_v51  ;;  %v3896_v6 = vcombine.low %v5500_v12, %v5505_v30  ;;  %v841_v30 = vld [vmem:[%s5116_s27 + $0x610] sm:$0xff] }
  0x80   : > { %v5649_v53 = vpack.c.bf16 %v790_v5, %v789_v20  ;;  %v858_v5 = vld [vmem:[%s5116_s27 + $0x698] sm:$0xff]  ;;  %v889_v20 = vld [vmem:[%s5116_s27 + $0x790] sm:$0xff] }
  0x81   : > { %4056 = vmatpush3.bf16.msra.mxu0 %v5609_v7  ;;  %7511 = vst [vmem:[#allocation70_spill] sm:$0xff] %v5635_v19  ;;  %v5641_v7 = vpack.c.bf16 %v838_v39, %v837_v16  ;;  %7514 = vst [vmem:[#allocation73_spill] sm:$0xff] %v5654_v21  ;;  %v840_v39 = vld [vmem:[%s5116_s27 + $0x608] sm:$0xff]  ;;  %v890_v51 = vld [vmem:[%s5116_s27 + $0x798] sm:$0xff] }
  0x82   : > { %4078 = vmatpush3.bf16.msra.mxu1 %v5613_v25  ;;  %4057 = vmatprep.subr.bf16.mxu0 %v5615_v54  ;;  %v856_v25 = vld [vmem:[%s5116_s27 + $0x688] sm:$0xff]  ;;  %v887_v54 = vld [vmem:[%s5116_s27 + $0x780] sm:$0xff]  ;;  %7513 = vst [vmem:[#allocation72_spill] sm:$0xff] %v5649_v53 }
  0x83   : > { %4079 = vmatprep.subr.bf16.mxu1 %v5621_v1  ;;  %7512 = vst [vmem:[#allocation71_spill] sm:$0xff] %v5641_v7  ;;  %v5656_v16 = vpack.c.bf16 %v856_v25, %v855_v48  ;;  %v871_v1 = vld [vmem:[%s5116_s27 + $0x700] sm:$0xff]  ;;  %v5662_v0 = vpack.c.bf16 %v888_v24, %v887_v54  ;;  %v5673_v25 = vld [vmem:[%s7447_s21 + $0x30] sm:$0xff]  ;;  %v5693_v48 = vld [vmem:[%s7447_s21 + $0xb8] sm:$0xff] }
  0x84   : > { %v5678_v54 = vld [vmem:[%s7447_s21 + $0xb0] sm:$0xff]  ;;  %v5697_v24 = vpack.c.bf16 %v872_v4, %v871_v1  ;;  %v891_v1 = vld [vmem:[%s5116_s27 + $0x7a0] sm:$0xff]  ;;  %v892_v4 = vld [vmem:[%s5116_s27 + $0x7a8] sm:$0xff] }
  0x85   : > { %4058 = vmatpush3.bf16.msra.mxu0 %v5629_v50  ;;  %7515 = vst [vmem:[#allocation74_spill] sm:$0xff] %v5656_v16  ;;  %7516 = vst [vmem:[#allocation75_spill] sm:$0xff] %v5662_v0  ;;  %v857_v50 = vld [vmem:[%s5116_s27 + $0x690] sm:$0xff] }
  0x86   : > { %4080 = vmatpush3.bf16.msra.mxu1 %v5633_v60  ;;  %4059 = vmatprep.subr.bf16.mxu0 %v5635_v19  ;;  %v3894_v19 = vcombine.low %v5475_v42, %v5490_v33  ;;  %v5683_v42 = vpack.c.bf16 %v840_v39, %v839_v38  ;;  %v5688_v33 = vld [vmem:[%s7447_s21 + $0x38] sm:$0xff]  ;;  %7518 = vst [vmem:[#allocation77_spill] sm:$0xff] %v5697_v24  ;;  %v873_v39 = vld [vmem:[%s5116_s27 + $0x710] sm:$0xff]  ;;  %v859_v60 = vld [vmem:[%s5116_s27 + $0x6a0] sm:$0xff] }
  0x87   : > { %4081 = vmatprep.subr.bf16.mxu1 %v5641_v7  ;;  %v5699_v12 = vpack.c.bf16 %v858_v5, %v857_v50  ;;  %v842_v38 = vld [vmem:[%s5116_s27 + $0x618] sm:$0xff]  ;;  %v3901_v50 = vcombine.high %v5688_v33, %v5693_v48 }
  0x88   : > { %7517 = vst [vmem:[#allocation76_spill] sm:$0xff] %v5683_v42  ;;  %v874_v7 = vld [vmem:[%s5116_s27 + $0x718] sm:$0xff]  ;;  %v5717_v5 = vpack.c.bf16 %v842_v38, %v841_v30  ;;  %v876_v30 = vld [vmem:[%s5116_s27 + $0x728] sm:$0xff]  ;;  %v861_v38 = vld [vmem:[%s5116_s27 + $0x6b0] sm:$0xff] }
  0x89   : > { %4060 = vmatpush3.bf16.msra.mxu0 %v5649_v53  ;;  %7519 = vst [vmem:[#allocation78_spill] sm:$0xff] %v5699_v12  ;;  %v5705_v53 = vpack.c.bf16 %v890_v51, %v889_v20  ;;  %v5723_v20 = vpack.c.bf16 %v860_v55, %v859_v60  ;;  %v843_v51 = vld [vmem:[%s5116_s27 + $0x620] sm:$0xff]  ;;  %v894_v55 = vld [vmem:[%s5116_s27 + $0x7b8] sm:$0xff] }
  0x8a   : > { %4082 = vmatpush3.bf16.msra.mxu1 %v5654_v21  ;;  %4089 = vmatprep.subr.bf16.mxu0 %v5656_v16  ;;  %v3899_v16 = vcombine.high %v5673_v25, %v5678_v54  ;;  %7521 = vst [vmem:[#allocation80_spill] sm:$0xff] %v5717_v5  ;;  %v875_v21 = vld [vmem:[%s5116_s27 + $0x720] sm:$0xff] }
  0x8b   : > { %4111 = vmatprep.subr.bf16.mxu1 %v5662_v0  ;;  %7520 = vst [vmem:[#allocation79_spill] sm:$0xff] %v5705_v53  ;;  %7523 = vst [vmem:[#allocation82_spill] sm:$0xff] %v5723_v20  ;;  %v844_v0 = vld [vmem:[%s5116_s27 + $0x628] sm:$0xff] }
  0x8c   : > { %1804 = vmatmul.mubr.bf16.vlgmr.msra.gmra.mrb[8].mxu0 %v3894_v19  ;;  %v5721_v19 = vpack.c.bf16 %v874_v7, %v873_v39  ;;  %v893_v7 = vld [vmem:[%s5116_s27 + $0x7b0] sm:$0xff]  ;;  %v5737_v60 = vpack.c.bf16 %v844_v0, %v843_v51  ;;  %v5741_v39 = vpack.c.bf16 %v876_v30, %v875_v21  ;;  %v878_v0 = vld [vmem:[%s5116_s27 + $0x738] sm:$0xff]  ;;  %v863_v51 = vld [vmem:[%s5116_s27 + $0x6c0] sm:$0xff] }
  0x8d   : > { %1845 = vmatmul.mubr.bf16.vlgmr.msra.gmra.mrb[8].mxu1 %v3896_v6  ;;  %4090 = vmatpush3.bf16.msra.mxu0 %v5683_v42  ;;  %v5729_v6 = vpack.c.bf16 %v892_v4, %v891_v1  ;;  %v862_v42 = vld [vmem:[%s5116_s27 + $0x6b8] sm:$0xff]  ;;  %v895_v21 = vld [vmem:[%s5116_s27 + $0x7c0] sm:$0xff] }
  0x8e   : > { %4112 = vmatpush3.bf16.msra.mxu1 %v5697_v24  ;;  %4091 = vmatprep.subr.bf16.mxu0 %v5699_v12  ;;  %7522 = vst [vmem:[#allocation81_spill] sm:$0xff] %v5721_v19  ;;  %7525 = vst [vmem:[#allocation84_spill] sm:$0xff] %v5737_v60  ;;  %v5743_v1 = vpack.c.bf16 %v862_v42, %v861_v38  ;;  %v846_v4 = vld [vmem:[%s5116_s27 + $0x638] sm:$0xff]  ;;  %v896_v42 = vld [vmem:[%s5116_s27 + $0x7c8] sm:$0xff] }
  0x8f   : > { %4113 = vmatprep.subr.bf16.mxu1 %v5705_v53  ;;  %7524 = vst [vmem:[#allocation83_spill] sm:$0xff] %v5729_v6  ;;  %1885 = vmatprep.mubr.bf16.mxu0 %v3899_v16  ;;  %7526 = vst [vmem:[#allocation85_spill] sm:$0xff] %v5741_v39  ;;  %v845_v16 = vld [vmem:[%s5116_s27 + $0x630] sm:$0xff]  ;;  %v924_v24 = vld [vmem:[%s5116_s27 + $0x8a8] sm:$0xff] }
  0x90   : > { %1926 = vmatprep.mubr.bf16.mxu1 %v3901_v50  ;;  %7527 = vst [vmem:[#allocation86_spill] sm:$0xff] %v5743_v1  ;;  %v877_v53 = vld [vmem:[%s5116_s27 + $0x730] sm:$0xff]  ;;  %v5749_v50 = vpack.c.bf16 %v894_v55, %v893_v7  ;;  %v5757_v30 = vpack.c.bf16 %v846_v4, %v845_v16  ;;  %v847_v55 = vld [vmem:[%s5116_s27 + $0x640] sm:$0xff]  ;;  %v880_v16 = vld [vmem:[%s5116_s27 + $0x748] sm:$0xff] }
  0x91   : > { %4092 = vmatpush3.bf16.msra.mxu0 %v5717_v5  ;;  %v5761_v38 = vpack.c.bf16 %v878_v0, %v877_v53  ;;  %v5769_v5 = vpack.c.bf16 %v896_v42, %v895_v21  ;;  %v865_v4 = vld [vmem:[%s5116_s27 + $0x6d0] sm:$0xff] }
  0x92   : > { %4114 = vmatpush3.bf16.msra.mxu1 %v5721_v19  ;;  %4093 = vmatprep.subr.bf16.mxu0 %v5723_v20  ;;  %7528 = vst [vmem:[#allocation87_spill] sm:$0xff] %v5749_v50  ;;  %v864_v19 = vld [vmem:[%s5116_s27 + $0x6c8] sm:$0xff]  ;;  %7529 = vst [vmem:[#allocation88_spill] sm:$0xff] %v5757_v30  ;;  %v879_v20 = vld [vmem:[%s5116_s27 + $0x740] sm:$0xff] }
  0x93   : > { %4115 = vmatprep.subr.bf16.mxu1 %v5729_v6  ;;  %7530 = vst [vmem:[#allocation89_spill] sm:$0xff] %v5761_v38  ;;  %v5763_v7 = vpack.c.bf16 %v864_v19, %v863_v51  ;;  %v848_v6 = vld [vmem:[%s5116_s27 + $0x648] sm:$0xff]  ;;  %7532 = vst [vmem:[#allocation91_spill] sm:$0xff] %v5769_v5  ;;  %v897_v53 = vld [vmem:[%s5116_s27 + $0x7d0] sm:$0xff]  ;;  %v5781_v51 = vpack.c.bf16 %v880_v16, %v879_v20 }
  0x94   : > { %v898_v19 = vld [vmem:[%s5116_s27 + $0x7d8] sm:$0xff]  ;;  %v5777_v0 = vpack.c.bf16 %v848_v6, %v847_v55  ;;  %v849_v42 = vld [vmem:[%s5116_s27 + $0x650] sm:$0xff]  ;;  %v867_v55 = vld [vmem:[%s5116_s27 + $0x6e0] sm:$0xff] }
  0x95   : > { %4094 = vmatpush3.bf16.msra.mxu0 %v5737_v60  ;;  %7531 = vst [vmem:[#allocation90_spill] sm:$0xff] %v5763_v7  ;;  %7534 = vst [vmem:[#allocation93_spill] sm:$0xff] %v5781_v51  ;;  %v5789_v60 = vpack.c.bf16 %v898_v19, %v897_v53  ;;  %v882_v6 = vld [vmem:[%s5116_s27 + $0x758] sm:$0xff]  ;;  %v899_v20 = vld [vmem:[%s5116_s27 + $0x7e0] sm:$0xff] }
  0x96   : > { %4116 = vmatpush3.bf16.msra.mxu1 %v5741_v39  ;;  %4095 = vmatprep.subr.bf16.mxu0 %v5743_v1  ;;  %v866_v39 = vld [vmem:[%s5116_s27 + $0x6d8] sm:$0xff]  ;;  %7533 = vst [vmem:[#allocation92_spill] sm:$0xff] %v5777_v0  ;;  %v881_v1 = vld [vmem:[%s5116_s27 + $0x750] sm:$0xff]  ;;  %v851_v19 = vld [vmem:[%s5116_s27 + $0x660] sm:$0xff] }
  0x97   : > { %4117 = vmatprep.subr.bf16.mxu1 %v5749_v50  ;;  %v5783_v21 = vpack.c.bf16 %v866_v39, %v865_v4  ;;  %v850_v50 = vld [vmem:[%s5116_s27 + $0x658] sm:$0xff]  ;;  %7536 = vst [vmem:[#allocation95_spill] sm:$0xff] %v5789_v60  ;;  %v900_v39 = vld [vmem:[%s5116_s27 + $0x7e8] sm:$0xff]  ;;  %v5801_v4 = vpack.c.bf16 %v882_v6, %v881_v1  ;;  %v901_v1 = vld [vmem:[%s5116_s27 + $0x7f0] sm:$0xff] }
  0x98   : > { %v5797_v16 = vpack.c.bf16 %v850_v50, %v849_v42  ;;  %v884_v50 = vld [vmem:[%s5116_s27 + $0x768] sm:$0xff]  ;;  %v869_v42 = vld [vmem:[%s5116_s27 + $0x6f0] sm:$0xff] }
  0x99   : > { %4096 = vmatpush3.bf16.msra.mxu0 %v5757_v30  ;;  %7535 = vst [vmem:[#allocation94_spill] sm:$0xff] %v5783_v21  ;;  %7538 = vst [vmem:[#allocation97_spill] sm:$0xff] %v5801_v4  ;;  %v5809_v30 = vpack.c.bf16 %v900_v39, %v899_v20  ;;  %v853_v39 = vld [vmem:[%s5116_s27 + $0x670] sm:$0xff] }
  0x9a   : > { %4118 = vmatpush3.bf16.msra.mxu1 %v5761_v38  ;;  %4097 = vmatprep.subr.bf16.mxu0 %v5763_v7  ;;  %v868_v38 = vld [vmem:[%s5116_s27 + $0x6e8] sm:$0xff]  ;;  %7537 = vst [vmem:[#allocation96_spill] sm:$0xff] %v5797_v16  ;;  %v883_v7 = vld [vmem:[%s5116_s27 + $0x760] sm:$0xff] }
  0x9b   : > { %4119 = vmatprep.subr.bf16.mxu1 %v5769_v5  ;;  %v5803_v53 = vpack.c.bf16 %v868_v38, %v867_v55  ;;  %v852_v5 = vld [vmem:[%s5116_s27 + $0x668] sm:$0xff]  ;;  %7540 = vst [vmem:[#allocation99_spill] sm:$0xff] %v5809_v30  ;;  %v902_v38 = vld [vmem:[%s5116_s27 + $0x7f8] sm:$0xff]  ;;  %v5821_v55 = vpack.c.bf16 %v884_v50, %v883_v7  ;;  %v903_v50 = vld [vmem:[%s5116_s27 + $0x800] sm:$0xff] }
  0x9c   : > { %v5817_v6 = vpack.c.bf16 %v852_v5, %v851_v19  ;;  %v886_v5 = vld [vmem:[%s5116_s27 + $0x778] sm:$0xff]  ;;  %v919_v19 = vld [vmem:[%s5116_s27 + $0x880] sm:$0xff]  ;;  %v952_v7 = vld [vmem:[%s5116_s27 + $0x988] sm:$0xff] }
  0x9d   : > { %4098 = vmatpush3.bf16.msra.mxu0 %v5777_v0  ;;  %7539 = vst [vmem:[#allocation98_spill] sm:$0xff] %v5803_v53  ;;  %7542 = vst [vmem:[#allocation101_spill] sm:$0xff] %v5821_v55  ;;  %v936_v0 = vld [vmem:[%s5116_s27 + $0x908] sm:$0xff] }
  0x9e   : > { %4120 = vmatpush3.bf16.msra.mxu1 %v5781_v51  ;;  %4099 = vmatprep.subr.bf16.mxu0 %v5783_v21  ;;  %v870_v51 = vld [vmem:[%s5116_s27 + $0x6f8] sm:$0xff]  ;;  %7541 = vst [vmem:[#allocation100_spill] sm:$0xff] %v5817_v6  ;;  %v885_v21 = vld [vmem:[%s5116_s27 + $0x770] sm:$0xff] }
  0x9f   : > { %4121 = vmatprep.subr.bf16.mxu1 %v5789_v60  ;;  %v5823_v20 = vpack.c.bf16 %v870_v51, %v869_v42  ;;  %v854_v60 = vld [vmem:[%s5116_s27 + $0x678] sm:$0xff]  ;;  %v5842_v42 = vpack.c.bf16 %v886_v5, %v885_v21  ;;  %v3900_v5 = vcombine.low %v5688_v33, %v5693_v48  ;;  %v905_v48 = vld [vmem:[%s5116_s27 + $0x810] sm:$0xff] }
  0xa0   : > { %v5837_v51 = vpack.c.bf16 %v854_v60, %v853_v39  ;;  %v922_v60 = vld [vmem:[%s5116_s27 + $0x898] sm:$0xff]  ;;  %v953_v39 = vld [vmem:[%s5116_s27 + $0x990] sm:$0xff] }
  0xa1   : > { %4100 = vmatpush3.bf16.msra.mxu0 %v5797_v16  ;;  %7543 = vst [vmem:[#allocation102_spill] sm:$0xff] %v5823_v20  ;;  %v5829_v16 = vpack.c.bf16 %v902_v38, %v901_v1  ;;  %7546 = vst [vmem:[#allocation105_spill] sm:$0xff] %v5842_v42  ;;  %v904_v38 = vld [vmem:[%s5116_s27 + $0x808] sm:$0xff]  ;;  %v954_v21 = vld [vmem:[%s5116_s27 + $0x998] sm:$0xff] }
  0xa2   : > { %4122 = vmatpush3.bf16.msra.mxu1 %v5801_v4  ;;  %4101 = vmatprep.subr.bf16.mxu0 %v5803_v53  ;;  %v920_v4 = vld [vmem:[%s5116_s27 + $0x888] sm:$0xff]  ;;  %v951_v53 = vld [vmem:[%s5116_s27 + $0x980] sm:$0xff]  ;;  %7545 = vst [vmem:[#allocation104_spill] sm:$0xff] %v5837_v51 }
  0xa3   : > { %4123 = vmatprep.subr.bf16.mxu1 %v5809_v30  ;;  %7544 = vst [vmem:[#allocation103_spill] sm:$0xff] %v5829_v16  ;;  %v5844_v1 = vpack.c.bf16 %v920_v4, %v919_v19  ;;  %v935_v30 = vld [vmem:[%s5116_s27 + $0x900] sm:$0xff]  ;;  %v5850_v12 = vpack.c.bf16 %v952_v7, %v951_v53  ;;  %v5881_v19 = vld [vmem:[%s7447_s21 + $0xc8] sm:$0xff] }
  0xa4   : > { %v5861_v4 = vld [vmem:[%s7447_s21 + $0x40] sm:$0xff]  ;;  %v5885_v7 = vpack.c.bf16 %v936_v0, %v935_v30  ;;  %v956_v0 = vld [vmem:[%s5116_s27 + $0x9a8] sm:$0xff] }
  0xa5   : > { %4102 = vmatpush3.bf16.msra.mxu0 %v5817_v6  ;;  %7547 = vst [vmem:[#allocation106_spill] sm:$0xff] %v5844_v1  ;;  %7548 = vst [vmem:[#allocation107_spill] sm:$0xff] %v5850_v12  ;;  %v921_v6 = vld [vmem:[%s5116_s27 + $0x890] sm:$0xff]  ;;  %v5866_v53 = vld [vmem:[%s7447_s21 + $0xc0] sm:$0xff] }
  0xa6   : > { %4124 = vmatpush3.bf16.msra.mxu1 %v5821_v55  ;;  %4103 = vmatprep.subr.bf16.mxu0 %v5823_v20  ;;  %v3898_v20 = vcombine.low %v5673_v25, %v5678_v54  ;;  %v5871_v25 = vpack.c.bf16 %v904_v38, %v903_v50  ;;  %v5876_v54 = vld [vmem:[%s7447_s21 + $0x48] sm:$0xff]  ;;  %7550 = vst [vmem:[#allocation109_spill] sm:$0xff] %v5885_v7  ;;  %v906_v50 = vld [vmem:[%s5116_s27 + $0x818] sm:$0xff]  ;;  %v937_v38 = vld [vmem:[%s5116_s27 + $0x910] sm:$0xff] }
  0xa7   : > { %4125 = vmatprep.subr.bf16.mxu1 %v5829_v16  ;;  %v5887_v33 = vpack.c.bf16 %v922_v60, %v921_v6  ;;  %v938_v16 = vld [vmem:[%s5116_s27 + $0x918] sm:$0xff]  ;;  %v923_v55 = vld [vmem:[%s5116_s27 + $0x8a0] sm:$0xff]  ;;  %v3905_v6 = vcombine.high %v5876_v54, %v5881_v19  ;;  %v5905_v60 = vpack.c.bf16 %v906_v50, %v905_v48  ;;  %v940_v48 = vld [vmem:[%s5116_s27 + $0x928] sm:$0xff] }
  0xa8   : > { %7549 = vst [vmem:[#allocation108_spill] sm:$0xff] %v5871_v25  ;;  %v955_v30 = vld [vmem:[%s5116_s27 + $0x9a0] sm:$0xff]  ;;  %v925_v50 = vld [vmem:[%s5116_s27 + $0x8b0] sm:$0xff] }
  0xa9   : > { %4104 = vmatpush3.bf16.msra.mxu0 %v5837_v51  ;;  %7551 = vst [vmem:[#allocation110_spill] sm:$0xff] %v5887_v33  ;;  %v5893_v51 = vpack.c.bf16 %v954_v21, %v953_v39  ;;  %7553 = vst [vmem:[#allocation112_spill] sm:$0xff] %v5905_v60  ;;  %v5911_v39 = vpack.c.bf16 %v924_v24, %v923_v55  ;;  %v907_v21 = vld [vmem:[%s5116_s27 + $0x820] sm:$0xff]  ;;  %v958_v24 = vld [vmem:[%s5116_s27 + $0x9b8] sm:$0xff] }
  0xaa   : > { %4126 = vmatpush3.bf16.msra.mxu1 %v5842_v42  ;;  %4133 = vmatprep.subr.bf16.mxu0 %v5844_v1  ;;  %v3903_v1 = vcombine.high %v5861_v4, %v5866_v53  ;;  %v939_v42 = vld [vmem:[%s5116_s27 + $0x920] sm:$0xff] }
  0xab   : > { %4155 = vmatprep.subr.bf16.mxu1 %v5850_v12  ;;  %7552 = vst [vmem:[#allocation111_spill] sm:$0xff] %v5893_v51  ;;  %7555 = vst [vmem:[#allocation114_spill] sm:$0xff] %v5911_v39  ;;  %v908_v12 = vld [vmem:[%s5116_s27 + $0x828] sm:$0xff] }
  0xac   : > { %1886 = vmatmul.mubr.bf16.vlgmr.msra.gmra.mrb[12].mxu0 %v3898_v20  ;;  %v5909_v20 = vpack.c.bf16 %v938_v16, %v937_v38  ;;  %v957_v16 = vld [vmem:[%s5116_s27 + $0x9b0] sm:$0xff]  ;;  %v5925_v55 = vpack.c.bf16 %v908_v12, %v907_v21  ;;  %v5929_v38 = vpack.c.bf16 %v940_v48, %v939_v42  ;;  %v942_v12 = vld [vmem:[%s5116_s27 + $0x938] sm:$0xff]  ;;  %v927_v21 = vld [vmem:[%s5116_s27 + $0x8c0] sm:$0xff] }
  0xad   : > { %1927 = vmatmul.mubr.bf16.vlgmr.msra.gmra.mrb[12].mxu1 %v3900_v5  ;;  %4134 = vmatpush3.bf16.msra.mxu0 %v5871_v25  ;;  %v5917_v5 = vpack.c.bf16 %v956_v0, %v955_v30  ;;  %v926_v25 = vld [vmem:[%s5116_s27 + $0x8b8] sm:$0xff]  ;;  %v959_v42 = vld [vmem:[%s5116_s27 + $0x9c0] sm:$0xff] }
  0xae   : > { %4156 = vmatpush3.bf16.msra.mxu1 %v5885_v7  ;;  %4135 = vmatprep.subr.bf16.mxu0 %v5887_v33  ;;  %7554 = vst [vmem:[#allocation113_spill] sm:$0xff] %v5909_v20  ;;  %7557 = vst [vmem:[#allocation116_spill] sm:$0xff] %v5925_v55  ;;  %v5931_v30 = vpack.c.bf16 %v926_v25, %v925_v50  ;;  %v910_v0 = vld [vmem:[%s5116_s27 + $0x838] sm:$0xff]  ;;  %v960_v25 = vld [vmem:[%s5116_s27 + $0x9c8] sm:$0xff] }
  0xaf   : > { %4157 = vmatprep.subr.bf16.mxu1 %v5893_v51  ;;  %7556 = vst [vmem:[#allocation115_spill] sm:$0xff] %v5917_v5  ;;  %1967 = vmatprep.mubr.bf16.mxu0 %v3903_v1  ;;  %7558 = vst [vmem:[#allocation117_spill] sm:$0xff] %v5929_v38  ;;  %v909_v1 = vld [vmem:[%s5116_s27 + $0x830] sm:$0xff]  ;;  %v988_v7 = vld [vmem:[%s5116_s27 + $0xaa8] sm:$0xff] }
  0xb0   : > { %2008 = vmatprep.mubr.bf16.mxu1 %v3905_v6  ;;  %7559 = vst [vmem:[#allocation118_spill] sm:$0xff] %v5931_v30  ;;  %v941_v51 = vld [vmem:[%s5116_s27 + $0x930] sm:$0xff]  ;;  %v5937_v6 = vpack.c.bf16 %v958_v24, %v957_v16  ;;  %v5945_v48 = vpack.c.bf16 %v910_v0, %v909_v1  ;;  %v911_v24 = vld [vmem:[%s5116_s27 + $0x840] sm:$0xff]  ;;  %v944_v1 = vld [vmem:[%s5116_s27 + $0x948] sm:$0xff] }
  0xb1   : > { %4136 = vmatpush3.bf16.msra.mxu0 %v5905_v60  ;;  %v5949_v50 = vpack.c.bf16 %v942_v12, %v941_v51  ;;  %v5957_v60 = vpack.c.bf16 %v960_v25, %v959_v42  ;;  %v929_v0 = vld [vmem:[%s5116_s27 + $0x8d0] sm:$0xff] }
  0xb2   : > { %4158 = vmatpush3.bf16.msra.mxu1 %v5909_v20  ;;  %4137 = vmatprep.subr.bf16.mxu0 %v5911_v39  ;;  %7560 = vst [vmem:[#allocation119_spill] sm:$0xff] %v5937_v6  ;;  %v928_v20 = vld [vmem:[%s5116_s27 + $0x8c8] sm:$0xff]  ;;  %7561 = vst [vmem:[#allocation120_spill] sm:$0xff] %v5945_v48  ;;  %v943_v39 = vld [vmem:[%s5116_s27 + $0x940] sm:$0xff] }
  0xb3   : > { %4159 = vmatprep.subr.bf16.mxu1 %v5917_v5  ;;  %7562 = vst [vmem:[#allocation121_spill] sm:$0xff] %v5949_v50  ;;  %v5951_v16 = vpack.c.bf16 %v928_v20, %v927_v21  ;;  %v912_v5 = vld [vmem:[%s5116_s27 + $0x848] sm:$0xff]  ;;  %7564 = vst [vmem:[#allocation123_spill] sm:$0xff] %v5957_v60  ;;  %v961_v51 = vld [vmem:[%s5116_s27 + $0x9d0] sm:$0xff]  ;;  %v5969_v21 = vpack.c.bf16 %v944_v1, %v943_v39 }
  0xb4   : > { %v962_v20 = vld [vmem:[%s5116_s27 + $0x9d8] sm:$0xff]  ;;  %v5965_v12 = vpack.c.bf16 %v912_v5, %v911_v24  ;;  %v913_v25 = vld [vmem:[%s5116_s27 + $0x850] sm:$0xff]  ;;  %v931_v24 = vld [vmem:[%s5116_s27 + $0x8e0] sm:$0xff] }
  0xb5   : > { %4138 = vmatpush3.bf16.msra.mxu0 %v5925_v55  ;;  %7563 = vst [vmem:[#allocation122_spill] sm:$0xff] %v5951_v16  ;;  %7566 = vst [vmem:[#allocation125_spill] sm:$0xff] %v5969_v21  ;;  %v5977_v55 = vpack.c.bf16 %v962_v20, %v961_v51  ;;  %v946_v5 = vld [vmem:[%s5116_s27 + $0x958] sm:$0xff]  ;;  %v963_v39 = vld [vmem:[%s5116_s27 + $0x9e0] sm:$0xff] }
  0xb6   : > { %4160 = vmatpush3.bf16.msra.mxu1 %v5929_v38  ;;  %4139 = vmatprep.subr.bf16.mxu0 %v5931_v30  ;;  %v930_v38 = vld [vmem:[%s5116_s27 + $0x8d8] sm:$0xff]  ;;  %7565 = vst [vmem:[#allocation124_spill] sm:$0xff] %v5965_v12  ;;  %v945_v30 = vld [vmem:[%s5116_s27 + $0x950] sm:$0xff]  ;;  %v915_v20 = vld [vmem:[%s5116_s27 + $0x860] sm:$0xff] }
  0xb7   : > { %4161 = vmatprep.subr.bf16.mxu1 %v5937_v6  ;;  %v5971_v42 = vpack.c.bf16 %v930_v38, %v929_v0  ;;  %v914_v6 = vld [vmem:[%s5116_s27 + $0x858] sm:$0xff]  ;;  %7568 = vst [vmem:[#allocation127_spill] sm:$0xff] %v5977_v55  ;;  %v964_v38 = vld [vmem:[%s5116_s27 + $0x9e8] sm:$0xff]  ;;  %v5989_v0 = vpack.c.bf16 %v946_v5, %v945_v30  ;;  %v965_v30 = vld [vmem:[%s5116_s27 + $0x9f0] sm:$0xff] }
  0xb8   : > { %v5985_v1 = vpack.c.bf16 %v914_v6, %v913_v25  ;;  %v948_v6 = vld [vmem:[%s5116_s27 + $0x968] sm:$0xff]  ;;  %v933_v25 = vld [vmem:[%s5116_s27 + $0x8f0] sm:$0xff] }
  0xb9   : > { %4140 = vmatpush3.bf16.msra.mxu0 %v5945_v48  ;;  %7567 = vst [vmem:[#allocation126_spill] sm:$0xff] %v5971_v42  ;;  %7570 = vst [vmem:[#allocation129_spill] sm:$0xff] %v5989_v0  ;;  %v5997_v48 = vpack.c.bf16 %v964_v38, %v963_v39  ;;  %v917_v38 = vld [vmem:[%s5116_s27 + $0x870] sm:$0xff] }
  0xba   : > { %4162 = vmatpush3.bf16.msra.mxu1 %v5949_v50  ;;  %4141 = vmatprep.subr.bf16.mxu0 %v5951_v16  ;;  %v932_v50 = vld [vmem:[%s5116_s27 + $0x8e8] sm:$0xff]  ;;  %7569 = vst [vmem:[#allocation128_spill] sm:$0xff] %v5985_v1  ;;  %v947_v16 = vld [vmem:[%s5116_s27 + $0x960] sm:$0xff] }
  0xbb   : > { %4163 = vmatprep.subr.bf16.mxu1 %v5957_v60  ;;  %v5991_v51 = vpack.c.bf16 %v932_v50, %v931_v24  ;;  %v916_v60 = vld [vmem:[%s5116_s27 + $0x868] sm:$0xff]  ;;  %7572 = vst [vmem:[#allocation131_spill] sm:$0xff] %v5997_v48  ;;  %v966_v50 = vld [vmem:[%s5116_s27 + $0x9f8] sm:$0xff]  ;;  %v6009_v24 = vpack.c.bf16 %v948_v6, %v947_v16  ;;  %v967_v6 = vld [vmem:[%s5116_s27 + $0xa00] sm:$0xff] }
  0xbc   : > { %v6005_v5 = vpack.c.bf16 %v916_v60, %v915_v20  ;;  %v950_v60 = vld [vmem:[%s5116_s27 + $0x978] sm:$0xff]  ;;  %v983_v20 = vld [vmem:[%s5116_s27 + $0xa80] sm:$0xff]  ;;  %v1016_v16 = vld [vmem:[%s5116_s27 + $0xb88] sm:$0xff] }
  0xbd   : > { %4142 = vmatpush3.bf16.msra.mxu0 %v5965_v12  ;;  %7571 = vst [vmem:[#allocation130_spill] sm:$0xff] %v5991_v51  ;;  %7574 = vst [vmem:[#allocation133_spill] sm:$0xff] %v6009_v24  ;;  %v1000_v12 = vld [vmem:[%s5116_s27 + $0xb08] sm:$0xff] }
  0xbe   : > { %4164 = vmatpush3.bf16.msra.mxu1 %v5969_v21  ;;  %4143 = vmatprep.subr.bf16.mxu0 %v5971_v42  ;;  %v934_v21 = vld [vmem:[%s5116_s27 + $0x8f8] sm:$0xff]  ;;  %7573 = vst [vmem:[#allocation132_spill] sm:$0xff] %v6005_v5  ;;  %v949_v42 = vld [vmem:[%s5116_s27 + $0x970] sm:$0xff] }
  0xbf   : > { %4165 = vmatprep.subr.bf16.mxu1 %v5977_v55  ;;  %v6011_v39 = vpack.c.bf16 %v934_v21, %v933_v25  ;;  %v918_v55 = vld [vmem:[%s5116_s27 + $0x878] sm:$0xff]  ;;  %v6030_v25 = vpack.c.bf16 %v950_v60, %v949_v42  ;;  %v3904_v60 = vcombine.low %v5876_v54, %v5881_v19  ;;  %v969_v19 = vld [vmem:[%s5116_s27 + $0xa10] sm:$0xff] }
  0xc0   : > { %v6025_v21 = vpack.c.bf16 %v918_v55, %v917_v38  ;;  %v986_v55 = vld [vmem:[%s5116_s27 + $0xa98] sm:$0xff]  ;;  %v1017_v38 = vld [vmem:[%s5116_s27 + $0xb90] sm:$0xff] }
  0xc1   : > { %4144 = vmatpush3.bf16.msra.mxu0 %v5985_v1  ;;  %7575 = vst [vmem:[#allocation134_spill] sm:$0xff] %v6011_v39  ;;  %v6017_v1 = vpack.c.bf16 %v966_v50, %v965_v30  ;;  %7578 = vst [vmem:[#allocation137_spill] sm:$0xff] %v6030_v25  ;;  %v968_v50 = vld [vmem:[%s5116_s27 + $0xa08] sm:$0xff]  ;;  %v1018_v42 = vld [vmem:[%s5116_s27 + $0xb98] sm:$0xff] }
  0xc2   : > { %4166 = vmatpush3.bf16.msra.mxu1 %v5989_v0  ;;  %4145 = vmatprep.subr.bf16.mxu0 %v5991_v51  ;;  %v984_v0 = vld [vmem:[%s5116_s27 + $0xa88] sm:$0xff]  ;;  %v1015_v51 = vld [vmem:[%s5116_s27 + $0xb80] sm:$0xff]  ;;  %7577 = vst [vmem:[#allocation136_spill] sm:$0xff] %v6025_v21 }
  0xc3   : > { %4167 = vmatprep.subr.bf16.mxu1 %v5997_v48  ;;  %7576 = vst [vmem:[#allocation135_spill] sm:$0xff] %v6017_v1  ;;  %v6032_v30 = vpack.c.bf16 %v984_v0, %v983_v20  ;;  %v999_v48 = vld [vmem:[%s5116_s27 + $0xb00] sm:$0xff]  ;;  %v6038_v33 = vpack.c.bf16 %v1016_v16, %v1015_v51  ;;  %v6049_v0 = vld [vmem:[%s7447_s21 + $0x50] sm:$0xff]  ;;  %v6069_v20 = vld [vmem:[%s7447_s21 + $0xd8] sm:$0xff] }
  0xc4   : > { %v6054_v51 = vld [vmem:[%s7447_s21 + $0xd0] sm:$0xff]  ;;  %v6073_v16 = vpack.c.bf16 %v1000_v12, %v999_v48  ;;  %v1019_v48 = vld [vmem:[%s5116_s27 + $0xba0] sm:$0xff]  ;;  %v1020_v12 = vld [vmem:[%s5116_s27 + $0xba8] sm:$0xff] }
  0xc5   : > { %4146 = vmatpush3.bf16.msra.mxu0 %v6005_v5  ;;  %7579 = vst [vmem:[#allocation138_spill] sm:$0xff] %v6032_v30  ;;  %7580 = vst [vmem:[#allocation139_spill] sm:$0xff] %v6038_v33  ;;  %v985_v5 = vld [vmem:[%s5116_s27 + $0xa90] sm:$0xff] }
  0xc6   : > { %4168 = vmatpush3.bf16.msra.mxu1 %v6009_v24  ;;  %4147 = vmatprep.subr.bf16.mxu0 %v6011_v39  ;;  %v3902_v39 = vcombine.low %v5861_v4, %v5866_v53  ;;  %v6059_v4 = vpack.c.bf16 %v968_v50, %v967_v6  ;;  %v6064_v53 = vld [vmem:[%s7447_s21 + $0x58] sm:$0xff]  ;;  %7582 = vst [vmem:[#allocation141_spill] sm:$0xff] %v6073_v16  ;;  %v1001_v50 = vld [vmem:[%s5116_s27 + $0xb10] sm:$0xff]  ;;  %v987_v24 = vld [vmem:[%s5116_s27 + $0xaa0] sm:$0xff] }
  0xc7   : > { %4169 = vmatprep.subr.bf16.mxu1 %v6017_v1  ;;  %v6075_v54 = vpack.c.bf16 %v986_v55, %v985_v5  ;;  %v970_v6 = vld [vmem:[%s5116_s27 + $0xa18] sm:$0xff]  ;;  %v3909_v5 = vcombine.high %v6064_v53, %v6069_v20 }
  0xc8   : > { %7581 = vst [vmem:[#allocation140_spill] sm:$0xff] %v6059_v4  ;;  %v1002_v1 = vld [vmem:[%s5116_s27 + $0xb18] sm:$0xff]  ;;  %v6093_v55 = vpack.c.bf16 %v970_v6, %v969_v19  ;;  %v1004_v19 = vld [vmem:[%s5116_s27 + $0xb28] sm:$0xff]  ;;  %v989_v6 = vld [vmem:[%s5116_s27 + $0xab0] sm:$0xff] }
  0xc9   : > { %4148 = vmatpush3.bf16.msra.mxu0 %v6025_v21  ;;  %7583 = vst [vmem:[#allocation142_spill] sm:$0xff] %v6075_v54  ;;  %v6081_v21 = vpack.c.bf16 %v1018_v42, %v1017_v38  ;;  %v6099_v38 = vpack.c.bf16 %v988_v7, %v987_v24  ;;  %v971_v42 = vld [vmem:[%s5116_s27 + $0xa20] sm:$0xff]  ;;  %v1022_v7 = vld [vmem:[%s5116_s27 + $0xbb8] sm:$0xff] }
  0xca   : > { %4170 = vmatpush3.bf16.msra.mxu1 %v6030_v25  ;;  %4177 = vmatprep.subr.bf16.mxu0 %v6032_v30  ;;  %v3907_v30 = vcombine.high %v6049_v0, %v6054_v51  ;;  %7585 = vst [vmem:[#allocation144_spill] sm:$0xff] %v6093_v55  ;;  %v1003_v25 = vld [vmem:[%s5116_s27 + $0xb20] sm:$0xff] }
  0xcb   : > { %4199 = vmatprep.subr.bf16.mxu1 %v6038_v33  ;;  %7584 = vst [vmem:[#allocation143_spill] sm:$0xff] %v6081_v21  ;;  %7587 = vst [vmem:[#allocation146_spill] sm:$0xff] %v6099_v38  ;;  %v972_v33 = vld [vmem:[%s5116_s27 + $0xa28] sm:$0xff] }
  0xcc   : > { %1968 = vmatmul.mubr.bf16.vlgmr.msra.gmra.mrb[16].mxu0 %v3902_v39  ;;  %v6097_v39 = vpack.c.bf16 %v1002_v1, %v1001_v50  ;;  %v1021_v1 = vld [vmem:[%s5116_s27 + $0xbb0] sm:$0xff]  ;;  %v6113_v24 = vpack.c.bf16 %v972_v33, %v971_v42  ;;  %v6117_v50 = vpack.c.bf16 %v1004_v19, %v1003_v25  ;;  %v1006_v33 = vld [vmem:[%s5116_s27 + $0xb38] sm:$0xff]  ;;  %v991_v42 = vld [vmem:[%s5116_s27 + $0xac0] sm:$0xff] }
  0xcd   : > { %2009 = vmatmul.mubr.bf16.vlgmr.msra.gmra.mrb[16].mxu1 %v3904_v60  ;;  %4178 = vmatpush3.bf16.msra.mxu0 %v6059_v4  ;;  %v6105_v60 = vpack.c.bf16 %v1020_v12, %v1019_v48  ;;  %v990_v4 = vld [vmem:[%s5116_s27 + $0xab8] sm:$0xff]  ;;  %v1024_v25 = vld [vmem:[%s5116_s27 + $0xbc8] sm:$0xff]  ;;  %v975_v19 = vld [vmem:[%s5116_s27 + $0xa40] sm:$0xff] }
  0xce   : > { %4200 = vmatpush3.bf16.msra.mxu1 %v6073_v16  ;;  %4179 = vmatprep.subr.bf16.mxu0 %v6075_v54  ;;  %7586 = vst [vmem:[#allocation145_spill] sm:$0xff] %v6097_v39  ;;  %7589 = vst [vmem:[#allocation148_spill] sm:$0xff] %v6113_v24  ;;  %v6119_v48 = vpack.c.bf16 %v990_v4, %v989_v6  ;;  %v974_v12 = vld [vmem:[%s5116_s27 + $0xa38] sm:$0xff] }
  0xcf   : > { %4201 = vmatprep.subr.bf16.mxu1 %v6081_v21  ;;  %7588 = vst [vmem:[#allocation147_spill] sm:$0xff] %v6105_v60  ;;  %2049 = vmatprep.mubr.bf16.mxu0 %v3907_v30  ;;  %7590 = vst [vmem:[#allocation149_spill] sm:$0xff] %v6117_v50  ;;  %v973_v30 = vld [vmem:[%s5116_s27 + $0xa30] sm:$0xff]  ;;  %v1010_v54 = vld [vmem:[%s5116_s27 + $0xb58] sm:$0xff] }
  0xd0   : > { %2090 = vmatprep.mubr.bf16.mxu1 %v3909_v5  ;;  %7591 = vst [vmem:[#allocation150_spill] sm:$0xff] %v6119_v48  ;;  %v1005_v21 = vld [vmem:[%s5116_s27 + $0xb30] sm:$0xff]  ;;  %v6125_v5 = vpack.c.bf16 %v1022_v7, %v1021_v1  ;;  %v6133_v4 = vpack.c.bf16 %v974_v12, %v973_v30  ;;  %v976_v7 = vld [vmem:[%s5116_s27 + $0xa48] sm:$0xff] }
  0xd1   : > { %4180 = vmatpush3.bf16.msra.mxu0 %v6093_v55  ;;  %v6138_v6 = vpack.c.bf16 %v1006_v33, %v1005_v21  ;;  %v993_v12 = vld [vmem:[%s5116_s27 + $0xad0] sm:$0xff]  ;;  %v1026_v55 = vld [vmem:[%s5116_s27 + $0xbd8] sm:$0xff] }
  0xd2   : > { %4202 = vmatpush3.bf16.msra.mxu1 %v6097_v39  ;;  %4181 = vmatprep.subr.bf16.mxu0 %v6099_v38  ;;  %7592 = vst [vmem:[#allocation151_spill] sm:$0xff] %v6125_v5  ;;  %v992_v39 = vld [vmem:[%s5116_s27 + $0xac8] sm:$0xff]  ;;  %v1023_v38 = vld [vmem:[%s5116_s27 + $0xbc0] sm:$0xff]  ;;  %7593 = vst [vmem:[#allocation152_spill] sm:$0xff] %v6133_v4 }
  0xd3   : > { %4203 = vmatprep.subr.bf16.mxu1 %v6105_v60  ;;  %7594 = vst [vmem:[#allocation153_spill] sm:$0xff] %v6138_v6  ;;  %v6140_v1 = vpack.c.bf16 %v992_v39, %v991_v42  ;;  %v1007_v60 = vld [vmem:[%s5116_s27 + $0xb40] sm:$0xff]  ;;  %v6146_v30 = vpack.c.bf16 %v1024_v25, %v1023_v38  ;;  %v977_v21 = vld [vmem:[%s5116_s27 + $0xa50] sm:$0xff]  ;;  %v978_v33 = vld [vmem:[%s5116_s27 + $0xa58] sm:$0xff]  ;;  %v6155_v39 = vpack.c.bf16 %v976_v7, %v975_v19 }
  0xd4   : > { %v1009_v42 = vld [vmem:[%s5116_s27 + $0xb50] sm:$0xff]  ;;  %v995_v38 = vld [vmem:[%s5116_s27 + $0xae0] sm:$0xff]  ;;  %v996_v25 = vld [vmem:[%s5116_s27 + $0xae8] sm:$0xff] }
  0xd5   : > { %4182 = vmatpush3.bf16.msra.mxu0 %v6113_v24  ;;  %7595 = vst [vmem:[#allocation154_spill] sm:$0xff] %v6140_v1  ;;  %v1008_v24 = vld [vmem:[%s5116_s27 + $0xb48] sm:$0xff]  ;;  %7596 = vst [vmem:[#allocation155_spill] sm:$0xff] %v6146_v30 }
  0xd6   : > { %4204 = vmatpush3.bf16.msra.mxu1 %v6117_v50  ;;  %4183 = vmatprep.subr.bf16.mxu0 %v6119_v48  ;;  %v994_v50 = vld [vmem:[%s5116_s27 + $0xad8] sm:$0xff]  ;;  %v1025_v48 = vld [vmem:[%s5116_s27 + $0xbd0] sm:$0xff]  ;;  %7597 = vst [vmem:[#allocation156_spill] sm:$0xff] %v6155_v39  ;;  %v1028_v19 = vld [vmem:[%s5116_s27 + $0xbe8] sm:$0xff] }
  0xd7   : > { %4205 = vmatprep.subr.bf16.mxu1 %v6125_v5  ;;  %v6163_v5 = vpack.c.bf16 %v1008_v24, %v1007_v60  ;;  %v6165_v16 = vpack.c.bf16 %v994_v50, %v993_v12  ;;  %v6170_v7 = vpack.c.bf16 %v1026_v55, %v1025_v48  ;;  %v1011_v60 = vld [vmem:[%s5116_s27 + $0xb60] sm:$0xff]  ;;  %v1012_v24 = vld [vmem:[%s5116_s27 + $0xb68] sm:$0xff]  ;;  %v997_v50 = vld [vmem:[%s5116_s27 + $0xaf0] sm:$0xff]  ;;  %v6183_v55 = vpack.c.bf16 %v1010_v54, %v1009_v42 }
  0xd8   : > { %v998_v12 = vld [vmem:[%s5116_s27 + $0xaf8] sm:$0xff]  ;;  %v6185_v48 = vpack.c.bf16 %v996_v25, %v995_v38  ;;  %v1013_v54 = vld [vmem:[%s5116_s27 + $0xb70] sm:$0xff]  ;;  %v1047_v38 = vld [vmem:[%s5116_s27 + $0xc80] sm:$0xff] }
  0xd9   : > { %4184 = vmatpush3.bf16.msra.mxu0 %v6133_v4  ;;  %7598 = vst [vmem:[#allocation157_spill] sm:$0xff] %v6163_v5  ;;  %7599 = vst [vmem:[#allocation158_spill] sm:$0xff] %v6165_v16  ;;  %v979_v4 = vld [vmem:[%s5116_s27 + $0xa60] sm:$0xff]  ;;  %v1014_v42 = vld [vmem:[%s5116_s27 + $0xb78] sm:$0xff] }
  0xda   : > { %4206 = vmatpush3.bf16.msra.mxu1 %v6138_v6  ;;  %4185 = vmatprep.subr.bf16.mxu0 %v6140_v1  ;;  %7600 = vst [vmem:[#allocation159_spill] sm:$0xff] %v6170_v7  ;;  %v6175_v6 = vpack.c.bf16 %v978_v33, %v977_v21  ;;  %7602 = vst [vmem:[#allocation161_spill] sm:$0xff] %v6183_v55  ;;  %v1030_v21 = vld [vmem:[%s5116_s27 + $0xbf8] sm:$0xff]  ;;  %v6190_v33 = vpack.c.bf16 %v1028_v19, %v1027_v59  ;;  %v1048_v25 = vld [vmem:[%s5116_s27 + $0xc88] sm:$0xff] }
  0xdb   : > { %4207 = vmatprep.subr.bf16.mxu1 %v6146_v30  ;;  %7603 = vst [vmem:[#allocation162_spill] sm:$0xff] %v6185_v48  ;;  %v1029_v30 = vld [vmem:[%s5116_s27 + $0xbf0] sm:$0xff]  ;;  %v982_v1 = vld [vmem:[%s5116_s27 + $0xa78] sm:$0xff]  ;;  %v6203_v59 = vpack.c.bf16 %v1012_v24, %v1011_v60  ;;  %v6205_v19 = vpack.c.bf16 %v998_v12, %v997_v50  ;;  %v6223_v50 = vpack.c.bf16 %v1014_v42, %v1013_v54  ;;  %v6242_v42 = vld [vmem:[%s7447_s21 + $0xe0] sm:$0xff] }
  0xdc   : > { %7601 = vst [vmem:[#allocation160_spill] sm:$0xff] %v6175_v6  ;;  %7604 = vst [vmem:[#allocation163_spill] sm:$0xff] %v6190_v33  ;;  %v1049_v60 = vld [vmem:[%s5116_s27 + $0xc90] sm:$0xff]  ;;  %v1050_v24 = vld [vmem:[%s5116_s27 + $0xc98] sm:$0xff]  ;;  %v6225_v12 = vpack.c.bf16 %v1048_v25, %v1047_v38  ;;  %v3906_v54 = vcombine.low %v6049_v0, %v6054_v51  ;;  %v3908_v38 = vcombine.low %v6064_v53, %v6069_v20 }
  0xdd   : > { %4186 = vmatpush3.bf16.msra.mxu0 %v6155_v39  ;;  %v981_v39 = vld [vmem:[%s5116_s27 + $0xa70] sm:$0xff]  ;;  %7606 = vst [vmem:[#allocation165_spill] sm:$0xff] %v6203_v59  ;;  %7607 = vst [vmem:[#allocation166_spill] sm:$0xff] %v6205_v19  ;;  %v6257_v0 = vld [vmem:[%s7447_s21 + $0xe8] sm:$0xff]  ;;  %v6263_v53 = vpack.c.bf16 %v1050_v24, %v1049_v60 }
  0xde   : > { %4208 = vmatpush3.bf16.msra.mxu1 %v6163_v5  ;;  %4187 = vmatprep.subr.bf16.mxu0 %v6165_v16  ;;  %v6195_v5 = vpack.c.bf16 %v980_v41, %v979_v4  ;;  %v1080_v41 = vld [vmem:[%s5116_s27 + $0xd88] sm:$0xff]  ;;  %v6210_v4 = vpack.c.bf16 %v1030_v21, %v1029_v30  ;;  %v6215_v2 = vpack.c.bf16 %v982_v1, %v981_v39  ;;  %v1081_v30 = vld [vmem:[%s5116_s27 + $0xd90] sm:$0xff]  ;;  %v1082_v21 = vld [vmem:[%s5116_s27 + $0xd98] sm:$0xff] }
  0xdf   : > { %4209 = vmatprep.subr.bf16.mxu1 %v6170_v7  ;;  %v1079_v7 = vld [vmem:[%s5116_s27 + $0xd80] sm:$0xff]  ;;  %v1032_v16 = vld [vmem:[%s5116_s27 + $0xc08] sm:$0xff]  ;;  %7610 = vst [vmem:[#allocation169_spill] sm:$0xff] %v6223_v50  ;;  %7611 = vst [vmem:[#allocation170_spill] sm:$0xff] %v6225_v12 }
  0xe0   : > { %7605 = vst [vmem:[#allocation164_spill] sm:$0xff] %v6195_v5  ;;  %7608 = vst [vmem:[#allocation167_spill] sm:$0xff] %v6210_v4  ;;  %v6232_v1 = vld [vmem:[%s7447_s21 + $0x60] sm:$0xff]  ;;  %v6235_v39 = vpack.c.bf16 %v1080_v41, %v1079_v7  ;;  %v6252_v7 = vld [vmem:[%s7447_s21 + $0x68] sm:$0xff]  ;;  %v6269_v41 = vpack.c.bf16 %v1082_v21, %v1081_v30 }
  0xe1   : > { %4188 = vmatpush3.bf16.msra.mxu0 %v6175_v6  ;;  %v1031_v6 = vld [vmem:[%s5116_s27 + $0xc00] sm:$0xff]  ;;  %7609 = vst [vmem:[#allocation168_spill] sm:$0xff] %v6215_v2  ;;  %7615 = vst [vmem:[#allocation174_spill] sm:$0xff] %v6263_v53  ;;  %v1033_v20 = vld [vmem:[%s5116_s27 + $0xc10] sm:$0xff]  ;;  %v3913_v60 = vcombine.high %v6252_v7, %v6257_v0 }
  0xe2   : > { %4210 = vmatpush3.bf16.msra.mxu1 %v6183_v55  ;;  %4189 = vmatprep.subr.bf16.mxu0 %v6185_v48  ;;  %v1063_v55 = vld [vmem:[%s5116_s27 + $0xd00] sm:$0xff]  ;;  %v1064_v48 = vld [vmem:[%s5116_s27 + $0xd08] sm:$0xff]  ;;  %7612 = vst [vmem:[#allocation171_spill] sm:$0xff] %v6235_v39  ;;  %v6247_v25 = vpack.c.bf16 %v1032_v16, %v1031_v6  ;;  %v1034_v16 = vld [vmem:[%s5116_s27 + $0xc18] sm:$0xff] }
  0xe3   : > { %4211 = vmatprep.subr.bf16.mxu1 %v6190_v33  ;;  %v6261_v51 = vpack.c.bf16 %v1064_v48, %v1063_v55  ;;  %v1065_v6 = vld [vmem:[%s5116_s27 + $0xd10] sm:$0xff]  ;;  %7616 = vst [vmem:[#allocation175_spill] sm:$0xff] %v6269_v41  ;;  %v1083_v55 = vld [vmem:[%s5116_s27 + $0xda0] sm:$0xff]  ;;  %v1084_v48 = vld [vmem:[%s5116_s27 + $0xda8] sm:$0xff]  ;;  %v6281_v24 = vpack.c.bf16 %v1034_v16, %v1033_v20 }
  0xe4   : > { %7613 = vst [vmem:[#allocation172_spill] sm:$0xff] %v6247_v25  ;;  %v1068_v20 = vld [vmem:[%s5116_s27 + $0xd28] sm:$0xff]  ;;  %v1053_v16 = vld [vmem:[%s5116_s27 + $0xcb0] sm:$0xff] }
  0xe5   : > { %4190 = vmatpush3.bf16.msra.mxu0 %v6195_v5  ;;  %7614 = vst [vmem:[#allocation173_spill] sm:$0xff] %v6261_v51  ;;  %7617 = vst [vmem:[#allocation176_spill] sm:$0xff] %v6281_v24 }
  0xe6   : > { %4212 = vmatpush3.bf16.msra.mxu1 %v6203_v59  ;;  %4191 = vmatprep.subr.bf16.mxu0 %v6205_v19  ;;  %v1052_v19 = vld [vmem:[%s5116_s27 + $0xca8] sm:$0xff] }
  0xe7   : > { %4213 = vmatprep.subr.bf16.mxu1 %v6210_v4  ;;  %v1051_v4 = vld [vmem:[%s5116_s27 + $0xca0] sm:$0xff] }
  0xe8   : > { %v6287_v21 = vpack.c.bf16 %v1052_v19, %v1051_v4  ;;  %v1086_v19 = vld [vmem:[%s5116_s27 + $0xdb8] sm:$0xff] }
  0xe9   : > { %4192 = vmatpush3.bf16.msra.mxu0 %v6215_v2  ;;  %v1066_v2 = vld [vmem:[%s5116_s27 + $0xd18] sm:$0xff] }
  0xea   : > { %4214 = vmatpush3.bf16.msra.mxu1 %v6223_v50  ;;  %4221 = vmatprep.subr.bf16.mxu0 %v6225_v12  ;;  %v3911_v12 = vcombine.high %v6232_v1, %v6242_v42  ;;  %v6285_v30 = vpack.c.bf16 %v1066_v2, %v1065_v6  ;;  %7619 = vst [vmem:[#allocation178_spill] sm:$0xff] %v6287_v21  ;;  %v1067_v50 = vld [vmem:[%s5116_s27 + $0xd20] sm:$0xff]  ;;  %v1085_v2 = vld [vmem:[%s5116_s27 + $0xdb0] sm:$0xff] }
  0xeb   : > { %4243 = vmatprep.subr.bf16.mxu1 %v6235_v39  ;;  %v1036_v39 = vld [vmem:[%s5116_s27 + $0xc28] sm:$0xff]  ;;  %v6305_v6 = vpack.c.bf16 %v1068_v20, %v1067_v50  ;;  %v1087_v50 = vld [vmem:[%s5116_s27 + $0xdc0] sm:$0xff] }
  0xec   : > { %2050 = vmatmul.mubr.bf16.vlgmr.msra.gmra.mrb[20].mxu0 %v3906_v54  ;;  %7618 = vst [vmem:[#allocation177_spill] sm:$0xff] %v6285_v30  ;;  %v1035_v54 = vld [vmem:[%s5116_s27 + $0xc20] sm:$0xff] }
  0xed   : > { %2091 = vmatmul.mubr.bf16.vlgmr.msra.gmra.mrb[20].mxu1 %v3908_v38  ;;  %4222 = vmatpush3.bf16.msra.mxu0 %v6247_v25  ;;  %v6293_v38 = vpack.c.bf16 %v1084_v48, %v1083_v55  ;;  %v1054_v25 = vld [vmem:[%s5116_s27 + $0xcb8] sm:$0xff]  ;;  %v6301_v4 = vpack.c.bf16 %v1036_v39, %v1035_v54  ;;  %7622 = vst [vmem:[#allocation181_spill] sm:$0xff] %v6305_v6  ;;  %v1055_v54 = vld [vmem:[%s5116_s27 + $0xcc0] sm:$0xff] }
  0xee   : > { %4244 = vmatpush3.bf16.msra.mxu1 %v6261_v51  ;;  %4223 = vmatprep.subr.bf16.mxu0 %v6263_v53  ;;  %v6307_v55 = vpack.c.bf16 %v1054_v25, %v1053_v16  ;;  %v1038_v48 = vld [vmem:[%s5116_s27 + $0xc38] sm:$0xff]  ;;  %v1088_v25 = vld [vmem:[%s5116_s27 + $0xdc8] sm:$0xff] }
  0xef   : > { %4245 = vmatprep.subr.bf16.mxu1 %v6269_v41  ;;  %7620 = vst [vmem:[#allocation179_spill] sm:$0xff] %v6293_v38  ;;  %2131 = vmatprep.mubr.bf16.mxu0 %v3911_v12  ;;  %7621 = vst [vmem:[#allocation180_spill] sm:$0xff] %v6301_v4  ;;  %v1037_v12 = vld [vmem:[%s5116_s27 + $0xc30] sm:$0xff]  ;;  %v1070_v39 = vld [vmem:[%s5116_s27 + $0xd38] sm:$0xff] }
  0xf0   : > { %2172 = vmatprep.mubr.bf16.mxu1 %v3913_v60  ;;  %7623 = vst [vmem:[#allocation182_spill] sm:$0xff] %v6307_v55  ;;  %v1069_v41 = vld [vmem:[%s5116_s27 + $0xd30] sm:$0xff]  ;;  %v6313_v60 = vpack.c.bf16 %v1086_v19, %v1085_v2  ;;  %v6321_v20 = vpack.c.bf16 %v1038_v48, %v1037_v12  ;;  %v1039_v19 = vld [vmem:[%s5116_s27 + $0xc40] sm:$0xff]  ;;  %v1072_v12 = vld [vmem:[%s5116_s27 + $0xd48] sm:$0xff] }
  0xf1   : > { %4224 = vmatpush3.bf16.msra.mxu0 %v6281_v24  ;;  %v6325_v16 = vpack.c.bf16 %v1070_v39, %v1069_v41  ;;  %v6333_v24 = vpack.c.bf16 %v1088_v25, %v1087_v50  ;;  %v1057_v48 = vld [vmem:[%s5116_s27 + $0xcd0] sm:$0xff]  ;;  %v1116_v51 = vld [vmem:[%s5116_s27 + $0xea8] sm:$0xff] }
  0xf2   : > { %4246 = vmatpush3.bf16.msra.mxu1 %v6285_v30  ;;  %4225 = vmatprep.subr.bf16.mxu0 %v6287_v21  ;;  %7624 = vst [vmem:[#allocation183_spill] sm:$0xff] %v6313_v60  ;;  %v1056_v30 = vld [vmem:[%s5116_s27 + $0xcc8] sm:$0xff]  ;;  %7625 = vst [vmem:[#allocation184_spill] sm:$0xff] %v6321_v20  ;;  %v1071_v21 = vld [vmem:[%s5116_s27 + $0xd40] sm:$0xff] }
  0xf3   : > { %4247 = vmatprep.subr.bf16.mxu1 %v6293_v38  ;;  %7626 = vst [vmem:[#allocation185_spill] sm:$0xff] %v6325_v16  ;;  %v6327_v2 = vpack.c.bf16 %v1056_v30, %v1055_v54  ;;  %v1040_v38 = vld [vmem:[%s5116_s27 + $0xc48] sm:$0xff]  ;;  %7628 = vst [vmem:[#allocation187_spill] sm:$0xff] %v6333_v24  ;;  %v1089_v41 = vld [vmem:[%s5116_s27 + $0xdd0] sm:$0xff]  ;;  %v6345_v54 = vpack.c.bf16 %v1072_v12, %v1071_v21 }
  0xf4   : > { %v1090_v30 = vld [vmem:[%s5116_s27 + $0xdd8] sm:$0xff]  ;;  %v6341_v39 = vpack.c.bf16 %v1040_v38, %v1039_v19  ;;  %v1041_v25 = vld [vmem:[%s5116_s27 + $0xc50] sm:$0xff]  ;;  %v1059_v19 = vld [vmem:[%s5116_s27 + $0xce0] sm:$0xff] }
  0xf5   : > { %4226 = vmatpush3.bf16.msra.mxu0 %v6301_v4  ;;  %7627 = vst [vmem:[#allocation186_spill] sm:$0xff] %v6327_v2  ;;  %7630 = vst [vmem:[#allocation189_spill] sm:$0xff] %v6345_v54  ;;  %v6353_v4 = vpack.c.bf16 %v1090_v30, %v1089_v41  ;;  %v1074_v38 = vld [vmem:[%s5116_s27 + $0xd58] sm:$0xff]  ;;  %v1091_v21 = vld [vmem:[%s5116_s27 + $0xde0] sm:$0xff] }
  0xf6   : > { %4248 = vmatpush3.bf16.msra.mxu1 %v6305_v6  ;;  %4227 = vmatprep.subr.bf16.mxu0 %v6307_v55  ;;  %v1058_v6 = vld [vmem:[%s5116_s27 + $0xcd8] sm:$0xff]  ;;  %7629 = vst [vmem:[#allocation188_spill] sm:$0xff] %v6341_v39  ;;  %v1073_v55 = vld [vmem:[%s5116_s27 + $0xd50] sm:$0xff]  ;;  %v1043_v30 = vld [vmem:[%s5116_s27 + $0xc60] sm:$0xff] }
  0xf7   : > { %4249 = vmatprep.subr.bf16.mxu1 %v6313_v60  ;;  %v6347_v50 = vpack.c.bf16 %v1058_v6, %v1057_v48  ;;  %v1042_v60 = vld [vmem:[%s5116_s27 + $0xc58] sm:$0xff]  ;;  %7632 = vst [vmem:[#allocation191_spill] sm:$0xff] %v6353_v4  ;;  %v1092_v6 = vld [vmem:[%s5116_s27 + $0xde8] sm:$0xff]  ;;  %v6365_v48 = vpack.c.bf16 %v1074_v38, %v1073_v55  ;;  %v1093_v55 = vld [vmem:[%s5116_s27 + $0xdf0] sm:$0xff] }
  0xf8   : > { %v6361_v12 = vpack.c.bf16 %v1042_v60, %v1041_v25  ;;  %v1076_v60 = vld [vmem:[%s5116_s27 + $0xd68] sm:$0xff]  ;;  %v1061_v25 = vld [vmem:[%s5116_s27 + $0xcf0] sm:$0xff] }
  0xf9   : > { %4228 = vmatpush3.bf16.msra.mxu0 %v6321_v20  ;;  %7631 = vst [vmem:[#allocation190_spill] sm:$0xff] %v6347_v50  ;;  %7634 = vst [vmem:[#allocation193_spill] sm:$0xff] %v6365_v48  ;;  %v6373_v20 = vpack.c.bf16 %v1092_v6, %v1091_v21  ;;  %v1045_v6 = vld [vmem:[%s5116_s27 + $0xc70] sm:$0xff] }
  0xfa   : > { %4250 = vmatpush3.bf16.msra.mxu1 %v6325_v16  ;;  %4229 = vmatprep.subr.bf16.mxu0 %v6327_v2  ;;  %v1060_v16 = vld [vmem:[%s5116_s27 + $0xce8] sm:$0xff]  ;;  %7633 = vst [vmem:[#allocation192_spill] sm:$0xff] %v6361_v12  ;;  %v1075_v2 = vld [vmem:[%s5116_s27 + $0xd60] sm:$0xff] }
  0xfb   : > { %4251 = vmatprep.subr.bf16.mxu1 %v6333_v24  ;;  %v6367_v41 = vpack.c.bf16 %v1060_v16, %v1059_v19  ;;  %v1044_v24 = vld [vmem:[%s5116_s27 + $0xc68] sm:$0xff]  ;;  %7636 = vst [vmem:[#allocation195_spill] sm:$0xff] %v6373_v20  ;;  %v1094_v16 = vld [vmem:[%s5116_s27 + $0xdf8] sm:$0xff]  ;;  %v6385_v19 = vpack.c.bf16 %v1076_v60, %v1075_v2  ;;  %v1095_v60 = vld [vmem:[%s5116_s27 + $0xe00] sm:$0xff] }
  0xfc   : > { %v6381_v38 = vpack.c.bf16 %v1044_v24, %v1043_v30  ;;  %v1078_v24 = vld [vmem:[%s5116_s27 + $0xd78] sm:$0xff]  ;;  %v1111_v30 = vld [vmem:[%s5116_s27 + $0xe80] sm:$0xff]  ;;  %v1144_v2 = vld [vmem:[%s5116_s27 + $0xf88] sm:$0xff] }
  0xfd   : > { %4230 = vmatpush3.bf16.msra.mxu0 %v6341_v39  ;;  %7635 = vst [vmem:[#allocation194_spill] sm:$0xff] %v6367_v41  ;;  %7638 = vst [vmem:[#allocation197_spill] sm:$0xff] %v6385_v19  ;;  %v1128_v39 = vld [vmem:[%s5116_s27 + $0xf08] sm:$0xff] }
  0xfe   : > { %4252 = vmatpush3.bf16.msra.mxu1 %v6345_v54  ;;  %4231 = vmatprep.subr.bf16.mxu0 %v6347_v50  ;;  %v1062_v54 = vld [vmem:[%s5116_s27 + $0xcf8] sm:$0xff]  ;;  %7637 = vst [vmem:[#allocation196_spill] sm:$0xff] %v6381_v38  ;;  %v1077_v50 = vld [vmem:[%s5116_s27 + $0xd70] sm:$0xff] }
  0xff   : > { %4253 = vmatprep.subr.bf16.mxu1 %v6353_v4  ;;  %v6387_v21 = vpack.c.bf16 %v1062_v54, %v1061_v25  ;;  %v1046_v4 = vld [vmem:[%s5116_s27 + $0xc78] sm:$0xff]  ;;  %v6406_v25 = vpack.c.bf16 %v1078_v24, %v1077_v50  ;;  %v3912_v24 = vcombine.low %v6252_v7, %v6257_v0  ;;  %v1097_v0 = vld [vmem:[%s5116_s27 + $0xe10] sm:$0xff] }
 0x100   : > { %v6401_v54 = vpack.c.bf16 %v1046_v4, %v1045_v6  ;;  %v1114_v4 = vld [vmem:[%s5116_s27 + $0xe98] sm:$0xff]  ;;  %v1145_v6 = vld [vmem:[%s5116_s27 + $0xf90] sm:$0xff] }
 0x101   : > { %4232 = vmatpush3.bf16.msra.mxu0 %v6361_v12  ;;  %7639 = vst [vmem:[#allocation198_spill] sm:$0xff] %v6387_v21  ;;  %v6393_v12 = vpack.c.bf16 %v1094_v16, %v1093_v55  ;;  %7642 = vst [vmem:[#allocation201_spill] sm:$0xff] %v6406_v25  ;;  %v1096_v16 = vld [vmem:[%s5116_s27 + $0xe08] sm:$0xff]  ;;  %v1146_v50 = vld [vmem:[%s5116_s27 + $0xf98] sm:$0xff] }
 0x102   : > { %4254 = vmatpush3.bf16.msra.mxu1 %v6365_v48  ;;  %4233 = vmatprep.subr.bf16.mxu0 %v6367_v41  ;;  %v1112_v48 = vld [vmem:[%s5116_s27 + $0xe88] sm:$0xff]  ;;  %v1143_v41 = vld [vmem:[%s5116_s27 + $0xf80] sm:$0xff]  ;;  %7641 = vst [vmem:[#allocation200_spill] sm:$0xff] %v6401_v54 }
 0x103   : > { %4255 = vmatprep.subr.bf16.mxu1 %v6373_v20  ;;  %7640 = vst [vmem:[#allocation199_spill] sm:$0xff] %v6393_v12  ;;  %v6408_v55 = vpack.c.bf16 %v1112_v48, %v1111_v30  ;;  %v1127_v20 = vld [vmem:[%s5116_s27 + $0xf00] sm:$0xff]  ;;  %v6414_v53 = vpack.c.bf16 %v1144_v2, %v1143_v41  ;;  %v6425_v48 = vld [vmem:[%s7447_s21 + $0x70] sm:$0xff]  ;;  %v6445_v30 = vld [vmem:[%s7447_s21 + $0xf8] sm:$0xff] }
 0x104   : > { %v6430_v41 = vld [vmem:[%s7447_s21 + $0xf0] sm:$0xff]  ;;  %v6449_v2 = vpack.c.bf16 %v1128_v39, %v1127_v20  ;;  %v1147_v20 = vld [vmem:[%s5116_s27 + $0xfa0] sm:$0xff]  ;;  %v1148_v39 = vld [vmem:[%s5116_s27 + $0xfa8] sm:$0xff] }
 0x105   : > { %4234 = vmatpush3.bf16.msra.mxu0 %v6381_v38  ;;  %7643 = vst [vmem:[#allocation202_spill] sm:$0xff] %v6408_v55  ;;  %7644 = vst [vmem:[#allocation203_spill] sm:$0xff] %v6414_v53  ;;  %v1113_v38 = vld [vmem:[%s5116_s27 + $0xe90] sm:$0xff] }
 0x106   : > { %4256 = vmatpush3.bf16.msra.mxu1 %v6385_v19  ;;  %4235 = vmatprep.subr.bf16.mxu0 %v6387_v21  ;;  %v3910_v21 = vcombine.low %v6232_v1, %v6242_v42  ;;  %v6435_v1 = vpack.c.bf16 %v1096_v16, %v1095_v60  ;;  %v6440_v42 = vld [vmem:[%s7447_s21 + $0x78] sm:$0xff]  ;;  %7646 = vst [vmem:[#allocation205_spill] sm:$0xff] %v6449_v2  ;;  %v1129_v16 = vld [vmem:[%s5116_s27 + $0xf10] sm:$0xff]  ;;  %v1115_v19 = vld [vmem:[%s5116_s27 + $0xea0] sm:$0xff] }
 0x107   : > { %4257 = vmatprep.subr.bf16.mxu1 %v6393_v12  ;;  %v6451_v7 = vpack.c.bf16 %v1114_v4, %v1113_v38  ;;  %v1098_v60 = vld [vmem:[%s5116_s27 + $0xe18] sm:$0xff]  ;;  %v3917_v38 = vcombine.high %v6440_v42, %v6445_v30 }
 0x108   : > { %7645 = vst [vmem:[#allocation204_spill] sm:$0xff] %v6435_v1  ;;  %v1130_v12 = vld [vmem:[%s5116_s27 + $0xf18] sm:$0xff]  ;;  %v6469_v4 = vpack.c.bf16 %v1098_v60, %v1097_v0  ;;  %v1132_v0 = vld [vmem:[%s5116_s27 + $0xf28] sm:$0xff]  ;;  %v1117_v60 = vld [vmem:[%s5116_s27 + $0xeb0] sm:$0xff] }
 0x109   : > { %4236 = vmatpush3.bf16.msra.mxu0 %v6401_v54  ;;  %7647 = vst [vmem:[#allocation206_spill] sm:$0xff] %v6451_v7  ;;  %v6457_v54 = vpack.c.bf16 %v1146_v50, %v1145_v6  ;;  %v6475_v6 = vpack.c.bf16 %v1116_v51, %v1115_v19  ;;  %v1099_v50 = vld [vmem:[%s5116_s27 + $0xe20] sm:$0xff]  ;;  %v1150_v51 = vld [vmem:[%s5116_s27 + $0xfb8] sm:$0xff] }
 0x10a   : > { %4258 = vmatpush3.bf16.msra.mxu1 %v6406_v25  ;;  %4265 = vmatprep.subr.bf16.mxu0 %v6408_v55  ;;  %v3915_v55 = vcombine.high %v6425_v48, %v6430_v41  ;;  %7649 = vst [vmem:[#allocation208_spill] sm:$0xff] %v6469_v4  ;;  %v1131_v25 = vld [vmem:[%s5116_s27 + $0xf20] sm:$0xff] }
 0x10b   : > { %4287 = vmatprep.subr.bf16.mxu1 %v6414_v53  ;;  %7648 = vst [vmem:[#allocation207_spill] sm:$0xff] %v6457_v54  ;;  %7651 = vst [vmem:[#allocation210_spill] sm:$0xff] %v6475_v6  ;;  %v1100_v53 = vld [vmem:[%s5116_s27 + $0xe28] sm:$0xff] }
 0x10c   : > { %2132 = vmatmul.mubr.bf16.vlgmr.msra.gmra.mrb[24].mxu0 %v3910_v21  ;;  %v6473_v21 = vpack.c.bf16 %v1130_v12, %v1129_v16  ;;  %v1149_v12 = vld [vmem:[%s5116_s27 + $0xfb0] sm:$0xff]  ;;  %v6489_v19 = vpack.c.bf16 %v1100_v53, %v1099_v50  ;;  %v6493_v16 = vpack.c.bf16 %v1132_v0, %v1131_v25  ;;  %v1134_v53 = vld [vmem:[%s5116_s27 + $0xf38] sm:$0xff]  ;;  %v1119_v50 = vld [vmem:[%s5116_s27 + $0xec0] sm:$0xff] }
 0x10d   : > { %2173 = vmatmul.mubr.bf16.vlgmr.msra.gmra.mrb[24].mxu1 %v3912_v24  ;;  %4266 = vmatpush3.bf16.msra.mxu0 %v6435_v1  ;;  %v6481_v24 = vpack.c.bf16 %v1148_v39, %v1147_v20  ;;  %v1118_v1 = vld [vmem:[%s5116_s27 + $0xeb8] sm:$0xff]  ;;  %v1151_v25 = vld [vmem:[%s5116_s27 + $0xfc0] sm:$0xff] }
 0x10e   : > { %4288 = vmatpush3.bf16.msra.mxu1 %v6449_v2  ;;  %4267 = vmatprep.subr.bf16.mxu0 %v6451_v7  ;;  %7650 = vst [vmem:[#allocation209_spill] sm:$0xff] %v6473_v21  ;;  %7653 = vst [vmem:[#allocation212_spill] sm:$0xff] %v6489_v19  ;;  %v6495_v20 = vpack.c.bf16 %v1118_v1, %v1117_v60  ;;  %v1102_v39 = vld [vmem:[%s5116_s27 + $0xe38] sm:$0xff]  ;;  %v1152_v1 = vld [vmem:[%s5116_s27 + $0xfc8] sm:$0xff] }
 0x10f   : > { %4289 = vmatprep.subr.bf16.mxu1 %v6457_v54  ;;  %7652 = vst [vmem:[#allocation211_spill] sm:$0xff] %v6481_v24  ;;  %2213 = vmatprep.mubr.bf16.mxu0 %v3915_v55  ;;  %7654 = vst [vmem:[#allocation213_spill] sm:$0xff] %v6493_v16  ;;  %v1101_v55 = vld [vmem:[%s5116_s27 + $0xe30] sm:$0xff] }
 0x110   : > { %2254 = vmatprep.mubr.bf16.mxu1 %v3917_v38  ;;  %7655 = vst [vmem:[#allocation214_spill] sm:$0xff] %v6495_v20  ;;  %v1133_v54 = vld [vmem:[%s5116_s27 + $0xf30] sm:$0xff]  ;;  %v6501_v38 = vpack.c.bf16 %v1150_v51, %v1149_v12  ;;  %v6509_v0 = vpack.c.bf16 %v1102_v39, %v1101_v55  ;;  %v1103_v51 = vld [vmem:[%s5116_s27 + $0xe40] sm:$0xff]  ;;  %v1136_v55 = vld [vmem:[%s5116_s27 + $0xf48] sm:$0xff] }
 0x111   : > { %4268 = vmatpush3.bf16.msra.mxu0 %v6469_v4  ;;  %v6513_v60 = vpack.c.bf16 %v1134_v53, %v1133_v54  ;;  %v6521_v4 = vpack.c.bf16 %v1152_v1, %v1151_v25  ;;  %v1121_v39 = vld [vmem:[%s5116_s27 + $0xed0] sm:$0xff]  ;;  %v1154_v53 = vld [vmem:[%s5116_s27 + $0xfd8] sm:$0xff] }
 0x112   : > { %4290 = vmatpush3.bf16.msra.mxu1 %v6473_v21  ;;  %4269 = vmatprep.subr.bf16.mxu0 %v6475_v6  ;;  %7656 = vst [vmem:[#allocation215_spill] sm:$0xff] %v6501_v38  ;;  %v1120_v21 = vld [vmem:[%s5116_s27 + $0xec8] sm:$0xff]  ;;  %7657 = vst [vmem:[#allocation216_spill] sm:$0xff] %v6509_v0  ;;  %v1135_v6 = vld [vmem:[%s5116_s27 + $0xf40] sm:$0xff] }
 0x113   : > { %4291 = vmatprep.subr.bf16.mxu1 %v6481_v24  ;;  %7658 = vst [vmem:[#allocation217_spill] sm:$0xff] %v6513_v60  ;;  %v6515_v12 = vpack.c.bf16 %v1120_v21, %v1119_v50  ;;  %v1104_v24 = vld [vmem:[%s5116_s27 + $0xe48] sm:$0xff]  ;;  %7660 = vst [vmem:[#allocation219_spill] sm:$0xff] %v6521_v4  ;;  %v1153_v54 = vld [vmem:[%s5116_s27 + $0xfd0] sm:$0xff]  ;;  %v6533_v50 = vpack.c.bf16 %v1136_v55, %v1135_v6  ;;  %v2283_v6 = vlaneseq }
 0x114   : > { %v6529_v21 = vpack.c.bf16 %v1104_v24, %v1103_v51  ;;  %v1105_v1 = vld [vmem:[%s5116_s27 + $0xe50] sm:$0xff]  ;;  %v1138_v24 = vld [vmem:[%s5116_s27 + $0xf58] sm:$0xff]  ;;  %v1123_v51 = vld [vmem:[%s5116_s27 + $0xee0] sm:$0xff] }
 0x115   : > { %4270 = vmatpush3.bf16.msra.mxu0 %v6489_v19  ;;  %7659 = vst [vmem:[#allocation218_spill] sm:$0xff] %v6515_v12  ;;  %7662 = vst [vmem:[#allocation221_spill] sm:$0xff] %v6533_v50  ;;  %v6541_v19 = vpack.c.bf16 %v1154_v53, %v1153_v54  ;;  %v1156_v55 = vld [vmem:[%s5116_s27 + $0xfe8] sm:$0xff]  ;;  %v2284_v5 = vshrl.u32 %v2283_v6, 7 }
 0x116   : > { %4292 = vmatpush3.bf16.msra.mxu1 %v6493_v16  ;;  %4271 = vmatprep.subr.bf16.mxu0 %v6495_v20  ;;  %v1122_v16 = vld [vmem:[%s5116_s27 + $0xed8] sm:$0xff]  ;;  %7661 = vst [vmem:[#allocation220_spill] sm:$0xff] %v6529_v21  ;;  %v1137_v20 = vld [vmem:[%s5116_s27 + $0xf50] sm:$0xff] }
 0x117   : > { %4293 = vmatprep.subr.bf16.mxu1 %v6501_v38  ;;  %v6535_v25 = vpack.c.bf16 %v1122_v16, %v1121_v39  ;;  %v1106_v38 = vld [vmem:[%s5116_s27 + $0xe58] sm:$0xff]  ;;  %7664 = vst [vmem:[#allocation223_spill] sm:$0xff] %v6541_v19  ;;  %v1155_v16 = vld [vmem:[%s5116_s27 + $0xfe0] sm:$0xff]  ;;  %v6553_v54 = vpack.c.bf16 %v1138_v24, %v1137_v20  ;;  %v1157_v20 = vld [vmem:[%s5116_s27 + $0xff0] sm:$0xff] }
 0x118   : > { %v6549_v39 = vpack.c.bf16 %v1106_v38, %v1105_v1  ;;  %v6561_v59 = vpack.c.bf16 %v1156_v55, %v1155_v16  ;;  %v1140_v38 = vld [vmem:[%s5116_s27 + $0xf68] sm:$0xff]  ;;  %v1125_v1 = vld [vmem:[%s5116_s27 + $0xef0] sm:$0xff] }
 0x119   : > { %4272 = vmatpush3.bf16.msra.mxu0 %v6509_v0  ;;  %7663 = vst [vmem:[#allocation222_spill] sm:$0xff] %v6535_v25  ;;  %v4926_v0 = vmov 1983009808   ;;  %7666 = vst [vmem:[#allocation225_spill] sm:$0xff] %v6553_v54 }
 0x11a   : > { %4294 = vmatpush3.bf16.msra.mxu1 %v6513_v60  ;;  %4273 = vmatprep.subr.bf16.mxu0 %v6515_v12  ;;  %v1124_v60 = vld [vmem:[%s5116_s27 + $0xee8] sm:$0xff]  ;;  %v2281_v7 = vunpack.c.l.s4 %v4926_v0  ;;  %7665 = vst [vmem:[#allocation224_spill] sm:$0xff] %v6549_v39  ;;  %v1107_v0 = vld [vmem:[%s5116_s27 + $0xe60] sm:$0xff] }
 0x11b   : > { %4295 = vmatprep.subr.bf16.mxu1 %v6521_v4  ;;  %v6555_v53 = vpack.c.bf16 %v1124_v60, %v1123_v51  ;;  %v1108_v4 = vld [vmem:[%s5116_s27 + $0xe68] sm:$0xff]  ;;  %v1139_v12 = vld [vmem:[%s5116_s27 + $0xf60] sm:$0xff]  ;;  %v1158_v60 = vld [vmem:[%s5116_s27 + $0xff8] sm:$0xff] }
 0x11c   : > { %v6583_v15 = vpack.c.bf16 %v1158_v60, %v1157_v20  ;;  %v7684_v20 = vld [vmem:[#allocation24_spill] sm:$0xff]  ;;  %v7685_v60 = vld [vmem:[#allocation25_spill] sm:$0xff] }
 0x11d   : > { %4274 = vmatpush3.bf16.msra.mxu0 %v6529_v21  ;;  %v1126_v21 = vld [vmem:[%s5116_s27 + $0xef8] sm:$0xff] }
 0x11e   : > { %4296 = vmatpush3.bf16.msra.mxu1 %v6533_v50  ;;  %4275 = vmatprep.subr.bf16.mxu0 %v6535_v25  ;;  %v2282_v50 = vunpack.c.0.s8 %v2281_v7  ;;  %v2263_v7 = vld [vmem:[%s7667_s25] sm:$0xff] }
 0x11f   : > { %v3973_v2 = vpop.f32.mrb[0].mxu0  ;;  %4297 = vmatprep.subr.bf16.mxu1 %v6541_v19  ;;  %v6569_v19 = vpack.c.bf16 %v1108_v4, %v1107_v0  ;;  %v2279_v61 = vcombine.high %v2263_v7, %v2263_v7 }
 0x120   : > { %v3995_v25 = vpop.f32.mrb[0].mxu1  ;;  %v3974_v33 = vpop.f32.mrb[1].mxu0 }
 0x121   : > { %v3975_v24 = vadd.f32 %v3974_v33, %v3973_v2  ;;  %v3996_v51 = vpop.f32.mrb[1].mxu1  ;;  %v3976_v37 = vpop.f32.mrb[2].mxu0  ;;  %4276 = vmatpush3.bf16.msra.mxu0 %v6549_v39  ;;  %v6576_v33 = vpack.c.bf16 %v1140_v38, %v1139_v12  ;;  %v6578_v2 = vpack.c.bf16 %v1126_v21, %v1125_v1  ;;  %v1109_v39 = vld [vmem:[%s5116_s27 + $0xe70] sm:$0xff]  ;;  %v7683_v1 = vld [vmem:[#allocation23_spill] sm:$0xff] }
 0x122   : > { %v3997_v6 = vadd.f32 %v3996_v51, %v3995_v25  ;;  %v3998_v16 = vpop.f32.mrb[2].mxu1  ;;  %4298 = vmatpush3.bf16.msra.mxu1 %v6553_v54  ;;  %v3977_v55 = vpop.f32.mrb[3].mxu0  ;;  %4277 = vmatprep.subr.bf16.mxu0 %v6555_v53  ;;  %v1142_v25 = vld [vmem:[%s5116_s27 + $0xf78] sm:$0xff]  ;;  %v6587_v51 = vsub.s32 %v2282_v50, %v2284_v5  ;;  %v6590_v12 = vpack.c.bf16 %v1110_v34, %v1109_v39  ;;  %v7681_v39 = vld [vmem:[#allocation21_spill] sm:$0xff] }
 0x123   : > { %v3978_v4 = vadd.f32 %v3977_v55, %v3976_v37  ;;  %v3999_v0 = vpop.f32.mrb[3].mxu1  ;;  %4299 = vmatprep.subr.bf16.mxu1 %v6561_v59  ;;  %v6594_v37 = vpack.c.bf16 %v1142_v25, %v1141_v3  ;;  %v3914_v5 = vcombine.low %v6425_v48, %v6430_v41  ;;  %v7677_v48 = vld [vmem:[#allocation17_spill] sm:$0xff]  ;;  %v7678_v41 = vld [vmem:[#allocation18_spill] sm:$0xff] }
 0x124   : > { %v1683_v54 = vadd.f32 %v3997_v6, %v3975_v24  ;;  %v4000_v63 = vadd.f32 %v3999_v0, %v3998_v16  ;;  %v6598_v38 = vrot.slane %v2263_v7, %v6587_v51  ;;  %v6603_v50 = vrot.slane %v2279_v61, %v6587_v51  ;;  %v7676_v61 = vld [vmem:[#allocation16_spill] sm:$0xff]  ;;  %v7686_v24 = vld [vmem:[#allocation26_spill] sm:$0xff]  ;;  %v7687_v7 = vld [vmem:[#allocation27_spill] sm:$0xff] }
 0x125   : > { %4278 = vmatpush3.bf16.msra.mxu0 %v6569_v19  ;;  %v7688_v6 = vld [vmem:[#allocation28_spill] sm:$0xff]  ;;  %v7689_v16 = vld [vmem:[#allocation29_spill] sm:$0xff]  ;;  %v7690_v55 = vld [vmem:[#allocation30_spill] sm:$0xff] }
 0x126   : > { %v1686_v21 = vadd.f32 %v4000_v63, %v3978_v4  ;;  %4300 = vmatpush3.bf16.msra.mxu1 %v6576_v33  ;;  %4279 = vmatprep.subr.bf16.mxu0 %v6578_v2  ;;  %v3916_v63 = vcombine.low %v6440_v42, %v6445_v30  ;;  %v2294_v3 = vcombine.high %v6598_v38, %v6598_v38  ;;  %v7679_v42 = vld [vmem:[#allocation19_spill] sm:$0xff]  ;;  %v7680_v30 = vld [vmem:[#allocation20_spill] sm:$0xff] }
 0x127   : > { %4301 = vmatprep.subr.bf16.mxu1 %v6583_v15  ;;  %v2295_v34 = vcombine.high %v6603_v50, %v6603_v50  ;;  %v7691_v0 = vld [vmem:[#allocation31_spill] sm:$0xff] }
 0x129   : > { %4280 = vmatpush3.bf16.msra.mxu0 %v6590_v12 }
 0x12a   : > { %4302 = vmatpush3.bf16.msra.mxu1 %v6594_v37  ;;  %4309 = vmatprep.subr.bf16.mxu0 %v5121_v9 }
 0x12b   : > { %4331 = vmatprep.subr.bf16.mxu1 %v5126_v13 }
 0x12c   : > { %2214 = vmatmul.mubr.bf16.vlgmr.msra.gmra.mrb[28].mxu0 %v3914_v5 }
 0x12d   : > { %2255 = vmatmul.mubr.bf16.vlgmr.msra.gmra.mrb[28].mxu1 %v3916_v63  ;;  %4310 = vmatpush3.bf16.msra.mxu0 %v5128_v14  ;;  %v7692_v63 = vld [vmem:[#allocation32_spill] sm:$0xff] }
 0x12e   : > { %4332 = vmatpush3.bf16.msra.mxu1 %v5134_v18  ;;  %4311 = vmatprep.subr.bf16.mxu0 %v5141_v22 }
 0x12f   : > { %4333 = vmatprep.subr.bf16.mxu1 %v5143_v23  ;;  %2479 = vmatprep.mubr.bf16.mxu0 %v2294_v3  ;;  %v2265_v3 = vld [vmem:[%s7667_s25 + $0x10] sm:$0xff] }
 0x130   : > { %2519 = vmatprep.mubr.bf16.mxu1 %v2295_v34 }
 0x131   : > { %4312 = vmatpush3.bf16.msra.mxu0 %v5149_v27  ;;  %v2264_v27 = vld [vmem:[%s7667_s25 + $0x8] sm:$0xff] }
 0x132   : > { %4334 = vmatpush3.bf16.msra.mxu1 %v5156_v31  ;;  %4313 = vmatprep.subr.bf16.mxu0 %v5158_v32 }
 0x133   : > { %4335 = vmatprep.subr.bf16.mxu1 %v5163_v36 }
 0x135   : > { %4314 = vmatpush3.bf16.msra.mxu0 %v5169_v40 }
 0x136   : > { %4336 = vmatpush3.bf16.msra.mxu1 %v5176_v44  ;;  %4315 = vmatprep.subr.bf16.mxu0 %v5178_v45 }
 0x137   : > { %4337 = vmatprep.subr.bf16.mxu1 %v5184_v49 }
 0x139   : > { %4316 = vmatpush3.bf16.msra.mxu0 %v5193_v56  ;;  %v2296_v56 = vcombine.high %v2264_v27, %v2264_v27 }
 0x13a   : > { %4338 = vmatpush3.bf16.msra.mxu1 %v5197_v57  ;;  %4317 = vmatprep.subr.bf16.mxu0 %v5199_v58 }
 0x13b   : > { %4339 = vmatprep.subr.bf16.mxu1 %v5205_v62 }
 0x13d   : > { %4318 = vmatpush3.bf16.msra.mxu0 %v5213_v8  ;;  %v6647_v8 = vrot.slane %v2264_v27, %v6587_v51 }
 0x13e   : > { %4340 = vmatpush3.bf16.msra.mxu1 %v5217_v10  ;;  %4319 = vmatprep.subr.bf16.mxu0 %v5219_v11  ;;  %v6650_v10 = vrot.slane %v2296_v56, %v6587_v51  ;;  %v7668_v11 = vld [vmem:[#allocation8_spill] sm:$0xff]  ;;  %v7698_v56 = vld [vmem:[#allocation38_spill] sm:$0xff] }
 0x13f   : > { %v4017_v9 = vpop.f32.mrb[4].mxu0  ;;  %4341 = vmatprep.subr.bf16.mxu1 %v5225_v17  ;;  %v7669_v17 = vld [vmem:[#allocation9_spill] sm:$0xff] }
 0x140   : > { %v4039_v13 = vpop.f32.mrb[4].mxu1  ;;  %v4018_v14 = vpop.f32.mrb[5].mxu0 }
 0x141   : > { %v4019_v18 = vadd.f32 %v4018_v14, %v4017_v9  ;;  %v4040_v22 = vpop.f32.mrb[5].mxu1  ;;  %v4020_v23 = vpop.f32.mrb[6].mxu0  ;;  %4320 = vmatpush3.bf16.msra.mxu0 %v5233_v26  ;;  %v7670_v26 = vld [vmem:[#allocation10_spill] sm:$0xff] }
 0x142   : > { %v4041_v31 = vadd.f32 %v4040_v22, %v4039_v13  ;;  %v4042_v32 = vpop.f32.mrb[6].mxu1  ;;  %4342 = vmatpush3.bf16.msra.mxu1 %v5237_v28  ;;  %v4021_v36 = vpop.f32.mrb[7].mxu0  ;;  %4321 = vmatprep.subr.bf16.mxu0 %v5239_v29  ;;  %v7671_v28 = vld [vmem:[#allocation11_spill] sm:$0xff]  ;;  %v2311_v29 = vcombine.high %v6647_v8, %v6647_v8  ;;  %v7693_v13 = vld [vmem:[#allocation33_spill] sm:$0xff] }
 0x143   : > { %v1724_v40 = vadd.f32 %v4019_v18, %v1683_v54  ;;  %v4022_v44 = vadd.f32 %v4021_v36, %v4020_v23  ;;  %v4043_v45 = vpop.f32.mrb[7].mxu1  ;;  %4343 = vmatprep.subr.bf16.mxu1 %v5245_v35  ;;  %v2312_v35 = vcombine.high %v6650_v10, %v6650_v10  ;;  %v7682_v54 = vld [vmem:[#allocation22_spill] sm:$0xff]  ;;  %v2313_v36 = vcombine.high %v2265_v3, %v2265_v3 }
 0x144   : > { %v4044_v49 = vadd.f32 %v4043_v45, %v4042_v32  ;;  %v7694_v18 = vld [vmem:[#allocation34_spill] sm:$0xff]  ;;  %v7696_v45 = vld [vmem:[#allocation36_spill] sm:$0xff] }
 0x145   : > { %v1765_v57 = vadd.f32 %v4041_v31, %v1724_v40  ;;  %v1727_v58 = vadd.f32 %v4022_v44, %v1686_v21  ;;  %4322 = vmatpush3.bf16.msra.mxu0 %v5253_v43  ;;  %v7672_v43 = vld [vmem:[#allocation12_spill] sm:$0xff]  ;;  %v7695_v31 = vld [vmem:[#allocation35_spill] sm:$0xff] }
 0x146   : > { %4344 = vmatpush3.bf16.msra.mxu1 %v5257_v46  ;;  %4323 = vmatprep.subr.bf16.mxu0 %v5259_v47  ;;  %v7673_v46 = vld [vmem:[#allocation13_spill] sm:$0xff]  ;;  %v7674_v47 = vld [vmem:[#allocation14_spill] sm:$0xff] }
 0x147   : > { %v1768_v62 = vadd.f32 %v4044_v49, %v1727_v58  ;;  %4345 = vmatprep.subr.bf16.mxu1 %v5265_v52  ;;  %v7675_v52 = vld [vmem:[#allocation15_spill] sm:$0xff]  ;;  %v7697_v49 = vld [vmem:[#allocation37_spill] sm:$0xff] }
 0x149   : > { %4324 = vmatpush3.bf16.msra.mxu0 %v7668_v11  ;;  %v7699_v11 = vld [vmem:[#allocation39_spill] sm:$0xff] }
 0x14a   : > { %4346 = vmatpush3.bf16.msra.mxu1 %v7669_v17  ;;  %4353 = vmatprep.subr.bf16.mxu0 %v7670_v26  ;;  %v6694_v17 = vrot.slane %v2265_v3, %v6587_v51  ;;  %v7700_v26 = vld [vmem:[#allocation40_spill] sm:$0xff] }
 0x14b   : > { %4375 = vmatprep.subr.bf16.mxu1 %v7671_v28  ;;  %v7701_v28 = vld [vmem:[#allocation41_spill] sm:$0xff] }
 0x14c   : > { %2480 = vmatmul.mubr.bf16.vlgmr.msra.gmra.mrb[32].mxu0 %v6598_v38 }
 0x14d   : > { %2520 = vmatmul.mubr.bf16.vlgmr.msra.gmra.mrb[32].mxu1 %v6603_v50  ;;  %4354 = vmatpush3.bf16.msra.mxu0 %v7672_v43 }
 0x14e   : > { %4376 = vmatpush3.bf16.msra.mxu1 %v7673_v46  ;;  %4355 = vmatprep.subr.bf16.mxu0 %v7674_v47  ;;  %v7704_v46 = vld [vmem:[#allocation44_spill] sm:$0xff]  ;;  %v7705_v47 = vld [vmem:[#allocation45_spill] sm:$0xff] }
 0x14f   : > { %4377 = vmatprep.subr.bf16.mxu1 %v7675_v52  ;;  %2559 = vmatprep.mubr.bf16.mxu0 %v2311_v29  ;;  %v7703_v29 = vld [vmem:[#allocation43_spill] sm:$0xff]  ;;  %v7706_v52 = vld [vmem:[#allocation46_spill] sm:$0xff] }
 0x150   : > { %2599 = vmatprep.mubr.bf16.mxu1 %v2312_v35  ;;  %v2328_v35 = vcombine.high %v6694_v17, %v6694_v17 }
 0x151   : > { %4356 = vmatpush3.bf16.msra.mxu0 %v7676_v61  ;;  %v7707_v61 = vld [vmem:[#allocation47_spill] sm:$0xff] }
 0x152   : > { %4378 = vmatpush3.bf16.msra.mxu1 %v7677_v48  ;;  %4357 = vmatprep.subr.bf16.mxu0 %v7678_v41  ;;  %v7708_v48 = vld [vmem:[#allocation48_spill] sm:$0xff]  ;;  %v7709_v41 = vld [vmem:[#allocation49_spill] sm:$0xff] }
 0x153   : > { %4379 = vmatprep.subr.bf16.mxu1 %v7679_v42  ;;  %v7711_v42 = vld [vmem:[#allocation51_spill] sm:$0xff] }
 0x155   : > { %4358 = vmatpush3.bf16.msra.mxu0 %v7680_v30  ;;  %v7712_v30 = vld [vmem:[#allocation52_spill] sm:$0xff] }
 0x156   : > { %4380 = vmatpush3.bf16.msra.mxu1 %v7681_v39  ;;  %4359 = vmatprep.subr.bf16.mxu0 %v7682_v54  ;;  %v7714_v39 = vld [vmem:[#allocation54_spill] sm:$0xff]  ;;  %v7715_v54 = vld [vmem:[#allocation55_spill] sm:$0xff] }
 0x157   : > { %4381 = vmatprep.subr.bf16.mxu1 %v7683_v1  ;;  %v7716_v1 = vld [vmem:[#allocation56_spill] sm:$0xff] }
 0x159   : > { %4360 = vmatpush3.bf16.msra.mxu0 %v7684_v20  ;;  %v7717_v20 = vld [vmem:[#allocation57_spill] sm:$0xff] }
 0x15a   : > { %4382 = vmatpush3.bf16.msra.mxu1 %v7685_v60  ;;  %4361 = vmatprep.subr.bf16.mxu0 %v7686_v24  ;;  %v7718_v60 = vld [vmem:[#allocation58_spill] sm:$0xff]  ;;  %v7719_v24 = vld [vmem:[#allocation59_spill] sm:$0xff] }
 0x15b   : > { %4383 = vmatprep.subr.bf16.mxu1 %v7687_v7  ;;  %v7720_v7 = vld [vmem:[#allocation60_spill] sm:$0xff] }
 0x15d   : > { %4362 = vmatpush3.bf16.msra.mxu0 %v7688_v6  ;;  %v7721_v6 = vld [vmem:[#allocation61_spill] sm:$0xff] }
 0x15e   : > { %4384 = vmatpush3.bf16.msra.mxu1 %v7689_v16  ;;  %4363 = vmatprep.subr.bf16.mxu0 %v7690_v55  ;;  %v7722_v16 = vld [vmem:[#allocation62_spill] sm:$0xff] }
 0x15f   : > { %v4061_v4 = vpop.f32.mrb[8].mxu0  ;;  %4385 = vmatprep.subr.bf16.mxu1 %v7691_v0 }
 0x160   : > { %v4083_v25 = vpop.f32.mrb[8].mxu1  ;;  %v4062_v21 = vpop.f32.mrb[9].mxu0 }
 0x161   : > { %v4063_v38 = vadd.f32 %v4062_v21, %v4061_v4  ;;  %v4084_v5 = vpop.f32.mrb[9].mxu1  ;;  %v4064_v50 = vpop.f32.mrb[10].mxu0  ;;  %4364 = vmatpush3.bf16.msra.mxu0 %v7692_v63  ;;  %v7723_v4 = vld [vmem:[#allocation63_spill] sm:$0xff] }
 0x162   : > { %v4085_v34 = vadd.f32 %v4084_v5, %v4083_v25  ;;  %v4086_v9 = vpop.f32.mrb[10].mxu1  ;;  %4386 = vmatpush3.bf16.msra.mxu1 %v7693_v13  ;;  %v4065_v14 = vpop.f32.mrb[11].mxu0  ;;  %4365 = vmatprep.subr.bf16.mxu0 %v7694_v18  ;;  %v2266_v63 = vld [vmem:[%s7667_s25 + $0x18] sm:$0xff] }
 0x163   : > { %v1806_v22 = vadd.f32 %v4063_v38, %v1765_v57  ;;  %v4066_v23 = vadd.f32 %v4065_v14, %v4064_v50  ;;  %v4087_v27 = vpop.f32.mrb[11].mxu1  ;;  %4387 = vmatprep.subr.bf16.mxu1 %v7695_v31  ;;  %v6697_v57 = vrot.slane %v2313_v36, %v6587_v51  ;;  %v7724_v50 = vld [vmem:[#allocation64_spill] sm:$0xff]  ;;  %v7726_v14 = vld [vmem:[#allocation66_spill] sm:$0xff] }
 0x164   : > { %v4088_v32 = vadd.f32 %v4087_v27, %v4086_v9  ;;  %v7725_v9 = vld [vmem:[#allocation65_spill] sm:$0xff]  ;;  %v7727_v27 = vld [vmem:[#allocation67_spill] sm:$0xff] }
 0x165   : > { %v1847_v40 = vadd.f32 %v4085_v34, %v1806_v22  ;;  %v1809_v44 = vadd.f32 %v4066_v23, %v1768_v62  ;;  %4366 = vmatpush3.bf16.msra.mxu0 %v7696_v45  ;;  %v7702_v62 = vld [vmem:[#allocation42_spill] sm:$0xff]  ;;  %v2329_v43 = vcombine.high %v6697_v57, %v6697_v57  ;;  %v7728_v45 = vld [vmem:[#allocation68_spill] sm:$0xff] }
 0x166   : > { %4388 = vmatpush3.bf16.msra.mxu1 %v7697_v49  ;;  %4367 = vmatprep.subr.bf16.mxu0 %v7698_v56  ;;  %v7729_v49 = vld [vmem:[#allocation69_spill] sm:$0xff]  ;;  %v7730_v56 = vld [vmem:[#allocation70_spill] sm:$0xff] }
 0x167   : > { %v1850_v58 = vadd.f32 %v4088_v32, %v1809_v44  ;;  %4389 = vmatprep.subr.bf16.mxu1 %v7699_v11  ;;  %v2330_v32 = vcombine.high %v2266_v63, %v2266_v63 }
 0x169   : > { %4368 = vmatpush3.bf16.msra.mxu0 %v7700_v26  ;;  %v7731_v26 = vld [vmem:[#allocation71_spill] sm:$0xff] }
 0x16a   : > { %4390 = vmatpush3.bf16.msra.mxu1 %v7701_v28  ;;  %4397 = vmatprep.subr.bf16.mxu0 %v7702_v62  ;;  %v6741_v28 = vrot.slane %v2266_v63, %v6587_v51  ;;  %v7732_v62 = vld [vmem:[#allocation72_spill] sm:$0xff] }
 0x16b   : > { %4419 = vmatprep.subr.bf16.mxu1 %v7703_v29  ;;  %v7733_v29 = vld [vmem:[#allocation73_spill] sm:$0xff] }
 0x16c   : > { %2560 = vmatmul.mubr.bf16.vlgmr.msra.gmra.mrb[36].mxu0 %v6647_v8  ;;  %v7710_v8 = vld [vmem:[#allocation50_spill] sm:$0xff] }
 0x16d   : > { %2600 = vmatmul.mubr.bf16.vlgmr.msra.gmra.mrb[36].mxu1 %v6650_v10  ;;  %4398 = vmatpush3.bf16.msra.mxu0 %v7704_v46  ;;  %v7713_v10 = vld [vmem:[#allocation53_spill] sm:$0xff] }
 0x16e   : > { %4420 = vmatpush3.bf16.msra.mxu1 %v7705_v47  ;;  %4399 = vmatprep.subr.bf16.mxu0 %v7706_v52  ;;  %v7736_v47 = vld [vmem:[#allocation76_spill] sm:$0xff]  ;;  %v7737_v52 = vld [vmem:[#allocation77_spill] sm:$0xff] }
 0x16f   : > { %4421 = vmatprep.subr.bf16.mxu1 %v7707_v61  ;;  %2639 = vmatprep.mubr.bf16.mxu0 %v2328_v35  ;;  %v7735_v35 = vld [vmem:[#allocation75_spill] sm:$0xff]  ;;  %v7738_v61 = vld [vmem:[#allocation78_spill] sm:$0xff] }
 0x170   : > { %2679 = vmatprep.mubr.bf16.mxu1 %v2329_v43  ;;  %v2345_v43 = vcombine.high %v6741_v28, %v6741_v28 }
 0x171   : > { %4400 = vmatpush3.bf16.msra.mxu0 %v7708_v48  ;;  %v7739_v48 = vld [vmem:[#allocation79_spill] sm:$0xff] }
 0x172   : > { %4422 = vmatpush3.bf16.msra.mxu1 %v7709_v41  ;;  %4401 = vmatprep.subr.bf16.mxu0 %v7710_v8  ;;  %v7740_v41 = vld [vmem:[#allocation80_spill] sm:$0xff]  ;;  %v7741_v8 = vld [vmem:[#allocation81_spill] sm:$0xff] }
 0x173   : > { %4423 = vmatprep.subr.bf16.mxu1 %v7711_v42  ;;  %v7743_v42 = vld [vmem:[#allocation83_spill] sm:$0xff] }
 0x175   : > { %4402 = vmatpush3.bf16.msra.mxu0 %v7712_v30  ;;  %v7744_v30 = vld [vmem:[#allocation84_spill] sm:$0xff] }
 0x176   : > { %4424 = vmatpush3.bf16.msra.mxu1 %v7713_v10  ;;  %4403 = vmatprep.subr.bf16.mxu0 %v7714_v39  ;;  %v7746_v10 = vld [vmem:[#allocation86_spill] sm:$0xff]  ;;  %v7747_v39 = vld [vmem:[#allocation87_spill] sm:$0xff] }
 0x177   : > { %4425 = vmatprep.subr.bf16.mxu1 %v7715_v54  ;;  %v7748_v54 = vld [vmem:[#allocation88_spill] sm:$0xff] }
 0x179   : > { %4404 = vmatpush3.bf16.msra.mxu0 %v7716_v1  ;;  %v7749_v1 = vld [vmem:[#allocation89_spill] sm:$0xff] }
 0x17a   : > { %4426 = vmatpush3.bf16.msra.mxu1 %v7717_v20  ;;  %4405 = vmatprep.subr.bf16.mxu0 %v7718_v60  ;;  %v7750_v20 = vld [vmem:[#allocation90_spill] sm:$0xff]  ;;  %v7751_v60 = vld [vmem:[#allocation91_spill] sm:$0xff] }
 0x17b   : > { %4427 = vmatprep.subr.bf16.mxu1 %v7719_v24  ;;  %v7752_v24 = vld [vmem:[#allocation92_spill] sm:$0xff] }
 0x17d   : > { %4406 = vmatpush3.bf16.msra.mxu0 %v7720_v7  ;;  %v7753_v7 = vld [vmem:[#allocation93_spill] sm:$0xff] }
 0x17e   : > { %4428 = vmatpush3.bf16.msra.mxu1 %v7721_v6  ;;  %4407 = vmatprep.subr.bf16.mxu0 %v7722_v16  ;;  %v7754_v6 = vld [vmem:[#allocation94_spill] sm:$0xff] }
 0x17f   : > { %v4105_v55 = vpop.f32.mrb[12].mxu0  ;;  %4429 = vmatprep.subr.bf16.mxu1 %v7723_v4 }
 0x180   : > { %v4127_v0 = vpop.f32.mrb[12].mxu1  ;;  %v4106_v25 = vpop.f32.mrb[13].mxu0 }
 0x181   : > { %v4107_v21 = vadd.f32 %v4106_v25, %v4105_v55  ;;  %v4128_v38 = vpop.f32.mrb[13].mxu1  ;;  %v4108_v5 = vpop.f32.mrb[14].mxu0  ;;  %4408 = vmatpush3.bf16.msra.mxu0 %v7724_v50  ;;  %v7755_v55 = vld [vmem:[#allocation95_spill] sm:$0xff] }
 0x182   : > { %v4129_v3 = vadd.f32 %v4128_v38, %v4127_v0  ;;  %v4130_v34 = vpop.f32.mrb[14].mxu1  ;;  %4430 = vmatpush3.bf16.msra.mxu1 %v7725_v9  ;;  %v4109_v13 = vpop.f32.mrb[15].mxu0  ;;  %4409 = vmatprep.subr.bf16.mxu0 %v7726_v14  ;;  %v2267_v50 = vld [vmem:[%s7667_s25 + $0x20] sm:$0xff] }
 0x183   : > { %v1888_v18 = vadd.f32 %v4107_v21, %v1847_v40  ;;  %v4110_v22 = vadd.f32 %v4109_v13, %v4108_v5  ;;  %v4131_v23 = vpop.f32.mrb[15].mxu1  ;;  %4431 = vmatprep.subr.bf16.mxu1 %v7727_v27  ;;  %v6744_v40 = vrot.slane %v2330_v32, %v6587_v51  ;;  %v7756_v5 = vld [vmem:[#allocation96_spill] sm:$0xff]  ;;  %v7758_v13 = vld [vmem:[#allocation98_spill] sm:$0xff] }
 0x184   : > { %v4132_v31 = vadd.f32 %v4131_v23, %v4130_v34  ;;  %v7757_v34 = vld [vmem:[#allocation97_spill] sm:$0xff]  ;;  %v7759_v23 = vld [vmem:[#allocation99_spill] sm:$0xff] }
 0x185   : > { %v1929_v36 = vadd.f32 %v4129_v3, %v1888_v18  ;;  %v1891_v44 = vadd.f32 %v4110_v22, %v1850_v58  ;;  %4410 = vmatpush3.bf16.msra.mxu0 %v7728_v45  ;;  %v7734_v58 = vld [vmem:[#allocation74_spill] sm:$0xff]  ;;  %v2346_v46 = vcombine.high %v6744_v40, %v6744_v40  ;;  %v7760_v45 = vld [vmem:[#allocation100_spill] sm:$0xff] }
 0x186   : > { %4432 = vmatpush3.bf16.msra.mxu1 %v7729_v49  ;;  %4411 = vmatprep.subr.bf16.mxu0 %v7730_v56  ;;  %v7761_v49 = vld [vmem:[#allocation101_spill] sm:$0xff]  ;;  %v7762_v56 = vld [vmem:[#allocation102_spill] sm:$0xff] }
 0x187   : > { %v1932_v11 = vadd.f32 %v4132_v31, %v1891_v44  ;;  %4433 = vmatprep.subr.bf16.mxu1 %v7731_v26  ;;  %v2347_v31 = vcombine.high %v2267_v50, %v2267_v50 }
 0x189   : > { %4412 = vmatpush3.bf16.msra.mxu0 %v7732_v62  ;;  %v7763_v62 = vld [vmem:[#allocation103_spill] sm:$0xff] }
 0x18a   : > { %4434 = vmatpush3.bf16.msra.mxu1 %v7733_v29  ;;  %4441 = vmatprep.subr.bf16.mxu0 %v7734_v58  ;;  %v6788_v29 = vrot.slane %v2267_v50, %v6587_v51  ;;  %v7764_v58 = vld [vmem:[#allocation104_spill] sm:$0xff] }
 0x18b   : > { %4463 = vmatprep.subr.bf16.mxu1 %v7735_v35  ;;  %v7765_v35 = vld [vmem:[#allocation105_spill] sm:$0xff] }
 0x18c   : > { %2640 = vmatmul.mubr.bf16.vlgmr.msra.gmra.mrb[40].mxu0 %v6694_v17  ;;  %v7742_v17 = vld [vmem:[#allocation82_spill] sm:$0xff] }
 0x18d   : > { %2680 = vmatmul.mubr.bf16.vlgmr.msra.gmra.mrb[40].mxu1 %v6697_v57  ;;  %4442 = vmatpush3.bf16.msra.mxu0 %v7736_v47  ;;  %v7745_v57 = vld [vmem:[#allocation85_spill] sm:$0xff] }
 0x18e   : > { %4464 = vmatpush3.bf16.msra.mxu1 %v7737_v52  ;;  %4443 = vmatprep.subr.bf16.mxu0 %v7738_v61  ;;  %v7768_v52 = vld [vmem:[#allocation108_spill] sm:$0xff]  ;;  %v7769_v61 = vld [vmem:[#allocation109_spill] sm:$0xff] }
 0x18f   : > { %4465 = vmatprep.subr.bf16.mxu1 %v7739_v48  ;;  %2719 = vmatprep.mubr.bf16.mxu0 %v2345_v43  ;;  %v7767_v43 = vld [vmem:[#allocation107_spill] sm:$0xff]  ;;  %v7770_v48 = vld [vmem:[#allocation110_spill] sm:$0xff] }
 0x190   : > { %2759 = vmatprep.mubr.bf16.mxu1 %v2346_v46  ;;  %v2362_v46 = vcombine.high %v6788_v29, %v6788_v29 }
 0x191   : > { %4444 = vmatpush3.bf16.msra.mxu0 %v7740_v41  ;;  %v7771_v41 = vld [vmem:[#allocation111_spill] sm:$0xff] }
 0x192   : > { %4466 = vmatpush3.bf16.msra.mxu1 %v7741_v8  ;;  %4445 = vmatprep.subr.bf16.mxu0 %v7742_v17  ;;  %v7772_v8 = vld [vmem:[#allocation112_spill] sm:$0xff]  ;;  %v7773_v17 = vld [vmem:[#allocation113_spill] sm:$0xff] }
 0x193   : > { %4467 = vmatprep.subr.bf16.mxu1 %v7743_v42  ;;  %v7775_v42 = vld [vmem:[#allocation115_spill] sm:$0xff] }
 0x195   : > { %4446 = vmatpush3.bf16.msra.mxu0 %v7744_v30  ;;  %v7776_v30 = vld [vmem:[#allocation116_spill] sm:$0xff] }
 0x196   : > { %4468 = vmatpush3.bf16.msra.mxu1 %v7745_v57  ;;  %4447 = vmatprep.subr.bf16.mxu0 %v7746_v10  ;;  %v7778_v57 = vld [vmem:[#allocation118_spill] sm:$0xff]  ;;  %v7779_v10 = vld [vmem:[#allocation119_spill] sm:$0xff] }
 0x197   : > { %4469 = vmatprep.subr.bf16.mxu1 %v7747_v39  ;;  %v7780_v39 = vld [vmem:[#allocation120_spill] sm:$0xff] }
 0x199   : > { %4448 = vmatpush3.bf16.msra.mxu0 %v7748_v54  ;;  %v7781_v54 = vld [vmem:[#allocation121_spill] sm:$0xff] }
 0x19a   : > { %4470 = vmatpush3.bf16.msra.mxu1 %v7749_v1  ;;  %4449 = vmatprep.subr.bf16.mxu0 %v7750_v20  ;;  %v7782_v1 = vld [vmem:[#allocation122_spill] sm:$0xff]  ;;  %v7783_v20 = vld [vmem:[#allocation123_spill] sm:$0xff] }
 0x19b   : > { %4471 = vmatprep.subr.bf16.mxu1 %v7751_v60  ;;  %v7784_v60 = vld [vmem:[#allocation124_spill] sm:$0xff] }
 0x19d   : > { %4450 = vmatpush3.bf16.msra.mxu0 %v7752_v24  ;;  %v7785_v24 = vld [vmem:[#allocation125_spill] sm:$0xff] }
 0x19e   : > { %4472 = vmatpush3.bf16.msra.mxu1 %v7753_v7  ;;  %4451 = vmatprep.subr.bf16.mxu0 %v7754_v6  ;;  %v7786_v7 = vld [vmem:[#allocation126_spill] sm:$0xff] }
 0x19f   : > { %v4149_v16 = vpop.f32.mrb[16].mxu0  ;;  %4473 = vmatprep.subr.bf16.mxu1 %v7755_v55 }
 0x1a0   : > { %v4171_v4 = vpop.f32.mrb[16].mxu1  ;;  %v4150_v0 = vpop.f32.mrb[17].mxu0 }
 0x1a1   : > { %v4151_v25 = vadd.f32 %v4150_v0, %v4149_v16  ;;  %v4172_v21 = vpop.f32.mrb[17].mxu1  ;;  %v4152_v38 = vpop.f32.mrb[18].mxu0  ;;  %4452 = vmatpush3.bf16.msra.mxu0 %v7756_v5  ;;  %v7787_v16 = vld [vmem:[#allocation127_spill] sm:$0xff]  ;;  %v2268_v5 = vld [vmem:[%s7667_s25 + $0x28] sm:$0xff] }
 0x1a2   : > { %v4173_v63 = vadd.f32 %v4172_v21, %v4171_v4  ;;  %v4174_v3 = vpop.f32.mrb[18].mxu1  ;;  %4474 = vmatpush3.bf16.msra.mxu1 %v7757_v34  ;;  %v4153_v9 = vpop.f32.mrb[19].mxu0  ;;  %4453 = vmatprep.subr.bf16.mxu0 %v7758_v13 }
 0x1a3   : > { %v1970_v14 = vadd.f32 %v4151_v25, %v1929_v36  ;;  %v4154_v18 = vadd.f32 %v4153_v9, %v4152_v38  ;;  %v4175_v22 = vpop.f32.mrb[19].mxu1  ;;  %4475 = vmatprep.subr.bf16.mxu1 %v7759_v23  ;;  %v6791_v36 = vrot.slane %v2347_v31, %v6587_v51  ;;  %v7788_v38 = vld [vmem:[#allocation128_spill] sm:$0xff]  ;;  %v7790_v9 = vld [vmem:[#allocation130_spill] sm:$0xff] }
 0x1a4   : > { %v4176_v27 = vadd.f32 %v4175_v22, %v4174_v3  ;;  %v7789_v3 = vld [vmem:[#allocation129_spill] sm:$0xff]  ;;  %v7791_v22 = vld [vmem:[#allocation131_spill] sm:$0xff] }
 0x1a5   : > { %v2011_v32 = vadd.f32 %v4173_v63, %v1970_v14  ;;  %v1973_v44 = vadd.f32 %v4154_v18, %v1932_v11  ;;  %4454 = vmatpush3.bf16.msra.mxu0 %v7760_v45  ;;  %v7766_v11 = vld [vmem:[#allocation106_spill] sm:$0xff]  ;;  %v2363_v47 = vcombine.high %v6791_v36, %v6791_v36  ;;  %v7792_v45 = vld [vmem:[#allocation132_spill] sm:$0xff] }
 0x1a6   : > { %4476 = vmatpush3.bf16.msra.mxu1 %v7761_v49  ;;  %4455 = vmatprep.subr.bf16.mxu0 %v7762_v56  ;;  %v7793_v49 = vld [vmem:[#allocation133_spill] sm:$0xff]  ;;  %v7794_v56 = vld [vmem:[#allocation134_spill] sm:$0xff] }
 0x1a7   : > { %v2014_v26 = vadd.f32 %v4176_v27, %v1973_v44  ;;  %4477 = vmatprep.subr.bf16.mxu1 %v7763_v62  ;;  %v2364_v27 = vcombine.high %v2268_v5, %v2268_v5 }
 0x1a9   : > { %4456 = vmatpush3.bf16.msra.mxu0 %v7764_v58  ;;  %v7795_v58 = vld [vmem:[#allocation135_spill] sm:$0xff] }
 0x1aa   : > { %4478 = vmatpush3.bf16.msra.mxu1 %v7765_v35  ;;  %4485 = vmatprep.subr.bf16.mxu0 %v7766_v11  ;;  %v6835_v35 = vrot.slane %v2268_v5, %v6587_v51  ;;  %v7796_v11 = vld [vmem:[#allocation136_spill] sm:$0xff] }
 0x1ab   : > { %4507 = vmatprep.subr.bf16.mxu1 %v7767_v43  ;;  %v7797_v43 = vld [vmem:[#allocation137_spill] sm:$0xff] }
 0x1ac   : > { %2720 = vmatmul.mubr.bf16.vlgmr.msra.gmra.mrb[44].mxu0 %v6741_v28  ;;  %v7774_v28 = vld [vmem:[#allocation114_spill] sm:$0xff] }
 0x1ad   : > { %2760 = vmatmul.mubr.bf16.vlgmr.msra.gmra.mrb[44].mxu1 %v6744_v40  ;;  %4486 = vmatpush3.bf16.msra.mxu0 %v7768_v52  ;;  %v7777_v40 = vld [vmem:[#allocation117_spill] sm:$0xff] }
 0x1ae   : > { %4508 = vmatpush3.bf16.msra.mxu1 %v7769_v61  ;;  %4487 = vmatprep.subr.bf16.mxu0 %v7770_v48  ;;  %v7800_v61 = vld [vmem:[#allocation140_spill] sm:$0xff]  ;;  %v7801_v48 = vld [vmem:[#allocation141_spill] sm:$0xff] }
 0x1af   : > { %4509 = vmatprep.subr.bf16.mxu1 %v7771_v41  ;;  %2799 = vmatprep.mubr.bf16.mxu0 %v2362_v46  ;;  %v7799_v46 = vld [vmem:[#allocation139_spill] sm:$0xff]  ;;  %v7802_v41 = vld [vmem:[#allocation142_spill] sm:$0xff] }
 0x1b0   : > { %2839 = vmatprep.mubr.bf16.mxu1 %v2363_v47  ;;  %v2379_v47 = vcombine.high %v6835_v35, %v6835_v35 }
 0x1b1   : > { %4488 = vmatpush3.bf16.msra.mxu0 %v7772_v8  ;;  %v7803_v8 = vld [vmem:[#allocation143_spill] sm:$0xff] }
 0x1b2   : > { %4510 = vmatpush3.bf16.msra.mxu1 %v7773_v17  ;;  %4489 = vmatprep.subr.bf16.mxu0 %v7774_v28  ;;  %v7804_v17 = vld [vmem:[#allocation144_spill] sm:$0xff]  ;;  %v7805_v28 = vld [vmem:[#allocation145_spill] sm:$0xff] }
 0x1b3   : > { %4511 = vmatprep.subr.bf16.mxu1 %v7775_v42  ;;  %v7807_v42 = vld [vmem:[#allocation147_spill] sm:$0xff] }
 0x1b5   : > { %4490 = vmatpush3.bf16.msra.mxu0 %v7776_v30  ;;  %v7808_v30 = vld [vmem:[#allocation148_spill] sm:$0xff] }
 0x1b6   : > { %4512 = vmatpush3.bf16.msra.mxu1 %v7777_v40  ;;  %4491 = vmatprep.subr.bf16.mxu0 %v7778_v57  ;;  %v7810_v40 = vld [vmem:[#allocation150_spill] sm:$0xff]  ;;  %v7811_v57 = vld [vmem:[#allocation151_spill] sm:$0xff] }
 0x1b7   : > { %4513 = vmatprep.subr.bf16.mxu1 %v7779_v10  ;;  %v7812_v10 = vld [vmem:[#allocation152_spill] sm:$0xff] }
 0x1b9   : > { %4492 = vmatpush3.bf16.msra.mxu0 %v7780_v39  ;;  %v7813_v39 = vld [vmem:[#allocation153_spill] sm:$0xff] }
 0x1ba   : > { %4514 = vmatpush3.bf16.msra.mxu1 %v7781_v54  ;;  %4493 = vmatprep.subr.bf16.mxu0 %v7782_v1  ;;  %v7814_v54 = vld [vmem:[#allocation154_spill] sm:$0xff]  ;;  %v7815_v1 = vld [vmem:[#allocation155_spill] sm:$0xff] }
 0x1bb   : > { %4515 = vmatprep.subr.bf16.mxu1 %v7783_v20  ;;  %v7816_v20 = vld [vmem:[#allocation156_spill] sm:$0xff] }
 0x1bd   : > { %4494 = vmatpush3.bf16.msra.mxu0 %v7784_v60  ;;  %v7817_v60 = vld [vmem:[#allocation157_spill] sm:$0xff] }
 0x1be   : > { %4516 = vmatpush3.bf16.msra.mxu1 %v7785_v24  ;;  %4495 = vmatprep.subr.bf16.mxu0 %v7786_v7  ;;  %v7818_v24 = vld [vmem:[#allocation158_spill] sm:$0xff] }
 0x1bf   : > { %v4193_v6 = vpop.f32.mrb[20].mxu0  ;;  %4517 = vmatprep.subr.bf16.mxu1 %v7787_v16 }
 0x1c0   : > { %v4215_v55 = vpop.f32.mrb[20].mxu1  ;;  %v4194_v4 = vpop.f32.mrb[21].mxu0 }
 0x1c1   : > { %v4195_v0 = vadd.f32 %v4194_v4, %v4193_v6  ;;  %v4216_v25 = vpop.f32.mrb[21].mxu1  ;;  %v4196_v21 = vpop.f32.mrb[22].mxu0  ;;  %4496 = vmatpush3.bf16.msra.mxu0 %v7788_v38  ;;  %v7819_v6 = vld [vmem:[#allocation159_spill] sm:$0xff]  ;;  %v2269_v38 = vld [vmem:[%s7667_s25 + $0x30] sm:$0xff] }
 0x1c2   : > { %v4217_v50 = vadd.f32 %v4216_v25, %v4215_v55  ;;  %v4218_v63 = vpop.f32.mrb[22].mxu1  ;;  %4518 = vmatpush3.bf16.msra.mxu1 %v7789_v3  ;;  %v4197_v34 = vpop.f32.mrb[23].mxu0  ;;  %4497 = vmatprep.subr.bf16.mxu0 %v7790_v9 }
 0x1c3   : > { %v2052_v13 = vadd.f32 %v4195_v0, %v2011_v32  ;;  %v4198_v14 = vadd.f32 %v4197_v34, %v4196_v21  ;;  %v4219_v18 = vpop.f32.mrb[23].mxu1  ;;  %4519 = vmatprep.subr.bf16.mxu1 %v7791_v22  ;;  %v6838_v32 = vrot.slane %v2364_v27, %v6587_v51  ;;  %v7820_v21 = vld [vmem:[#allocation160_spill] sm:$0xff]  ;;  %v7822_v34 = vld [vmem:[#allocation162_spill] sm:$0xff] }
 0x1c4   : > { %v4220_v23 = vadd.f32 %v4219_v18, %v4218_v63  ;;  %v7821_v63 = vld [vmem:[#allocation161_spill] sm:$0xff]  ;;  %v7823_v18 = vld [vmem:[#allocation163_spill] sm:$0xff] }
 0x1c5   : > { %v2093_v31 = vadd.f32 %v4217_v50, %v2052_v13  ;;  %v2055_v44 = vadd.f32 %v4198_v14, %v2014_v26  ;;  %4498 = vmatpush3.bf16.msra.mxu0 %v7792_v45  ;;  %v7798_v26 = vld [vmem:[#allocation138_spill] sm:$0xff]  ;;  %v2380_v52 = vcombine.high %v6838_v32, %v6838_v32  ;;  %v7824_v45 = vld [vmem:[#allocation164_spill] sm:$0xff] }
 0x1c6   : > { %4520 = vmatpush3.bf16.msra.mxu1 %v7793_v49  ;;  %4499 = vmatprep.subr.bf16.mxu0 %v7794_v56  ;;  %v7825_v49 = vld [vmem:[#allocation165_spill] sm:$0xff]  ;;  %v7826_v56 = vld [vmem:[#allocation166_spill] sm:$0xff] }
 0x1c7   : > { %v2096_v62 = vadd.f32 %v4220_v23, %v2055_v44  ;;  %4521 = vmatprep.subr.bf16.mxu1 %v7795_v58  ;;  %v2381_v23 = vcombine.high %v2269_v38, %v2269_v38 }
 0x1c9   : > { %4500 = vmatpush3.bf16.msra.mxu0 %v7796_v11  ;;  %v7827_v11 = vld [vmem:[#allocation167_spill] sm:$0xff] }
 0x1ca   : > { %4522 = vmatpush3.bf16.msra.mxu1 %v7797_v43  ;;  %4529 = vmatprep.subr.bf16.mxu0 %v7798_v26  ;;  %v6882_v43 = vrot.slane %v2269_v38, %v6587_v51  ;;  %v7828_v26 = vld [vmem:[#allocation168_spill] sm:$0xff] }
 0x1cb   : > { %4551 = vmatprep.subr.bf16.mxu1 %v7799_v46  ;;  %v7829_v46 = vld [vmem:[#allocation169_spill] sm:$0xff] }
 0x1cc   : > { %2800 = vmatmul.mubr.bf16.vlgmr.msra.gmra.mrb[48].mxu0 %v6788_v29  ;;  %v7806_v29 = vld [vmem:[#allocation146_spill] sm:$0xff] }
 0x1cd   : > { %2840 = vmatmul.mubr.bf16.vlgmr.msra.gmra.mrb[48].mxu1 %v6791_v36  ;;  %4530 = vmatpush3.bf16.msra.mxu0 %v7800_v61  ;;  %v7809_v36 = vld [vmem:[#allocation149_spill] sm:$0xff] }
 0x1ce   : > { %4552 = vmatpush3.bf16.msra.mxu1 %v7801_v48  ;;  %4531 = vmatprep.subr.bf16.mxu0 %v7802_v41  ;;  %v7832_v48 = vld [vmem:[#allocation172_spill] sm:$0xff]  ;;  %v7833_v41 = vld [vmem:[#allocation173_spill] sm:$0xff] }
 0x1cf   : > { %4553 = vmatprep.subr.bf16.mxu1 %v7803_v8  ;;  %2879 = vmatprep.mubr.bf16.mxu0 %v2379_v47  ;;  %v7831_v47 = vld [vmem:[#allocation171_spill] sm:$0xff]  ;;  %v7834_v8 = vld [vmem:[#allocation174_spill] sm:$0xff] }
 0x1d0   : > { %2919 = vmatprep.mubr.bf16.mxu1 %v2380_v52  ;;  %v2396_v52 = vcombine.high %v6882_v43, %v6882_v43 }
 0x1d1   : > { %4532 = vmatpush3.bf16.msra.mxu0 %v7804_v17  ;;  %v7835_v17 = vld [vmem:[#allocation175_spill] sm:$0xff] }
 0x1d2   : > { %4554 = vmatpush3.bf16.msra.mxu1 %v7805_v28  ;;  %4533 = vmatprep.subr.bf16.mxu0 %v7806_v29  ;;  %v7836_v28 = vld [vmem:[#allocation176_spill] sm:$0xff]  ;;  %v7837_v29 = vld [vmem:[#allocation177_spill] sm:$0xff] }
 0x1d3   : > { %4555 = vmatprep.subr.bf16.mxu1 %v7807_v42  ;;  %v7839_v42 = vld [vmem:[#allocation179_spill] sm:$0xff] }
 0x1d5   : > { %4534 = vmatpush3.bf16.msra.mxu0 %v7808_v30  ;;  %v7840_v30 = vld [vmem:[#allocation180_spill] sm:$0xff] }
 0x1d6   : > { %4556 = vmatpush3.bf16.msra.mxu1 %v7809_v36  ;;  %4535 = vmatprep.subr.bf16.mxu0 %v7810_v40  ;;  %v7842_v36 = vld [vmem:[#allocation182_spill] sm:$0xff]  ;;  %v7843_v40 = vld [vmem:[#allocation183_spill] sm:$0xff] }
 0x1d7   : > { %4557 = vmatprep.subr.bf16.mxu1 %v7811_v57  ;;  %v7844_v57 = vld [vmem:[#allocation184_spill] sm:$0xff] }
 0x1d9   : > { %4536 = vmatpush3.bf16.msra.mxu0 %v7812_v10  ;;  %v7845_v10 = vld [vmem:[#allocation185_spill] sm:$0xff] }
 0x1da   : > { %4558 = vmatpush3.bf16.msra.mxu1 %v7813_v39  ;;  %4537 = vmatprep.subr.bf16.mxu0 %v7814_v54  ;;  %v7846_v39 = vld [vmem:[#allocation186_spill] sm:$0xff]  ;;  %v7847_v54 = vld [vmem:[#allocation187_spill] sm:$0xff] }
 0x1db   : > { %4559 = vmatprep.subr.bf16.mxu1 %v7815_v1  ;;  %v7848_v1 = vld [vmem:[#allocation188_spill] sm:$0xff] }
 0x1dd   : > { %4538 = vmatpush3.bf16.msra.mxu0 %v7816_v20  ;;  %v7849_v20 = vld [vmem:[#allocation189_spill] sm:$0xff] }
 0x1de   : > { %4560 = vmatpush3.bf16.msra.mxu1 %v7817_v60  ;;  %4539 = vmatprep.subr.bf16.mxu0 %v7818_v24  ;;  %v7850_v60 = vld [vmem:[#allocation190_spill] sm:$0xff] }
 0x1df   : > { %v4237_v7 = vpop.f32.mrb[24].mxu0  ;;  %4561 = vmatprep.subr.bf16.mxu1 %v7819_v6 }
 0x1e0   : > { %v4259_v16 = vpop.f32.mrb[24].mxu1  ;;  %v4238_v55 = vpop.f32.mrb[25].mxu0 }
 0x1e1   : > { %v4239_v4 = vadd.f32 %v4238_v55, %v4237_v7  ;;  %v4260_v0 = vpop.f32.mrb[25].mxu1  ;;  %v4240_v25 = vpop.f32.mrb[26].mxu0  ;;  %4540 = vmatpush3.bf16.msra.mxu0 %v7820_v21  ;;  %v7851_v7 = vld [vmem:[#allocation191_spill] sm:$0xff] }
 0x1e2   : > { %v4261_v5 = vadd.f32 %v4260_v0, %v4259_v16  ;;  %v4262_v50 = vpop.f32.mrb[26].mxu1  ;;  %4562 = vmatpush3.bf16.msra.mxu1 %v7821_v63  ;;  %v4241_v3 = vpop.f32.mrb[27].mxu0  ;;  %4541 = vmatprep.subr.bf16.mxu0 %v7822_v34  ;;  %v2270_v21 = vld [vmem:[%s7667_s25 + $0x38] sm:$0xff] }
 0x1e3   : > { %v2134_v9 = vadd.f32 %v4239_v4, %v2093_v31  ;;  %v4242_v13 = vadd.f32 %v4241_v3, %v4240_v25  ;;  %v4263_v14 = vpop.f32.mrb[27].mxu1  ;;  %4563 = vmatprep.subr.bf16.mxu1 %v7823_v18  ;;  %v6885_v31 = vrot.slane %v2381_v23, %v6587_v51  ;;  %v7852_v25 = vld [vmem:[#allocation192_spill] sm:$0xff]  ;;  %v7854_v3 = vld [vmem:[#allocation194_spill] sm:$0xff] }
 0x1e4   : > { %v4264_v22 = vadd.f32 %v4263_v14, %v4262_v50  ;;  %v7853_v50 = vld [vmem:[#allocation193_spill] sm:$0xff]  ;;  %v7855_v14 = vld [vmem:[#allocation195_spill] sm:$0xff] }
 0x1e5   : > { %v2175_v27 = vadd.f32 %v4261_v5, %v2134_v9  ;;  %v2137_v44 = vadd.f32 %v4242_v13, %v2096_v62  ;;  %4542 = vmatpush3.bf16.msra.mxu0 %v7824_v45  ;;  %v7830_v62 = vld [vmem:[#allocation170_spill] sm:$0xff]  ;;  %v2397_v61 = vcombine.high %v6885_v31, %v6885_v31  ;;  %v7856_v45 = vld [vmem:[#allocation196_spill] sm:$0xff] }
 0x1e6   : > { %4564 = vmatpush3.bf16.msra.mxu1 %v7825_v49  ;;  %4543 = vmatprep.subr.bf16.mxu0 %v7826_v56  ;;  %v7857_v49 = vld [vmem:[#allocation197_spill] sm:$0xff]  ;;  %v7858_v56 = vld [vmem:[#allocation198_spill] sm:$0xff] }
 0x1e7   : > { %v2178_v58 = vadd.f32 %v4264_v22, %v2137_v44  ;;  %4565 = vmatprep.subr.bf16.mxu1 %v7827_v11  ;;  %v2398_v22 = vcombine.high %v2270_v21, %v2270_v21 }
 0x1e9   : > { %4544 = vmatpush3.bf16.msra.mxu0 %v7828_v26  ;;  %v7859_v26 = vld [vmem:[#allocation199_spill] sm:$0xff] }
 0x1ea   : > { %4566 = vmatpush3.bf16.msra.mxu1 %v7829_v46  ;;  %4573 = vmatprep.subr.bf16.mxu0 %v7830_v62  ;;  %v6936_v46 = vrot.slane %v2398_v22, %v6587_v51 }
 0x1eb   : > { %4595 = vmatprep.subr.bf16.mxu1 %v7831_v47  ;;  %v7861_v47 = vld [vmem:[#allocation201_spill] sm:$0xff] }
 0x1ec   : > { %2880 = vmatmul.mubr.bf16.vlgmr.msra.gmra.mrb[52].mxu0 %v6835_v35  ;;  %v7838_v35 = vld [vmem:[#allocation178_spill] sm:$0xff] }
 0x1ed   : > { %2920 = vmatmul.mubr.bf16.vlgmr.msra.gmra.mrb[52].mxu1 %v6838_v32  ;;  %4574 = vmatpush3.bf16.msra.mxu0 %v7832_v48  ;;  %v7841_v32 = vld [vmem:[#allocation181_spill] sm:$0xff] }
 0x1ee   : > { %4596 = vmatpush3.bf16.msra.mxu1 %v7833_v41  ;;  %4575 = vmatprep.subr.bf16.mxu0 %v7834_v8  ;;  %v7864_v41 = vld [vmem:[#allocation204_spill] sm:$0xff]  ;;  %v7865_v8 = vld [vmem:[#allocation205_spill] sm:$0xff] }
 0x1ef   : > { %4597 = vmatprep.subr.bf16.mxu1 %v7835_v17  ;;  %2959 = vmatprep.mubr.bf16.mxu0 %v2396_v52  ;;  %v7862_v52 = vld [vmem:[#allocation202_spill] sm:$0xff] }
 0x1f0   : > { %2999 = vmatprep.mubr.bf16.mxu1 %v2397_v61  ;;  %v7863_v61 = vld [vmem:[#allocation203_spill] sm:$0xff]  ;;  %v7866_v17 = vld [vmem:[#allocation206_spill] sm:$0xff] }
 0x1f1   : > { %4576 = vmatpush3.bf16.msra.mxu0 %v7836_v28  ;;  %v7867_v28 = vld [vmem:[#allocation207_spill] sm:$0xff] }
 0x1f2   : > { %4598 = vmatpush3.bf16.msra.mxu1 %v7837_v29  ;;  %4577 = vmatprep.subr.bf16.mxu0 %v7838_v35  ;;  %v7868_v29 = vld [vmem:[#allocation208_spill] sm:$0xff]  ;;  %v7869_v35 = vld [vmem:[#allocation209_spill] sm:$0xff] }
 0x1f3   : > { %4599 = vmatprep.subr.bf16.mxu1 %v7839_v42  ;;  %v7871_v42 = vld [vmem:[#allocation211_spill] sm:$0xff] }
 0x1f5   : > { %4578 = vmatpush3.bf16.msra.mxu0 %v7840_v30  ;;  %v7872_v30 = vld [vmem:[#allocation212_spill] sm:$0xff] }
 0x1f6   : > { %4600 = vmatpush3.bf16.msra.mxu1 %v7841_v32  ;;  %4579 = vmatprep.subr.bf16.mxu0 %v7842_v36  ;;  %v7874_v32 = vld [vmem:[#allocation214_spill] sm:$0xff]  ;;  %v7875_v36 = vld [vmem:[#allocation215_spill] sm:$0xff] }
 0x1f7   : > { %4601 = vmatprep.subr.bf16.mxu1 %v7843_v40  ;;  %v7876_v40 = vld [vmem:[#allocation216_spill] sm:$0xff] }
 0x1f9   : > { %4580 = vmatpush3.bf16.msra.mxu0 %v7844_v57  ;;  %v7877_v57 = vld [vmem:[#allocation217_spill] sm:$0xff] }
 0x1fa   : > { %4602 = vmatpush3.bf16.msra.mxu1 %v7845_v10  ;;  %4581 = vmatprep.subr.bf16.mxu0 %v7846_v39  ;;  %v7878_v10 = vld [vmem:[#allocation218_spill] sm:$0xff]  ;;  %v7879_v39 = vld [vmem:[#allocation219_spill] sm:$0xff] }
 0x1fb   : > { %4603 = vmatprep.subr.bf16.mxu1 %v7847_v54  ;;  %v7880_v54 = vld [vmem:[#allocation220_spill] sm:$0xff] }
 0x1fd   : > { %4582 = vmatpush3.bf16.msra.mxu0 %v7848_v1  ;;  %v7881_v1 = vld [vmem:[#allocation221_spill] sm:$0xff] }
 0x1fe   : > { %4604 = vmatpush3.bf16.msra.mxu1 %v7849_v20  ;;  %4583 = vmatprep.subr.bf16.mxu0 %v7850_v60  ;;  %v7882_v20 = vld [vmem:[#allocation222_spill] sm:$0xff] }
 0x1ff   : > { %v4281_v24 = vpop.f32.mrb[28].mxu0  ;;  %4605 = vmatprep.subr.bf16.mxu1 %v7851_v7 }
 0x200   : > { %v4303_v6 = vpop.f32.mrb[28].mxu1  ;;  %v4282_v16 = vpop.f32.mrb[29].mxu0 }
 0x201   : > { %v4283_v55 = vadd.f32 %v4282_v16, %v4281_v24  ;;  %v4304_v4 = vpop.f32.mrb[29].mxu1  ;;  %v4284_v0 = vpop.f32.mrb[30].mxu0  ;;  %4584 = vmatpush3.bf16.msra.mxu0 %v7852_v25  ;;  %v7883_v24 = vld [vmem:[#allocation223_spill] sm:$0xff] }
 0x202   : > { %v4305_v38 = vadd.f32 %v4304_v4, %v4303_v6  ;;  %v4306_v5 = vpop.f32.mrb[30].mxu1  ;;  %4606 = vmatpush3.bf16.msra.mxu1 %v7853_v50  ;;  %v4285_v63 = vpop.f32.mrb[31].mxu0  ;;  %4585 = vmatprep.subr.bf16.mxu0 %v7854_v3 }
 0x203   : > { %v2216_v34 = vadd.f32 %v4283_v55, %v2175_v27  ;;  %v4286_v9 = vadd.f32 %v4285_v63, %v4284_v0  ;;  %v4307_v13 = vpop.f32.mrb[31].mxu1  ;;  %4607 = vmatprep.subr.bf16.mxu1 %v7855_v14  ;;  %v6933_v27 = vrot.slane %v2270_v21, %v6587_v51  ;;  %v2414_v51 = vcombine.high %v6936_v46, %v6936_v46  ;;  %v7884_v0 = vld [vmem:[#allocation224_spill] sm:$0xff] }
 0x204   : > { %v4308_v18 = vadd.f32 %v4307_v13, %v4306_v5  ;;  %v4927_v63 = vmov 65535  }
 0x205   : > { %v6924_v23 = vadd.f32 %v4305_v38, %v2216_v34  ;;  %v2219_v44 = vadd.f32 %v4286_v9, %v2178_v58  ;;  %4586 = vmatpush3.bf16.msra.mxu0 %v7856_v45  ;;  %v7860_v58 = vld [vmem:[#allocation200_spill] sm:$0xff]  ;;  %v2413_v48 = vcombine.high %v6933_v27, %v6933_v27  ;;  %v7885_v38 = vld [vmem:[#allocation225_spill] sm:$0xff]  ;;  %v3102_v3 = vsel %vm3100_vm0, 4294967295, %v4927_v63  ;;  %v3087_v9 = vld [vmem:[%s7886_s0] sm:$0x3]  ;;  %s3885_s0 = sshll.u32 %s5108_s30, 2 }
 0x206   : > { %4608 = vmatpush3.bf16.msra.mxu1 %v7857_v49  ;;  %4587 = vmatprep.subr.bf16.mxu0 %v7858_v56  ;;  %v3103_v13 = vsel %vm3101_vm1, %v3102_v3, 0 }
 0x207   : > { %v6929_v11 = vadd.f32 %v4308_v18, %v2219_v44  ;;  %4609 = vmatprep.subr.bf16.mxu1 %v7859_v26 }
 0x209   : > { %v3088_v62 = vpack.c.bf16 %v6929_v11, %v6924_v23  ;;  %4588 = vmatpush3.bf16.msra.mxu0 %v7860_v58 }
 0x20a   : > { %4610 = vmatpush3.bf16.msra.mxu1 %v7861_v47  ;;  %4617 = vmatprep.subr.bf16.mxu0 %v7862_v52 }
 0x20b   : > { %4639 = vmatprep.subr.bf16.mxu1 %v7863_v61 }
 0x20c   : > { %2960 = vmatmul.mubr.bf16.vlgmr.msra.gmra.mrb[56].mxu0 %v6882_v43  ;;  %v7870_v43 = vld [vmem:[#allocation210_spill] sm:$0xff] }
 0x20d   : > { %3000 = vmatmul.mubr.bf16.vlgmr.msra.gmra.mrb[56].mxu1 %v6885_v31  ;;  %4618 = vmatpush3.bf16.msra.mxu0 %v7864_v41  ;;  %v7873_v31 = vld [vmem:[#allocation213_spill] sm:$0xff] }
 0x20e   : > { %4640 = vmatpush3.bf16.msra.mxu1 %v7865_v8  ;;  %4619 = vmatprep.subr.bf16.mxu0 %v7866_v17 }
 0x20f   : > { %4641 = vmatprep.subr.bf16.mxu1 %v7867_v28  ;;  %3039 = vmatprep.mubr.bf16.mxu0 %v2413_v48 }
 0x210   : > { %3079 = vmatprep.mubr.bf16.mxu1 %v2414_v51 }
 0x211   : > { %4620 = vmatpush3.bf16.msra.mxu0 %v7868_v29 }
 0x212   : > { %4642 = vmatpush3.bf16.msra.mxu1 %v7869_v35  ;;  %4621 = vmatprep.subr.bf16.mxu0 %v7870_v43 }
 0x213   : > { %4643 = vmatprep.subr.bf16.mxu1 %v7871_v42 }
 0x215   : > { %4622 = vmatpush3.bf16.msra.mxu0 %v7872_v30 }
 0x216   : > { %4644 = vmatpush3.bf16.msra.mxu1 %v7873_v31  ;;  %4623 = vmatprep.subr.bf16.mxu0 %v7874_v32  ;;  %v3150_v32 = vld [vmem:[%s7887_s6] sm:$0x3]  ;;  %s3781_s6 = sshll.u32 %s633_s28, 4  ;;  %s7150_s6 = int_to_ptr.vmem [resolvable:$true] %s3781_s6 }
 0x217   : > { %4645 = vmatprep.subr.bf16.mxu1 %v7875_v36 }
 0x219   : > { %4624 = vmatpush3.bf16.msra.mxu0 %v7876_v40  ;;  %v3163_v40 = vand.u32 %v3150_v32, %v3103_v13 }
 0x21a   : > { %4646 = vmatpush3.bf16.msra.mxu1 %v7877_v57  ;;  %4625 = vmatprep.subr.bf16.mxu0 %v7878_v10  ;;  %v4839_v57 = vld [vmem:[%s7198_s8] sm:$0xff]  }
 0x21b   : > { %4647 = vmatprep.subr.bf16.mxu1 %v7879_v39 }
 0x21d   : > { %4626 = vmatpush3.bf16.msra.mxu0 %v7880_v54 }
 0x21e   : > { %4648 = vmatpush3.bf16.msra.mxu1 %v7881_v1  ;;  %4627 = vmatprep.subr.bf16.mxu0 %v7882_v20 }
 0x21f   : > { %v4325_v60 = vpop.f32.mrb[32].mxu0  ;;  %4649 = vmatprep.subr.bf16.mxu1 %v7883_v24 }
 0x220   : > { %v4347_v7 = vpop.f32.mrb[32].mxu1  ;;  %v4326_v6 = vpop.f32.mrb[33].mxu0 }
 0x221   : > { %v4327_v16 = vadd.f32 %v4326_v6, %v4325_v60  ;;  %v4348_v55 = vpop.f32.mrb[33].mxu1  ;;  %v4328_v4 = vpop.f32.mrb[34].mxu0  ;;  %4628 = vmatpush3.bf16.msra.mxu0 %v7884_v0 }
 0x222   : > { %v4349_v25 = vadd.f32 %v4348_v55, %v4347_v7  ;;  %v4350_v21 = vpop.f32.mrb[34].mxu1  ;;  %4650 = vmatpush3.bf16.msra.mxu1 %v7885_v38  ;;  %v4329_v5 = vpop.f32.mrb[35].mxu0  ;;  %4629 = vmatprep.subr.bf16.mxu0 %v6555_v53  ;;  %v4928_v53 = vmov 0.0  }
 0x223   : > { %v4351_v50 = vpop.f32.mrb[35].mxu1  ;;  %4651 = vmatprep.subr.bf16.mxu1 %v6561_v59  ;;  %v3105_v59 = vand.u32 %v3103_v13, %v3087_v9 }
 0x224   : > { %v2522_v34 = vadd.f32 %v4349_v25, %v4327_v16 }
 0x225   : > { %4630 = vmatpush3.bf16.msra.mxu0 %v6569_v19 }
 0x226   : > { %4652 = vmatpush3.bf16.msra.mxu1 %v6576_v33  ;;  %4631 = vmatprep.subr.bf16.mxu0 %v6578_v2 }
 0x227   : > { %4653 = vmatprep.subr.bf16.mxu1 %v6583_v15 }
 0x229   : > { %4632 = vmatpush3.bf16.msra.mxu0 %v6590_v12 }
 0x22a   : > { %4654 = vmatpush3.bf16.msra.mxu1 %v6594_v37  ;;  %4697 = vmatprep.subr.bf16.mxu0 %v4928_v53 }
 0x22b   : > { %4703 = vmatprep.subr.bf16.mxu1 %v4928_v53 }
 0x22c   : > { %3040 = vmatmul.mubr.bf16.vlgmr.msra.gmra.mrb[60].mxu0 %v6933_v27 }
 0x22d   : > { %3080 = vmatmul.mubr.bf16.vlgmr.msra.gmra.mrb[60].mxu1 %v6936_v46  ;;  %4698 = vmatpush3.bf16.msra.mxu0 %v3105_v59 }
 0x22e   : > { %4699 = vmatprep.mubr.msk.bf16.mxu0 %vm4929_vm2, %v4928_v53  ;;  %4705 = vmatprep.mubr.msk.bf16.mxu1 %vm4929_vm2, %v4928_v53 }
 0x22f   : > { %4709 = vmatprep.subr.bf16.mxu0 %v4928_v53  ;;  %4704 = vmatpush3.bf16.msra.mxu1 %v3163_v40  ;;  %v3920_v40 = vld [vmem:[%s7889_s7] ss:$0 sm:$0xff]  ;;  %s645_s7 = scalar_lea.vmem %s7209_s19, %s5108_s30 }
 0x230   : > { %4715 = vmatprep.subr.bf16.mxu1 %v4928_v53 }
 0x234   : > { %4700 = vmatmul.mubr.msk.bf16.vlgmr.msra.gmra.mrb[64].mxu0 %vm3096_vm3, %v3088_v62 }
 0x235   : > { %4711 = vmatprep.mubr.msk.bf16.mxu0 %vm4929_vm2, %v4928_v53  ;;  %4710 = vmatpush3.bf16.msra.mxu0 %v4839_v57 }
 0x236   : > { %4755 = vmatprep.subr.bf16.mxu0 %v4928_v53 }
 0x23f   : > { %v4369_v15 = vpop.f32.mrb[36].mxu0 }
 0x240   : > { %v4391_v19 = vpop.f32.mrb[36].mxu1  ;;  %v4370_v33 = vpop.f32.mrb[37].mxu0 }
 0x241   : > { %v4371_v2 = vadd.f32 %v4370_v33, %v4369_v15  ;;  %v4392_v12 = vpop.f32.mrb[37].mxu1  ;;  %v4372_v37 = vpop.f32.mrb[38].mxu0 }
 0x242   : > { %v4393_v14 = vadd.f32 %v4392_v12, %v4391_v19  ;;  %v4394_v18 = vpop.f32.mrb[38].mxu1  ;;  %v4373_v22 = vpop.f32.mrb[39].mxu0 }
 0x243   : > { %v2562_v44 = vadd.f32 %v4371_v2, %v2522_v34  ;;  %v4395_v45 = vpop.f32.mrb[39].mxu1 }
 0x245   : > { %v2602_v49 = vadd.f32 %v4393_v14, %v2562_v44 }
 0x25f   : > { %v4413_v56 = vpop.f32.mrb[40].mxu0 }
 0x260   : > { %v4435_v26 = vpop.f32.mrb[40].mxu1  ;;  %v4414_v23 = vpop.f32.mrb[41].mxu0 }
 0x261   : > { %v4415_v11 = vadd.f32 %v4414_v23, %v4413_v56  ;;  %v4436_v27 = vpop.f32.mrb[41].mxu1  ;;  %v4416_v46 = vpop.f32.mrb[42].mxu0 }
 0x262   : > { %v4437_v62 = vadd.f32 %v4436_v27, %v4435_v26  ;;  %v4438_v58 = vpop.f32.mrb[42].mxu1  ;;  %v4417_v47 = vpop.f32.mrb[43].mxu0 }
 0x263   : > { %v2642_v52 = vadd.f32 %v4415_v11, %v2602_v49  ;;  %v4439_v61 = vpop.f32.mrb[43].mxu1 }
 0x265   : > { %v2682_v48 = vadd.f32 %v4437_v62, %v2642_v52 }
 0x27f   : > { %v4457_v51 = vpop.f32.mrb[44].mxu0 }
 0x280   : > { %v4479_v41 = vpop.f32.mrb[44].mxu1  ;;  %v4458_v8 = vpop.f32.mrb[45].mxu0 }
 0x281   : > { %v4459_v17 = vadd.f32 %v4458_v8, %v4457_v51  ;;  %v4480_v28 = vpop.f32.mrb[45].mxu1  ;;  %v4460_v29 = vpop.f32.mrb[46].mxu0  ;;  %v3918_v51 = vld [vmem:[%s7888_s5] ss:$0 sm:$0xff]  ;;  %s642_s5 = scalar_lea.vmem %s7208_s18, %s3885_s0  ;;  %s3953_s0 = sshll.u32 %s5057_s2, 4 }
 0x282   : > { %v4481_v35 = vadd.f32 %v4480_v28, %v4479_v41  ;;  %v4482_v43 = vpop.f32.mrb[46].mxu1  ;;  %v4461_v42 = vpop.f32.mrb[47].mxu0  ;;  %v4840_v41 = vld [vmem:[%s7200_s10] sm:$0xff]   ;;  %s4862_s2 = scalar_lea.vmem %s7150_s6, 16 }
 0x283   : > { %v2722_v30 = vadd.f32 %v4459_v17, %v2682_v48  ;;  %v4483_v31 = vpop.f32.mrb[47].mxu1  ;;  %p4863_p11 = scmp.ne.s32.totalorder %s7150_s6, %s4862_s2 }
 0x285   : > { %v2762_v36 = vadd.f32 %v4481_v35, %v2722_v30  ;;  %p4864_p12 = pnand %p4863_p11, %p5074_p5 }
 0x287   : > { %p4865_p13 = pneg %p4864_p12 }
 0x29f   : > { %v4501_v10 = vpop.f32.mrb[48].mxu0 }
 0x2a0   : > { %v4523_v39 = vpop.f32.mrb[48].mxu1  ;;  %v4502_v54 = vpop.f32.mrb[49].mxu0 }
 0x2a1   : > { %v4503_v1 = vadd.f32 %v4502_v54, %v4501_v10  ;;  %v4524_v20 = vpop.f32.mrb[49].mxu1  ;;  %v4504_v60 = vpop.f32.mrb[50].mxu0 }
 0x2a2   : > { %v4525_v24 = vadd.f32 %v4524_v20, %v4523_v39  ;;  %v4526_v7 = vpop.f32.mrb[50].mxu1  ;;  %v4505_v6 = vpop.f32.mrb[51].mxu0  ;;  %v4842_v60 = vld [vmem:[%s7202_s12] sm:$0xff]  }
 0x2a3   : > { %v2802_v16 = vadd.f32 %v4503_v1, %v2762_v36  ;;  %v4527_v55 = vpop.f32.mrb[51].mxu1  ;;  %v4841_v36 = vld [vmem:[%s7200_s10 + $0x8] sm:$0xff]   ;;  %v3922_v7 = vld [vmem:[%s7199_s9] ss:$0 sm:$0xff] }
 0x2a4   : > { %v4843_v55 = vld [vmem:[%s7202_s12 + $0x8] sm:$0xff]  }
 0x2a5   : > { %v2842_v4 = vadd.f32 %v4525_v24, %v2802_v16 }
 0x2bf   : > { %v4545_v0 = vpop.f32.mrb[52].mxu0 }
 0x2c0   : > { %v4567_v25 = vpop.f32.mrb[52].mxu1  ;;  %v4546_v21 = vpop.f32.mrb[53].mxu0 }
 0x2c1   : > { %v4547_v38 = vadd.f32 %v4546_v21, %v4545_v0  ;;  %v4568_v5 = vpop.f32.mrb[53].mxu1  ;;  %v4548_v50 = vpop.f32.mrb[54].mxu0 }
 0x2c2   : > { %v4569_v63 = vadd.f32 %v4568_v5, %v4567_v25  ;;  %v4570_v3 = vpop.f32.mrb[54].mxu1  ;;  %v4549_v34 = vpop.f32.mrb[55].mxu0  ;;  %v4844_v5 = vld [vmem:[%s7202_s12 + $0x10] sm:$0xff]   ;;  %v4845_v50 = vld [vmem:[%s7202_s12 + $0x18] sm:$0xff]  }
 0x2c3   : > { %v2882_v9 = vadd.f32 %v4547_v38, %v2842_v4  ;;  %v4571_v13 = vpop.f32.mrb[55].mxu1  ;;  %v4847_v3 = vld [vmem:[%s7203_s13 + $0x8] sm:$0xff]   ;;  %v4848_v34 = vld [vmem:[%s7203_s13 + $0x10] sm:$0xff]  }
 0x2c4   : > { %v4850_v13 = vld [vmem:[%s7203_s13 + $0x20] sm:$0xff]  }
 0x2c5   : > { %v2922_v59 = vadd.f32 %v4569_v63, %v2882_v9  ;;  %v4846_v63 = vld [vmem:[%s7203_s13] sm:$0xff]   ;;  %v4849_v9 = vld [vmem:[%s7203_s13 + $0x18] sm:$0xff]  }
 0x2df   : > { %v4589_v15 = vpop.f32.mrb[56].mxu0 }
 0x2e0   : > { %v4611_v19 = vpop.f32.mrb[56].mxu1  ;;  %v4590_v33 = vpop.f32.mrb[57].mxu0 }
 0x2e1   : > { %v4591_v2 = vadd.f32 %v4590_v33, %v4589_v15  ;;  %v4612_v12 = vpop.f32.mrb[57].mxu1  ;;  %v4592_v37 = vpop.f32.mrb[58].mxu0  ;;  %v4852_v15 = vld [vmem:[%s7203_s13 + $0x30] sm:$0xff]   ;;  %v3925_v33 = vld [vmem:[%s7201_s11] ss:$0 sm:$0xff] }
 0x2e2   : > { %v4613_v14 = vadd.f32 %v4612_v12, %v4611_v19  ;;  %v4614_v18 = vpop.f32.mrb[58].mxu1  ;;  %v4593_v22 = vpop.f32.mrb[59].mxu0  ;;  %v4853_v19 = vld [vmem:[%s7203_s13 + $0x38] sm:$0xff]  }
 0x2e3   : > { %v2962_v44 = vadd.f32 %v4591_v2, %v2922_v59  ;;  %v4615_v45 = vpop.f32.mrb[59].mxu1  ;;  %v4851_v59 = vld [vmem:[%s7203_s13 + $0x28] sm:$0xff]  }
 0x2e5   : > { %v3002_v49 = vadd.f32 %v4613_v14, %v2962_v44 }
 0x2ff   : > { %v4633_v56 = vpop.f32.mrb[60].mxu0 }
 0x300   : > { %v4655_v26 = vpop.f32.mrb[60].mxu1  ;;  %v4634_v23 = vpop.f32.mrb[61].mxu0 }
 0x301   : > { %v4635_v11 = vadd.f32 %v4634_v23, %v4633_v56  ;;  %v4656_v27 = vpop.f32.mrb[61].mxu1  ;;  %v4636_v46 = vpop.f32.mrb[62].mxu0 }
 0x302   : > { %v4657_v62 = vadd.f32 %v4656_v27, %v4655_v26  ;;  %v4658_v58 = vpop.f32.mrb[62].mxu1  ;;  %v4637_v47 = vpop.f32.mrb[63].mxu0  ;;  %v3521_v27 = vld [vmem:[%s7890_s3] sm:$0x3]  ;;  %s4866_s3 = sshll.u32 %s4930_s23, 4  ;;  %s4867_s3 = int_to_ptr.vmem [resolvable:$false] %s4866_s3 }
 0x303   : > { %v3042_v52 = vadd.f32 %v4635_v11, %v3002_v49  ;;  %v4659_v61 = vpop.f32.mrb[63].mxu1  ;;  %s4868_s30 = scalar_lea.vmem %s4867_s3, 32  ;;  %p4869_p0 = scmp.lt.s32.totalorder %s7150_s6, %s4867_s3 }
 0x304   : > { %p4870_p1 = scmp.lt.s32.totalorder %s4868_s30, %s4862_s2 }
 0x305   : > { %v3082_v48 = vadd.f32 %v4657_v62, %v3042_v52 }
 0x306   : > { %p4871_p2 = por %p4870_p1, %p4869_p0 }
 0x307   : > { %v3151_v8 = vpack.c.bf16 %v3082_v48, %v3082_v48  ;;  %v3141_v17 = vpop.f32.mrb[64].mxu0 }
 0x308   : > { %v3142_v28 = vadd.f32 %v3918_v51, %v3141_v17  ;;  %v4701_v29 = vpop.f32.mrb[65].mxu0  ;;  %p4872_p3 = pnand %p4871_p2, %p4865_p13 }
 0x309   : > { %v3144_v35 = vpop.f32.mrb[66].mxu0  ;;  %4706 = vmatmul.mubr.msk.bf16.vlgmr.msra.gmra.mrb[64].mxu1 %vm3096_vm3, %v3151_v8 }
 0x30a   : > { %v3145_v43 = vadd.f32 %v3918_v51, %v3144_v35  ;;  %v4702_v42 = vpop.f32.mrb[67].mxu0  ;;  %4716 = vmatpush3.bf16.msra.mxu1 %v4840_v41  ;;  %4719 = vmatprep.mubr.msk.bf16.mxu1 %vm4929_vm2, %v4928_v53  ;;  %v3148_v30 = vmax.f32 %v3142_v28, 0.0  ;;  %v3943_v51 = vld [vmem:[%s7204_s14] ss:$0 sm:$0xff] }
 0x30b   : > { %4717 = vmatprep.subr.bf16.mxu1 %v4928_v53 }
 0x30c   : > { %v3149_v31 = vmax.f32 %v3145_v43, 0.0 }
 0x30e   : > { %v3208_v32 = vpack.c.bf16 %v3149_v31, %v3148_v30  ;;  %4718 = vmatpush3.bf16.msra.mxu1 %v4841_v36  ;;  %v4854_v30 = vld [vmem:[%s7206_s16] sm:$0xff]   ;;  %v4856_v36 = vld [vmem:[%s7206_s16 + $0x10] sm:$0xff]  }
 0x30f   : > { %4723 = vmatprep.subr.bf16.mxu1 %v4928_v53 }
 0x310   : > { %4712 = vmatmul.mubr.msk.bf16.vlgmr.msra.gmra.mrb[68].mxu0 %vm3222_vm4, %v3208_v32  ;;  %v4855_v32 = vld [vmem:[%s7206_s16 + $0x8] sm:$0xff]  }
 0x311   : > { %4757 = vmatprep.mubr.msk.bf16.mxu0 %vm4929_vm2, %v4928_v53 }
 0x3dc   : > { %v3199_v57 = vpop.f32.mrb[64].mxu1 }
 0x3dd   : > { %v3200_v10 = vadd.f32 %v3920_v40, %v3199_v57  ;;  %v4707_v39 = vpop.f32.mrb[65].mxu1  ;;  %v4857_v40 = vld [vmem:[%s7206_s16 + $0x18] sm:$0xff]   ;;  %v4858_v57 = vld [vmem:[%s7206_s16 + $0x20] sm:$0xff]  }
 0x3de   : > { %v3202_v54 = vpop.f32.mrb[66].mxu1  ;;  %v4860_v39 = vld [vmem:[%s7206_s16 + $0x30] sm:$0xff]  }
 0x3df   : > { %v3205_v1 = vmax.f32 %v3200_v10, 0.0  ;;  %v4708_v20 = vpop.f32.mrb[67].mxu1  ;;  %v4859_v10 = vld [vmem:[%s7206_s16 + $0x28] sm:$0xff]   ;;  %v4861_v54 = vld [vmem:[%s7206_s16 + $0x38] sm:$0xff]  }
 0x3e1   : > { %v3271_v24 = vpack.c.bf16 %v3205_v1, %v3205_v1  ;;  %v3581_v1 = vld [vmem:[%s7205_s15] sm:$0x1] }
 0x3e3   : > { %v3260_v6 = vpop.f32.mrb[68].mxu0  ;;  %4720 = vmatmul.mubr.msk.bf16.vlgmr.msra.gmra.mrb[68].mxu1 %vm3291_vm5, %v3271_v24 }
 0x3e4   : > { %4724 = vmatpush3.bf16.msra.mxu1 %v4842_v60  ;;  %v4713_v16 = vpop.f32.mrb[69].mxu0  ;;  %4731 = vmatprep.mubr.msk.bf16.mxu1 %vm4929_vm2, %v4928_v53  ;;  %v3261_v0 = vadd.f32 %v3922_v7, %v3260_v6 }
 0x3e5   : > { %v3263_v4 = vpop.f32.mrb[70].mxu0  ;;  %4725 = vmatprep.subr.bf16.mxu1 %v4928_v53 }
 0x3e6   : > { %v3264_v25 = vadd.f32 %v3922_v7, %v3263_v4  ;;  %v4714_v21 = vpop.f32.mrb[71].mxu0  ;;  %v3665_v4 = vld [vmem:[%s7207_s17] sm:$0x1] }
 0x3e8   : > { %v3343_v38 = vpack.c.bf16 %v3264_v25, %v3261_v0  ;;  %4726 = vmatpush3.bf16.msra.mxu1 %v4843_v55 }
 0x3e9   : > { %4727 = vmatprep.subr.bf16.mxu1 %v4928_v53 }
 0x3ec   : > { %4728 = vmatpush3.bf16.msra.mxu1 %v4844_v5 }
 0x3ed   : > { %4729 = vmatprep.subr.bf16.mxu1 %v4928_v53 }
 0x3f0   : > { %4730 = vmatpush3.bf16.msra.mxu1 %v4845_v50 }
 0x3f1   : > { %4735 = vmatprep.subr.bf16.mxu1 %v4928_v53 }
 0x3f3   : > { %4732 = vmatmul.mubr.msk.bf16.vlgmr.msra.gmra.mrb[72].mxu1 %vm3368_vm6, %v3343_v38 }
 0x3f4   : > { %4736 = vmatpush3.bf16.msra.mxu1 %v4846_v63  ;;  %4751 = vmatprep.mubr.msk.bf16.mxu1 %vm4929_vm2, %v4928_v53 }
 0x3f5   : > { %4737 = vmatprep.subr.bf16.mxu1 %v4928_v53 }
 0x3f8   : > { %4738 = vmatpush3.bf16.msra.mxu1 %v4847_v3 }
 0x3f9   : > { %4739 = vmatprep.subr.bf16.mxu1 %v4928_v53 }
 0x3fc   : > { %4740 = vmatpush3.bf16.msra.mxu1 %v4848_v34 }
 0x3fd   : > { %4741 = vmatprep.subr.bf16.mxu1 %v4928_v53 }
 0x400   : > { %4742 = vmatpush3.bf16.msra.mxu1 %v4849_v9 }
 0x401   : > { %4743 = vmatprep.subr.bf16.mxu1 %v4928_v53 }
 0x404   : > { %4744 = vmatpush3.bf16.msra.mxu1 %v4850_v13 }
 0x405   : > { %4745 = vmatprep.subr.bf16.mxu1 %v4928_v53 }
 0x408   : > { %4746 = vmatpush3.bf16.msra.mxu1 %v4851_v59 }
 0x409   : > { %4747 = vmatprep.subr.bf16.mxu1 %v4928_v53 }
 0x40c   : > { %4748 = vmatpush3.bf16.msra.mxu1 %v4852_v15 }
 0x40d   : > { %4749 = vmatprep.subr.bf16.mxu1 %v4928_v53 }
 0x410   : > { %4750 = vmatpush3.bf16.msra.mxu1 %v4853_v19 }
 0x4b6   : > { %v3329_v2 = vpop.f32.mrb[68].mxu1 }
 0x4b7   : > { %v3330_v12 = vadd.f32 %v3925_v33, %v3329_v2  ;;  %v4721_v37 = vpop.f32.mrb[69].mxu1 }
 0x4b8   : > { %v3332_v14 = vpop.f32.mrb[70].mxu1 }
 0x4b9   : > { %v3431_v18 = vpack.c.bf16 %v3330_v12, %v3330_v12  ;;  %v4722_v22 = vpop.f32.mrb[71].mxu1 }
 0x4bb   : > { %4752 = vmatmul.mubr.bf16.vlgmr.msra.gmra.mrb[76].mxu1 %v3431_v18  ;;  %v3603_v46 = vsel %vm3101_vm1, %v3431_v18, 0 }
 0x4c6   : > { %v3406_v44 = vpop.f32.mrb[72].mxu1 }
 0x4c7   : > { %v4733_v45 = vpop.f32.mrb[73].mxu1  ;;  %v3413_v56 = vmax.f32 %v3406_v44, 0.0 }
 0x4c8   : > { %v3409_v49 = vpop.f32.mrb[74].mxu1 }
 0x4c9   : > { %v3414_v26 = vmax.f32 %v3409_v49, 0.0  ;;  %v4734_v23 = vpop.f32.mrb[75].mxu1 }
 0x4cb   : > { %v3522_v11 = vpack.c.bf16 %v3414_v26, %v3413_v56 }
 0x4cd   : > { %4756 = vmatpush3.bf16.msra.mxu0 %v3522_v11 }
 0x4ce   : > { %4761 = vmatprep.subr.bf16.mxu0 %v4928_v53 }
 0x4d0   : > { %4758 = vmatmul.mubr.msk.bf16.vlgmr.msra.gmra.mrb[72].mxu0 %vm3222_vm4, %v3521_v27 }
 0x4d1   : > { %4762 = vmatpush3.bf16.msra.mxu0 %v3603_v46  ;;  %4763 = vmatprep.mubr.msk.bf16.mxu0 %vm4929_vm2, %v4928_v53 }
 0x4d2   : > { %4767 = vmatprep.subr.bf16.mxu0 %v4928_v53 }
 0x58e   : > { %v3514_v62 = vpop.f32.mrb[76].mxu1 }
 0x58f   : > { %v4753_v58 = vpop.f32.mrb[77].mxu1  ;;  %v3520_v61 = vmax.f32 %v3514_v62, 0.0 }
 0x590   : > { %v3517_v47 = vpop.f32.mrb[78].mxu1 }
 0x591   : > { %v4754_v52 = vpop.f32.mrb[79].mxu1 }
 0x5a3   : > { %v3560_v48 = vpop.f32.mrb[72].mxu0 }
 0x5a4   : > { %v3566_v41 = vadd.f32 %v3560_v48, %v3520_v61  ;;  %v4759_v8 = vpop.f32.mrb[73].mxu0 }
 0x5a5   : > { %v3563_v17 = vpop.f32.mrb[74].mxu0 }
 0x5a6   : > { %3567 = vst [vmem:[%s642_s5] sm:$0xf] %v3566_v41  ;;  %v4760_v28 = vpop.f32.mrb[75].mxu0  ;;  %v3575_v29 = vmul.f32 %v3943_v51, %v3566_v41  ;;  %s3763_s5 = scalar_lea.sflag [#allocation3], %s632_s26 }
 0x5a8   : > { %v3577_v35 = vsel %vm3576_vm7, %v3575_v29, 0.0 }
 0x5a9   : > { %3578 = vadd.xlane.f32.xlu0 %v3577_v35 }
 0x636   : > { %v3579_v43 = vpop.xlane.xlu0 %3578 }
 0x637   : > { %v3580_v42 = vpack.c.bf16 %v3579_v43, %v3579_v43 }
 0x639   : > { %3582 = vxpose.xlu0.c.b16.start.end [1/1] (short) (narrow) %v3580_v42, 16 }
 0x69f   : > { %v3590_v31 = vpop.trf.xlu0 }
 0x6a0   : > { %4764 = vmatmul.mubr.msk.bf16.vlgmr.msra.gmra.mrb[76].mxu0 %vm3598_vm8, %v3590_v31 }
 0x6a1   : > { %4768 = vmatpush3.bf16.msra.mxu0 %v4854_v30  ;;  %4783 = vmatprep.mubr.msk.bf16.mxu0 %vm4929_vm2, %v4928_v53 }
 0x6a2   : > { %4769 = vmatprep.subr.bf16.mxu0 %v4928_v53 }
 0x6a5   : > { %4770 = vmatpush3.bf16.msra.mxu0 %v4855_v32 }
 0x6a6   : > { %4771 = vmatprep.subr.bf16.mxu0 %v4928_v53 }
 0x6a9   : > { %4772 = vmatpush3.bf16.msra.mxu0 %v4856_v36 }
 0x6aa   : > { %4773 = vmatprep.subr.bf16.mxu0 %v4928_v53 }
 0x6ad   : > { %4774 = vmatpush3.bf16.msra.mxu0 %v4857_v40 }
 0x6ae   : > { %4775 = vmatprep.subr.bf16.mxu0 %v4928_v53 }
 0x6b1   : > { %4776 = vmatpush3.bf16.msra.mxu0 %v4858_v57 }
 0x6b2   : > { %4777 = vmatprep.subr.bf16.mxu0 %v4928_v53 }
 0x6b5   : > { %4778 = vmatpush3.bf16.msra.mxu0 %v4859_v10 }
 0x6b6   : > { %4779 = vmatprep.subr.bf16.mxu0 %v4928_v53 }
 0x6b9   : > { %4780 = vmatpush3.bf16.msra.mxu0 %v4860_v39 }
 0x6ba   : > { %4781 = vmatprep.subr.bf16.mxu0 %v4928_v53 }
 0x6bd   : > { %4782 = vmatpush3.bf16.msra.mxu0 %v4861_v54 }
 0x773   : > { %v3639_v20 = vpop.f32.mrb[76].mxu0 }
 0x774   : > { %v3640_v60 = vadd.f32 %v3639_v20, %v3581_v1  ;;  %v4765_v24 = vpop.f32.mrb[77].mxu0 }
 0x775   : > { %v3642_v7 = vpop.f32.mrb[78].mxu0 }
 0x776   : > { %3645 = vst [vmem:[%s645_s7] sm:$0x1] %v3640_v60  ;;  %v3646_v53 = vmul.f32 0.01, %v3640_v60  ;;  %v4766_v6 = vpop.f32.mrb[79].mxu0  ;;  %s7148_s7 = scalar_lea.hbm %s7210_s20, %s3953_s0 }
 0x778   : > { %v3647_v16 = vmax.f32 %v3640_v60, %v3646_v53 }
 0x77a   : > { %v3664_v55 = vpack.c.bf16 %v3647_v16, %v3647_v16 }
 0x77c   : > { %4784 = vmatmul.mubr.bf16.vlgmr.msra.gmra.mrb[80].mxu0 %v3664_v55 }
 0x84f   : > { %v3748_v0 = vpop.f32.mrb[80].mxu0 }
 0x850   : > { %v3749_v25 = vadd.f32 %v3748_v0, %v3665_v4  ;;  %v4785_v21 = vpop.f32.mrb[81].mxu0 }
 0x851   : > { %v3751_v38 = vpop.f32.mrb[82].mxu0 }
 0x852   : > { %3754 = vst [vmem:[%s633_s28] sm:$0x1] %v3749_v25  ;;  %v4786_v5 = vpop.f32.mrb[83].mxu0 }
 0x853   : > { %4875 = shalt.err (!%p4872_p3)
}
 0x854   : > { %s4876_s26 = scalar_lea.hbm %s7148_s7, 16  ;;  %s4880_s27 = scalar_lea.hbm %s7210_s20, 32 }
 0x855   : > { %p4877_p4 = scmp.ne.s32.totalorder %s7148_s7, %s4876_s26  ;;  %p4881_p9 = scmp.lt.u32.totalorder %s7148_s7, %s7210_s20 }
 0x856   : > { %p4882_p10 = scmp.lt.u32.totalorder %s4880_s27, %s4876_s26  ;;  %p4884_p12 = scmp.lt.u32.totalorder %s4876_s26, %s7148_s7 }
 0x857   : > { %p4878_p7 = pnand %p4877_p4, %p5074_p5 }
 0x858   : > { %p4883_p11 = por %p4882_p10, %p4881_p9 }
 0x859   : > { %p4879_p8 = pneg %p4878_p7 }
 0x85a   : > { %p4885_p13 = por %p4884_p12, %p4883_p11 }
 0x85c   : > { %p4886_p0 = pnand %p4885_p13, %p4879_p8 }
 0x85e   : > { %4889 = shalt.err (!%p4886_p0)
}
 0x85f   : > { %4787 = dma.vmem_to_hbm [thread:$0]  (%p5074_p5), %s7150_s6, 16, %s7148_s7, %s3763_s5  }
 0x860 PF: > { %p4793_p1 = scmp.ge.s32.totalorder %s4924_s24, 2  ;;  %s3806_s2 = sand.u32 1, %s4912_s1  }
 0x861   : > { %s3807_s30 = scalar_lea.sflag [#allocation3], %s3806_s2 }
 0x862   : > { %p4790_p2 = pnand %p4793_p1, %p5078_p6 }
 0x864   : > { %4907 = dma.done.wait (!%p4790_p2), %s3807_s30, 16  }
 0x865   : > { %4909 = vsyncadd (!%p4790_p2), %s3807_s30, 4294967280  ;;  %s7891_s24 = sld [smem:[#allocation6_spill]]  ;;  %s7892_s26 = sld [smem:[#allocation5_spill]] }
 0x866   : > { %s7893_s23 = sld [smem:[#allocation7_spill]]  ;;  %s7894_s1 = smov %s4916_s22 }
 0x86b   : > { %p31_p3 = scmp.ge.s32.totalorder %s7891_s24, 4   ;;  %s7895_s22 = smov %s7892_s26 }
 0x86d   :  { %33 = sbr.rel (!%p31_p3) target bundleno = 12 (0xc), region = 151 }
 0x874   :  { %3811 = vsyncpa [#allocation3], 1 }
 0x875   :  { %3813 = vsyncpa [#allocation3 + $0x1], 1 }

// kernel: effi_zoomin_forward.3
= control target key start
LH: loop header
LB: loop body
LE: loop exit
PB: predicated region body
PF: predicated region fallthrough
CT: control target
= control target key end

     0   :  { %s8058_s0 = inlined_call_operand.vmem [shape: f32[2,4096,3], index: 0, kind: input, shape index: {}]   ;;  %s8059_s1 = inlined_call_operand.vmem [shape: bf16[16,4096], index: 1, kind: input, shape index: {}]   ;;  %s8060_s2 = inlined_call_operand.vmem [shape: bf16[4,4096], index: 2, kind: input, shape index: {}]   ;;  %s8061_s3 = inlined_call_operand.vmem [shape: bf16[4,16], index: 3, kind: input, shape index: {}]   ;;  %s8062_s4 = inlined_call_operand.vmem [shape: bf16[3,16], index: 4, kind: input, shape index: {}]   ;;  %s8063_s5 = inlined_call_operand.vmem [shape: f32[1,16], index: 5, kind: input, shape index: {}]   ;;  %s8064_s6 = inlined_call_operand.vmem [shape: bf16[3,32], index: 6, kind: input, shape index: {}]   ;;  %s8065_s7 = inlined_call_operand.vmem [shape: f32[1,32], index: 7, kind: input, shape index: {}]   ;;  %s8066_s8 = inlined_call_operand.vmem [shape: bf16[16,64], index: 8, kind: input, shape index: {}]   ;;  %s8067_s9 = inlined_call_operand.vmem [shape: f32[1,64], index: 9, kind: input, shape index: {}]   ;;  %s8068_s10 = inlined_call_operand.vmem [shape: bf16[32,128], index: 10, kind: input, shape index: {}]   ;;  %s8069_s11 = inlined_call_operand.vmem [shape: f32[1,128], index: 11, kind: input, shape index: {}]   ;;  %s8070_s12 = inlined_call_operand.vmem [shape: bf16[64,128], index: 12, kind: input, shape index: {}]   ;;  %s8071_s13 = inlined_call_operand.vmem [shape: bf16[128,128], index: 13, kind: input, shape index: {}]   ;;  %s8072_s14 = inlined_call_operand.vmem [shape: f32[1,128], index: 14, kind: input, shape index: {}]   ;;  %s8073_s15 = inlined_call_operand.vmem [shape: f32[1,128], index: 15, kind: input, shape index: {}]   ;;  %s8074_s16 = inlined_call_operand.vmem [shape: bf16[128,128], index: 16, kind: input, shape index: {}]   ;;  %s8075_s17 = inlined_call_operand.vmem [shape: f32[1,128], index: 17, kind: input, shape index: {}]   ;;  %s8076_s18 = inlined_call_operand.vmem [shape: f32[2,1,128], index: 18, kind: input, shape index: {}]   ;;  %s8077_s19 = inlined_call_operand.vmem [shape: bf16[128,128], index: 19, kind: input, shape index: {}]   ;;  %s8078_s20 = inlined_call_operand.vmem [shape: bf16[128,128], index: 20, kind: input, shape index: {}]   ;;  %s8079_s21 = inlined_call_operand.vmem [shape: f32[1,128], index: 21, kind: input, shape index: {}]   ;;  %s8080_s22 = inlined_call_operand.hbm [shape: f32[2,4,128], index: 22, kind: output, shape index: {0}]   ;;  %s8081_s23 = inlined_call_operand.hbm [shape: f32[2,1,128], index: 23, kind: output, shape index: {1}]   ;;  %s8082_s24 = inlined_call_operand.hbm [shape: f32[2,1,128], index: 24, kind: output, shape index: {2}]   ;;  %s8083_s25 = inlined_call_operand.hbm [shape: f32[2,1,128], index: 25, kind: output, shape index: {3}]  }
   0x1   :  { %8312 = sst [smem:[#allocation235_spill]] %s8058_s0 }
   0x2   :  { %8313 = sst [smem:[#allocation236_spill]] %s8059_s1 }
   0x3   :  { %8314 = sst [smem:[#allocation237_spill]] %s8060_s2 }
   0x4   :  { %8315 = sst [smem:[#allocation238_spill]] %s8061_s3 }
   0x5   :  { %8316 = sst [smem:[#allocation239_spill]] %s8062_s4 }
   0x6   :  { %8317 = sst [smem:[#allocation240_spill]] %s8063_s5 }
   0x7   :  { %8318 = sst [smem:[#allocation241_spill]] %s8064_s6 }
   0x8   :  { %8319 = sst [smem:[#allocation242_spill]] %s8065_s7 }
   0x9   :  { %8320 = sst [smem:[#allocation243_spill]] %s8066_s8 }
   0xa   :  { %8321 = sst [smem:[#allocation244_spill]] %s8067_s9 }
   0xb   :  { %8322 = sst [smem:[#allocation245_spill]] %s8068_s10 }
   0xc   :  { %8323 = sst [smem:[#allocation246_spill]] %s8069_s11 }
   0xd   :  { %8324 = sst [smem:[#allocation247_spill]] %s8070_s12 }
   0xe   :  { %8325 = sst [smem:[#allocation248_spill]] %s8071_s13 }
   0xf   :  { %8326 = sst [smem:[#allocation249_spill]] %s8072_s14 }
  0x10   :  { %8327 = sst [smem:[#allocation250_spill]] %s8073_s15 }
  0x11   :  { %31 = vsyncpa [#allocation3], 0 }
  0x12   :  { %33 = vsyncpa [#allocation3 + $0x1], 0 }
  0x13   :  { %34 = vsyncpa [#allocation5], 0 }
  0x14   :  { %36 = vsyncpa [#allocation5 + $0x1], 0 }
  0x15   :  { %37 = vsyncpa [#allocation8], 0 }
  0x16   :  { %39 = vsyncpa [#allocation8 + $0x1], 0  ;;  %s5726_s29 = smov 0   ;;  %s5728_s2 = smov 0  }
  0x17   :  { %s5730_s6 = smov 0   ;;  %s5732_s30 = smov 0  }
  0x18 LB: > { %8328 = sst [smem:[#allocation12_spill]] %s5574_s29  ;;  %s5747_s7 = sadd.s32 4294967295, %s5586_s30   ;;  %s5586_s30 = sphi %s5732_s30, %s8792_s30   ;;  %s5582_s6 = sphi %s5730_s6, %s8794_s6   ;;  %s5578_s2 = sphi %s5728_s2, %s8796_s2   ;;  %s5574_s29 = sphi %s5726_s29, %s8795_s29  }
  0x19   : > { %8329 = sst [smem:[#allocation13_spill]] %s5582_s6  ;;  %s8086_s3 = sadd.s32 4294967294, %s5586_s30  }
  0x1a   : > { %s5751_s26 = sadd.s32 1, %s5586_s30   ;;  %s524_s1 = sadd.s32 1, %s5582_s6 }
  0x1b   : > { %8330 = sst [smem:[#allocation14_spill]] %s5751_s26  ;;  %s521_s8 = ssub.s32 %s5586_s30, %s5751_s26 }
  0x1c   : > { %p534_p0 = scmp.ne.s32.totalorder %s5582_s6, %s5578_s2  ;;  %p522_p1 = scmp.eq.s32.totalorder %s521_s8, 0 }
  0x1d   : > { %p535_p2 = scmp.eq.s32.totalorder %s5747_s7, 1  ;;  %p540_p3 = scmp.ne.s32.totalorder %s5578_s2, %s5574_s29 }
  0x1e   : > { %p541_p4 = scmp.eq.s32.totalorder %s8086_s3, 1  ;;  %p4343_p7 = scmp.ge.s32.totalorder %s5586_s30, 1 }
  0x1f   : > { %s5764_s27 = scalar_select %p522_p1, %s5582_s6, %s524_s1  }
  0x20   : > { %p5766_p5 = por %p535_p2, %p534_p0  ;;  %p5770_p6 = por %p541_p4, %p540_p3 }
  0x21   : > { %8331 = sst [smem:[#allocation15_spill]] %s5764_s27  ;;  %p711_p8 = scmp.lt.s32.totalorder %s5586_s30, 3 }
  0x22   : > { %s8333_s28 = scalar_select %p5770_p6, 1, 0 }
  0x23   : > { %p712_p9 = pnand %p4343_p7, %p711_p8 }
  0x24   : > { %8334 = sst [smem:[#allocation16_spill]] %s8333_s28 }
  0x25   : > { %715 = sbr.rel (%p712_p9) target bundleno = 2190 (0x88e), region = 108 }
  0x2c   : > { %p794_p10 = scmp.lt.s32.totalorder %s5747_s7, 1  ;;  %s8335_s0 = sld [smem:[#allocation236_spill]]  ;;  %vm3256_vm0 = vcmask 1040384   ;;  %vm3257_vm1 = vcmask 1041408   ;;  %vm5591_vm2 = vmmov 0   ;;  %vm3252_vm3 = vcmask 23552  }
  0x2d   : > { %s8336_s1 = sld [smem:[#allocation235_spill]]  ;;  %s8555_s27 = sld [smem:[#allocation237_spill]]  ;;  %vm3378_vm4 = vcmask 130048   ;;  %vm3447_vm5 = vcmask 261120   ;;  %vm3524_vm6 = vcmask 523264   ;;  %vm3732_vm7 = vcmask 1043456  }
  0x2e   : > { %s5800_s9 = scalar_select %p794_p10, %s5747_s7, 1  ;;  %vm3754_vm8 = vcmask 31744  }
  0x2f   : > { %s8775_s26 = sld [smem:[#allocation241_spill]]  ;;  %s8776_s29 = sld [smem:[#allocation243_spill]] }
  0x30   : > { %s4437_s5 = sshll.u32 %s5800_s9, 12  ;;  %s8778_s10 = sld [smem:[#allocation245_spill]] }
  0x31   : > { %s8780_s12 = sld [smem:[#allocation247_spill]]  ;;  %s8781_s3 = sld [smem:[#allocation244_spill]] }
  0x32   : > { %v5780_v0 = vld [vmem:[%s8335_s0] sm:$0xff]  ;;  %v5790_v2 = vld [vmem:[%s8335_s0 + $0x8] sm:$0xff]  ;;  %s8782_s13 = sld [smem:[#allocation248_spill]]  ;;  %s8783_s11 = sld [smem:[#allocation246_spill]] }
  0x33   : > { %v5785_v1 = vld [vmem:[%s8335_s0 + $0x80] sm:$0xff]  ;;  %v5797_v4 = vld [vmem:[%s8335_s0 + $0x88] sm:$0xff]  ;;  %s5808_s8 = scalar_lea.vmem %s8336_s1, %s4437_s5  ;;  %s8777_s1 = sld [smem:[#allocation240_spill]] }
  0x34   : > { %v4348_v3 = vcombine.high %v5780_v0, %v5785_v1  ;;  %v4350_v5 = vcombine.high %v5790_v2, %v5797_v4  ;;  %v819_v6 = vld [vmem:[%s5808_s8 + $0x80] sm:$0xff]  ;;  %v820_v7 = vld [vmem:[%s5808_s8 + $0x88] sm:$0xff]  ;;  %v821_v17 = vld [vmem:[%s5808_s8 + $0x90] sm:$0xff]  ;;  %s8785_s14 = sld [smem:[#allocation249_spill]]  ;;  %s8786_s15 = sld [smem:[#allocation250_spill]] }
  0x35   : > { %v851_v8 = vld [vmem:[%s5808_s8 + $0x180] sm:$0xff]  ;;  %v5813_v9 = vpack.c.bf16 %v820_v7, %v819_v6  ;;  %v852_v10 = vld [vmem:[%s5808_s8 + $0x188] sm:$0xff]  ;;  %v822_v19 = vld [vmem:[%s5808_s8 + $0x98] sm:$0xff]  ;;  %s7908_s5 = sshll.u32 %s5747_s7, 4 }
  0x36   : > { %1795 = vmatprep.mubr.bf16.mxu0 %v4348_v3  ;;  %1836 = vmatprep.mubr.bf16.mxu1 %v4350_v5  ;;  %v803_v11 = vld [vmem:[%s5808_s8] sm:$0xff]  ;;  %v804_v12 = vld [vmem:[%s5808_s8 + $0x8] sm:$0xff]  ;;  %v5818_v13 = vpack.c.bf16 %v852_v10, %v851_v8  ;;  %v853_v20 = vld [vmem:[%s5808_s8 + $0x190] sm:$0xff]  ;;  %v5833_v22 = vpack.c.bf16 %v822_v19, %v821_v17 }
  0x37   : > { %v5820_v14 = vpack.c.bf16 %v804_v12, %v803_v11  ;;  %v835_v15 = vld [vmem:[%s5808_s8 + $0x100] sm:$0xff]  ;;  %v836_v16 = vld [vmem:[%s5808_s8 + $0x108] sm:$0xff]  ;;  %4438 = vmatprep.subr.bf16.mxu0 %v5813_v9  ;;  %v854_v21 = vld [vmem:[%s5808_s8 + $0x198] sm:$0xff] }
  0x38   : > { %v5826_v18 = vpack.c.bf16 %v836_v16, %v835_v15  ;;  %4460 = vmatprep.subr.bf16.mxu1 %v5818_v13  ;;  %v5835_v23 = vpack.c.bf16 %v854_v21, %v853_v20  ;;  %v805_v24 = vld [vmem:[%s5808_s8 + $0x10] sm:$0xff]  ;;  %v806_v25 = vld [vmem:[%s5808_s8 + $0x18] sm:$0xff]  ;;  %v823_v29 = vld [vmem:[%s5808_s8 + $0xa0] sm:$0xff] }
  0x39   : > { %4439 = vmatpush3.bf16.msra.mxu0 %v5820_v14  ;;  %v837_v26 = vld [vmem:[%s5808_s8 + $0x110] sm:$0xff]  ;;  %v5841_v27 = vpack.c.bf16 %v806_v25, %v805_v24  ;;  %v838_v28 = vld [vmem:[%s5808_s8 + $0x118] sm:$0xff]  ;;  %v824_v30 = vld [vmem:[%s5808_s8 + $0xa8] sm:$0xff] }
  0x3a   : > { %4461 = vmatpush3.bf16.msra.mxu1 %v5826_v18  ;;  %4440 = vmatprep.subr.bf16.mxu0 %v5833_v22  ;;  %v5848_v31 = vpack.c.bf16 %v838_v28, %v837_v26  ;;  %v5850_v32 = vpack.c.bf16 %v824_v30, %v823_v29  ;;  %v855_v33 = vld [vmem:[%s5808_s8 + $0x1a0] sm:$0xff]  ;;  %v856_v34 = vld [vmem:[%s5808_s8 + $0x1a8] sm:$0xff]  ;;  %v825_v41 = vld [vmem:[%s5808_s8 + $0xb0] sm:$0xff] }
  0x3b   : > { %4462 = vmatprep.subr.bf16.mxu1 %v5835_v23  ;;  %v807_v35 = vld [vmem:[%s5808_s8 + $0x20] sm:$0xff]  ;;  %v5855_v36 = vpack.c.bf16 %v856_v34, %v855_v33  ;;  %v808_v37 = vld [vmem:[%s5808_s8 + $0x28] sm:$0xff]  ;;  %v826_v42 = vld [vmem:[%s5808_s8 + $0xb8] sm:$0xff] }
  0x3c   : > { %v839_v38 = vld [vmem:[%s5808_s8 + $0x120] sm:$0xff]  ;;  %v840_v39 = vld [vmem:[%s5808_s8 + $0x128] sm:$0xff]  ;;  %v5861_v40 = vpack.c.bf16 %v808_v37, %v807_v35  ;;  %v857_v43 = vld [vmem:[%s5808_s8 + $0x1b0] sm:$0xff]  ;;  %v5870_v45 = vpack.c.bf16 %v826_v42, %v825_v41 }
  0x3d   : > { %4441 = vmatpush3.bf16.msra.mxu0 %v5841_v27  ;;  %v5868_v44 = vpack.c.bf16 %v840_v39, %v839_v38  ;;  %v858_v46 = vld [vmem:[%s5808_s8 + $0x1b8] sm:$0xff]  ;;  %v809_v47 = vld [vmem:[%s5808_s8 + $0x30] sm:$0xff]  ;;  %v827_v52 = vld [vmem:[%s5808_s8 + $0xc0] sm:$0xff] }
  0x3e   : > { %4463 = vmatpush3.bf16.msra.mxu1 %v5848_v31  ;;  %4442 = vmatprep.subr.bf16.mxu0 %v5850_v32  ;;  %v810_v48 = vld [vmem:[%s5808_s8 + $0x38] sm:$0xff]  ;;  %v5876_v49 = vpack.c.bf16 %v858_v46, %v857_v43  ;;  %v841_v50 = vld [vmem:[%s5808_s8 + $0x130] sm:$0xff]  ;;  %v828_v53 = vld [vmem:[%s5808_s8 + $0xc8] sm:$0xff] }
  0x3f   : > { %4464 = vmatprep.subr.bf16.mxu1 %v5855_v36  ;;  %v842_v51 = vld [vmem:[%s5808_s8 + $0x138] sm:$0xff]  ;;  %v859_v54 = vld [vmem:[%s5808_s8 + $0x1c0] sm:$0xff]  ;;  %v860_v55 = vld [vmem:[%s5808_s8 + $0x1c8] sm:$0xff]  ;;  %v5885_v56 = vpack.c.bf16 %v810_v48, %v809_v47  ;;  %v5891_v58 = vpack.c.bf16 %v828_v53, %v827_v52 }
  0x40   : > { %v5889_v57 = vpack.c.bf16 %v842_v51, %v841_v50  ;;  %v811_v59 = vld [vmem:[%s5808_s8 + $0x40] sm:$0xff]  ;;  %v812_v60 = vld [vmem:[%s5808_s8 + $0x48] sm:$0xff]  ;;  %v5897_v62 = vpack.c.bf16 %v860_v55, %v859_v54  ;;  %v829_v3 = vld [vmem:[%s5808_s8 + $0xd0] sm:$0xff] }
  0x41   : > { %4443 = vmatpush3.bf16.msra.mxu0 %v5861_v40  ;;  %v843_v61 = vld [vmem:[%s5808_s8 + $0x140] sm:$0xff]  ;;  %v844_v63 = vld [vmem:[%s5808_s8 + $0x148] sm:$0xff]  ;;  %v830_v5 = vld [vmem:[%s5808_s8 + $0xd8] sm:$0xff]  ;;  %v5905_v8 = vpack.c.bf16 %v812_v60, %v811_v59 }
  0x42   : > { %4465 = vmatpush3.bf16.msra.mxu1 %v5868_v44  ;;  %4444 = vmatprep.subr.bf16.mxu0 %v5870_v45  ;;  %v861_v6 = vld [vmem:[%s5808_s8 + $0x1d0] sm:$0xff]  ;;  %v862_v7 = vld [vmem:[%s5808_s8 + $0x1d8] sm:$0xff]  ;;  %v5909_v10 = vpack.c.bf16 %v844_v63, %v843_v61  ;;  %v5911_v11 = vpack.c.bf16 %v830_v5, %v829_v3  ;;  %v831_v20 = vld [vmem:[%s5808_s8 + $0xe0] sm:$0xff] }
  0x43   : > { %4466 = vmatprep.subr.bf16.mxu1 %v5876_v49  ;;  %v813_v12 = vld [vmem:[%s5808_s8 + $0x50] sm:$0xff]  ;;  %v814_v15 = vld [vmem:[%s5808_s8 + $0x58] sm:$0xff]  ;;  %v5917_v17 = vpack.c.bf16 %v862_v7, %v861_v6  ;;  %v832_v21 = vld [vmem:[%s5808_s8 + $0xe8] sm:$0xff] }
  0x44   : > { %v845_v16 = vld [vmem:[%s5808_s8 + $0x150] sm:$0xff]  ;;  %v846_v19 = vld [vmem:[%s5808_s8 + $0x158] sm:$0xff]  ;;  %v863_v24 = vld [vmem:[%s5808_s8 + $0x1e0] sm:$0xff]  ;;  %v5925_v26 = vpack.c.bf16 %v814_v15, %v813_v12  ;;  %v5931_v29 = vpack.c.bf16 %v832_v21, %v831_v20  ;;  %v4347_v21 = vcombine.low %v5780_v0, %v5785_v1 }
  0x45   : > { %4445 = vmatpush3.bf16.msra.mxu0 %v5885_v56  ;;  %v864_v25 = vld [vmem:[%s5808_s8 + $0x1e8] sm:$0xff]  ;;  %v5929_v28 = vpack.c.bf16 %v846_v19, %v845_v16  ;;  %v815_v30 = vld [vmem:[%s5808_s8 + $0x60] sm:$0xff]  ;;  %v833_v38 = vld [vmem:[%s5808_s8 + $0xf0] sm:$0xff] }
  0x46   : > { %4467 = vmatpush3.bf16.msra.mxu1 %v5889_v57  ;;  %4446 = vmatprep.subr.bf16.mxu0 %v5891_v58  ;;  %v816_v33 = vld [vmem:[%s5808_s8 + $0x68] sm:$0xff]  ;;  %v847_v34 = vld [vmem:[%s5808_s8 + $0x160] sm:$0xff]  ;;  %v5937_v35 = vpack.c.bf16 %v864_v25, %v863_v24  ;;  %v834_v39 = vld [vmem:[%s5808_s8 + $0xf8] sm:$0xff] }
  0x47   : > { %4468 = vmatprep.subr.bf16.mxu1 %v5897_v62  ;;  %v848_v37 = vld [vmem:[%s5808_s8 + $0x168] sm:$0xff]  ;;  %v865_v41 = vld [vmem:[%s5808_s8 + $0x1f0] sm:$0xff]  ;;  %v866_v42 = vld [vmem:[%s5808_s8 + $0x1f8] sm:$0xff]  ;;  %v5945_v43 = vpack.c.bf16 %v816_v33, %v815_v30  ;;  %v5951_v47 = vpack.c.bf16 %v834_v39, %v833_v38  ;;  %v4349_v33 = vcombine.low %v5790_v2, %v5797_v4 }
  0x48   : > { %v5949_v46 = vpack.c.bf16 %v848_v37, %v847_v34  ;;  %v817_v48 = vld [vmem:[%s5808_s8 + $0x70] sm:$0xff]  ;;  %v818_v50 = vld [vmem:[%s5808_s8 + $0x78] sm:$0xff]  ;;  %v5957_v52 = vpack.c.bf16 %v866_v42, %v865_v41  ;;  %v883_v54 = vld [vmem:[%s5808_s8 + $0x280] sm:$0xff] }
  0x49   : > { %4447 = vmatpush3.bf16.msra.mxu0 %v5905_v8  ;;  %v849_v51 = vld [vmem:[%s5808_s8 + $0x170] sm:$0xff]  ;;  %v850_v53 = vld [vmem:[%s5808_s8 + $0x178] sm:$0xff]  ;;  %v884_v55 = vld [vmem:[%s5808_s8 + $0x288] sm:$0xff]  ;;  %v5965_v61 = vpack.c.bf16 %v818_v50, %v817_v48 }
  0x4a   : > { %4469 = vmatpush3.bf16.msra.mxu1 %v5909_v10  ;;  %4448 = vmatprep.subr.bf16.mxu0 %v5911_v11  ;;  %v915_v59 = vld [vmem:[%s5808_s8 + $0x380] sm:$0xff]  ;;  %v916_v60 = vld [vmem:[%s5808_s8 + $0x388] sm:$0xff]  ;;  %v5969_v63 = vpack.c.bf16 %v850_v53, %v849_v51  ;;  %v5971_v3 = vpack.c.bf16 %v884_v55, %v883_v54  ;;  %v5979_v12 = vld [vmem:[%s8335_s0 + $0x10] sm:$0xff] }
  0x4b   : > { %4470 = vmatprep.subr.bf16.mxu1 %v5917_v17  ;;  %8337 = vst [vmem:[#allocation17_spill] sm:$0xff] %v5965_v61  ;;  %v867_v5 = vld [vmem:[%s5808_s8 + $0x200] sm:$0xff]  ;;  %v868_v6 = vld [vmem:[%s5808_s8 + $0x208] sm:$0xff]  ;;  %v5982_v15 = vpack.c.bf16 %v916_v60, %v915_v59  ;;  %v885_v19 = vld [vmem:[%s5808_s8 + $0x290] sm:$0xff] }
  0x4c   : > { %8338 = vst [vmem:[#allocation18_spill] sm:$0xff] %v5969_v63  ;;  %8339 = vst [vmem:[#allocation19_spill] sm:$0xff] %v5971_v3  ;;  %v899_v7 = vld [vmem:[%s5808_s8 + $0x300] sm:$0xff]  ;;  %v900_v16 = vld [vmem:[%s5808_s8 + $0x308] sm:$0xff]  ;;  %v5999_v34 = vpack.c.bf16 %v868_v6, %v867_v5 }
  0x4d   : > { %4449 = vmatpush3.bf16.msra.mxu0 %v5925_v26  ;;  %8340 = vst [vmem:[#allocation20_spill] sm:$0xff] %v5982_v15  ;;  %v886_v20 = vld [vmem:[%s5808_s8 + $0x298] sm:$0xff]  ;;  %v917_v24 = vld [vmem:[%s5808_s8 + $0x390] sm:$0xff]  ;;  %v6013_v37 = vpack.c.bf16 %v900_v16, %v899_v7  ;;  %v887_v48 = vld [vmem:[%s5808_s8 + $0x2a0] sm:$0xff] }
  0x4e   : > { %4471 = vmatpush3.bf16.msra.mxu1 %v5929_v28  ;;  %4450 = vmatprep.subr.bf16.mxu0 %v5931_v29  ;;  %v918_v25 = vld [vmem:[%s5808_s8 + $0x398] sm:$0xff]  ;;  %v5994_v30 = vld [vmem:[%s8335_s0 + $0x90] sm:$0xff]  ;;  %8341 = vst [vmem:[#allocation21_spill] sm:$0xff] %v5999_v34  ;;  %v6015_v2 = vpack.c.bf16 %v886_v20, %v885_v19  ;;  %v888_v50 = vld [vmem:[%s5808_s8 + $0x2a8] sm:$0xff] }
  0x4f   : > { %4472 = vmatprep.subr.bf16.mxu1 %v5937_v35  ;;  %v6004_v0 = vld [vmem:[%s8335_s0 + $0x18] sm:$0xff]  ;;  %8342 = vst [vmem:[#allocation22_spill] sm:$0xff] %v6013_v37  ;;  %v869_v4 = vld [vmem:[%s5808_s8 + $0x210] sm:$0xff]  ;;  %v6021_v41 = vpack.c.bf16 %v918_v25, %v917_v24  ;;  %v4352_v51 = vcombine.high %v5979_v12, %v5994_v30  ;;  %v919_v53 = vld [vmem:[%s5808_s8 + $0x3a0] sm:$0xff]  ;;  %v6039_v5 = vpack.c.bf16 %v888_v50, %v887_v48 }
  0x50   : > { %v6009_v1 = vld [vmem:[%s8335_s0 + $0x98] sm:$0xff]  ;;  %8343 = vst [vmem:[#allocation23_spill] sm:$0xff] %v6015_v2  ;;  %v901_v39 = vld [vmem:[%s5808_s8 + $0x310] sm:$0xff]  ;;  %v920_v54 = vld [vmem:[%s5808_s8 + $0x3a8] sm:$0xff] }
  0x51   : > { %4451 = vmatpush3.bf16.msra.mxu0 %v5945_v43  ;;  %v870_v38 = vld [vmem:[%s5808_s8 + $0x218] sm:$0xff]  ;;  %8344 = vst [vmem:[#allocation24_spill] sm:$0xff] %v6021_v41  ;;  %v4354_v55 = vcombine.high %v6004_v0, %v6009_v1  ;;  %8347 = vst [vmem:[#allocation27_spill] sm:$0xff] %v6039_v5  ;;  %v871_v6 = vld [vmem:[%s5808_s8 + $0x220] sm:$0xff]  ;;  %v6045_v19 = vpack.c.bf16 %v920_v54, %v919_v53 }
  0x52   : > { %4473 = vmatpush3.bf16.msra.mxu1 %v5949_v46  ;;  %4452 = vmatprep.subr.bf16.mxu0 %v5951_v47  ;;  %v902_v42 = vld [vmem:[%s5808_s8 + $0x318] sm:$0xff]  ;;  %v6033_v59 = vpack.c.bf16 %v870_v38, %v869_v4  ;;  %v872_v7 = vld [vmem:[%s5808_s8 + $0x228] sm:$0xff]  ;;  %v903_v16 = vld [vmem:[%s5808_s8 + $0x320] sm:$0xff] }
  0x53   : > { %4474 = vmatprep.subr.bf16.mxu1 %v5957_v52  ;;  %v6037_v60 = vpack.c.bf16 %v902_v42, %v901_v39  ;;  %8348 = vst [vmem:[#allocation28_spill] sm:$0xff] %v6045_v19  ;;  %v904_v20 = vld [vmem:[%s5808_s8 + $0x328] sm:$0xff]  ;;  %v890_v24 = vld [vmem:[%s5808_s8 + $0x2b8] sm:$0xff]  ;;  %v921_v25 = vld [vmem:[%s5808_s8 + $0x3b0] sm:$0xff]  ;;  %v6053_v4 = vpack.c.bf16 %v872_v7, %v871_v6 }
  0x54   : > { %8345 = vst [vmem:[#allocation25_spill] sm:$0xff] %v6033_v59  ;;  %v6057_v38 = vpack.c.bf16 %v904_v20, %v903_v16  ;;  %v873_v42 = vld [vmem:[%s5808_s8 + $0x230] sm:$0xff]  ;;  %v874_v48 = vld [vmem:[%s5808_s8 + $0x238] sm:$0xff]  ;;  %v891_v54 = vld [vmem:[%s5808_s8 + $0x2c0] sm:$0xff] }
  0x55   : > { %4453 = vmatpush3.bf16.msra.mxu0 %v5965_v61  ;;  %8346 = vst [vmem:[#allocation26_spill] sm:$0xff] %v6037_v60  ;;  %8349 = vst [vmem:[#allocation29_spill] sm:$0xff] %v6053_v4  ;;  %v905_v50 = vld [vmem:[%s5808_s8 + $0x330] sm:$0xff]  ;;  %v906_v53 = vld [vmem:[%s5808_s8 + $0x338] sm:$0xff]  ;;  %v6073_v16 = vpack.c.bf16 %v874_v48, %v873_v42 }
  0x56   : > { %4475 = vmatpush3.bf16.msra.mxu1 %v5969_v63  ;;  %4482 = vmatprep.subr.bf16.mxu0 %v5971_v3  ;;  %8350 = vst [vmem:[#allocation30_spill] sm:$0xff] %v6057_v38  ;;  %v923_v6 = vld [vmem:[%s5808_s8 + $0x3c0] sm:$0xff]  ;;  %v924_v7 = vld [vmem:[%s5808_s8 + $0x3c8] sm:$0xff]  ;;  %v6077_v20 = vpack.c.bf16 %v906_v53, %v905_v50  ;;  %v893_v48 = vld [vmem:[%s5808_s8 + $0x2d0] sm:$0xff] }
  0x57   : > { %4504 = vmatprep.subr.bf16.mxu1 %v5982_v15  ;;  %8353 = vst [vmem:[#allocation33_spill] sm:$0xff] %v6073_v16  ;;  %v908_v42 = vld [vmem:[%s5808_s8 + $0x348] sm:$0xff]  ;;  %v925_v50 = vld [vmem:[%s5808_s8 + $0x3d0] sm:$0xff]  ;;  %v926_v53 = vld [vmem:[%s5808_s8 + $0x3d8] sm:$0xff] }
  0x58   : > { %1796 = vmatmul.mubr.bf16.vlgmr.msra.gmra.mrb[0].mxu0 %v4347_v21  ;;  %v889_v21 = vld [vmem:[%s5808_s8 + $0x2b0] sm:$0xff]  ;;  %8354 = vst [vmem:[#allocation34_spill] sm:$0xff] %v6077_v20 }
  0x59   : > { %1837 = vmatmul.mubr.bf16.vlgmr.msra.gmra.mrb[0].mxu1 %v4349_v33  ;;  %4483 = vmatpush3.bf16.msra.mxu0 %v5999_v34  ;;  %v922_v33 = vld [vmem:[%s5808_s8 + $0x3b8] sm:$0xff]  ;;  %v6059_v39 = vpack.c.bf16 %v890_v24, %v889_v21  ;;  %v875_v24 = vld [vmem:[%s5808_s8 + $0x240] sm:$0xff]  ;;  %v1297_v3 = vld [vmem:[%s5808_s8 + $0xf70] sm:$0xff] }
  0x5a   : > { %4505 = vmatpush3.bf16.msra.mxu1 %v6013_v37  ;;  %4484 = vmatprep.subr.bf16.mxu0 %v6015_v2  ;;  %v1208_v37 = vld [vmem:[%s5808_s8 + $0xca8] sm:$0xff]  ;;  %v1266_v34 = vld [vmem:[%s5808_s8 + $0xe78] sm:$0xff] }
  0x5b   : > { %4506 = vmatprep.subr.bf16.mxu1 %v6021_v41  ;;  %1877 = vmatprep.mubr.bf16.mxu0 %v4352_v51  ;;  %8351 = vst [vmem:[#allocation31_spill] sm:$0xff] %v6059_v39  ;;  %v6065_v51 = vpack.c.bf16 %v922_v33, %v921_v25  ;;  %v876_v25 = vld [vmem:[%s5808_s8 + $0x248] sm:$0xff]  ;;  %v907_v33 = vld [vmem:[%s5808_s8 + $0x340] sm:$0xff] }
  0x5c   : > { %1918 = vmatprep.mubr.bf16.mxu1 %v4354_v55  ;;  %v892_v55 = vld [vmem:[%s5808_s8 + $0x2c8] sm:$0xff] }
  0x5d   : > { %4485 = vmatpush3.bf16.msra.mxu0 %v6033_v59  ;;  %8352 = vst [vmem:[#allocation32_spill] sm:$0xff] %v6065_v51  ;;  %v6079_v21 = vpack.c.bf16 %v892_v55, %v891_v54  ;;  %v6093_v54 = vpack.c.bf16 %v876_v25, %v875_v24  ;;  %v6097_v55 = vpack.c.bf16 %v908_v42, %v907_v33  ;;  %v910_v24 = vld [vmem:[%s5808_s8 + $0x358] sm:$0xff]  ;;  %v895_v25 = vld [vmem:[%s5808_s8 + $0x2e0] sm:$0xff]  ;;  %v1136_v41 = vld [vmem:[%s5808_s8 + $0xa68] sm:$0xff] }
  0x5e   : > { %4507 = vmatpush3.bf16.msra.mxu1 %v6037_v60  ;;  %4486 = vmatprep.subr.bf16.mxu0 %v6039_v5  ;;  %v927_v33 = vld [vmem:[%s5808_s8 + $0x3e0] sm:$0xff]  ;;  %v952_v60 = vld [vmem:[%s5808_s8 + $0x4a8] sm:$0xff] }
  0x5f   : > { %4508 = vmatprep.subr.bf16.mxu1 %v6045_v19  ;;  %8355 = vst [vmem:[#allocation35_spill] sm:$0xff] %v6079_v21  ;;  %v6085_v19 = vpack.c.bf16 %v924_v7, %v923_v6  ;;  %8357 = vst [vmem:[#allocation37_spill] sm:$0xff] %v6093_v54  ;;  %v877_v7 = vld [vmem:[%s5808_s8 + $0x250] sm:$0xff]  ;;  %v951_v5 = vld [vmem:[%s5808_s8 + $0x4a0] sm:$0xff] }
  0x60   : > { %8358 = vst [vmem:[#allocation38_spill] sm:$0xff] %v6097_v55  ;;  %v1183_v59 = vld [vmem:[%s5808_s8 + $0xbe0] sm:$0xff] }
  0x61   : > { %4487 = vmatpush3.bf16.msra.mxu0 %v6053_v4  ;;  %8356 = vst [vmem:[#allocation36_spill] sm:$0xff] %v6085_v19  ;;  %v6105_v4 = vpack.c.bf16 %v926_v53, %v925_v50  ;;  %v879_v53 = vld [vmem:[%s5808_s8 + $0x260] sm:$0xff] }
  0x62   : > { %4509 = vmatpush3.bf16.msra.mxu1 %v6057_v38  ;;  %4488 = vmatprep.subr.bf16.mxu0 %v6059_v39  ;;  %v894_v38 = vld [vmem:[%s5808_s8 + $0x2d8] sm:$0xff]  ;;  %v909_v39 = vld [vmem:[%s5808_s8 + $0x350] sm:$0xff] }
  0x63   : > { %4510 = vmatprep.subr.bf16.mxu1 %v6065_v51  ;;  %v6099_v6 = vpack.c.bf16 %v894_v38, %v893_v48  ;;  %v878_v51 = vld [vmem:[%s5808_s8 + $0x258] sm:$0xff]  ;;  %8360 = vst [vmem:[#allocation40_spill] sm:$0xff] %v6105_v4  ;;  %v928_v38 = vld [vmem:[%s5808_s8 + $0x3e8] sm:$0xff]  ;;  %v6117_v48 = vpack.c.bf16 %v910_v24, %v909_v39  ;;  %v929_v39 = vld [vmem:[%s5808_s8 + $0x3f0] sm:$0xff] }
  0x64   : > { %v6113_v42 = vpack.c.bf16 %v878_v51, %v877_v7  ;;  %v912_v51 = vld [vmem:[%s5808_s8 + $0x368] sm:$0xff]  ;;  %v897_v7 = vld [vmem:[%s5808_s8 + $0x2f0] sm:$0xff] }
  0x65   : > { %4489 = vmatpush3.bf16.msra.mxu0 %v6073_v16  ;;  %8359 = vst [vmem:[#allocation39_spill] sm:$0xff] %v6099_v6  ;;  %8362 = vst [vmem:[#allocation42_spill] sm:$0xff] %v6117_v48  ;;  %v6125_v16 = vpack.c.bf16 %v928_v38, %v927_v33  ;;  %v881_v38 = vld [vmem:[%s5808_s8 + $0x270] sm:$0xff] }
  0x66   : > { %4511 = vmatpush3.bf16.msra.mxu1 %v6077_v20  ;;  %4490 = vmatprep.subr.bf16.mxu0 %v6079_v21  ;;  %v896_v20 = vld [vmem:[%s5808_s8 + $0x2e8] sm:$0xff]  ;;  %8361 = vst [vmem:[#allocation41_spill] sm:$0xff] %v6113_v42  ;;  %v911_v21 = vld [vmem:[%s5808_s8 + $0x360] sm:$0xff] }
  0x67   : > { %4512 = vmatprep.subr.bf16.mxu1 %v6085_v19  ;;  %v6119_v50 = vpack.c.bf16 %v896_v20, %v895_v25  ;;  %v880_v19 = vld [vmem:[%s5808_s8 + $0x268] sm:$0xff]  ;;  %8364 = vst [vmem:[#allocation44_spill] sm:$0xff] %v6125_v16  ;;  %v930_v20 = vld [vmem:[%s5808_s8 + $0x3f8] sm:$0xff]  ;;  %v6137_v25 = vpack.c.bf16 %v912_v51, %v911_v21 }
  0x68   : > { %v6133_v24 = vpack.c.bf16 %v880_v19, %v879_v53  ;;  %v914_v19 = vld [vmem:[%s5808_s8 + $0x378] sm:$0xff]  ;;  %v947_v53 = vld [vmem:[%s5808_s8 + $0x480] sm:$0xff]  ;;  %v980_v21 = vld [vmem:[%s5808_s8 + $0x588] sm:$0xff] }
  0x69   : > { %4491 = vmatpush3.bf16.msra.mxu0 %v6093_v54  ;;  %8363 = vst [vmem:[#allocation43_spill] sm:$0xff] %v6119_v50  ;;  %8366 = vst [vmem:[#allocation46_spill] sm:$0xff] %v6137_v25  ;;  %v6145_v54 = vpack.c.bf16 %v930_v20, %v929_v39  ;;  %v931_v39 = vld [vmem:[%s5808_s8 + $0x400] sm:$0xff]  ;;  %v932_v20 = vld [vmem:[%s5808_s8 + $0x408] sm:$0xff] }
  0x6a   : > { %4513 = vmatpush3.bf16.msra.mxu1 %v6097_v55  ;;  %4492 = vmatprep.subr.bf16.mxu0 %v6099_v6  ;;  %v898_v55 = vld [vmem:[%s5808_s8 + $0x2f8] sm:$0xff]  ;;  %8365 = vst [vmem:[#allocation45_spill] sm:$0xff] %v6133_v24  ;;  %v913_v6 = vld [vmem:[%s5808_s8 + $0x370] sm:$0xff] }
  0x6b   : > { %4514 = vmatprep.subr.bf16.mxu1 %v6105_v4  ;;  %v6139_v33 = vpack.c.bf16 %v898_v55, %v897_v7  ;;  %v882_v4 = vld [vmem:[%s5808_s8 + $0x278] sm:$0xff]  ;;  %8368 = vst [vmem:[#allocation48_spill] sm:$0xff] %v6145_v54  ;;  %v6157_v51 = vpack.c.bf16 %v914_v19, %v913_v6  ;;  %v981_v19 = vld [vmem:[%s5808_s8 + $0x590] sm:$0xff] }
  0x6c   : > { %v6153_v55 = vpack.c.bf16 %v882_v4, %v881_v38  ;;  %v964_v38 = vld [vmem:[%s5808_s8 + $0x508] sm:$0xff]  ;;  %v950_v6 = vld [vmem:[%s5808_s8 + $0x498] sm:$0xff] }
  0x6d   : > { %4493 = vmatpush3.bf16.msra.mxu0 %v6113_v42  ;;  %8367 = vst [vmem:[#allocation47_spill] sm:$0xff] %v6139_v33  ;;  %8370 = vst [vmem:[#allocation50_spill] sm:$0xff] %v6157_v51  ;;  %v6167_v42 = vld [vmem:[%s8335_s0 + $0x20] sm:$0xff] }
  0x6e   : > { %4515 = vmatpush3.bf16.msra.mxu1 %v6117_v48  ;;  %4494 = vmatprep.subr.bf16.mxu0 %v6119_v50  ;;  %v948_v48 = vld [vmem:[%s5808_s8 + $0x488] sm:$0xff]  ;;  %v979_v50 = vld [vmem:[%s5808_s8 + $0x580] sm:$0xff]  ;;  %8369 = vst [vmem:[#allocation49_spill] sm:$0xff] %v6153_v55 }
  0x6f   : > { %4516 = vmatprep.subr.bf16.mxu1 %v6125_v16  ;;  %v6159_v7 = vpack.c.bf16 %v948_v48, %v947_v53  ;;  %v963_v16 = vld [vmem:[%s5808_s8 + $0x500] sm:$0xff]  ;;  %v6170_v4 = vpack.c.bf16 %v980_v21, %v979_v50  ;;  %v4351_v48 = vcombine.low %v5979_v12, %v5994_v30  ;;  %v982_v53 = vld [vmem:[%s5808_s8 + $0x598] sm:$0xff]  ;;  %v4353_v50 = vcombine.low %v6004_v0, %v6009_v1  ;;  %v6192_v12 = vld [vmem:[%s8335_s0 + $0x28] sm:$0xff] }
  0x70   : > { %v6187_v21 = vpack.c.bf16 %v932_v20, %v931_v39  ;;  %v6197_v30 = vld [vmem:[%s8335_s0 + $0xa8] sm:$0xff]  ;;  %v933_v1 = vld [vmem:[%s5808_s8 + $0x410] sm:$0xff]  ;;  %v934_v39 = vld [vmem:[%s5808_s8 + $0x418] sm:$0xff] }
  0x71   : > { %4495 = vmatpush3.bf16.msra.mxu0 %v6133_v24  ;;  %8371 = vst [vmem:[#allocation51_spill] sm:$0xff] %v6159_v7  ;;  %8372 = vst [vmem:[#allocation52_spill] sm:$0xff] %v6170_v4  ;;  %v965_v20 = vld [vmem:[%s5808_s8 + $0x510] sm:$0xff]  ;;  %v966_v24 = vld [vmem:[%s5808_s8 + $0x518] sm:$0xff] }
  0x72   : > { %4517 = vmatpush3.bf16.msra.mxu1 %v6137_v25  ;;  %4496 = vmatprep.subr.bf16.mxu0 %v6139_v33  ;;  %v949_v25 = vld [vmem:[%s5808_s8 + $0x490] sm:$0xff]  ;;  %v6182_v33 = vld [vmem:[%s8335_s0 + $0xa0] sm:$0xff]  ;;  %8373 = vst [vmem:[#allocation53_spill] sm:$0xff] %v6187_v21 }
  0x73   : > { %4518 = vmatprep.subr.bf16.mxu1 %v6145_v54  ;;  %v6203_v0 = vpack.c.bf16 %v950_v6, %v949_v25  ;;  %v6209_v54 = vpack.c.bf16 %v982_v53, %v981_v19  ;;  %v984_v25 = vld [vmem:[%s5808_s8 + $0x5a8] sm:$0xff]  ;;  %v6221_v6 = vpack.c.bf16 %v934_v39, %v933_v1  ;;  %v6227_v19 = vpack.c.bf16 %v952_v60, %v951_v5  ;;  %v935_v53 = vld [vmem:[%s5808_s8 + $0x420] sm:$0xff]  ;;  %v953_v39 = vld [vmem:[%s5808_s8 + $0x4b0] sm:$0xff] }
  0x74   : > { %v968_v1 = vld [vmem:[%s5808_s8 + $0x528] sm:$0xff]  ;;  %v986_v60 = vld [vmem:[%s5808_s8 + $0x5b8] sm:$0xff] }
  0x75   : > { %4497 = vmatpush3.bf16.msra.mxu0 %v6153_v55  ;;  %v6201_v55 = vpack.c.bf16 %v964_v38, %v963_v16  ;;  %8375 = vst [vmem:[#allocation55_spill] sm:$0xff] %v6203_v0  ;;  %8376 = vst [vmem:[#allocation56_spill] sm:$0xff] %v6209_v54  ;;  %v983_v16 = vld [vmem:[%s5808_s8 + $0x5a0] sm:$0xff]  ;;  %v4358_v38 = vcombine.high %v6192_v12, %v6197_v30 }
  0x76   : > { %4519 = vmatpush3.bf16.msra.mxu1 %v6157_v51  ;;  %4526 = vmatprep.subr.bf16.mxu0 %v6159_v7  ;;  %v4356_v7 = vcombine.high %v6167_v42, %v6182_v33  ;;  %8377 = vst [vmem:[#allocation57_spill] sm:$0xff] %v6221_v6  ;;  %8379 = vst [vmem:[#allocation59_spill] sm:$0xff] %v6227_v19  ;;  %v967_v51 = vld [vmem:[%s5808_s8 + $0x520] sm:$0xff] }
  0x77   : > { %8374 = vst [vmem:[#allocation54_spill] sm:$0xff] %v6201_v55  ;;  %4548 = vmatprep.subr.bf16.mxu1 %v6170_v4  ;;  %v936_v4 = vld [vmem:[%s5808_s8 + $0x428] sm:$0xff] }
  0x78   : > { %1878 = vmatmul.mubr.bf16.vlgmr.msra.gmra.mrb[4].mxu0 %v4351_v48  ;;  %v6225_v48 = vpack.c.bf16 %v966_v24, %v965_v20  ;;  %v985_v24 = vld [vmem:[%s5808_s8 + $0x5b0] sm:$0xff]  ;;  %v6241_v5 = vpack.c.bf16 %v936_v4, %v935_v53  ;;  %v6245_v20 = vpack.c.bf16 %v968_v1, %v967_v51  ;;  %v970_v4 = vld [vmem:[%s5808_s8 + $0x538] sm:$0xff]  ;;  %v955_v53 = vld [vmem:[%s5808_s8 + $0x4c0] sm:$0xff] }
  0x79   : > { %1919 = vmatmul.mubr.bf16.vlgmr.msra.gmra.mrb[4].mxu1 %v4353_v50  ;;  %4527 = vmatpush3.bf16.msra.mxu0 %v6187_v21  ;;  %v6233_v50 = vpack.c.bf16 %v984_v25, %v983_v16  ;;  %v954_v21 = vld [vmem:[%s5808_s8 + $0x4b8] sm:$0xff]  ;;  %v987_v51 = vld [vmem:[%s5808_s8 + $0x5c0] sm:$0xff] }
  0x7a   : > { %4549 = vmatpush3.bf16.msra.mxu1 %v6201_v55  ;;  %4528 = vmatprep.subr.bf16.mxu0 %v6203_v0  ;;  %8378 = vst [vmem:[#allocation58_spill] sm:$0xff] %v6225_v48  ;;  %8381 = vst [vmem:[#allocation61_spill] sm:$0xff] %v6241_v5  ;;  %v6247_v16 = vpack.c.bf16 %v954_v21, %v953_v39  ;;  %v938_v25 = vld [vmem:[%s5808_s8 + $0x438] sm:$0xff]  ;;  %v988_v21 = vld [vmem:[%s5808_s8 + $0x5c8] sm:$0xff] }
  0x7b   : > { %4550 = vmatprep.subr.bf16.mxu1 %v6209_v54  ;;  %8380 = vst [vmem:[#allocation60_spill] sm:$0xff] %v6233_v50  ;;  %1959 = vmatprep.mubr.bf16.mxu0 %v4356_v7  ;;  %8382 = vst [vmem:[#allocation62_spill] sm:$0xff] %v6245_v20  ;;  %v937_v7 = vld [vmem:[%s5808_s8 + $0x430] sm:$0xff]  ;;  %v1016_v55 = vld [vmem:[%s5808_s8 + $0x6a8] sm:$0xff] }
  0x7c   : > { %2000 = vmatprep.mubr.bf16.mxu1 %v4358_v38  ;;  %8383 = vst [vmem:[#allocation63_spill] sm:$0xff] %v6247_v16  ;;  %v969_v54 = vld [vmem:[%s5808_s8 + $0x530] sm:$0xff]  ;;  %v6253_v38 = vpack.c.bf16 %v986_v60, %v985_v24  ;;  %v6261_v1 = vpack.c.bf16 %v938_v25, %v937_v7  ;;  %v939_v60 = vld [vmem:[%s5808_s8 + $0x440] sm:$0xff]  ;;  %v972_v7 = vld [vmem:[%s5808_s8 + $0x548] sm:$0xff] }
  0x7d   : > { %4529 = vmatpush3.bf16.msra.mxu0 %v6221_v6  ;;  %v6265_v39 = vpack.c.bf16 %v970_v4, %v969_v54  ;;  %v6273_v6 = vpack.c.bf16 %v988_v21, %v987_v51  ;;  %v957_v25 = vld [vmem:[%s5808_s8 + $0x4d0] sm:$0xff] }
  0x7e   : > { %4551 = vmatpush3.bf16.msra.mxu1 %v6225_v48  ;;  %4530 = vmatprep.subr.bf16.mxu0 %v6227_v19  ;;  %8384 = vst [vmem:[#allocation64_spill] sm:$0xff] %v6253_v38  ;;  %v956_v48 = vld [vmem:[%s5808_s8 + $0x4c8] sm:$0xff]  ;;  %8385 = vst [vmem:[#allocation65_spill] sm:$0xff] %v6261_v1  ;;  %v971_v19 = vld [vmem:[%s5808_s8 + $0x540] sm:$0xff] }
  0x7f   : > { %4552 = vmatprep.subr.bf16.mxu1 %v6233_v50  ;;  %8386 = vst [vmem:[#allocation66_spill] sm:$0xff] %v6265_v39  ;;  %v6267_v24 = vpack.c.bf16 %v956_v48, %v955_v53  ;;  %v940_v50 = vld [vmem:[%s5808_s8 + $0x448] sm:$0xff]  ;;  %8388 = vst [vmem:[#allocation68_spill] sm:$0xff] %v6273_v6  ;;  %v989_v54 = vld [vmem:[%s5808_s8 + $0x5d0] sm:$0xff]  ;;  %v6285_v53 = vpack.c.bf16 %v972_v7, %v971_v19 }
  0x80   : > { %v990_v48 = vld [vmem:[%s5808_s8 + $0x5d8] sm:$0xff]  ;;  %v6281_v4 = vpack.c.bf16 %v940_v50, %v939_v60  ;;  %v941_v21 = vld [vmem:[%s5808_s8 + $0x450] sm:$0xff]  ;;  %v959_v60 = vld [vmem:[%s5808_s8 + $0x4e0] sm:$0xff] }
  0x81   : > { %4531 = vmatpush3.bf16.msra.mxu0 %v6241_v5  ;;  %8387 = vst [vmem:[#allocation67_spill] sm:$0xff] %v6267_v24  ;;  %8390 = vst [vmem:[#allocation70_spill] sm:$0xff] %v6285_v53  ;;  %v6293_v5 = vpack.c.bf16 %v990_v48, %v989_v54  ;;  %v974_v50 = vld [vmem:[%s5808_s8 + $0x558] sm:$0xff]  ;;  %v991_v19 = vld [vmem:[%s5808_s8 + $0x5e0] sm:$0xff] }
  0x82   : > { %4553 = vmatpush3.bf16.msra.mxu1 %v6245_v20  ;;  %4532 = vmatprep.subr.bf16.mxu0 %v6247_v16  ;;  %v958_v20 = vld [vmem:[%s5808_s8 + $0x4d8] sm:$0xff]  ;;  %8389 = vst [vmem:[#allocation69_spill] sm:$0xff] %v6281_v4  ;;  %v973_v16 = vld [vmem:[%s5808_s8 + $0x550] sm:$0xff]  ;;  %v943_v48 = vld [vmem:[%s5808_s8 + $0x460] sm:$0xff] }
  0x83   : > { %4554 = vmatprep.subr.bf16.mxu1 %v6253_v38  ;;  %v6287_v51 = vpack.c.bf16 %v958_v20, %v957_v25  ;;  %v942_v38 = vld [vmem:[%s5808_s8 + $0x458] sm:$0xff]  ;;  %8392 = vst [vmem:[#allocation72_spill] sm:$0xff] %v6293_v5  ;;  %v992_v20 = vld [vmem:[%s5808_s8 + $0x5e8] sm:$0xff]  ;;  %v6305_v25 = vpack.c.bf16 %v974_v50, %v973_v16  ;;  %v993_v16 = vld [vmem:[%s5808_s8 + $0x5f0] sm:$0xff] }
  0x84   : > { %v6301_v7 = vpack.c.bf16 %v942_v38, %v941_v21  ;;  %v976_v38 = vld [vmem:[%s5808_s8 + $0x568] sm:$0xff]  ;;  %v961_v21 = vld [vmem:[%s5808_s8 + $0x4f0] sm:$0xff] }
  0x85   : > { %4533 = vmatpush3.bf16.msra.mxu0 %v6261_v1  ;;  %8391 = vst [vmem:[#allocation71_spill] sm:$0xff] %v6287_v51  ;;  %8394 = vst [vmem:[#allocation74_spill] sm:$0xff] %v6305_v25  ;;  %v6313_v1 = vpack.c.bf16 %v992_v20, %v991_v19  ;;  %v945_v20 = vld [vmem:[%s5808_s8 + $0x470] sm:$0xff] }
  0x86   : > { %4555 = vmatpush3.bf16.msra.mxu1 %v6265_v39  ;;  %4534 = vmatprep.subr.bf16.mxu0 %v6267_v24  ;;  %v960_v39 = vld [vmem:[%s5808_s8 + $0x4e8] sm:$0xff]  ;;  %8393 = vst [vmem:[#allocation73_spill] sm:$0xff] %v6301_v7  ;;  %v975_v24 = vld [vmem:[%s5808_s8 + $0x560] sm:$0xff] }
  0x87   : > { %4556 = vmatprep.subr.bf16.mxu1 %v6273_v6  ;;  %v6307_v54 = vpack.c.bf16 %v960_v39, %v959_v60  ;;  %v944_v6 = vld [vmem:[%s5808_s8 + $0x468] sm:$0xff]  ;;  %8396 = vst [vmem:[#allocation76_spill] sm:$0xff] %v6313_v1  ;;  %v994_v39 = vld [vmem:[%s5808_s8 + $0x5f8] sm:$0xff]  ;;  %v6325_v60 = vpack.c.bf16 %v976_v38, %v975_v24  ;;  %v995_v38 = vld [vmem:[%s5808_s8 + $0x600] sm:$0xff] }
  0x88   : > { %v6321_v50 = vpack.c.bf16 %v944_v6, %v943_v48  ;;  %v978_v6 = vld [vmem:[%s5808_s8 + $0x578] sm:$0xff]  ;;  %v1011_v48 = vld [vmem:[%s5808_s8 + $0x680] sm:$0xff]  ;;  %v1044_v24 = vld [vmem:[%s5808_s8 + $0x788] sm:$0xff] }
  0x89   : > { %4535 = vmatpush3.bf16.msra.mxu0 %v6281_v4  ;;  %8395 = vst [vmem:[#allocation75_spill] sm:$0xff] %v6307_v54  ;;  %8398 = vst [vmem:[#allocation78_spill] sm:$0xff] %v6325_v60  ;;  %v1028_v4 = vld [vmem:[%s5808_s8 + $0x708] sm:$0xff] }
  0x8a   : > { %4557 = vmatpush3.bf16.msra.mxu1 %v6285_v53  ;;  %4536 = vmatprep.subr.bf16.mxu0 %v6287_v51  ;;  %v962_v53 = vld [vmem:[%s5808_s8 + $0x4f8] sm:$0xff]  ;;  %8397 = vst [vmem:[#allocation77_spill] sm:$0xff] %v6321_v50  ;;  %v977_v51 = vld [vmem:[%s5808_s8 + $0x570] sm:$0xff] }
  0x8b   : > { %4558 = vmatprep.subr.bf16.mxu1 %v6293_v5  ;;  %v6327_v19 = vpack.c.bf16 %v962_v53, %v961_v21  ;;  %v946_v5 = vld [vmem:[%s5808_s8 + $0x478] sm:$0xff]  ;;  %v6346_v21 = vpack.c.bf16 %v978_v6, %v977_v51  ;;  %v4357_v6 = vcombine.low %v6192_v12, %v6197_v30  ;;  %v997_v30 = vld [vmem:[%s5808_s8 + $0x610] sm:$0xff] }
  0x8c   : > { %v6341_v53 = vpack.c.bf16 %v946_v5, %v945_v20  ;;  %v1014_v5 = vld [vmem:[%s5808_s8 + $0x698] sm:$0xff]  ;;  %v1045_v20 = vld [vmem:[%s5808_s8 + $0x790] sm:$0xff] }
  0x8d   : > { %4537 = vmatpush3.bf16.msra.mxu0 %v6301_v7  ;;  %8399 = vst [vmem:[#allocation79_spill] sm:$0xff] %v6327_v19  ;;  %v6333_v7 = vpack.c.bf16 %v994_v39, %v993_v16  ;;  %8402 = vst [vmem:[#allocation82_spill] sm:$0xff] %v6346_v21  ;;  %v996_v39 = vld [vmem:[%s5808_s8 + $0x608] sm:$0xff]  ;;  %v1046_v51 = vld [vmem:[%s5808_s8 + $0x798] sm:$0xff] }
  0x8e   : > { %4559 = vmatpush3.bf16.msra.mxu1 %v6305_v25  ;;  %4538 = vmatprep.subr.bf16.mxu0 %v6307_v54  ;;  %v1012_v25 = vld [vmem:[%s5808_s8 + $0x688] sm:$0xff]  ;;  %v1043_v54 = vld [vmem:[%s5808_s8 + $0x780] sm:$0xff]  ;;  %8401 = vst [vmem:[#allocation81_spill] sm:$0xff] %v6341_v53 }
  0x8f   : > { %4560 = vmatprep.subr.bf16.mxu1 %v6313_v1  ;;  %8400 = vst [vmem:[#allocation80_spill] sm:$0xff] %v6333_v7  ;;  %v6348_v16 = vpack.c.bf16 %v1012_v25, %v1011_v48  ;;  %v1027_v1 = vld [vmem:[%s5808_s8 + $0x700] sm:$0xff]  ;;  %v6354_v0 = vpack.c.bf16 %v1044_v24, %v1043_v54  ;;  %v6365_v25 = vld [vmem:[%s8335_s0 + $0x30] sm:$0xff]  ;;  %v6385_v48 = vld [vmem:[%s8335_s0 + $0xb8] sm:$0xff] }
  0x90   : > { %v6370_v54 = vld [vmem:[%s8335_s0 + $0xb0] sm:$0xff]  ;;  %v6389_v24 = vpack.c.bf16 %v1028_v4, %v1027_v1  ;;  %v1047_v1 = vld [vmem:[%s5808_s8 + $0x7a0] sm:$0xff]  ;;  %v1048_v4 = vld [vmem:[%s5808_s8 + $0x7a8] sm:$0xff] }
  0x91   : > { %4539 = vmatpush3.bf16.msra.mxu0 %v6321_v50  ;;  %8403 = vst [vmem:[#allocation83_spill] sm:$0xff] %v6348_v16  ;;  %8404 = vst [vmem:[#allocation84_spill] sm:$0xff] %v6354_v0  ;;  %v1013_v50 = vld [vmem:[%s5808_s8 + $0x690] sm:$0xff] }
  0x92   : > { %4561 = vmatpush3.bf16.msra.mxu1 %v6325_v60  ;;  %4540 = vmatprep.subr.bf16.mxu0 %v6327_v19  ;;  %v4355_v19 = vcombine.low %v6167_v42, %v6182_v33  ;;  %v6375_v42 = vpack.c.bf16 %v996_v39, %v995_v38  ;;  %v6380_v33 = vld [vmem:[%s8335_s0 + $0x38] sm:$0xff]  ;;  %8406 = vst [vmem:[#allocation86_spill] sm:$0xff] %v6389_v24  ;;  %v1029_v39 = vld [vmem:[%s5808_s8 + $0x710] sm:$0xff]  ;;  %v1015_v60 = vld [vmem:[%s5808_s8 + $0x6a0] sm:$0xff] }
  0x93   : > { %4562 = vmatprep.subr.bf16.mxu1 %v6333_v7  ;;  %v6391_v12 = vpack.c.bf16 %v1014_v5, %v1013_v50  ;;  %v998_v38 = vld [vmem:[%s5808_s8 + $0x618] sm:$0xff]  ;;  %v4362_v50 = vcombine.high %v6380_v33, %v6385_v48 }
  0x94   : > { %8405 = vst [vmem:[#allocation85_spill] sm:$0xff] %v6375_v42  ;;  %v1030_v7 = vld [vmem:[%s5808_s8 + $0x718] sm:$0xff]  ;;  %v6409_v5 = vpack.c.bf16 %v998_v38, %v997_v30  ;;  %v1032_v30 = vld [vmem:[%s5808_s8 + $0x728] sm:$0xff]  ;;  %v1017_v38 = vld [vmem:[%s5808_s8 + $0x6b0] sm:$0xff] }
  0x95   : > { %4541 = vmatpush3.bf16.msra.mxu0 %v6341_v53  ;;  %8407 = vst [vmem:[#allocation87_spill] sm:$0xff] %v6391_v12  ;;  %v6397_v53 = vpack.c.bf16 %v1046_v51, %v1045_v20  ;;  %v6415_v20 = vpack.c.bf16 %v1016_v55, %v1015_v60  ;;  %v999_v51 = vld [vmem:[%s5808_s8 + $0x620] sm:$0xff]  ;;  %v1050_v55 = vld [vmem:[%s5808_s8 + $0x7b8] sm:$0xff] }
  0x96   : > { %4563 = vmatpush3.bf16.msra.mxu1 %v6346_v21  ;;  %4570 = vmatprep.subr.bf16.mxu0 %v6348_v16  ;;  %v4360_v16 = vcombine.high %v6365_v25, %v6370_v54  ;;  %8409 = vst [vmem:[#allocation89_spill] sm:$0xff] %v6409_v5  ;;  %v1031_v21 = vld [vmem:[%s5808_s8 + $0x720] sm:$0xff] }
  0x97   : > { %4592 = vmatprep.subr.bf16.mxu1 %v6354_v0  ;;  %8408 = vst [vmem:[#allocation88_spill] sm:$0xff] %v6397_v53  ;;  %8411 = vst [vmem:[#allocation91_spill] sm:$0xff] %v6415_v20  ;;  %v1000_v0 = vld [vmem:[%s5808_s8 + $0x628] sm:$0xff] }
  0x98   : > { %1960 = vmatmul.mubr.bf16.vlgmr.msra.gmra.mrb[8].mxu0 %v4355_v19  ;;  %v6413_v19 = vpack.c.bf16 %v1030_v7, %v1029_v39  ;;  %v1049_v7 = vld [vmem:[%s5808_s8 + $0x7b0] sm:$0xff]  ;;  %v6429_v60 = vpack.c.bf16 %v1000_v0, %v999_v51  ;;  %v6433_v39 = vpack.c.bf16 %v1032_v30, %v1031_v21  ;;  %v1034_v0 = vld [vmem:[%s5808_s8 + $0x738] sm:$0xff]  ;;  %v1019_v51 = vld [vmem:[%s5808_s8 + $0x6c0] sm:$0xff] }
  0x99   : > { %2001 = vmatmul.mubr.bf16.vlgmr.msra.gmra.mrb[8].mxu1 %v4357_v6  ;;  %4571 = vmatpush3.bf16.msra.mxu0 %v6375_v42  ;;  %v6421_v6 = vpack.c.bf16 %v1048_v4, %v1047_v1  ;;  %v1018_v42 = vld [vmem:[%s5808_s8 + $0x6b8] sm:$0xff]  ;;  %v1051_v21 = vld [vmem:[%s5808_s8 + $0x7c0] sm:$0xff] }
  0x9a   : > { %4593 = vmatpush3.bf16.msra.mxu1 %v6389_v24  ;;  %4572 = vmatprep.subr.bf16.mxu0 %v6391_v12  ;;  %8410 = vst [vmem:[#allocation90_spill] sm:$0xff] %v6413_v19  ;;  %8413 = vst [vmem:[#allocation93_spill] sm:$0xff] %v6429_v60  ;;  %v6435_v1 = vpack.c.bf16 %v1018_v42, %v1017_v38  ;;  %v1002_v4 = vld [vmem:[%s5808_s8 + $0x638] sm:$0xff]  ;;  %v1052_v42 = vld [vmem:[%s5808_s8 + $0x7c8] sm:$0xff] }
  0x9b   : > { %4594 = vmatprep.subr.bf16.mxu1 %v6397_v53  ;;  %8412 = vst [vmem:[#allocation92_spill] sm:$0xff] %v6421_v6  ;;  %2041 = vmatprep.mubr.bf16.mxu0 %v4360_v16  ;;  %8414 = vst [vmem:[#allocation94_spill] sm:$0xff] %v6433_v39  ;;  %v1001_v16 = vld [vmem:[%s5808_s8 + $0x630] sm:$0xff]  ;;  %v1080_v24 = vld [vmem:[%s5808_s8 + $0x8a8] sm:$0xff] }
  0x9c   : > { %2082 = vmatprep.mubr.bf16.mxu1 %v4362_v50  ;;  %8415 = vst [vmem:[#allocation95_spill] sm:$0xff] %v6435_v1  ;;  %v1033_v53 = vld [vmem:[%s5808_s8 + $0x730] sm:$0xff]  ;;  %v6441_v50 = vpack.c.bf16 %v1050_v55, %v1049_v7  ;;  %v6449_v30 = vpack.c.bf16 %v1002_v4, %v1001_v16  ;;  %v1003_v55 = vld [vmem:[%s5808_s8 + $0x640] sm:$0xff]  ;;  %v1036_v16 = vld [vmem:[%s5808_s8 + $0x748] sm:$0xff] }
  0x9d   : > { %4573 = vmatpush3.bf16.msra.mxu0 %v6409_v5  ;;  %v6453_v38 = vpack.c.bf16 %v1034_v0, %v1033_v53  ;;  %v6461_v5 = vpack.c.bf16 %v1052_v42, %v1051_v21  ;;  %v1021_v4 = vld [vmem:[%s5808_s8 + $0x6d0] sm:$0xff] }
  0x9e   : > { %4595 = vmatpush3.bf16.msra.mxu1 %v6413_v19  ;;  %4574 = vmatprep.subr.bf16.mxu0 %v6415_v20  ;;  %8416 = vst [vmem:[#allocation96_spill] sm:$0xff] %v6441_v50  ;;  %v1020_v19 = vld [vmem:[%s5808_s8 + $0x6c8] sm:$0xff]  ;;  %8417 = vst [vmem:[#allocation97_spill] sm:$0xff] %v6449_v30  ;;  %v1035_v20 = vld [vmem:[%s5808_s8 + $0x740] sm:$0xff] }
  0x9f   : > { %4596 = vmatprep.subr.bf16.mxu1 %v6421_v6  ;;  %8418 = vst [vmem:[#allocation98_spill] sm:$0xff] %v6453_v38  ;;  %v6455_v7 = vpack.c.bf16 %v1020_v19, %v1019_v51  ;;  %v1004_v6 = vld [vmem:[%s5808_s8 + $0x648] sm:$0xff]  ;;  %8420 = vst [vmem:[#allocation100_spill] sm:$0xff] %v6461_v5  ;;  %v1053_v53 = vld [vmem:[%s5808_s8 + $0x7d0] sm:$0xff]  ;;  %v6473_v51 = vpack.c.bf16 %v1036_v16, %v1035_v20 }
  0xa0   : > { %v1054_v19 = vld [vmem:[%s5808_s8 + $0x7d8] sm:$0xff]  ;;  %v6469_v0 = vpack.c.bf16 %v1004_v6, %v1003_v55  ;;  %v1005_v42 = vld [vmem:[%s5808_s8 + $0x650] sm:$0xff]  ;;  %v1023_v55 = vld [vmem:[%s5808_s8 + $0x6e0] sm:$0xff] }
  0xa1   : > { %4575 = vmatpush3.bf16.msra.mxu0 %v6429_v60  ;;  %8419 = vst [vmem:[#allocation99_spill] sm:$0xff] %v6455_v7  ;;  %8422 = vst [vmem:[#allocation102_spill] sm:$0xff] %v6473_v51  ;;  %v6481_v60 = vpack.c.bf16 %v1054_v19, %v1053_v53  ;;  %v1038_v6 = vld [vmem:[%s5808_s8 + $0x758] sm:$0xff]  ;;  %v1055_v20 = vld [vmem:[%s5808_s8 + $0x7e0] sm:$0xff] }
  0xa2   : > { %4597 = vmatpush3.bf16.msra.mxu1 %v6433_v39  ;;  %4576 = vmatprep.subr.bf16.mxu0 %v6435_v1  ;;  %v1022_v39 = vld [vmem:[%s5808_s8 + $0x6d8] sm:$0xff]  ;;  %8421 = vst [vmem:[#allocation101_spill] sm:$0xff] %v6469_v0  ;;  %v1037_v1 = vld [vmem:[%s5808_s8 + $0x750] sm:$0xff]  ;;  %v1007_v19 = vld [vmem:[%s5808_s8 + $0x660] sm:$0xff] }
  0xa3   : > { %4598 = vmatprep.subr.bf16.mxu1 %v6441_v50  ;;  %v6475_v21 = vpack.c.bf16 %v1022_v39, %v1021_v4  ;;  %v1006_v50 = vld [vmem:[%s5808_s8 + $0x658] sm:$0xff]  ;;  %8424 = vst [vmem:[#allocation104_spill] sm:$0xff] %v6481_v60  ;;  %v1056_v39 = vld [vmem:[%s5808_s8 + $0x7e8] sm:$0xff]  ;;  %v6493_v4 = vpack.c.bf16 %v1038_v6, %v1037_v1  ;;  %v1057_v1 = vld [vmem:[%s5808_s8 + $0x7f0] sm:$0xff] }
  0xa4   : > { %v6489_v16 = vpack.c.bf16 %v1006_v50, %v1005_v42  ;;  %v1040_v50 = vld [vmem:[%s5808_s8 + $0x768] sm:$0xff]  ;;  %v1025_v42 = vld [vmem:[%s5808_s8 + $0x6f0] sm:$0xff] }
  0xa5   : > { %4577 = vmatpush3.bf16.msra.mxu0 %v6449_v30  ;;  %8423 = vst [vmem:[#allocation103_spill] sm:$0xff] %v6475_v21  ;;  %8426 = vst [vmem:[#allocation106_spill] sm:$0xff] %v6493_v4  ;;  %v6501_v30 = vpack.c.bf16 %v1056_v39, %v1055_v20  ;;  %v1009_v39 = vld [vmem:[%s5808_s8 + $0x670] sm:$0xff] }
  0xa6   : > { %4599 = vmatpush3.bf16.msra.mxu1 %v6453_v38  ;;  %4578 = vmatprep.subr.bf16.mxu0 %v6455_v7  ;;  %v1024_v38 = vld [vmem:[%s5808_s8 + $0x6e8] sm:$0xff]  ;;  %8425 = vst [vmem:[#allocation105_spill] sm:$0xff] %v6489_v16  ;;  %v1039_v7 = vld [vmem:[%s5808_s8 + $0x760] sm:$0xff] }
  0xa7   : > { %4600 = vmatprep.subr.bf16.mxu1 %v6461_v5  ;;  %v6495_v53 = vpack.c.bf16 %v1024_v38, %v1023_v55  ;;  %v1008_v5 = vld [vmem:[%s5808_s8 + $0x668] sm:$0xff]  ;;  %8428 = vst [vmem:[#allocation108_spill] sm:$0xff] %v6501_v30  ;;  %v1058_v38 = vld [vmem:[%s5808_s8 + $0x7f8] sm:$0xff]  ;;  %v6513_v55 = vpack.c.bf16 %v1040_v50, %v1039_v7  ;;  %v1059_v50 = vld [vmem:[%s5808_s8 + $0x800] sm:$0xff] }
  0xa8   : > { %v6509_v6 = vpack.c.bf16 %v1008_v5, %v1007_v19  ;;  %v1042_v5 = vld [vmem:[%s5808_s8 + $0x778] sm:$0xff]  ;;  %v1075_v19 = vld [vmem:[%s5808_s8 + $0x880] sm:$0xff]  ;;  %v1108_v7 = vld [vmem:[%s5808_s8 + $0x988] sm:$0xff] }
  0xa9   : > { %4579 = vmatpush3.bf16.msra.mxu0 %v6469_v0  ;;  %8427 = vst [vmem:[#allocation107_spill] sm:$0xff] %v6495_v53  ;;  %8430 = vst [vmem:[#allocation110_spill] sm:$0xff] %v6513_v55  ;;  %v1092_v0 = vld [vmem:[%s5808_s8 + $0x908] sm:$0xff] }
  0xaa   : > { %4601 = vmatpush3.bf16.msra.mxu1 %v6473_v51  ;;  %4580 = vmatprep.subr.bf16.mxu0 %v6475_v21  ;;  %v1026_v51 = vld [vmem:[%s5808_s8 + $0x6f8] sm:$0xff]  ;;  %8429 = vst [vmem:[#allocation109_spill] sm:$0xff] %v6509_v6  ;;  %v1041_v21 = vld [vmem:[%s5808_s8 + $0x770] sm:$0xff] }
  0xab   : > { %4602 = vmatprep.subr.bf16.mxu1 %v6481_v60  ;;  %v6515_v20 = vpack.c.bf16 %v1026_v51, %v1025_v42  ;;  %v1010_v60 = vld [vmem:[%s5808_s8 + $0x678] sm:$0xff]  ;;  %v6534_v42 = vpack.c.bf16 %v1042_v5, %v1041_v21  ;;  %v4361_v5 = vcombine.low %v6380_v33, %v6385_v48  ;;  %v1061_v48 = vld [vmem:[%s5808_s8 + $0x810] sm:$0xff] }
  0xac   : > { %v6529_v51 = vpack.c.bf16 %v1010_v60, %v1009_v39  ;;  %v1078_v60 = vld [vmem:[%s5808_s8 + $0x898] sm:$0xff]  ;;  %v1109_v39 = vld [vmem:[%s5808_s8 + $0x990] sm:$0xff] }
  0xad   : > { %4581 = vmatpush3.bf16.msra.mxu0 %v6489_v16  ;;  %8431 = vst [vmem:[#allocation111_spill] sm:$0xff] %v6515_v20  ;;  %v6521_v16 = vpack.c.bf16 %v1058_v38, %v1057_v1  ;;  %8434 = vst [vmem:[#allocation114_spill] sm:$0xff] %v6534_v42  ;;  %v1060_v38 = vld [vmem:[%s5808_s8 + $0x808] sm:$0xff]  ;;  %v1110_v21 = vld [vmem:[%s5808_s8 + $0x998] sm:$0xff] }
  0xae   : > { %4603 = vmatpush3.bf16.msra.mxu1 %v6493_v4  ;;  %4582 = vmatprep.subr.bf16.mxu0 %v6495_v53  ;;  %v1076_v4 = vld [vmem:[%s5808_s8 + $0x888] sm:$0xff]  ;;  %v1107_v53 = vld [vmem:[%s5808_s8 + $0x980] sm:$0xff]  ;;  %8433 = vst [vmem:[#allocation113_spill] sm:$0xff] %v6529_v51 }
  0xaf   : > { %4604 = vmatprep.subr.bf16.mxu1 %v6501_v30  ;;  %8432 = vst [vmem:[#allocation112_spill] sm:$0xff] %v6521_v16  ;;  %v6536_v1 = vpack.c.bf16 %v1076_v4, %v1075_v19  ;;  %v1091_v30 = vld [vmem:[%s5808_s8 + $0x900] sm:$0xff]  ;;  %v6542_v12 = vpack.c.bf16 %v1108_v7, %v1107_v53  ;;  %v6573_v19 = vld [vmem:[%s8335_s0 + $0xc8] sm:$0xff] }
  0xb0   : > { %v6553_v4 = vld [vmem:[%s8335_s0 + $0x40] sm:$0xff]  ;;  %v6577_v7 = vpack.c.bf16 %v1092_v0, %v1091_v30  ;;  %v1112_v0 = vld [vmem:[%s5808_s8 + $0x9a8] sm:$0xff] }
  0xb1   : > { %4583 = vmatpush3.bf16.msra.mxu0 %v6509_v6  ;;  %8435 = vst [vmem:[#allocation115_spill] sm:$0xff] %v6536_v1  ;;  %8436 = vst [vmem:[#allocation116_spill] sm:$0xff] %v6542_v12  ;;  %v1077_v6 = vld [vmem:[%s5808_s8 + $0x890] sm:$0xff]  ;;  %v6558_v53 = vld [vmem:[%s8335_s0 + $0xc0] sm:$0xff] }
  0xb2   : > { %4605 = vmatpush3.bf16.msra.mxu1 %v6513_v55  ;;  %4584 = vmatprep.subr.bf16.mxu0 %v6515_v20  ;;  %v4359_v20 = vcombine.low %v6365_v25, %v6370_v54  ;;  %v6563_v25 = vpack.c.bf16 %v1060_v38, %v1059_v50  ;;  %v6568_v54 = vld [vmem:[%s8335_s0 + $0x48] sm:$0xff]  ;;  %8438 = vst [vmem:[#allocation118_spill] sm:$0xff] %v6577_v7  ;;  %v1062_v50 = vld [vmem:[%s5808_s8 + $0x818] sm:$0xff]  ;;  %v1093_v38 = vld [vmem:[%s5808_s8 + $0x910] sm:$0xff] }
  0xb3   : > { %4606 = vmatprep.subr.bf16.mxu1 %v6521_v16  ;;  %v6579_v33 = vpack.c.bf16 %v1078_v60, %v1077_v6  ;;  %v1094_v16 = vld [vmem:[%s5808_s8 + $0x918] sm:$0xff]  ;;  %v1079_v55 = vld [vmem:[%s5808_s8 + $0x8a0] sm:$0xff]  ;;  %v4366_v6 = vcombine.high %v6568_v54, %v6573_v19  ;;  %v6597_v60 = vpack.c.bf16 %v1062_v50, %v1061_v48  ;;  %v1096_v48 = vld [vmem:[%s5808_s8 + $0x928] sm:$0xff] }
  0xb4   : > { %8437 = vst [vmem:[#allocation117_spill] sm:$0xff] %v6563_v25  ;;  %v1111_v30 = vld [vmem:[%s5808_s8 + $0x9a0] sm:$0xff]  ;;  %v1081_v50 = vld [vmem:[%s5808_s8 + $0x8b0] sm:$0xff] }
  0xb5   : > { %4585 = vmatpush3.bf16.msra.mxu0 %v6529_v51  ;;  %8439 = vst [vmem:[#allocation119_spill] sm:$0xff] %v6579_v33  ;;  %v6585_v51 = vpack.c.bf16 %v1110_v21, %v1109_v39  ;;  %8441 = vst [vmem:[#allocation121_spill] sm:$0xff] %v6597_v60  ;;  %v6603_v39 = vpack.c.bf16 %v1080_v24, %v1079_v55  ;;  %v1063_v21 = vld [vmem:[%s5808_s8 + $0x820] sm:$0xff]  ;;  %v1114_v24 = vld [vmem:[%s5808_s8 + $0x9b8] sm:$0xff] }
  0xb6   : > { %4607 = vmatpush3.bf16.msra.mxu1 %v6534_v42  ;;  %4614 = vmatprep.subr.bf16.mxu0 %v6536_v1  ;;  %v4364_v1 = vcombine.high %v6553_v4, %v6558_v53  ;;  %v1095_v42 = vld [vmem:[%s5808_s8 + $0x920] sm:$0xff] }
  0xb7   : > { %4636 = vmatprep.subr.bf16.mxu1 %v6542_v12  ;;  %8440 = vst [vmem:[#allocation120_spill] sm:$0xff] %v6585_v51  ;;  %8443 = vst [vmem:[#allocation123_spill] sm:$0xff] %v6603_v39  ;;  %v1064_v12 = vld [vmem:[%s5808_s8 + $0x828] sm:$0xff] }
  0xb8   : > { %2042 = vmatmul.mubr.bf16.vlgmr.msra.gmra.mrb[12].mxu0 %v4359_v20  ;;  %v6601_v20 = vpack.c.bf16 %v1094_v16, %v1093_v38  ;;  %v1113_v16 = vld [vmem:[%s5808_s8 + $0x9b0] sm:$0xff]  ;;  %v6617_v55 = vpack.c.bf16 %v1064_v12, %v1063_v21  ;;  %v6621_v38 = vpack.c.bf16 %v1096_v48, %v1095_v42  ;;  %v1098_v12 = vld [vmem:[%s5808_s8 + $0x938] sm:$0xff]  ;;  %v1083_v21 = vld [vmem:[%s5808_s8 + $0x8c0] sm:$0xff] }
  0xb9   : > { %2083 = vmatmul.mubr.bf16.vlgmr.msra.gmra.mrb[12].mxu1 %v4361_v5  ;;  %4615 = vmatpush3.bf16.msra.mxu0 %v6563_v25  ;;  %v6609_v5 = vpack.c.bf16 %v1112_v0, %v1111_v30  ;;  %v1082_v25 = vld [vmem:[%s5808_s8 + $0x8b8] sm:$0xff]  ;;  %v1115_v42 = vld [vmem:[%s5808_s8 + $0x9c0] sm:$0xff] }
  0xba   : > { %4637 = vmatpush3.bf16.msra.mxu1 %v6577_v7  ;;  %4616 = vmatprep.subr.bf16.mxu0 %v6579_v33  ;;  %8442 = vst [vmem:[#allocation122_spill] sm:$0xff] %v6601_v20  ;;  %8445 = vst [vmem:[#allocation125_spill] sm:$0xff] %v6617_v55  ;;  %v6623_v30 = vpack.c.bf16 %v1082_v25, %v1081_v50  ;;  %v1066_v0 = vld [vmem:[%s5808_s8 + $0x838] sm:$0xff]  ;;  %v1116_v25 = vld [vmem:[%s5808_s8 + $0x9c8] sm:$0xff] }
  0xbb   : > { %4638 = vmatprep.subr.bf16.mxu1 %v6585_v51  ;;  %8444 = vst [vmem:[#allocation124_spill] sm:$0xff] %v6609_v5  ;;  %2123 = vmatprep.mubr.bf16.mxu0 %v4364_v1  ;;  %8446 = vst [vmem:[#allocation126_spill] sm:$0xff] %v6621_v38  ;;  %v1065_v1 = vld [vmem:[%s5808_s8 + $0x830] sm:$0xff]  ;;  %v1144_v7 = vld [vmem:[%s5808_s8 + $0xaa8] sm:$0xff] }
  0xbc   : > { %2164 = vmatprep.mubr.bf16.mxu1 %v4366_v6  ;;  %8447 = vst [vmem:[#allocation127_spill] sm:$0xff] %v6623_v30  ;;  %v1097_v51 = vld [vmem:[%s5808_s8 + $0x930] sm:$0xff]  ;;  %v6629_v6 = vpack.c.bf16 %v1114_v24, %v1113_v16  ;;  %v6637_v48 = vpack.c.bf16 %v1066_v0, %v1065_v1  ;;  %v1067_v24 = vld [vmem:[%s5808_s8 + $0x840] sm:$0xff]  ;;  %v1100_v1 = vld [vmem:[%s5808_s8 + $0x948] sm:$0xff] }
  0xbd   : > { %4617 = vmatpush3.bf16.msra.mxu0 %v6597_v60  ;;  %v6641_v50 = vpack.c.bf16 %v1098_v12, %v1097_v51  ;;  %v6649_v60 = vpack.c.bf16 %v1116_v25, %v1115_v42  ;;  %v1085_v0 = vld [vmem:[%s5808_s8 + $0x8d0] sm:$0xff] }
  0xbe   : > { %4639 = vmatpush3.bf16.msra.mxu1 %v6601_v20  ;;  %4618 = vmatprep.subr.bf16.mxu0 %v6603_v39  ;;  %8448 = vst [vmem:[#allocation128_spill] sm:$0xff] %v6629_v6  ;;  %v1084_v20 = vld [vmem:[%s5808_s8 + $0x8c8] sm:$0xff]  ;;  %8449 = vst [vmem:[#allocation129_spill] sm:$0xff] %v6637_v48  ;;  %v1099_v39 = vld [vmem:[%s5808_s8 + $0x940] sm:$0xff] }
  0xbf   : > { %4640 = vmatprep.subr.bf16.mxu1 %v6609_v5  ;;  %8450 = vst [vmem:[#allocation130_spill] sm:$0xff] %v6641_v50  ;;  %v6643_v16 = vpack.c.bf16 %v1084_v20, %v1083_v21  ;;  %v1068_v5 = vld [vmem:[%s5808_s8 + $0x848] sm:$0xff]  ;;  %8452 = vst [vmem:[#allocation132_spill] sm:$0xff] %v6649_v60  ;;  %v1117_v51 = vld [vmem:[%s5808_s8 + $0x9d0] sm:$0xff]  ;;  %v6661_v21 = vpack.c.bf16 %v1100_v1, %v1099_v39 }
  0xc0   : > { %v1118_v20 = vld [vmem:[%s5808_s8 + $0x9d8] sm:$0xff]  ;;  %v6657_v12 = vpack.c.bf16 %v1068_v5, %v1067_v24  ;;  %v1069_v25 = vld [vmem:[%s5808_s8 + $0x850] sm:$0xff]  ;;  %v1087_v24 = vld [vmem:[%s5808_s8 + $0x8e0] sm:$0xff] }
  0xc1   : > { %4619 = vmatpush3.bf16.msra.mxu0 %v6617_v55  ;;  %8451 = vst [vmem:[#allocation131_spill] sm:$0xff] %v6643_v16  ;;  %8454 = vst [vmem:[#allocation134_spill] sm:$0xff] %v6661_v21  ;;  %v6669_v55 = vpack.c.bf16 %v1118_v20, %v1117_v51  ;;  %v1102_v5 = vld [vmem:[%s5808_s8 + $0x958] sm:$0xff]  ;;  %v1119_v39 = vld [vmem:[%s5808_s8 + $0x9e0] sm:$0xff] }
  0xc2   : > { %4641 = vmatpush3.bf16.msra.mxu1 %v6621_v38  ;;  %4620 = vmatprep.subr.bf16.mxu0 %v6623_v30  ;;  %v1086_v38 = vld [vmem:[%s5808_s8 + $0x8d8] sm:$0xff]  ;;  %8453 = vst [vmem:[#allocation133_spill] sm:$0xff] %v6657_v12  ;;  %v1101_v30 = vld [vmem:[%s5808_s8 + $0x950] sm:$0xff]  ;;  %v1071_v20 = vld [vmem:[%s5808_s8 + $0x860] sm:$0xff] }
  0xc3   : > { %4642 = vmatprep.subr.bf16.mxu1 %v6629_v6  ;;  %v6663_v42 = vpack.c.bf16 %v1086_v38, %v1085_v0  ;;  %v1070_v6 = vld [vmem:[%s5808_s8 + $0x858] sm:$0xff]  ;;  %8456 = vst [vmem:[#allocation136_spill] sm:$0xff] %v6669_v55  ;;  %v1120_v38 = vld [vmem:[%s5808_s8 + $0x9e8] sm:$0xff]  ;;  %v6681_v0 = vpack.c.bf16 %v1102_v5, %v1101_v30  ;;  %v1121_v30 = vld [vmem:[%s5808_s8 + $0x9f0] sm:$0xff] }
  0xc4   : > { %v6677_v1 = vpack.c.bf16 %v1070_v6, %v1069_v25  ;;  %v1104_v6 = vld [vmem:[%s5808_s8 + $0x968] sm:$0xff]  ;;  %v1089_v25 = vld [vmem:[%s5808_s8 + $0x8f0] sm:$0xff] }
  0xc5   : > { %4621 = vmatpush3.bf16.msra.mxu0 %v6637_v48  ;;  %8455 = vst [vmem:[#allocation135_spill] sm:$0xff] %v6663_v42  ;;  %8458 = vst [vmem:[#allocation138_spill] sm:$0xff] %v6681_v0  ;;  %v6689_v48 = vpack.c.bf16 %v1120_v38, %v1119_v39  ;;  %v1073_v38 = vld [vmem:[%s5808_s8 + $0x870] sm:$0xff] }
  0xc6   : > { %4643 = vmatpush3.bf16.msra.mxu1 %v6641_v50  ;;  %4622 = vmatprep.subr.bf16.mxu0 %v6643_v16  ;;  %v1088_v50 = vld [vmem:[%s5808_s8 + $0x8e8] sm:$0xff]  ;;  %8457 = vst [vmem:[#allocation137_spill] sm:$0xff] %v6677_v1  ;;  %v1103_v16 = vld [vmem:[%s5808_s8 + $0x960] sm:$0xff] }
  0xc7   : > { %4644 = vmatprep.subr.bf16.mxu1 %v6649_v60  ;;  %v6683_v51 = vpack.c.bf16 %v1088_v50, %v1087_v24  ;;  %v1072_v60 = vld [vmem:[%s5808_s8 + $0x868] sm:$0xff]  ;;  %8460 = vst [vmem:[#allocation140_spill] sm:$0xff] %v6689_v48  ;;  %v1122_v50 = vld [vmem:[%s5808_s8 + $0x9f8] sm:$0xff]  ;;  %v6701_v24 = vpack.c.bf16 %v1104_v6, %v1103_v16  ;;  %v1123_v6 = vld [vmem:[%s5808_s8 + $0xa00] sm:$0xff] }
  0xc8   : > { %v6697_v5 = vpack.c.bf16 %v1072_v60, %v1071_v20  ;;  %v1106_v60 = vld [vmem:[%s5808_s8 + $0x978] sm:$0xff]  ;;  %v1139_v20 = vld [vmem:[%s5808_s8 + $0xa80] sm:$0xff]  ;;  %v1172_v16 = vld [vmem:[%s5808_s8 + $0xb88] sm:$0xff] }
  0xc9   : > { %4623 = vmatpush3.bf16.msra.mxu0 %v6657_v12  ;;  %8459 = vst [vmem:[#allocation139_spill] sm:$0xff] %v6683_v51  ;;  %8462 = vst [vmem:[#allocation142_spill] sm:$0xff] %v6701_v24  ;;  %v1156_v12 = vld [vmem:[%s5808_s8 + $0xb08] sm:$0xff] }
  0xca   : > { %4645 = vmatpush3.bf16.msra.mxu1 %v6661_v21  ;;  %4624 = vmatprep.subr.bf16.mxu0 %v6663_v42  ;;  %v1090_v21 = vld [vmem:[%s5808_s8 + $0x8f8] sm:$0xff]  ;;  %8461 = vst [vmem:[#allocation141_spill] sm:$0xff] %v6697_v5  ;;  %v1105_v42 = vld [vmem:[%s5808_s8 + $0x970] sm:$0xff] }
  0xcb   : > { %4646 = vmatprep.subr.bf16.mxu1 %v6669_v55  ;;  %v6703_v39 = vpack.c.bf16 %v1090_v21, %v1089_v25  ;;  %v1074_v55 = vld [vmem:[%s5808_s8 + $0x878] sm:$0xff]  ;;  %v6722_v25 = vpack.c.bf16 %v1106_v60, %v1105_v42  ;;  %v4365_v60 = vcombine.low %v6568_v54, %v6573_v19  ;;  %v1125_v19 = vld [vmem:[%s5808_s8 + $0xa10] sm:$0xff] }
  0xcc   : > { %v6717_v21 = vpack.c.bf16 %v1074_v55, %v1073_v38  ;;  %v1142_v55 = vld [vmem:[%s5808_s8 + $0xa98] sm:$0xff]  ;;  %v1173_v38 = vld [vmem:[%s5808_s8 + $0xb90] sm:$0xff] }
  0xcd   : > { %4625 = vmatpush3.bf16.msra.mxu0 %v6677_v1  ;;  %8463 = vst [vmem:[#allocation143_spill] sm:$0xff] %v6703_v39  ;;  %v6709_v1 = vpack.c.bf16 %v1122_v50, %v1121_v30  ;;  %8466 = vst [vmem:[#allocation146_spill] sm:$0xff] %v6722_v25  ;;  %v1124_v50 = vld [vmem:[%s5808_s8 + $0xa08] sm:$0xff]  ;;  %v1174_v42 = vld [vmem:[%s5808_s8 + $0xb98] sm:$0xff] }
  0xce   : > { %4647 = vmatpush3.bf16.msra.mxu1 %v6681_v0  ;;  %4626 = vmatprep.subr.bf16.mxu0 %v6683_v51  ;;  %v1140_v0 = vld [vmem:[%s5808_s8 + $0xa88] sm:$0xff]  ;;  %v1171_v51 = vld [vmem:[%s5808_s8 + $0xb80] sm:$0xff]  ;;  %8465 = vst [vmem:[#allocation145_spill] sm:$0xff] %v6717_v21 }
  0xcf   : > { %4648 = vmatprep.subr.bf16.mxu1 %v6689_v48  ;;  %8464 = vst [vmem:[#allocation144_spill] sm:$0xff] %v6709_v1  ;;  %v6724_v30 = vpack.c.bf16 %v1140_v0, %v1139_v20  ;;  %v1155_v48 = vld [vmem:[%s5808_s8 + $0xb00] sm:$0xff]  ;;  %v6730_v33 = vpack.c.bf16 %v1172_v16, %v1171_v51  ;;  %v6741_v0 = vld [vmem:[%s8335_s0 + $0x50] sm:$0xff]  ;;  %v6761_v20 = vld [vmem:[%s8335_s0 + $0xd8] sm:$0xff] }
  0xd0   : > { %v6746_v51 = vld [vmem:[%s8335_s0 + $0xd0] sm:$0xff]  ;;  %v6765_v16 = vpack.c.bf16 %v1156_v12, %v1155_v48  ;;  %v1175_v48 = vld [vmem:[%s5808_s8 + $0xba0] sm:$0xff]  ;;  %v1176_v12 = vld [vmem:[%s5808_s8 + $0xba8] sm:$0xff] }
  0xd1   : > { %4627 = vmatpush3.bf16.msra.mxu0 %v6697_v5  ;;  %8467 = vst [vmem:[#allocation147_spill] sm:$0xff] %v6724_v30  ;;  %8468 = vst [vmem:[#allocation148_spill] sm:$0xff] %v6730_v33  ;;  %v1141_v5 = vld [vmem:[%s5808_s8 + $0xa90] sm:$0xff] }
  0xd2   : > { %4649 = vmatpush3.bf16.msra.mxu1 %v6701_v24  ;;  %4628 = vmatprep.subr.bf16.mxu0 %v6703_v39  ;;  %v4363_v39 = vcombine.low %v6553_v4, %v6558_v53  ;;  %v6751_v4 = vpack.c.bf16 %v1124_v50, %v1123_v6  ;;  %v6756_v53 = vld [vmem:[%s8335_s0 + $0x58] sm:$0xff]  ;;  %8470 = vst [vmem:[#allocation150_spill] sm:$0xff] %v6765_v16  ;;  %v1157_v50 = vld [vmem:[%s5808_s8 + $0xb10] sm:$0xff]  ;;  %v1143_v24 = vld [vmem:[%s5808_s8 + $0xaa0] sm:$0xff] }
  0xd3   : > { %4650 = vmatprep.subr.bf16.mxu1 %v6709_v1  ;;  %v6767_v54 = vpack.c.bf16 %v1142_v55, %v1141_v5  ;;  %v1126_v6 = vld [vmem:[%s5808_s8 + $0xa18] sm:$0xff]  ;;  %v4370_v5 = vcombine.high %v6756_v53, %v6761_v20 }
  0xd4   : > { %8469 = vst [vmem:[#allocation149_spill] sm:$0xff] %v6751_v4  ;;  %v1158_v1 = vld [vmem:[%s5808_s8 + $0xb18] sm:$0xff]  ;;  %v6785_v55 = vpack.c.bf16 %v1126_v6, %v1125_v19  ;;  %v1160_v19 = vld [vmem:[%s5808_s8 + $0xb28] sm:$0xff]  ;;  %v1145_v6 = vld [vmem:[%s5808_s8 + $0xab0] sm:$0xff] }
  0xd5   : > { %4629 = vmatpush3.bf16.msra.mxu0 %v6717_v21  ;;  %8471 = vst [vmem:[#allocation151_spill] sm:$0xff] %v6767_v54  ;;  %v6773_v21 = vpack.c.bf16 %v1174_v42, %v1173_v38  ;;  %v6791_v38 = vpack.c.bf16 %v1144_v7, %v1143_v24  ;;  %v1127_v42 = vld [vmem:[%s5808_s8 + $0xa20] sm:$0xff]  ;;  %v1178_v7 = vld [vmem:[%s5808_s8 + $0xbb8] sm:$0xff] }
  0xd6   : > { %4651 = vmatpush3.bf16.msra.mxu1 %v6722_v25  ;;  %4658 = vmatprep.subr.bf16.mxu0 %v6724_v30  ;;  %v4368_v30 = vcombine.high %v6741_v0, %v6746_v51  ;;  %8473 = vst [vmem:[#allocation153_spill] sm:$0xff] %v6785_v55  ;;  %v1159_v25 = vld [vmem:[%s5808_s8 + $0xb20] sm:$0xff] }
  0xd7   : > { %4680 = vmatprep.subr.bf16.mxu1 %v6730_v33  ;;  %8472 = vst [vmem:[#allocation152_spill] sm:$0xff] %v6773_v21  ;;  %8475 = vst [vmem:[#allocation155_spill] sm:$0xff] %v6791_v38  ;;  %v1128_v33 = vld [vmem:[%s5808_s8 + $0xa28] sm:$0xff] }
  0xd8   : > { %2124 = vmatmul.mubr.bf16.vlgmr.msra.gmra.mrb[16].mxu0 %v4363_v39  ;;  %v6789_v39 = vpack.c.bf16 %v1158_v1, %v1157_v50  ;;  %v1177_v1 = vld [vmem:[%s5808_s8 + $0xbb0] sm:$0xff]  ;;  %v6805_v24 = vpack.c.bf16 %v1128_v33, %v1127_v42  ;;  %v6809_v50 = vpack.c.bf16 %v1160_v19, %v1159_v25  ;;  %v1162_v33 = vld [vmem:[%s5808_s8 + $0xb38] sm:$0xff]  ;;  %v1147_v42 = vld [vmem:[%s5808_s8 + $0xac0] sm:$0xff] }
  0xd9   : > { %2165 = vmatmul.mubr.bf16.vlgmr.msra.gmra.mrb[16].mxu1 %v4365_v60  ;;  %4659 = vmatpush3.bf16.msra.mxu0 %v6751_v4  ;;  %v6797_v60 = vpack.c.bf16 %v1176_v12, %v1175_v48  ;;  %v1146_v4 = vld [vmem:[%s5808_s8 + $0xab8] sm:$0xff]  ;;  %v1180_v25 = vld [vmem:[%s5808_s8 + $0xbc8] sm:$0xff]  ;;  %v1131_v19 = vld [vmem:[%s5808_s8 + $0xa40] sm:$0xff] }
  0xda   : > { %4681 = vmatpush3.bf16.msra.mxu1 %v6765_v16  ;;  %4660 = vmatprep.subr.bf16.mxu0 %v6767_v54  ;;  %8474 = vst [vmem:[#allocation154_spill] sm:$0xff] %v6789_v39  ;;  %8477 = vst [vmem:[#allocation157_spill] sm:$0xff] %v6805_v24  ;;  %v6811_v48 = vpack.c.bf16 %v1146_v4, %v1145_v6  ;;  %v1130_v12 = vld [vmem:[%s5808_s8 + $0xa38] sm:$0xff] }
  0xdb   : > { %4682 = vmatprep.subr.bf16.mxu1 %v6773_v21  ;;  %8476 = vst [vmem:[#allocation156_spill] sm:$0xff] %v6797_v60  ;;  %2205 = vmatprep.mubr.bf16.mxu0 %v4368_v30  ;;  %8478 = vst [vmem:[#allocation158_spill] sm:$0xff] %v6809_v50  ;;  %v1129_v30 = vld [vmem:[%s5808_s8 + $0xa30] sm:$0xff]  ;;  %v1166_v54 = vld [vmem:[%s5808_s8 + $0xb58] sm:$0xff] }
  0xdc   : > { %2246 = vmatprep.mubr.bf16.mxu1 %v4370_v5  ;;  %8479 = vst [vmem:[#allocation159_spill] sm:$0xff] %v6811_v48  ;;  %v1161_v21 = vld [vmem:[%s5808_s8 + $0xb30] sm:$0xff]  ;;  %v6817_v5 = vpack.c.bf16 %v1178_v7, %v1177_v1  ;;  %v6825_v4 = vpack.c.bf16 %v1130_v12, %v1129_v30  ;;  %v1132_v7 = vld [vmem:[%s5808_s8 + $0xa48] sm:$0xff] }
  0xdd   : > { %4661 = vmatpush3.bf16.msra.mxu0 %v6785_v55  ;;  %v6830_v6 = vpack.c.bf16 %v1162_v33, %v1161_v21  ;;  %v1149_v12 = vld [vmem:[%s5808_s8 + $0xad0] sm:$0xff]  ;;  %v1182_v55 = vld [vmem:[%s5808_s8 + $0xbd8] sm:$0xff] }
  0xde   : > { %4683 = vmatpush3.bf16.msra.mxu1 %v6789_v39  ;;  %4662 = vmatprep.subr.bf16.mxu0 %v6791_v38  ;;  %8480 = vst [vmem:[#allocation160_spill] sm:$0xff] %v6817_v5  ;;  %v1148_v39 = vld [vmem:[%s5808_s8 + $0xac8] sm:$0xff]  ;;  %v1179_v38 = vld [vmem:[%s5808_s8 + $0xbc0] sm:$0xff]  ;;  %8481 = vst [vmem:[#allocation161_spill] sm:$0xff] %v6825_v4 }
  0xdf   : > { %4684 = vmatprep.subr.bf16.mxu1 %v6797_v60  ;;  %8482 = vst [vmem:[#allocation162_spill] sm:$0xff] %v6830_v6  ;;  %v6832_v1 = vpack.c.bf16 %v1148_v39, %v1147_v42  ;;  %v1163_v60 = vld [vmem:[%s5808_s8 + $0xb40] sm:$0xff]  ;;  %v6838_v30 = vpack.c.bf16 %v1180_v25, %v1179_v38  ;;  %v1133_v21 = vld [vmem:[%s5808_s8 + $0xa50] sm:$0xff]  ;;  %v1134_v33 = vld [vmem:[%s5808_s8 + $0xa58] sm:$0xff]  ;;  %v6847_v39 = vpack.c.bf16 %v1132_v7, %v1131_v19 }
  0xe0   : > { %v1165_v42 = vld [vmem:[%s5808_s8 + $0xb50] sm:$0xff]  ;;  %v1151_v38 = vld [vmem:[%s5808_s8 + $0xae0] sm:$0xff]  ;;  %v1152_v25 = vld [vmem:[%s5808_s8 + $0xae8] sm:$0xff] }
  0xe1   : > { %4663 = vmatpush3.bf16.msra.mxu0 %v6805_v24  ;;  %8483 = vst [vmem:[#allocation163_spill] sm:$0xff] %v6832_v1  ;;  %v1164_v24 = vld [vmem:[%s5808_s8 + $0xb48] sm:$0xff]  ;;  %8484 = vst [vmem:[#allocation164_spill] sm:$0xff] %v6838_v30 }
  0xe2   : > { %4685 = vmatpush3.bf16.msra.mxu1 %v6809_v50  ;;  %4664 = vmatprep.subr.bf16.mxu0 %v6811_v48  ;;  %v1150_v50 = vld [vmem:[%s5808_s8 + $0xad8] sm:$0xff]  ;;  %v1181_v48 = vld [vmem:[%s5808_s8 + $0xbd0] sm:$0xff]  ;;  %8485 = vst [vmem:[#allocation165_spill] sm:$0xff] %v6847_v39  ;;  %v1184_v19 = vld [vmem:[%s5808_s8 + $0xbe8] sm:$0xff] }
  0xe3   : > { %4686 = vmatprep.subr.bf16.mxu1 %v6817_v5  ;;  %v6855_v5 = vpack.c.bf16 %v1164_v24, %v1163_v60  ;;  %v6857_v16 = vpack.c.bf16 %v1150_v50, %v1149_v12  ;;  %v6862_v7 = vpack.c.bf16 %v1182_v55, %v1181_v48  ;;  %v1167_v60 = vld [vmem:[%s5808_s8 + $0xb60] sm:$0xff]  ;;  %v1168_v24 = vld [vmem:[%s5808_s8 + $0xb68] sm:$0xff]  ;;  %v1153_v50 = vld [vmem:[%s5808_s8 + $0xaf0] sm:$0xff]  ;;  %v6875_v55 = vpack.c.bf16 %v1166_v54, %v1165_v42 }
  0xe4   : > { %v1154_v12 = vld [vmem:[%s5808_s8 + $0xaf8] sm:$0xff]  ;;  %v6877_v48 = vpack.c.bf16 %v1152_v25, %v1151_v38  ;;  %v1169_v54 = vld [vmem:[%s5808_s8 + $0xb70] sm:$0xff]  ;;  %v1203_v38 = vld [vmem:[%s5808_s8 + $0xc80] sm:$0xff] }
  0xe5   : > { %4665 = vmatpush3.bf16.msra.mxu0 %v6825_v4  ;;  %8486 = vst [vmem:[#allocation166_spill] sm:$0xff] %v6855_v5  ;;  %8487 = vst [vmem:[#allocation167_spill] sm:$0xff] %v6857_v16  ;;  %v1135_v4 = vld [vmem:[%s5808_s8 + $0xa60] sm:$0xff]  ;;  %v1170_v42 = vld [vmem:[%s5808_s8 + $0xb78] sm:$0xff] }
  0xe6   : > { %4687 = vmatpush3.bf16.msra.mxu1 %v6830_v6  ;;  %4666 = vmatprep.subr.bf16.mxu0 %v6832_v1  ;;  %8488 = vst [vmem:[#allocation168_spill] sm:$0xff] %v6862_v7  ;;  %v6867_v6 = vpack.c.bf16 %v1134_v33, %v1133_v21  ;;  %8490 = vst [vmem:[#allocation170_spill] sm:$0xff] %v6875_v55  ;;  %v1186_v21 = vld [vmem:[%s5808_s8 + $0xbf8] sm:$0xff]  ;;  %v6882_v33 = vpack.c.bf16 %v1184_v19, %v1183_v59  ;;  %v1204_v25 = vld [vmem:[%s5808_s8 + $0xc88] sm:$0xff] }
  0xe7   : > { %4688 = vmatprep.subr.bf16.mxu1 %v6838_v30  ;;  %8491 = vst [vmem:[#allocation171_spill] sm:$0xff] %v6877_v48  ;;  %v1185_v30 = vld [vmem:[%s5808_s8 + $0xbf0] sm:$0xff]  ;;  %v1138_v1 = vld [vmem:[%s5808_s8 + $0xa78] sm:$0xff]  ;;  %v6895_v59 = vpack.c.bf16 %v1168_v24, %v1167_v60  ;;  %v6897_v19 = vpack.c.bf16 %v1154_v12, %v1153_v50  ;;  %v6915_v50 = vpack.c.bf16 %v1170_v42, %v1169_v54  ;;  %v6937_v42 = vld [vmem:[%s8335_s0 + $0x68] sm:$0xff] }
  0xe8   : > { %8489 = vst [vmem:[#allocation169_spill] sm:$0xff] %v6867_v6  ;;  %8492 = vst [vmem:[#allocation172_spill] sm:$0xff] %v6882_v33  ;;  %v1205_v60 = vld [vmem:[%s5808_s8 + $0xc90] sm:$0xff]  ;;  %v1206_v24 = vld [vmem:[%s5808_s8 + $0xc98] sm:$0xff] }
  0xe9   : > { %4667 = vmatpush3.bf16.msra.mxu0 %v6847_v39  ;;  %v1137_v39 = vld [vmem:[%s5808_s8 + $0xa70] sm:$0xff]  ;;  %8494 = vst [vmem:[#allocation174_spill] sm:$0xff] %v6895_v59  ;;  %8495 = vst [vmem:[#allocation175_spill] sm:$0xff] %v6897_v19 }
  0xea   : > { %4689 = vmatpush3.bf16.msra.mxu1 %v6855_v5  ;;  %4668 = vmatprep.subr.bf16.mxu0 %v6857_v16  ;;  %v6887_v5 = vpack.c.bf16 %v1136_v41, %v1135_v4  ;;  %v1236_v41 = vld [vmem:[%s5808_s8 + $0xd88] sm:$0xff]  ;;  %v6902_v4 = vpack.c.bf16 %v1186_v21, %v1185_v30  ;;  %v6907_v2 = vpack.c.bf16 %v1138_v1, %v1137_v39  ;;  %v1237_v12 = vld [vmem:[%s5808_s8 + $0xd90] sm:$0xff]  ;;  %v1238_v1 = vld [vmem:[%s5808_s8 + $0xd98] sm:$0xff] }
  0xeb   : > { %4690 = vmatprep.subr.bf16.mxu1 %v6862_v7  ;;  %v1235_v7 = vld [vmem:[%s5808_s8 + $0xd80] sm:$0xff]  ;;  %v1188_v16 = vld [vmem:[%s5808_s8 + $0xc08] sm:$0xff]  ;;  %8498 = vst [vmem:[#allocation178_spill] sm:$0xff] %v6915_v50  ;;  %v6917_v30 = vpack.c.bf16 %v1204_v25, %v1203_v38  ;;  %v4367_v25 = vcombine.low %v6741_v0, %v6746_v51  ;;  %v6961_v51 = vpack.c.bf16 %v1206_v24, %v1205_v60 }
  0xec   : > { %8493 = vst [vmem:[#allocation173_spill] sm:$0xff] %v6887_v5  ;;  %8496 = vst [vmem:[#allocation176_spill] sm:$0xff] %v6902_v4  ;;  %v6924_v39 = vld [vmem:[%s8335_s0 + $0x60] sm:$0xff]  ;;  %v6932_v54 = vpack.c.bf16 %v1236_v41, %v1235_v7  ;;  %v6942_v38 = vld [vmem:[%s8335_s0 + $0xe8] sm:$0xff]  ;;  %v4369_v7 = vcombine.low %v6756_v53, %v6761_v20 }
  0xed   : > { %4669 = vmatpush3.bf16.msra.mxu0 %v6867_v6  ;;  %v1187_v6 = vld [vmem:[%s5808_s8 + $0xc00] sm:$0xff]  ;;  %8497 = vst [vmem:[#allocation177_spill] sm:$0xff] %v6907_v2  ;;  %8499 = vst [vmem:[#allocation179_spill] sm:$0xff] %v6917_v30  ;;  %v1240_v20 = vld [vmem:[%s5808_s8 + $0xda8] sm:$0xff] }
  0xee   : > { %4691 = vmatpush3.bf16.msra.mxu1 %v6875_v55  ;;  %4670 = vmatprep.subr.bf16.mxu0 %v6877_v48  ;;  %v1219_v55 = vld [vmem:[%s5808_s8 + $0xd00] sm:$0xff]  ;;  %v1220_v48 = vld [vmem:[%s5808_s8 + $0xd08] sm:$0xff]  ;;  %8500 = vst [vmem:[#allocation180_spill] sm:$0xff] %v6932_v54  ;;  %v6951_v41 = vpack.c.bf16 %v1188_v16, %v1187_v6  ;;  %8503 = vst [vmem:[#allocation183_spill] sm:$0xff] %v6961_v51  ;;  %v6966_v16 = vpack.c.bf16 %v1238_v1, %v1237_v12 }
  0xef   : > { %4692 = vmatprep.subr.bf16.mxu1 %v6882_v33  ;;  %v6929_v21 = vld [vmem:[%s8335_s0 + $0xe0] sm:$0xff]  ;;  %v6959_v0 = vpack.c.bf16 %v1220_v48, %v1219_v55  ;;  %v4374_v55 = vcombine.high %v6937_v42, %v6942_v38  ;;  %v1224_v24 = vld [vmem:[%s5808_s8 + $0xd28] sm:$0xff]  ;;  %v1209_v12 = vld [vmem:[%s5808_s8 + $0xcb0] sm:$0xff] }
  0xf0   : > { %8501 = vst [vmem:[#allocation181_spill] sm:$0xff] %v6951_v41  ;;  %v1207_v33 = vld [vmem:[%s5808_s8 + $0xca0] sm:$0xff]  ;;  %8504 = vst [vmem:[#allocation184_spill] sm:$0xff] %v6966_v16  ;;  %v4372_v6 = vcombine.high %v6924_v39, %v6929_v21  ;;  %v1210_v1 = vld [vmem:[%s5808_s8 + $0xcb8] sm:$0xff] }
  0xf1   : > { %4671 = vmatpush3.bf16.msra.mxu0 %v6887_v5  ;;  %v1222_v5 = vld [vmem:[%s5808_s8 + $0xd18] sm:$0xff]  ;;  %8502 = vst [vmem:[#allocation182_spill] sm:$0xff] %v6959_v0  ;;  %v1239_v53 = vld [vmem:[%s5808_s8 + $0xda0] sm:$0xff] }
  0xf2   : > { %4693 = vmatpush3.bf16.msra.mxu1 %v6895_v59  ;;  %4672 = vmatprep.subr.bf16.mxu0 %v6897_v19  ;;  %v1189_v19 = vld [vmem:[%s5808_s8 + $0xc10] sm:$0xff]  ;;  %v1190_v59 = vld [vmem:[%s5808_s8 + $0xc18] sm:$0xff]  ;;  %v1223_v60 = vld [vmem:[%s5808_s8 + $0xd20] sm:$0xff] }
  0xf3   : > { %4694 = vmatprep.subr.bf16.mxu1 %v6902_v4  ;;  %v1221_v4 = vld [vmem:[%s5808_s8 + $0xd10] sm:$0xff]  ;;  %v6975_v48 = vpack.c.bf16 %v1190_v59, %v1189_v19  ;;  %v6990_v59 = vpack.c.bf16 %v1240_v20, %v1239_v53  ;;  %v7003_v53 = vpack.c.bf16 %v1210_v1, %v1209_v12  ;;  %v1195_v12 = vld [vmem:[%s5808_s8 + $0xc40] sm:$0xff]  ;;  %v1196_v1 = vld [vmem:[%s5808_s8 + $0xc48] sm:$0xff] }
  0xf4   : > { %v1193_v19 = vld [vmem:[%s5808_s8 + $0xc30] sm:$0xff] }
  0xf5   : > { %4673 = vmatpush3.bf16.msra.mxu0 %v6907_v2  ;;  %8505 = vst [vmem:[#allocation185_spill] sm:$0xff] %v6975_v48  ;;  %v1242_v2 = vld [vmem:[%s5808_s8 + $0xdb8] sm:$0xff]  ;;  %8508 = vst [vmem:[#allocation188_spill] sm:$0xff] %v6990_v59 }
  0xf6   : > { %4695 = vmatpush3.bf16.msra.mxu1 %v6915_v50  ;;  %4702 = vmatprep.subr.bf16.mxu0 %v6917_v30  ;;  %v1191_v30 = vld [vmem:[%s5808_s8 + $0xc20] sm:$0xff]  ;;  %v1192_v50 = vld [vmem:[%s5808_s8 + $0xc28] sm:$0xff]  ;;  %8511 = vst [vmem:[#allocation191_spill] sm:$0xff] %v7003_v53 }
  0xf7   : > { %4724 = vmatprep.subr.bf16.mxu1 %v6932_v54  ;;  %v6985_v54 = vpack.c.bf16 %v1208_v37, %v1207_v33  ;;  %v1225_v37 = vld [vmem:[%s5808_s8 + $0xd30] sm:$0xff]  ;;  %v1226_v33 = vld [vmem:[%s5808_s8 + $0xd38] sm:$0xff] }
  0xf8   : > { %2206 = vmatmul.mubr.bf16.vlgmr.msra.gmra.mrb[20].mxu0 %v4367_v25  ;;  %v6983_v25 = vpack.c.bf16 %v1222_v5, %v1221_v4  ;;  %v6995_v5 = vpack.c.bf16 %v1192_v50, %v1191_v30  ;;  %v7001_v4 = vpack.c.bf16 %v1224_v24, %v1223_v60  ;;  %v1211_v50 = vld [vmem:[%s5808_s8 + $0xcc0] sm:$0xff]  ;;  %v1212_v30 = vld [vmem:[%s5808_s8 + $0xcc8] sm:$0xff]  ;;  %v7017_v24 = vpack.c.bf16 %v1226_v33, %v1225_v37  ;;  %v1245_v37 = vld [vmem:[%s5808_s8 + $0xdd0] sm:$0xff] }
  0xf9   : > { %2247 = vmatmul.mubr.bf16.vlgmr.msra.gmra.mrb[20].mxu1 %v4369_v7  ;;  %4703 = vmatpush3.bf16.msra.mxu0 %v6951_v41  ;;  %8507 = vst [vmem:[#allocation187_spill] sm:$0xff] %v6985_v54  ;;  %v1241_v7 = vld [vmem:[%s5808_s8 + $0xdb0] sm:$0xff]  ;;  %v1194_v41 = vld [vmem:[%s5808_s8 + $0xc38] sm:$0xff] }
  0xfa   : > { %4725 = vmatpush3.bf16.msra.mxu1 %v6959_v0  ;;  %4704 = vmatprep.subr.bf16.mxu0 %v6961_v51  ;;  %8506 = vst [vmem:[#allocation186_spill] sm:$0xff] %v6983_v25  ;;  %8509 = vst [vmem:[#allocation189_spill] sm:$0xff] %v6995_v5  ;;  %v7006_v20 = vpack.c.bf16 %v1242_v2, %v1241_v7  ;;  %v7013_v60 = vpack.c.bf16 %v1194_v41, %v1193_v19  ;;  %v1227_v7 = vld [vmem:[%s5808_s8 + $0xd40] sm:$0xff]  ;;  %v1228_v41 = vld [vmem:[%s5808_s8 + $0xd48] sm:$0xff] }
  0xfb   : > { %4726 = vmatprep.subr.bf16.mxu1 %v6966_v16  ;;  %2287 = vmatprep.mubr.bf16.mxu0 %v4372_v6  ;;  %8510 = vst [vmem:[#allocation190_spill] sm:$0xff] %v7001_v4  ;;  %v1243_v6 = vld [vmem:[%s5808_s8 + $0xdc0] sm:$0xff]  ;;  %8514 = vst [vmem:[#allocation194_spill] sm:$0xff] %v7017_v24  ;;  %v7019_v2 = vpack.c.bf16 %v1212_v30, %v1211_v50  ;;  %v1213_v19 = vld [vmem:[%s5808_s8 + $0xcd0] sm:$0xff]  ;;  %v7033_v50 = vpack.c.bf16 %v1196_v1, %v1195_v12 }
  0xfc   : > { %2328 = vmatprep.mubr.bf16.mxu1 %v4374_v55  ;;  %8512 = vst [vmem:[#allocation192_spill] sm:$0xff] %v7006_v20  ;;  %v1244_v55 = vld [vmem:[%s5808_s8 + $0xdc8] sm:$0xff]  ;;  %8513 = vst [vmem:[#allocation193_spill] sm:$0xff] %v7013_v60  ;;  %v1246_v33 = vld [vmem:[%s5808_s8 + $0xdd8] sm:$0xff]  ;;  %v7037_v30 = vpack.c.bf16 %v1228_v41, %v1227_v7 }
  0xfd   : > { %4705 = vmatpush3.bf16.msra.mxu0 %v6975_v48  ;;  %8515 = vst [vmem:[#allocation195_spill] sm:$0xff] %v7019_v2  ;;  %8517 = vst [vmem:[#allocation197_spill] sm:$0xff] %v7033_v50  ;;  %v1230_v12 = vld [vmem:[%s5808_s8 + $0xd58] sm:$0xff]  ;;  %v1215_v1 = vld [vmem:[%s5808_s8 + $0xce0] sm:$0xff] }
  0xfe   : > { %4727 = vmatpush3.bf16.msra.mxu1 %v6983_v25  ;;  %4706 = vmatprep.subr.bf16.mxu0 %v6985_v54  ;;  %8518 = vst [vmem:[#allocation198_spill] sm:$0xff] %v7037_v30  ;;  %v1247_v7 = vld [vmem:[%s5808_s8 + $0xde0] sm:$0xff]  ;;  %v1272_v25 = vld [vmem:[%s5808_s8 + $0xea8] sm:$0xff] }
  0xff   : > { %4728 = vmatprep.subr.bf16.mxu1 %v6990_v59  ;;  %v7025_v59 = vpack.c.bf16 %v1244_v55, %v1243_v6  ;;  %v1197_v55 = vld [vmem:[%s5808_s8 + $0xc50] sm:$0xff] }
 0x101   : > { %4707 = vmatpush3.bf16.msra.mxu0 %v6995_v5  ;;  %8516 = vst [vmem:[#allocation196_spill] sm:$0xff] %v7025_v59  ;;  %v7045_v5 = vpack.c.bf16 %v1246_v33, %v1245_v37  ;;  %v1199_v33 = vld [vmem:[%s5808_s8 + $0xc60] sm:$0xff] }
 0x102   : > { %4729 = vmatpush3.bf16.msra.mxu1 %v7001_v4  ;;  %4708 = vmatprep.subr.bf16.mxu0 %v7003_v53  ;;  %v1214_v4 = vld [vmem:[%s5808_s8 + $0xcd8] sm:$0xff]  ;;  %v1229_v53 = vld [vmem:[%s5808_s8 + $0xd50] sm:$0xff] }
 0x103   : > { %4730 = vmatprep.subr.bf16.mxu1 %v7006_v20  ;;  %v7039_v6 = vpack.c.bf16 %v1214_v4, %v1213_v19  ;;  %v1198_v20 = vld [vmem:[%s5808_s8 + $0xc58] sm:$0xff]  ;;  %8520 = vst [vmem:[#allocation200_spill] sm:$0xff] %v7045_v5  ;;  %v1248_v4 = vld [vmem:[%s5808_s8 + $0xde8] sm:$0xff]  ;;  %v7057_v19 = vpack.c.bf16 %v1230_v12, %v1229_v53  ;;  %v1249_v53 = vld [vmem:[%s5808_s8 + $0xdf0] sm:$0xff] }
 0x104   : > { %v7053_v41 = vpack.c.bf16 %v1198_v20, %v1197_v55  ;;  %v1232_v20 = vld [vmem:[%s5808_s8 + $0xd68] sm:$0xff]  ;;  %v1217_v55 = vld [vmem:[%s5808_s8 + $0xcf0] sm:$0xff] }
 0x105   : > { %4709 = vmatpush3.bf16.msra.mxu0 %v7013_v60  ;;  %8519 = vst [vmem:[#allocation199_spill] sm:$0xff] %v7039_v6  ;;  %8522 = vst [vmem:[#allocation202_spill] sm:$0xff] %v7057_v19  ;;  %v7065_v60 = vpack.c.bf16 %v1248_v4, %v1247_v7  ;;  %v1201_v4 = vld [vmem:[%s5808_s8 + $0xc70] sm:$0xff] }
 0x106   : > { %4731 = vmatpush3.bf16.msra.mxu1 %v7017_v24  ;;  %4710 = vmatprep.subr.bf16.mxu0 %v7019_v2  ;;  %v1216_v24 = vld [vmem:[%s5808_s8 + $0xce8] sm:$0xff]  ;;  %8521 = vst [vmem:[#allocation201_spill] sm:$0xff] %v7053_v41  ;;  %v1231_v2 = vld [vmem:[%s5808_s8 + $0xd60] sm:$0xff] }
 0x107   : > { %4732 = vmatprep.subr.bf16.mxu1 %v7025_v59  ;;  %v7059_v37 = vpack.c.bf16 %v1216_v24, %v1215_v1  ;;  %v1200_v59 = vld [vmem:[%s5808_s8 + $0xc68] sm:$0xff]  ;;  %8524 = vst [vmem:[#allocation204_spill] sm:$0xff] %v7065_v60  ;;  %v1250_v24 = vld [vmem:[%s5808_s8 + $0xdf8] sm:$0xff]  ;;  %v7077_v1 = vpack.c.bf16 %v1232_v20, %v1231_v2  ;;  %v1251_v20 = vld [vmem:[%s5808_s8 + $0xe00] sm:$0xff] }
 0x108   : > { %v7073_v12 = vpack.c.bf16 %v1200_v59, %v1199_v33  ;;  %v1234_v59 = vld [vmem:[%s5808_s8 + $0xd78] sm:$0xff]  ;;  %v1267_v33 = vld [vmem:[%s5808_s8 + $0xe80] sm:$0xff]  ;;  %v1300_v2 = vld [vmem:[%s5808_s8 + $0xf88] sm:$0xff] }
 0x109   : > { %4711 = vmatpush3.bf16.msra.mxu0 %v7033_v50  ;;  %8523 = vst [vmem:[#allocation203_spill] sm:$0xff] %v7059_v37  ;;  %8526 = vst [vmem:[#allocation206_spill] sm:$0xff] %v7077_v1  ;;  %v1284_v50 = vld [vmem:[%s5808_s8 + $0xf08] sm:$0xff] }
 0x10a   : > { %4733 = vmatpush3.bf16.msra.mxu1 %v7037_v30  ;;  %4712 = vmatprep.subr.bf16.mxu0 %v7039_v6  ;;  %v1218_v30 = vld [vmem:[%s5808_s8 + $0xcf8] sm:$0xff]  ;;  %8525 = vst [vmem:[#allocation205_spill] sm:$0xff] %v7073_v12  ;;  %v1233_v6 = vld [vmem:[%s5808_s8 + $0xd70] sm:$0xff] }
 0x10b   : > { %4734 = vmatprep.subr.bf16.mxu1 %v7045_v5  ;;  %v7079_v7 = vpack.c.bf16 %v1218_v30, %v1217_v55  ;;  %v1202_v5 = vld [vmem:[%s5808_s8 + $0xc78] sm:$0xff]  ;;  %v7098_v55 = vpack.c.bf16 %v1234_v59, %v1233_v6  ;;  %v4373_v59 = vcombine.low %v6937_v42, %v6942_v38  ;;  %v1253_v38 = vld [vmem:[%s5808_s8 + $0xe10] sm:$0xff] }
 0x10c   : > { %v7093_v30 = vpack.c.bf16 %v1202_v5, %v1201_v4  ;;  %v1270_v5 = vld [vmem:[%s5808_s8 + $0xe98] sm:$0xff]  ;;  %v1301_v4 = vld [vmem:[%s5808_s8 + $0xf90] sm:$0xff] }
 0x10d   : > { %4713 = vmatpush3.bf16.msra.mxu0 %v7053_v41  ;;  %8527 = vst [vmem:[#allocation207_spill] sm:$0xff] %v7079_v7  ;;  %v7085_v41 = vpack.c.bf16 %v1250_v24, %v1249_v53  ;;  %8530 = vst [vmem:[#allocation210_spill] sm:$0xff] %v7098_v55  ;;  %v1252_v24 = vld [vmem:[%s5808_s8 + $0xe08] sm:$0xff]  ;;  %v1302_v6 = vld [vmem:[%s5808_s8 + $0xf98] sm:$0xff] }
 0x10e   : > { %4735 = vmatpush3.bf16.msra.mxu1 %v7057_v19  ;;  %4714 = vmatprep.subr.bf16.mxu0 %v7059_v37  ;;  %v1268_v19 = vld [vmem:[%s5808_s8 + $0xe88] sm:$0xff]  ;;  %v1299_v37 = vld [vmem:[%s5808_s8 + $0xf80] sm:$0xff]  ;;  %8529 = vst [vmem:[#allocation209_spill] sm:$0xff] %v7093_v30 }
 0x10f   : > { %4736 = vmatprep.subr.bf16.mxu1 %v7065_v60  ;;  %8528 = vst [vmem:[#allocation208_spill] sm:$0xff] %v7085_v41  ;;  %v7100_v53 = vpack.c.bf16 %v1268_v19, %v1267_v33  ;;  %v1283_v60 = vld [vmem:[%s5808_s8 + $0xf00] sm:$0xff]  ;;  %v7106_v54 = vpack.c.bf16 %v1300_v2, %v1299_v37  ;;  %v7117_v19 = vld [vmem:[%s8335_s0 + $0x70] sm:$0xff]  ;;  %v7137_v33 = vld [vmem:[%s8335_s0 + $0xf8] sm:$0xff] }
 0x110   : > { %v7122_v37 = vld [vmem:[%s8335_s0 + $0xf0] sm:$0xff]  ;;  %v7141_v2 = vpack.c.bf16 %v1284_v50, %v1283_v60  ;;  %v1303_v60 = vld [vmem:[%s5808_s8 + $0xfa0] sm:$0xff]  ;;  %v1304_v50 = vld [vmem:[%s5808_s8 + $0xfa8] sm:$0xff] }
 0x111   : > { %4715 = vmatpush3.bf16.msra.mxu0 %v7073_v12  ;;  %8531 = vst [vmem:[#allocation211_spill] sm:$0xff] %v7100_v53  ;;  %8532 = vst [vmem:[#allocation212_spill] sm:$0xff] %v7106_v54  ;;  %v1269_v12 = vld [vmem:[%s5808_s8 + $0xe90] sm:$0xff] }
 0x112   : > { %4737 = vmatpush3.bf16.msra.mxu1 %v7077_v1  ;;  %4716 = vmatprep.subr.bf16.mxu0 %v7079_v7  ;;  %v4371_v7 = vcombine.low %v6924_v39, %v6929_v21  ;;  %v7127_v39 = vpack.c.bf16 %v1252_v24, %v1251_v20  ;;  %v7132_v21 = vld [vmem:[%s8335_s0 + $0x78] sm:$0xff]  ;;  %8534 = vst [vmem:[#allocation214_spill] sm:$0xff] %v7141_v2  ;;  %v1285_v24 = vld [vmem:[%s5808_s8 + $0xf10] sm:$0xff]  ;;  %v1271_v1 = vld [vmem:[%s5808_s8 + $0xea0] sm:$0xff] }
 0x113   : > { %4738 = vmatprep.subr.bf16.mxu1 %v7085_v41  ;;  %v7143_v42 = vpack.c.bf16 %v1270_v5, %v1269_v12  ;;  %v1254_v20 = vld [vmem:[%s5808_s8 + $0xe18] sm:$0xff]  ;;  %v4378_v12 = vcombine.high %v7132_v21, %v7137_v33 }
 0x114   : > { %8533 = vst [vmem:[#allocation213_spill] sm:$0xff] %v7127_v39  ;;  %v1286_v41 = vld [vmem:[%s5808_s8 + $0xf18] sm:$0xff]  ;;  %v7161_v5 = vpack.c.bf16 %v1254_v20, %v1253_v38  ;;  %v1288_v38 = vld [vmem:[%s5808_s8 + $0xf28] sm:$0xff]  ;;  %v1273_v20 = vld [vmem:[%s5808_s8 + $0xeb0] sm:$0xff] }
 0x115   : > { %4717 = vmatpush3.bf16.msra.mxu0 %v7093_v30  ;;  %8535 = vst [vmem:[#allocation215_spill] sm:$0xff] %v7143_v42  ;;  %v7149_v30 = vpack.c.bf16 %v1302_v6, %v1301_v4  ;;  %v7167_v4 = vpack.c.bf16 %v1272_v25, %v1271_v1  ;;  %v1255_v6 = vld [vmem:[%s5808_s8 + $0xe20] sm:$0xff]  ;;  %v1306_v25 = vld [vmem:[%s5808_s8 + $0xfb8] sm:$0xff] }
 0x116   : > { %4739 = vmatpush3.bf16.msra.mxu1 %v7098_v55  ;;  %4746 = vmatprep.subr.bf16.mxu0 %v7100_v53  ;;  %v4376_v53 = vcombine.high %v7117_v19, %v7122_v37  ;;  %8537 = vst [vmem:[#allocation217_spill] sm:$0xff] %v7161_v5  ;;  %v1287_v55 = vld [vmem:[%s5808_s8 + $0xf20] sm:$0xff] }
 0x117   : > { %4768 = vmatprep.subr.bf16.mxu1 %v7106_v54  ;;  %8536 = vst [vmem:[#allocation216_spill] sm:$0xff] %v7149_v30  ;;  %8539 = vst [vmem:[#allocation219_spill] sm:$0xff] %v7167_v4  ;;  %v1256_v54 = vld [vmem:[%s5808_s8 + $0xe28] sm:$0xff] }
 0x118   : > { %2288 = vmatmul.mubr.bf16.vlgmr.msra.gmra.mrb[24].mxu0 %v4371_v7  ;;  %v7165_v7 = vpack.c.bf16 %v1286_v41, %v1285_v24  ;;  %v1305_v41 = vld [vmem:[%s5808_s8 + $0xfb0] sm:$0xff]  ;;  %v7181_v1 = vpack.c.bf16 %v1256_v54, %v1255_v6  ;;  %v7185_v24 = vpack.c.bf16 %v1288_v38, %v1287_v55  ;;  %v1290_v54 = vld [vmem:[%s5808_s8 + $0xf38] sm:$0xff]  ;;  %v1275_v6 = vld [vmem:[%s5808_s8 + $0xec0] sm:$0xff] }
 0x119   : > { %2329 = vmatmul.mubr.bf16.vlgmr.msra.gmra.mrb[24].mxu1 %v4373_v59  ;;  %4747 = vmatpush3.bf16.msra.mxu0 %v7127_v39  ;;  %v7173_v59 = vpack.c.bf16 %v1304_v50, %v1303_v60  ;;  %v1274_v39 = vld [vmem:[%s5808_s8 + $0xeb8] sm:$0xff]  ;;  %v1307_v55 = vld [vmem:[%s5808_s8 + $0xfc0] sm:$0xff] }
 0x11a   : > { %4769 = vmatpush3.bf16.msra.mxu1 %v7141_v2  ;;  %4748 = vmatprep.subr.bf16.mxu0 %v7143_v42  ;;  %8538 = vst [vmem:[#allocation218_spill] sm:$0xff] %v7165_v7  ;;  %8541 = vst [vmem:[#allocation221_spill] sm:$0xff] %v7181_v1  ;;  %v7187_v60 = vpack.c.bf16 %v1274_v39, %v1273_v20  ;;  %v1258_v50 = vld [vmem:[%s5808_s8 + $0xe38] sm:$0xff]  ;;  %v1308_v39 = vld [vmem:[%s5808_s8 + $0xfc8] sm:$0xff] }
 0x11b   : > { %4770 = vmatprep.subr.bf16.mxu1 %v7149_v30  ;;  %8540 = vst [vmem:[#allocation220_spill] sm:$0xff] %v7173_v59  ;;  %2369 = vmatprep.mubr.bf16.mxu0 %v4376_v53  ;;  %8542 = vst [vmem:[#allocation222_spill] sm:$0xff] %v7185_v24  ;;  %v1257_v53 = vld [vmem:[%s5808_s8 + $0xe30] sm:$0xff] }
 0x11c   : > { %2410 = vmatprep.mubr.bf16.mxu1 %v4378_v12  ;;  %8543 = vst [vmem:[#allocation223_spill] sm:$0xff] %v7187_v60  ;;  %v1289_v30 = vld [vmem:[%s5808_s8 + $0xf30] sm:$0xff]  ;;  %v7193_v12 = vpack.c.bf16 %v1306_v25, %v1305_v41  ;;  %v7201_v38 = vpack.c.bf16 %v1258_v50, %v1257_v53  ;;  %v1259_v25 = vld [vmem:[%s5808_s8 + $0xe40] sm:$0xff]  ;;  %v1292_v53 = vld [vmem:[%s5808_s8 + $0xf48] sm:$0xff] }
 0x11d   : > { %4749 = vmatpush3.bf16.msra.mxu0 %v7161_v5  ;;  %v7205_v20 = vpack.c.bf16 %v1290_v54, %v1289_v30  ;;  %v7213_v5 = vpack.c.bf16 %v1308_v39, %v1307_v55  ;;  %v1277_v50 = vld [vmem:[%s5808_s8 + $0xed0] sm:$0xff]  ;;  %v1310_v54 = vld [vmem:[%s5808_s8 + $0xfd8] sm:$0xff] }
 0x11e   : > { %4771 = vmatpush3.bf16.msra.mxu1 %v7165_v7  ;;  %4750 = vmatprep.subr.bf16.mxu0 %v7167_v4  ;;  %8544 = vst [vmem:[#allocation224_spill] sm:$0xff] %v7193_v12  ;;  %v1276_v7 = vld [vmem:[%s5808_s8 + $0xec8] sm:$0xff]  ;;  %8545 = vst [vmem:[#allocation225_spill] sm:$0xff] %v7201_v38  ;;  %v1291_v4 = vld [vmem:[%s5808_s8 + $0xf40] sm:$0xff] }
 0x11f   : > { %4772 = vmatprep.subr.bf16.mxu1 %v7173_v59  ;;  %8546 = vst [vmem:[#allocation226_spill] sm:$0xff] %v7205_v20  ;;  %v7207_v41 = vpack.c.bf16 %v1276_v7, %v1275_v6  ;;  %v1260_v59 = vld [vmem:[%s5808_s8 + $0xe48] sm:$0xff]  ;;  %8548 = vst [vmem:[#allocation228_spill] sm:$0xff] %v7213_v5  ;;  %v1309_v30 = vld [vmem:[%s5808_s8 + $0xfd0] sm:$0xff]  ;;  %v7225_v6 = vpack.c.bf16 %v1292_v53, %v1291_v4  ;;  %v2439_v4 = vlaneseq }
 0x120   : > { %v7221_v7 = vpack.c.bf16 %v1260_v59, %v1259_v25  ;;  %v1261_v39 = vld [vmem:[%s5808_s8 + $0xe50] sm:$0xff]  ;;  %v1294_v59 = vld [vmem:[%s5808_s8 + $0xf58] sm:$0xff]  ;;  %v1279_v25 = vld [vmem:[%s5808_s8 + $0xee0] sm:$0xff] }
 0x121   : > { %4751 = vmatpush3.bf16.msra.mxu0 %v7181_v1  ;;  %8547 = vst [vmem:[#allocation227_spill] sm:$0xff] %v7207_v41  ;;  %8550 = vst [vmem:[#allocation230_spill] sm:$0xff] %v7225_v6  ;;  %v7233_v1 = vpack.c.bf16 %v1310_v54, %v1309_v30  ;;  %v1312_v53 = vld [vmem:[%s5808_s8 + $0xfe8] sm:$0xff]  ;;  %v2440_v16 = vshrl.u32 %v2439_v4, 7 }
 0x122   : > { %4773 = vmatpush3.bf16.msra.mxu1 %v7185_v24  ;;  %4752 = vmatprep.subr.bf16.mxu0 %v7187_v60  ;;  %v1278_v24 = vld [vmem:[%s5808_s8 + $0xed8] sm:$0xff]  ;;  %8549 = vst [vmem:[#allocation229_spill] sm:$0xff] %v7221_v7  ;;  %v1293_v60 = vld [vmem:[%s5808_s8 + $0xf50] sm:$0xff] }
 0x123   : > { %4774 = vmatprep.subr.bf16.mxu1 %v7193_v12  ;;  %v7227_v55 = vpack.c.bf16 %v1278_v24, %v1277_v50  ;;  %v1262_v12 = vld [vmem:[%s5808_s8 + $0xe58] sm:$0xff]  ;;  %8552 = vst [vmem:[#allocation232_spill] sm:$0xff] %v7233_v1  ;;  %v1311_v24 = vld [vmem:[%s5808_s8 + $0xfe0] sm:$0xff]  ;;  %v7245_v30 = vpack.c.bf16 %v1294_v59, %v1293_v60  ;;  %v1313_v60 = vld [vmem:[%s5808_s8 + $0xff0] sm:$0xff] }
 0x124   : > { %v7241_v50 = vpack.c.bf16 %v1262_v12, %v1261_v39  ;;  %v7253_v48 = vpack.c.bf16 %v1312_v53, %v1311_v24  ;;  %v1296_v12 = vld [vmem:[%s5808_s8 + $0xf68] sm:$0xff]  ;;  %v1281_v39 = vld [vmem:[%s5808_s8 + $0xef0] sm:$0xff] }
 0x125   : > { %4753 = vmatpush3.bf16.msra.mxu0 %v7201_v38  ;;  %8551 = vst [vmem:[#allocation231_spill] sm:$0xff] %v7227_v55  ;;  %v5588_v38 = vmov 1983009808   ;;  %8554 = vst [vmem:[#allocation234_spill] sm:$0xff] %v7245_v30 }
 0x126   : > { %4775 = vmatpush3.bf16.msra.mxu1 %v7205_v20  ;;  %4754 = vmatprep.subr.bf16.mxu0 %v7207_v41  ;;  %v1280_v20 = vld [vmem:[%s5808_s8 + $0xee8] sm:$0xff]  ;;  %v2437_v42 = vunpack.c.l.s4 %v5588_v38  ;;  %8553 = vst [vmem:[#allocation233_spill] sm:$0xff] %v7241_v50  ;;  %v1263_v38 = vld [vmem:[%s5808_s8 + $0xe60] sm:$0xff] }
 0x127   : > { %4776 = vmatprep.subr.bf16.mxu1 %v7213_v5  ;;  %v7247_v54 = vpack.c.bf16 %v1280_v20, %v1279_v25  ;;  %v1264_v5 = vld [vmem:[%s5808_s8 + $0xe68] sm:$0xff]  ;;  %v1295_v41 = vld [vmem:[%s5808_s8 + $0xf60] sm:$0xff]  ;;  %v1314_v20 = vld [vmem:[%s5808_s8 + $0xff8] sm:$0xff] }
 0x128   : > { %v7275_v15 = vpack.c.bf16 %v1314_v20, %v1313_v60  ;;  %v8572_v60 = vld [vmem:[#allocation33_spill] sm:$0xff]  ;;  %v8573_v20 = vld [vmem:[#allocation34_spill] sm:$0xff] }
 0x129   : > { %4755 = vmatpush3.bf16.msra.mxu0 %v7221_v7  ;;  %v1282_v7 = vld [vmem:[%s5808_s8 + $0xef8] sm:$0xff] }
 0x12a   : > { %4777 = vmatpush3.bf16.msra.mxu1 %v7225_v6  ;;  %4756 = vmatprep.subr.bf16.mxu0 %v7227_v55  ;;  %v2438_v6 = vunpack.c.0.s8 %v2437_v42  ;;  %v2419_v42 = vld [vmem:[%s8555_s27] sm:$0xff] }
 0x12b   : > { %v4454_v2 = vpop.f32.mrb[0].mxu0  ;;  %4778 = vmatprep.subr.bf16.mxu1 %v7233_v1  ;;  %v7261_v1 = vpack.c.bf16 %v1264_v5, %v1263_v38  ;;  %v2435_v61 = vcombine.high %v2419_v42, %v2419_v42 }
 0x12c   : > { %v4476_v55 = vpop.f32.mrb[0].mxu1  ;;  %v4455_v51 = vpop.f32.mrb[1].mxu0 }
 0x12d   : > { %v4456_v59 = vadd.f32 %v4455_v51, %v4454_v2  ;;  %v4477_v25 = vpop.f32.mrb[1].mxu1  ;;  %v4457_v0 = vpop.f32.mrb[2].mxu0  ;;  %4757 = vmatpush3.bf16.msra.mxu0 %v7241_v50  ;;  %v7268_v51 = vpack.c.bf16 %v1296_v12, %v1295_v41  ;;  %v7270_v2 = vpack.c.bf16 %v1282_v7, %v1281_v39  ;;  %v1265_v50 = vld [vmem:[%s5808_s8 + $0xe70] sm:$0xff]  ;;  %v8571_v39 = vld [vmem:[#allocation32_spill] sm:$0xff] }
 0x12e   : > { %v4478_v4 = vadd.f32 %v4477_v25, %v4476_v55  ;;  %v4479_v24 = vpop.f32.mrb[2].mxu1  ;;  %4779 = vmatpush3.bf16.msra.mxu1 %v7245_v30  ;;  %v4458_v53 = vpop.f32.mrb[3].mxu0  ;;  %4758 = vmatprep.subr.bf16.mxu0 %v7247_v54  ;;  %v1298_v55 = vld [vmem:[%s5808_s8 + $0xf78] sm:$0xff]  ;;  %v7279_v25 = vsub.s32 %v2438_v6, %v2440_v16  ;;  %v7282_v41 = vpack.c.bf16 %v1266_v34, %v1265_v50  ;;  %s8774_s8 = sld [smem:[#allocation239_spill]] }
 0x12f   : > { %v4459_v5 = vadd.f32 %v4458_v53, %v4457_v0  ;;  %v4480_v38 = vpop.f32.mrb[3].mxu1  ;;  %4780 = vmatprep.subr.bf16.mxu1 %v7253_v48  ;;  %v7286_v0 = vpack.c.bf16 %v1298_v55, %v1297_v3  ;;  %v4375_v16 = vcombine.low %v7117_v19, %v7122_v37  ;;  %v8565_v19 = vld [vmem:[#allocation26_spill] sm:$0xff]  ;;  %v8566_v37 = vld [vmem:[#allocation27_spill] sm:$0xff] }
 0x130   : > { %v1839_v30 = vadd.f32 %v4478_v4, %v4456_v59  ;;  %v4481_v63 = vadd.f32 %v4480_v38, %v4479_v24  ;;  %v7290_v12 = vrot.slane %v2419_v42, %v7279_v25  ;;  %v7295_v6 = vrot.slane %v2435_v61, %v7279_v25  ;;  %v8564_v61 = vld [vmem:[#allocation25_spill] sm:$0xff]  ;;  %v8569_v50 = vld [vmem:[#allocation30_spill] sm:$0xff]  ;;  %v8574_v59 = vld [vmem:[#allocation35_spill] sm:$0xff] }
 0x131   : > { %4759 = vmatpush3.bf16.msra.mxu0 %v7261_v1  ;;  %v8575_v42 = vld [vmem:[#allocation36_spill] sm:$0xff]  ;;  %v8576_v4 = vld [vmem:[#allocation37_spill] sm:$0xff]  ;;  %v8577_v24 = vld [vmem:[#allocation38_spill] sm:$0xff] }
 0x132   : > { %v1842_v7 = vadd.f32 %v4481_v63, %v4459_v5  ;;  %4781 = vmatpush3.bf16.msra.mxu1 %v7268_v51  ;;  %4760 = vmatprep.subr.bf16.mxu0 %v7270_v2  ;;  %v4377_v63 = vcombine.low %v7132_v21, %v7137_v33  ;;  %v2450_v3 = vcombine.high %v7290_v12, %v7290_v12  ;;  %v8567_v21 = vld [vmem:[#allocation28_spill] sm:$0xff]  ;;  %v8568_v33 = vld [vmem:[#allocation29_spill] sm:$0xff]  ;;  %v8578_v53 = vld [vmem:[#allocation39_spill] sm:$0xff] }
 0x133   : > { %4782 = vmatprep.subr.bf16.mxu1 %v7275_v15  ;;  %v2451_v34 = vcombine.high %v7295_v6, %v7295_v6  ;;  %v8579_v38 = vld [vmem:[#allocation40_spill] sm:$0xff] }
 0x135   : > { %4761 = vmatpush3.bf16.msra.mxu0 %v7282_v41 }
 0x136   : > { %4783 = vmatpush3.bf16.msra.mxu1 %v7286_v0  ;;  %4790 = vmatprep.subr.bf16.mxu0 %v5813_v9 }
 0x137   : > { %4812 = vmatprep.subr.bf16.mxu1 %v5818_v13 }
 0x138   : > { %2370 = vmatmul.mubr.bf16.vlgmr.msra.gmra.mrb[28].mxu0 %v4375_v16 }
 0x139   : > { %2411 = vmatmul.mubr.bf16.vlgmr.msra.gmra.mrb[28].mxu1 %v4377_v63  ;;  %4791 = vmatpush3.bf16.msra.mxu0 %v5820_v14  ;;  %v8580_v63 = vld [vmem:[#allocation41_spill] sm:$0xff] }
 0x13a   : > { %4813 = vmatpush3.bf16.msra.mxu1 %v5826_v18  ;;  %4792 = vmatprep.subr.bf16.mxu0 %v5833_v22 }
 0x13b   : > { %4814 = vmatprep.subr.bf16.mxu1 %v5835_v23  ;;  %2635 = vmatprep.mubr.bf16.mxu0 %v2450_v3  ;;  %v2421_v3 = vld [vmem:[%s8555_s27 + $0x10] sm:$0xff] }
 0x13c   : > { %2675 = vmatprep.mubr.bf16.mxu1 %v2451_v34 }
 0x13d   : > { %4793 = vmatpush3.bf16.msra.mxu0 %v5841_v27  ;;  %v2420_v27 = vld [vmem:[%s8555_s27 + $0x8] sm:$0xff] }
 0x13e   : > { %4815 = vmatpush3.bf16.msra.mxu1 %v5848_v31  ;;  %4794 = vmatprep.subr.bf16.mxu0 %v5850_v32 }
 0x13f   : > { %4816 = vmatprep.subr.bf16.mxu1 %v5855_v36 }
 0x141   : > { %4795 = vmatpush3.bf16.msra.mxu0 %v5861_v40 }
 0x142   : > { %4817 = vmatpush3.bf16.msra.mxu1 %v5868_v44  ;;  %4796 = vmatprep.subr.bf16.mxu0 %v5870_v45 }
 0x143   : > { %4818 = vmatprep.subr.bf16.mxu1 %v5876_v49 }
 0x145   : > { %4797 = vmatpush3.bf16.msra.mxu0 %v5885_v56  ;;  %v2452_v56 = vcombine.high %v2420_v27, %v2420_v27 }
 0x146   : > { %4819 = vmatpush3.bf16.msra.mxu1 %v5889_v57  ;;  %4798 = vmatprep.subr.bf16.mxu0 %v5891_v58 }
 0x147   : > { %4820 = vmatprep.subr.bf16.mxu1 %v5897_v62 }
 0x149   : > { %4799 = vmatpush3.bf16.msra.mxu0 %v5905_v8  ;;  %v7339_v8 = vrot.slane %v2420_v27, %v7279_v25 }
 0x14a   : > { %4821 = vmatpush3.bf16.msra.mxu1 %v5909_v10  ;;  %4800 = vmatprep.subr.bf16.mxu0 %v5911_v11  ;;  %v7342_v10 = vrot.slane %v2452_v56, %v7279_v25  ;;  %v8556_v11 = vld [vmem:[#allocation17_spill] sm:$0xff]  ;;  %v8586_v56 = vld [vmem:[#allocation47_spill] sm:$0xff] }
 0x14b   : > { %v4498_v9 = vpop.f32.mrb[4].mxu0  ;;  %4822 = vmatprep.subr.bf16.mxu1 %v5917_v17  ;;  %v8557_v17 = vld [vmem:[#allocation18_spill] sm:$0xff] }
 0x14c   : > { %v4520_v13 = vpop.f32.mrb[4].mxu1  ;;  %v4499_v14 = vpop.f32.mrb[5].mxu0 }
 0x14d   : > { %v4500_v18 = vadd.f32 %v4499_v14, %v4498_v9  ;;  %v4521_v22 = vpop.f32.mrb[5].mxu1  ;;  %v4501_v23 = vpop.f32.mrb[6].mxu0  ;;  %4801 = vmatpush3.bf16.msra.mxu0 %v5925_v26  ;;  %v8558_v26 = vld [vmem:[#allocation19_spill] sm:$0xff] }
 0x14e   : > { %v4522_v31 = vadd.f32 %v4521_v22, %v4520_v13  ;;  %v4523_v32 = vpop.f32.mrb[6].mxu1  ;;  %4823 = vmatpush3.bf16.msra.mxu1 %v5929_v28  ;;  %v4502_v36 = vpop.f32.mrb[7].mxu0  ;;  %4802 = vmatprep.subr.bf16.mxu0 %v5931_v29  ;;  %v8559_v28 = vld [vmem:[#allocation20_spill] sm:$0xff]  ;;  %v2467_v29 = vcombine.high %v7339_v8, %v7339_v8  ;;  %v8581_v13 = vld [vmem:[#allocation42_spill] sm:$0xff] }
 0x14f   : > { %v1880_v40 = vadd.f32 %v4500_v18, %v1839_v30  ;;  %v4503_v44 = vadd.f32 %v4502_v36, %v4501_v23  ;;  %v4524_v45 = vpop.f32.mrb[7].mxu1  ;;  %4824 = vmatprep.subr.bf16.mxu1 %v5937_v35  ;;  %v2468_v35 = vcombine.high %v7342_v10, %v7342_v10  ;;  %v8570_v30 = vld [vmem:[#allocation31_spill] sm:$0xff]  ;;  %v2469_v36 = vcombine.high %v2421_v3, %v2421_v3 }
 0x150   : > { %v4525_v49 = vadd.f32 %v4524_v45, %v4523_v32  ;;  %v8582_v18 = vld [vmem:[#allocation43_spill] sm:$0xff]  ;;  %v8584_v45 = vld [vmem:[#allocation45_spill] sm:$0xff] }
 0x151   : > { %v1921_v57 = vadd.f32 %v4522_v31, %v1880_v40  ;;  %v1883_v58 = vadd.f32 %v4503_v44, %v1842_v7  ;;  %4803 = vmatpush3.bf16.msra.mxu0 %v5945_v43  ;;  %v8560_v43 = vld [vmem:[#allocation21_spill] sm:$0xff]  ;;  %v8583_v31 = vld [vmem:[#allocation44_spill] sm:$0xff] }
 0x152   : > { %4825 = vmatpush3.bf16.msra.mxu1 %v5949_v46  ;;  %4804 = vmatprep.subr.bf16.mxu0 %v5951_v47  ;;  %v8561_v46 = vld [vmem:[#allocation22_spill] sm:$0xff]  ;;  %v8562_v47 = vld [vmem:[#allocation23_spill] sm:$0xff] }
 0x153   : > { %v1924_v62 = vadd.f32 %v4525_v49, %v1883_v58  ;;  %4826 = vmatprep.subr.bf16.mxu1 %v5957_v52  ;;  %v8563_v52 = vld [vmem:[#allocation24_spill] sm:$0xff]  ;;  %v8585_v49 = vld [vmem:[#allocation46_spill] sm:$0xff] }
 0x155   : > { %4805 = vmatpush3.bf16.msra.mxu0 %v8556_v11  ;;  %v8587_v11 = vld [vmem:[#allocation48_spill] sm:$0xff] }
 0x156   : > { %4827 = vmatpush3.bf16.msra.mxu1 %v8557_v17  ;;  %4834 = vmatprep.subr.bf16.mxu0 %v8558_v26  ;;  %v7386_v17 = vrot.slane %v2421_v3, %v7279_v25  ;;  %v8588_v26 = vld [vmem:[#allocation49_spill] sm:$0xff] }
 0x157   : > { %4856 = vmatprep.subr.bf16.mxu1 %v8559_v28  ;;  %v8589_v28 = vld [vmem:[#allocation50_spill] sm:$0xff] }
 0x158   : > { %2636 = vmatmul.mubr.bf16.vlgmr.msra.gmra.mrb[32].mxu0 %v7290_v12 }
 0x159   : > { %2676 = vmatmul.mubr.bf16.vlgmr.msra.gmra.mrb[32].mxu1 %v7295_v6  ;;  %4835 = vmatpush3.bf16.msra.mxu0 %v8560_v43 }
 0x15a   : > { %4857 = vmatpush3.bf16.msra.mxu1 %v8561_v46  ;;  %4836 = vmatprep.subr.bf16.mxu0 %v8562_v47  ;;  %v8592_v46 = vld [vmem:[#allocation53_spill] sm:$0xff]  ;;  %v8593_v47 = vld [vmem:[#allocation54_spill] sm:$0xff] }
 0x15b   : > { %4858 = vmatprep.subr.bf16.mxu1 %v8563_v52  ;;  %2715 = vmatprep.mubr.bf16.mxu0 %v2467_v29  ;;  %v8591_v29 = vld [vmem:[#allocation52_spill] sm:$0xff]  ;;  %v8594_v52 = vld [vmem:[#allocation55_spill] sm:$0xff] }
 0x15c   : > { %2755 = vmatprep.mubr.bf16.mxu1 %v2468_v35  ;;  %v2484_v35 = vcombine.high %v7386_v17, %v7386_v17 }
 0x15d   : > { %4837 = vmatpush3.bf16.msra.mxu0 %v8564_v61  ;;  %v8595_v61 = vld [vmem:[#allocation56_spill] sm:$0xff] }
 0x15e   : > { %4859 = vmatpush3.bf16.msra.mxu1 %v8565_v19  ;;  %4838 = vmatprep.subr.bf16.mxu0 %v8566_v37  ;;  %v8596_v19 = vld [vmem:[#allocation57_spill] sm:$0xff]  ;;  %v8597_v37 = vld [vmem:[#allocation58_spill] sm:$0xff] }
 0x15f   : > { %4860 = vmatprep.subr.bf16.mxu1 %v8567_v21  ;;  %v8599_v21 = vld [vmem:[#allocation60_spill] sm:$0xff] }
 0x161   : > { %4839 = vmatpush3.bf16.msra.mxu0 %v8568_v33  ;;  %v8600_v33 = vld [vmem:[#allocation61_spill] sm:$0xff] }
 0x162   : > { %4861 = vmatpush3.bf16.msra.mxu1 %v8569_v50  ;;  %4840 = vmatprep.subr.bf16.mxu0 %v8570_v30  ;;  %v8602_v50 = vld [vmem:[#allocation63_spill] sm:$0xff]  ;;  %v8603_v30 = vld [vmem:[#allocation64_spill] sm:$0xff] }
 0x163   : > { %4862 = vmatprep.subr.bf16.mxu1 %v8571_v39  ;;  %v8604_v39 = vld [vmem:[#allocation65_spill] sm:$0xff] }
 0x165   : > { %4841 = vmatpush3.bf16.msra.mxu0 %v8572_v60  ;;  %v8605_v60 = vld [vmem:[#allocation66_spill] sm:$0xff] }
 0x166   : > { %4863 = vmatpush3.bf16.msra.mxu1 %v8573_v20  ;;  %4842 = vmatprep.subr.bf16.mxu0 %v8574_v59  ;;  %v8606_v20 = vld [vmem:[#allocation67_spill] sm:$0xff]  ;;  %v8607_v59 = vld [vmem:[#allocation68_spill] sm:$0xff] }
 0x167   : > { %4864 = vmatprep.subr.bf16.mxu1 %v8575_v42  ;;  %v8608_v42 = vld [vmem:[#allocation69_spill] sm:$0xff] }
 0x169   : > { %4843 = vmatpush3.bf16.msra.mxu0 %v8576_v4  ;;  %v8609_v4 = vld [vmem:[#allocation70_spill] sm:$0xff] }
 0x16a   : > { %4865 = vmatpush3.bf16.msra.mxu1 %v8577_v24  ;;  %4844 = vmatprep.subr.bf16.mxu0 %v8578_v53  ;;  %v8610_v24 = vld [vmem:[#allocation71_spill] sm:$0xff] }
 0x16b   : > { %v4542_v5 = vpop.f32.mrb[8].mxu0  ;;  %4866 = vmatprep.subr.bf16.mxu1 %v8579_v38 }
 0x16c   : > { %v4564_v55 = vpop.f32.mrb[8].mxu1  ;;  %v4543_v7 = vpop.f32.mrb[9].mxu0 }
 0x16d   : > { %v4544_v12 = vadd.f32 %v4543_v7, %v4542_v5  ;;  %v4565_v16 = vpop.f32.mrb[9].mxu1  ;;  %v4545_v6 = vpop.f32.mrb[10].mxu0  ;;  %4845 = vmatpush3.bf16.msra.mxu0 %v8580_v63  ;;  %v8611_v5 = vld [vmem:[#allocation72_spill] sm:$0xff]  ;;  %v2422_v63 = vld [vmem:[%s8555_s27 + $0x18] sm:$0xff] }
 0x16e   : > { %v4566_v34 = vadd.f32 %v4565_v16, %v4564_v55  ;;  %v4567_v9 = vpop.f32.mrb[10].mxu1  ;;  %4867 = vmatpush3.bf16.msra.mxu1 %v8581_v13  ;;  %v4546_v14 = vpop.f32.mrb[11].mxu0  ;;  %4846 = vmatprep.subr.bf16.mxu0 %v8582_v18 }
 0x16f   : > { %v1962_v22 = vadd.f32 %v4544_v12, %v1921_v57  ;;  %v4547_v23 = vadd.f32 %v4546_v14, %v4545_v6  ;;  %v4568_v27 = vpop.f32.mrb[11].mxu1  ;;  %4868 = vmatprep.subr.bf16.mxu1 %v8583_v31  ;;  %v7389_v57 = vrot.slane %v2469_v36, %v7279_v25  ;;  %v8612_v6 = vld [vmem:[#allocation73_spill] sm:$0xff]  ;;  %v8614_v14 = vld [vmem:[#allocation75_spill] sm:$0xff] }
 0x170   : > { %v4569_v32 = vadd.f32 %v4568_v27, %v4567_v9  ;;  %v8613_v9 = vld [vmem:[#allocation74_spill] sm:$0xff]  ;;  %v8615_v27 = vld [vmem:[#allocation76_spill] sm:$0xff] }
 0x171   : > { %v2003_v40 = vadd.f32 %v4566_v34, %v1962_v22  ;;  %v1965_v44 = vadd.f32 %v4547_v23, %v1924_v62  ;;  %4847 = vmatpush3.bf16.msra.mxu0 %v8584_v45  ;;  %v8590_v62 = vld [vmem:[#allocation51_spill] sm:$0xff]  ;;  %v2485_v43 = vcombine.high %v7389_v57, %v7389_v57  ;;  %v8616_v45 = vld [vmem:[#allocation77_spill] sm:$0xff] }
 0x172   : > { %4869 = vmatpush3.bf16.msra.mxu1 %v8585_v49  ;;  %4848 = vmatprep.subr.bf16.mxu0 %v8586_v56  ;;  %v8617_v49 = vld [vmem:[#allocation78_spill] sm:$0xff]  ;;  %v8618_v56 = vld [vmem:[#allocation79_spill] sm:$0xff] }
 0x173   : > { %v2006_v58 = vadd.f32 %v4569_v32, %v1965_v44  ;;  %4870 = vmatprep.subr.bf16.mxu1 %v8587_v11  ;;  %v2486_v32 = vcombine.high %v2422_v63, %v2422_v63 }
 0x175   : > { %4849 = vmatpush3.bf16.msra.mxu0 %v8588_v26  ;;  %v8619_v26 = vld [vmem:[#allocation80_spill] sm:$0xff] }
 0x176   : > { %4871 = vmatpush3.bf16.msra.mxu1 %v8589_v28  ;;  %4878 = vmatprep.subr.bf16.mxu0 %v8590_v62  ;;  %v7433_v28 = vrot.slane %v2422_v63, %v7279_v25  ;;  %v8620_v62 = vld [vmem:[#allocation81_spill] sm:$0xff] }
 0x177   : > { %4900 = vmatprep.subr.bf16.mxu1 %v8591_v29  ;;  %v8621_v29 = vld [vmem:[#allocation82_spill] sm:$0xff] }
 0x178   : > { %2716 = vmatmul.mubr.bf16.vlgmr.msra.gmra.mrb[36].mxu0 %v7339_v8  ;;  %v8598_v8 = vld [vmem:[#allocation59_spill] sm:$0xff] }
 0x179   : > { %2756 = vmatmul.mubr.bf16.vlgmr.msra.gmra.mrb[36].mxu1 %v7342_v10  ;;  %4879 = vmatpush3.bf16.msra.mxu0 %v8592_v46  ;;  %v8601_v10 = vld [vmem:[#allocation62_spill] sm:$0xff] }
 0x17a   : > { %4901 = vmatpush3.bf16.msra.mxu1 %v8593_v47  ;;  %4880 = vmatprep.subr.bf16.mxu0 %v8594_v52  ;;  %v8624_v47 = vld [vmem:[#allocation85_spill] sm:$0xff]  ;;  %v8625_v52 = vld [vmem:[#allocation86_spill] sm:$0xff] }
 0x17b   : > { %4902 = vmatprep.subr.bf16.mxu1 %v8595_v61  ;;  %2795 = vmatprep.mubr.bf16.mxu0 %v2484_v35  ;;  %v8623_v35 = vld [vmem:[#allocation84_spill] sm:$0xff]  ;;  %v8626_v61 = vld [vmem:[#allocation87_spill] sm:$0xff] }
 0x17c   : > { %2835 = vmatprep.mubr.bf16.mxu1 %v2485_v43  ;;  %v2501_v43 = vcombine.high %v7433_v28, %v7433_v28 }
 0x17d   : > { %4881 = vmatpush3.bf16.msra.mxu0 %v8596_v19  ;;  %v8627_v19 = vld [vmem:[#allocation88_spill] sm:$0xff] }
 0x17e   : > { %4903 = vmatpush3.bf16.msra.mxu1 %v8597_v37  ;;  %4882 = vmatprep.subr.bf16.mxu0 %v8598_v8  ;;  %v8628_v37 = vld [vmem:[#allocation89_spill] sm:$0xff]  ;;  %v8629_v8 = vld [vmem:[#allocation90_spill] sm:$0xff] }
 0x17f   : > { %4904 = vmatprep.subr.bf16.mxu1 %v8599_v21  ;;  %v8631_v21 = vld [vmem:[#allocation92_spill] sm:$0xff] }
 0x181   : > { %4883 = vmatpush3.bf16.msra.mxu0 %v8600_v33  ;;  %v8632_v33 = vld [vmem:[#allocation93_spill] sm:$0xff] }
 0x182   : > { %4905 = vmatpush3.bf16.msra.mxu1 %v8601_v10  ;;  %4884 = vmatprep.subr.bf16.mxu0 %v8602_v50  ;;  %v8634_v10 = vld [vmem:[#allocation95_spill] sm:$0xff]  ;;  %v8635_v50 = vld [vmem:[#allocation96_spill] sm:$0xff] }
 0x183   : > { %4906 = vmatprep.subr.bf16.mxu1 %v8603_v30  ;;  %v8636_v30 = vld [vmem:[#allocation97_spill] sm:$0xff] }
 0x185   : > { %4885 = vmatpush3.bf16.msra.mxu0 %v8604_v39  ;;  %v8637_v39 = vld [vmem:[#allocation98_spill] sm:$0xff] }
 0x186   : > { %4907 = vmatpush3.bf16.msra.mxu1 %v8605_v60  ;;  %4886 = vmatprep.subr.bf16.mxu0 %v8606_v20  ;;  %v8638_v60 = vld [vmem:[#allocation99_spill] sm:$0xff]  ;;  %v8639_v20 = vld [vmem:[#allocation100_spill] sm:$0xff] }
 0x187   : > { %4908 = vmatprep.subr.bf16.mxu1 %v8607_v59  ;;  %v8640_v59 = vld [vmem:[#allocation101_spill] sm:$0xff] }
 0x189   : > { %4887 = vmatpush3.bf16.msra.mxu0 %v8608_v42  ;;  %v8641_v42 = vld [vmem:[#allocation102_spill] sm:$0xff] }
 0x18a   : > { %4909 = vmatpush3.bf16.msra.mxu1 %v8609_v4  ;;  %4888 = vmatprep.subr.bf16.mxu0 %v8610_v24  ;;  %v8642_v4 = vld [vmem:[#allocation103_spill] sm:$0xff] }
 0x18b   : > { %v4586_v53 = vpop.f32.mrb[12].mxu0  ;;  %4910 = vmatprep.subr.bf16.mxu1 %v8611_v5 }
 0x18c   : > { %v4608_v38 = vpop.f32.mrb[12].mxu1  ;;  %v4587_v55 = vpop.f32.mrb[13].mxu0 }
 0x18d   : > { %v4588_v7 = vadd.f32 %v4587_v55, %v4586_v53  ;;  %v4609_v12 = vpop.f32.mrb[13].mxu1  ;;  %v4589_v16 = vpop.f32.mrb[14].mxu0  ;;  %4889 = vmatpush3.bf16.msra.mxu0 %v8612_v6  ;;  %v8643_v53 = vld [vmem:[#allocation104_spill] sm:$0xff] }
 0x18e   : > { %v4610_v3 = vadd.f32 %v4609_v12, %v4608_v38  ;;  %v4611_v34 = vpop.f32.mrb[14].mxu1  ;;  %4911 = vmatpush3.bf16.msra.mxu1 %v8613_v9  ;;  %v4590_v13 = vpop.f32.mrb[15].mxu0  ;;  %4890 = vmatprep.subr.bf16.mxu0 %v8614_v14  ;;  %v2423_v6 = vld [vmem:[%s8555_s27 + $0x20] sm:$0xff] }
 0x18f   : > { %v2044_v18 = vadd.f32 %v4588_v7, %v2003_v40  ;;  %v4591_v22 = vadd.f32 %v4590_v13, %v4589_v16  ;;  %v4612_v23 = vpop.f32.mrb[15].mxu1  ;;  %4912 = vmatprep.subr.bf16.mxu1 %v8615_v27  ;;  %v7436_v40 = vrot.slane %v2486_v32, %v7279_v25  ;;  %v8644_v16 = vld [vmem:[#allocation105_spill] sm:$0xff]  ;;  %v8646_v13 = vld [vmem:[#allocation107_spill] sm:$0xff] }
 0x190   : > { %v4613_v31 = vadd.f32 %v4612_v23, %v4611_v34  ;;  %v8645_v34 = vld [vmem:[#allocation106_spill] sm:$0xff]  ;;  %v8647_v23 = vld [vmem:[#allocation108_spill] sm:$0xff] }
 0x191   : > { %v2085_v36 = vadd.f32 %v4610_v3, %v2044_v18  ;;  %v2047_v44 = vadd.f32 %v4591_v22, %v2006_v58  ;;  %4891 = vmatpush3.bf16.msra.mxu0 %v8616_v45  ;;  %v8622_v58 = vld [vmem:[#allocation83_spill] sm:$0xff]  ;;  %v2502_v46 = vcombine.high %v7436_v40, %v7436_v40  ;;  %v8648_v45 = vld [vmem:[#allocation109_spill] sm:$0xff] }
 0x192   : > { %4913 = vmatpush3.bf16.msra.mxu1 %v8617_v49  ;;  %4892 = vmatprep.subr.bf16.mxu0 %v8618_v56  ;;  %v8649_v49 = vld [vmem:[#allocation110_spill] sm:$0xff]  ;;  %v8650_v56 = vld [vmem:[#allocation111_spill] sm:$0xff] }
 0x193   : > { %v2088_v11 = vadd.f32 %v4613_v31, %v2047_v44  ;;  %4914 = vmatprep.subr.bf16.mxu1 %v8619_v26  ;;  %v2503_v31 = vcombine.high %v2423_v6, %v2423_v6 }
 0x195   : > { %4893 = vmatpush3.bf16.msra.mxu0 %v8620_v62  ;;  %v8651_v62 = vld [vmem:[#allocation112_spill] sm:$0xff] }
 0x196   : > { %4915 = vmatpush3.bf16.msra.mxu1 %v8621_v29  ;;  %4922 = vmatprep.subr.bf16.mxu0 %v8622_v58  ;;  %v7480_v29 = vrot.slane %v2423_v6, %v7279_v25  ;;  %v8652_v58 = vld [vmem:[#allocation113_spill] sm:$0xff] }
 0x197   : > { %4944 = vmatprep.subr.bf16.mxu1 %v8623_v35  ;;  %v8653_v35 = vld [vmem:[#allocation114_spill] sm:$0xff] }
 0x198   : > { %2796 = vmatmul.mubr.bf16.vlgmr.msra.gmra.mrb[40].mxu0 %v7386_v17  ;;  %v8630_v17 = vld [vmem:[#allocation91_spill] sm:$0xff] }
 0x199   : > { %2836 = vmatmul.mubr.bf16.vlgmr.msra.gmra.mrb[40].mxu1 %v7389_v57  ;;  %4923 = vmatpush3.bf16.msra.mxu0 %v8624_v47  ;;  %v8633_v57 = vld [vmem:[#allocation94_spill] sm:$0xff] }
 0x19a   : > { %4945 = vmatpush3.bf16.msra.mxu1 %v8625_v52  ;;  %4924 = vmatprep.subr.bf16.mxu0 %v8626_v61  ;;  %v8656_v52 = vld [vmem:[#allocation117_spill] sm:$0xff]  ;;  %v8657_v61 = vld [vmem:[#allocation118_spill] sm:$0xff] }
 0x19b   : > { %4946 = vmatprep.subr.bf16.mxu1 %v8627_v19  ;;  %2875 = vmatprep.mubr.bf16.mxu0 %v2501_v43  ;;  %v8655_v43 = vld [vmem:[#allocation116_spill] sm:$0xff]  ;;  %v8658_v19 = vld [vmem:[#allocation119_spill] sm:$0xff] }
 0x19c   : > { %2915 = vmatprep.mubr.bf16.mxu1 %v2502_v46  ;;  %v2518_v46 = vcombine.high %v7480_v29, %v7480_v29 }
 0x19d   : > { %4925 = vmatpush3.bf16.msra.mxu0 %v8628_v37  ;;  %v8659_v37 = vld [vmem:[#allocation120_spill] sm:$0xff] }
 0x19e   : > { %4947 = vmatpush3.bf16.msra.mxu1 %v8629_v8  ;;  %4926 = vmatprep.subr.bf16.mxu0 %v8630_v17  ;;  %v8660_v8 = vld [vmem:[#allocation121_spill] sm:$0xff]  ;;  %v8661_v17 = vld [vmem:[#allocation122_spill] sm:$0xff] }
 0x19f   : > { %4948 = vmatprep.subr.bf16.mxu1 %v8631_v21  ;;  %v8663_v21 = vld [vmem:[#allocation124_spill] sm:$0xff] }
 0x1a1   : > { %4927 = vmatpush3.bf16.msra.mxu0 %v8632_v33  ;;  %v8664_v33 = vld [vmem:[#allocation125_spill] sm:$0xff] }
 0x1a2   : > { %4949 = vmatpush3.bf16.msra.mxu1 %v8633_v57  ;;  %4928 = vmatprep.subr.bf16.mxu0 %v8634_v10  ;;  %v8666_v57 = vld [vmem:[#allocation127_spill] sm:$0xff]  ;;  %v8667_v10 = vld [vmem:[#allocation128_spill] sm:$0xff] }
 0x1a3   : > { %4950 = vmatprep.subr.bf16.mxu1 %v8635_v50  ;;  %v8668_v50 = vld [vmem:[#allocation129_spill] sm:$0xff] }
 0x1a5   : > { %4929 = vmatpush3.bf16.msra.mxu0 %v8636_v30  ;;  %v8669_v30 = vld [vmem:[#allocation130_spill] sm:$0xff] }
 0x1a6   : > { %4951 = vmatpush3.bf16.msra.mxu1 %v8637_v39  ;;  %4930 = vmatprep.subr.bf16.mxu0 %v8638_v60  ;;  %v8670_v39 = vld [vmem:[#allocation131_spill] sm:$0xff]  ;;  %v8671_v60 = vld [vmem:[#allocation132_spill] sm:$0xff] }
 0x1a7   : > { %4952 = vmatprep.subr.bf16.mxu1 %v8639_v20  ;;  %v8672_v20 = vld [vmem:[#allocation133_spill] sm:$0xff] }
 0x1a9   : > { %4931 = vmatpush3.bf16.msra.mxu0 %v8640_v59  ;;  %v8673_v59 = vld [vmem:[#allocation134_spill] sm:$0xff] }
 0x1aa   : > { %4953 = vmatpush3.bf16.msra.mxu1 %v8641_v42  ;;  %4932 = vmatprep.subr.bf16.mxu0 %v8642_v4  ;;  %v8674_v42 = vld [vmem:[#allocation135_spill] sm:$0xff] }
 0x1ab   : > { %v4630_v24 = vpop.f32.mrb[16].mxu0  ;;  %4954 = vmatprep.subr.bf16.mxu1 %v8643_v53 }
 0x1ac   : > { %v4652_v5 = vpop.f32.mrb[16].mxu1  ;;  %v4631_v38 = vpop.f32.mrb[17].mxu0 }
 0x1ad   : > { %v4632_v55 = vadd.f32 %v4631_v38, %v4630_v24  ;;  %v4653_v7 = vpop.f32.mrb[17].mxu1  ;;  %v4633_v12 = vpop.f32.mrb[18].mxu0  ;;  %4933 = vmatpush3.bf16.msra.mxu0 %v8644_v16  ;;  %v8675_v24 = vld [vmem:[#allocation136_spill] sm:$0xff] }
 0x1ae   : > { %v4654_v63 = vadd.f32 %v4653_v7, %v4652_v5  ;;  %v4655_v3 = vpop.f32.mrb[18].mxu1  ;;  %4955 = vmatpush3.bf16.msra.mxu1 %v8645_v34  ;;  %v4634_v9 = vpop.f32.mrb[19].mxu0  ;;  %4934 = vmatprep.subr.bf16.mxu0 %v8646_v13  ;;  %v2424_v16 = vld [vmem:[%s8555_s27 + $0x28] sm:$0xff] }
 0x1af   : > { %v2126_v14 = vadd.f32 %v4632_v55, %v2085_v36  ;;  %v4635_v18 = vadd.f32 %v4634_v9, %v4633_v12  ;;  %v4656_v22 = vpop.f32.mrb[19].mxu1  ;;  %4956 = vmatprep.subr.bf16.mxu1 %v8647_v23  ;;  %v7483_v36 = vrot.slane %v2503_v31, %v7279_v25  ;;  %v8676_v12 = vld [vmem:[#allocation137_spill] sm:$0xff]  ;;  %v8678_v9 = vld [vmem:[#allocation139_spill] sm:$0xff] }
 0x1b0   : > { %v4657_v27 = vadd.f32 %v4656_v22, %v4655_v3  ;;  %v8677_v3 = vld [vmem:[#allocation138_spill] sm:$0xff]  ;;  %v8679_v22 = vld [vmem:[#allocation140_spill] sm:$0xff] }
 0x1b1   : > { %v2167_v32 = vadd.f32 %v4654_v63, %v2126_v14  ;;  %v2129_v44 = vadd.f32 %v4635_v18, %v2088_v11  ;;  %4935 = vmatpush3.bf16.msra.mxu0 %v8648_v45  ;;  %v8654_v11 = vld [vmem:[#allocation115_spill] sm:$0xff]  ;;  %v2519_v47 = vcombine.high %v7483_v36, %v7483_v36  ;;  %v8680_v45 = vld [vmem:[#allocation141_spill] sm:$0xff] }
 0x1b2   : > { %4957 = vmatpush3.bf16.msra.mxu1 %v8649_v49  ;;  %4936 = vmatprep.subr.bf16.mxu0 %v8650_v56  ;;  %v8681_v49 = vld [vmem:[#allocation142_spill] sm:$0xff]  ;;  %v8682_v56 = vld [vmem:[#allocation143_spill] sm:$0xff] }
 0x1b3   : > { %v2170_v26 = vadd.f32 %v4657_v27, %v2129_v44  ;;  %4958 = vmatprep.subr.bf16.mxu1 %v8651_v62  ;;  %v2520_v27 = vcombine.high %v2424_v16, %v2424_v16 }
 0x1b5   : > { %4937 = vmatpush3.bf16.msra.mxu0 %v8652_v58  ;;  %v8683_v58 = vld [vmem:[#allocation144_spill] sm:$0xff] }
 0x1b6   : > { %4959 = vmatpush3.bf16.msra.mxu1 %v8653_v35  ;;  %4966 = vmatprep.subr.bf16.mxu0 %v8654_v11  ;;  %v7527_v35 = vrot.slane %v2424_v16, %v7279_v25  ;;  %v8684_v11 = vld [vmem:[#allocation145_spill] sm:$0xff] }
 0x1b7   : > { %4988 = vmatprep.subr.bf16.mxu1 %v8655_v43  ;;  %v8685_v43 = vld [vmem:[#allocation146_spill] sm:$0xff] }
 0x1b8   : > { %2876 = vmatmul.mubr.bf16.vlgmr.msra.gmra.mrb[44].mxu0 %v7433_v28  ;;  %v8662_v28 = vld [vmem:[#allocation123_spill] sm:$0xff] }
 0x1b9   : > { %2916 = vmatmul.mubr.bf16.vlgmr.msra.gmra.mrb[44].mxu1 %v7436_v40  ;;  %4967 = vmatpush3.bf16.msra.mxu0 %v8656_v52  ;;  %v8665_v40 = vld [vmem:[#allocation126_spill] sm:$0xff] }
 0x1ba   : > { %4989 = vmatpush3.bf16.msra.mxu1 %v8657_v61  ;;  %4968 = vmatprep.subr.bf16.mxu0 %v8658_v19  ;;  %v8688_v61 = vld [vmem:[#allocation149_spill] sm:$0xff]  ;;  %v8689_v19 = vld [vmem:[#allocation150_spill] sm:$0xff] }
 0x1bb   : > { %4990 = vmatprep.subr.bf16.mxu1 %v8659_v37  ;;  %2955 = vmatprep.mubr.bf16.mxu0 %v2518_v46  ;;  %v8687_v46 = vld [vmem:[#allocation148_spill] sm:$0xff]  ;;  %v8690_v37 = vld [vmem:[#allocation151_spill] sm:$0xff] }
 0x1bc   : > { %2995 = vmatprep.mubr.bf16.mxu1 %v2519_v47  ;;  %v2535_v47 = vcombine.high %v7527_v35, %v7527_v35 }
 0x1bd   : > { %4969 = vmatpush3.bf16.msra.mxu0 %v8660_v8  ;;  %v8691_v8 = vld [vmem:[#allocation152_spill] sm:$0xff] }
 0x1be   : > { %4991 = vmatpush3.bf16.msra.mxu1 %v8661_v17  ;;  %4970 = vmatprep.subr.bf16.mxu0 %v8662_v28  ;;  %v8692_v17 = vld [vmem:[#allocation153_spill] sm:$0xff]  ;;  %v8693_v28 = vld [vmem:[#allocation154_spill] sm:$0xff] }
 0x1bf   : > { %4992 = vmatprep.subr.bf16.mxu1 %v8663_v21  ;;  %v8695_v21 = vld [vmem:[#allocation156_spill] sm:$0xff] }
 0x1c1   : > { %4971 = vmatpush3.bf16.msra.mxu0 %v8664_v33  ;;  %v8696_v33 = vld [vmem:[#allocation157_spill] sm:$0xff] }
 0x1c2   : > { %4993 = vmatpush3.bf16.msra.mxu1 %v8665_v40  ;;  %4972 = vmatprep.subr.bf16.mxu0 %v8666_v57  ;;  %v8698_v40 = vld [vmem:[#allocation159_spill] sm:$0xff]  ;;  %v8699_v57 = vld [vmem:[#allocation160_spill] sm:$0xff] }
 0x1c3   : > { %4994 = vmatprep.subr.bf16.mxu1 %v8667_v10  ;;  %v8700_v10 = vld [vmem:[#allocation161_spill] sm:$0xff] }
 0x1c5   : > { %4973 = vmatpush3.bf16.msra.mxu0 %v8668_v50  ;;  %v8701_v50 = vld [vmem:[#allocation162_spill] sm:$0xff] }
 0x1c6   : > { %4995 = vmatpush3.bf16.msra.mxu1 %v8669_v30  ;;  %4974 = vmatprep.subr.bf16.mxu0 %v8670_v39  ;;  %v8702_v30 = vld [vmem:[#allocation163_spill] sm:$0xff]  ;;  %v8703_v39 = vld [vmem:[#allocation164_spill] sm:$0xff] }
 0x1c7   : > { %4996 = vmatprep.subr.bf16.mxu1 %v8671_v60  ;;  %v8704_v60 = vld [vmem:[#allocation165_spill] sm:$0xff] }
 0x1c9   : > { %4975 = vmatpush3.bf16.msra.mxu0 %v8672_v20  ;;  %v8705_v20 = vld [vmem:[#allocation166_spill] sm:$0xff] }
 0x1ca   : > { %4997 = vmatpush3.bf16.msra.mxu1 %v8673_v59  ;;  %4976 = vmatprep.subr.bf16.mxu0 %v8674_v42  ;;  %v8706_v59 = vld [vmem:[#allocation167_spill] sm:$0xff] }
 0x1cb   : > { %v4674_v4 = vpop.f32.mrb[20].mxu0  ;;  %4998 = vmatprep.subr.bf16.mxu1 %v8675_v24 }
 0x1cc   : > { %v4696_v53 = vpop.f32.mrb[20].mxu1  ;;  %v4675_v5 = vpop.f32.mrb[21].mxu0 }
 0x1cd   : > { %v4676_v38 = vadd.f32 %v4675_v5, %v4674_v4  ;;  %v4697_v55 = vpop.f32.mrb[21].mxu1  ;;  %v4677_v7 = vpop.f32.mrb[22].mxu0  ;;  %4977 = vmatpush3.bf16.msra.mxu0 %v8676_v12  ;;  %v8707_v4 = vld [vmem:[#allocation168_spill] sm:$0xff]  ;;  %v2425_v12 = vld [vmem:[%s8555_s27 + $0x30] sm:$0xff] }
 0x1ce   : > { %v4698_v6 = vadd.f32 %v4697_v55, %v4696_v53  ;;  %v4699_v63 = vpop.f32.mrb[22].mxu1  ;;  %4999 = vmatpush3.bf16.msra.mxu1 %v8677_v3  ;;  %v4678_v34 = vpop.f32.mrb[23].mxu0  ;;  %4978 = vmatprep.subr.bf16.mxu0 %v8678_v9 }
 0x1cf   : > { %v2208_v13 = vadd.f32 %v4676_v38, %v2167_v32  ;;  %v4679_v14 = vadd.f32 %v4678_v34, %v4677_v7  ;;  %v4700_v18 = vpop.f32.mrb[23].mxu1  ;;  %5000 = vmatprep.subr.bf16.mxu1 %v8679_v22  ;;  %v7530_v32 = vrot.slane %v2520_v27, %v7279_v25  ;;  %v8708_v7 = vld [vmem:[#allocation169_spill] sm:$0xff]  ;;  %v8710_v34 = vld [vmem:[#allocation171_spill] sm:$0xff] }
 0x1d0   : > { %v4701_v23 = vadd.f32 %v4700_v18, %v4699_v63  ;;  %v8709_v63 = vld [vmem:[#allocation170_spill] sm:$0xff]  ;;  %v8711_v18 = vld [vmem:[#allocation172_spill] sm:$0xff] }
 0x1d1   : > { %v2249_v31 = vadd.f32 %v4698_v6, %v2208_v13  ;;  %v2211_v44 = vadd.f32 %v4679_v14, %v2170_v26  ;;  %4979 = vmatpush3.bf16.msra.mxu0 %v8680_v45  ;;  %v8686_v26 = vld [vmem:[#allocation147_spill] sm:$0xff]  ;;  %v2536_v52 = vcombine.high %v7530_v32, %v7530_v32  ;;  %v8712_v45 = vld [vmem:[#allocation173_spill] sm:$0xff] }
 0x1d2   : > { %5001 = vmatpush3.bf16.msra.mxu1 %v8681_v49  ;;  %4980 = vmatprep.subr.bf16.mxu0 %v8682_v56  ;;  %v8713_v49 = vld [vmem:[#allocation174_spill] sm:$0xff]  ;;  %v8714_v56 = vld [vmem:[#allocation175_spill] sm:$0xff] }
 0x1d3   : > { %v2252_v62 = vadd.f32 %v4701_v23, %v2211_v44  ;;  %5002 = vmatprep.subr.bf16.mxu1 %v8683_v58  ;;  %v2537_v23 = vcombine.high %v2425_v12, %v2425_v12 }
 0x1d5   : > { %4981 = vmatpush3.bf16.msra.mxu0 %v8684_v11  ;;  %v8715_v11 = vld [vmem:[#allocation176_spill] sm:$0xff] }
 0x1d6   : > { %5003 = vmatpush3.bf16.msra.mxu1 %v8685_v43  ;;  %5010 = vmatprep.subr.bf16.mxu0 %v8686_v26  ;;  %v7574_v43 = vrot.slane %v2425_v12, %v7279_v25  ;;  %v8716_v26 = vld [vmem:[#allocation177_spill] sm:$0xff] }
 0x1d7   : > { %5032 = vmatprep.subr.bf16.mxu1 %v8687_v46  ;;  %v8717_v46 = vld [vmem:[#allocation178_spill] sm:$0xff] }
 0x1d8   : > { %2956 = vmatmul.mubr.bf16.vlgmr.msra.gmra.mrb[48].mxu0 %v7480_v29  ;;  %v8694_v29 = vld [vmem:[#allocation155_spill] sm:$0xff] }
 0x1d9   : > { %2996 = vmatmul.mubr.bf16.vlgmr.msra.gmra.mrb[48].mxu1 %v7483_v36  ;;  %5011 = vmatpush3.bf16.msra.mxu0 %v8688_v61  ;;  %v8697_v36 = vld [vmem:[#allocation158_spill] sm:$0xff] }
 0x1da   : > { %5033 = vmatpush3.bf16.msra.mxu1 %v8689_v19  ;;  %5012 = vmatprep.subr.bf16.mxu0 %v8690_v37  ;;  %v8720_v19 = vld [vmem:[#allocation181_spill] sm:$0xff]  ;;  %v8721_v37 = vld [vmem:[#allocation182_spill] sm:$0xff] }
 0x1db   : > { %5034 = vmatprep.subr.bf16.mxu1 %v8691_v8  ;;  %3035 = vmatprep.mubr.bf16.mxu0 %v2535_v47  ;;  %v8719_v47 = vld [vmem:[#allocation180_spill] sm:$0xff]  ;;  %v8722_v8 = vld [vmem:[#allocation183_spill] sm:$0xff] }
 0x1dc   : > { %3075 = vmatprep.mubr.bf16.mxu1 %v2536_v52  ;;  %v2552_v52 = vcombine.high %v7574_v43, %v7574_v43 }
 0x1dd   : > { %5013 = vmatpush3.bf16.msra.mxu0 %v8692_v17  ;;  %v8723_v17 = vld [vmem:[#allocation184_spill] sm:$0xff] }
 0x1de   : > { %5035 = vmatpush3.bf16.msra.mxu1 %v8693_v28  ;;  %5014 = vmatprep.subr.bf16.mxu0 %v8694_v29  ;;  %v8724_v28 = vld [vmem:[#allocation185_spill] sm:$0xff]  ;;  %v8725_v29 = vld [vmem:[#allocation186_spill] sm:$0xff] }
 0x1df   : > { %5036 = vmatprep.subr.bf16.mxu1 %v8695_v21  ;;  %v8727_v21 = vld [vmem:[#allocation188_spill] sm:$0xff] }
 0x1e1   : > { %5015 = vmatpush3.bf16.msra.mxu0 %v8696_v33  ;;  %v8728_v33 = vld [vmem:[#allocation189_spill] sm:$0xff] }
 0x1e2   : > { %5037 = vmatpush3.bf16.msra.mxu1 %v8697_v36  ;;  %5016 = vmatprep.subr.bf16.mxu0 %v8698_v40  ;;  %v8730_v36 = vld [vmem:[#allocation191_spill] sm:$0xff]  ;;  %v8731_v40 = vld [vmem:[#allocation192_spill] sm:$0xff] }
 0x1e3   : > { %5038 = vmatprep.subr.bf16.mxu1 %v8699_v57  ;;  %v8732_v57 = vld [vmem:[#allocation193_spill] sm:$0xff] }
 0x1e5   : > { %5017 = vmatpush3.bf16.msra.mxu0 %v8700_v10  ;;  %v8733_v10 = vld [vmem:[#allocation194_spill] sm:$0xff] }
 0x1e6   : > { %5039 = vmatpush3.bf16.msra.mxu1 %v8701_v50  ;;  %5018 = vmatprep.subr.bf16.mxu0 %v8702_v30  ;;  %v8734_v50 = vld [vmem:[#allocation195_spill] sm:$0xff]  ;;  %v8735_v30 = vld [vmem:[#allocation196_spill] sm:$0xff] }
 0x1e7   : > { %5040 = vmatprep.subr.bf16.mxu1 %v8703_v39  ;;  %v8736_v39 = vld [vmem:[#allocation197_spill] sm:$0xff] }
 0x1e9   : > { %5019 = vmatpush3.bf16.msra.mxu0 %v8704_v60  ;;  %v8737_v60 = vld [vmem:[#allocation198_spill] sm:$0xff] }
 0x1ea   : > { %5041 = vmatpush3.bf16.msra.mxu1 %v8705_v20  ;;  %5020 = vmatprep.subr.bf16.mxu0 %v8706_v59  ;;  %v8738_v20 = vld [vmem:[#allocation199_spill] sm:$0xff] }
 0x1eb   : > { %v4718_v42 = vpop.f32.mrb[24].mxu0  ;;  %5042 = vmatprep.subr.bf16.mxu1 %v8707_v4 }
 0x1ec   : > { %v4740_v24 = vpop.f32.mrb[24].mxu1  ;;  %v4719_v53 = vpop.f32.mrb[25].mxu0 }
 0x1ed   : > { %v4720_v5 = vadd.f32 %v4719_v53, %v4718_v42  ;;  %v4741_v38 = vpop.f32.mrb[25].mxu1  ;;  %v4721_v55 = vpop.f32.mrb[26].mxu0  ;;  %5021 = vmatpush3.bf16.msra.mxu0 %v8708_v7  ;;  %v8739_v42 = vld [vmem:[#allocation200_spill] sm:$0xff]  ;;  %v2426_v7 = vld [vmem:[%s8555_s27 + $0x38] sm:$0xff] }
 0x1ee   : > { %v4742_v16 = vadd.f32 %v4741_v38, %v4740_v24  ;;  %v4743_v6 = vpop.f32.mrb[26].mxu1  ;;  %5043 = vmatpush3.bf16.msra.mxu1 %v8709_v63  ;;  %v4722_v3 = vpop.f32.mrb[27].mxu0  ;;  %5022 = vmatprep.subr.bf16.mxu0 %v8710_v34 }
 0x1ef   : > { %v2290_v9 = vadd.f32 %v4720_v5, %v2249_v31  ;;  %v4723_v13 = vadd.f32 %v4722_v3, %v4721_v55  ;;  %v4744_v14 = vpop.f32.mrb[27].mxu1  ;;  %5044 = vmatprep.subr.bf16.mxu1 %v8711_v18  ;;  %v7577_v31 = vrot.slane %v2537_v23, %v7279_v25  ;;  %v8740_v55 = vld [vmem:[#allocation201_spill] sm:$0xff]  ;;  %v8742_v3 = vld [vmem:[#allocation203_spill] sm:$0xff] }
 0x1f0   : > { %v4745_v22 = vadd.f32 %v4744_v14, %v4743_v6  ;;  %v8741_v6 = vld [vmem:[#allocation202_spill] sm:$0xff]  ;;  %v8743_v14 = vld [vmem:[#allocation204_spill] sm:$0xff] }
 0x1f1   : > { %v2331_v27 = vadd.f32 %v4742_v16, %v2290_v9  ;;  %v2293_v44 = vadd.f32 %v4723_v13, %v2252_v62  ;;  %5023 = vmatpush3.bf16.msra.mxu0 %v8712_v45  ;;  %v8718_v62 = vld [vmem:[#allocation179_spill] sm:$0xff]  ;;  %v2553_v61 = vcombine.high %v7577_v31, %v7577_v31  ;;  %v8744_v45 = vld [vmem:[#allocation205_spill] sm:$0xff] }
 0x1f2   : > { %5045 = vmatpush3.bf16.msra.mxu1 %v8713_v49  ;;  %5024 = vmatprep.subr.bf16.mxu0 %v8714_v56  ;;  %v8745_v49 = vld [vmem:[#allocation206_spill] sm:$0xff]  ;;  %v8746_v56 = vld [vmem:[#allocation207_spill] sm:$0xff] }
 0x1f3   : > { %v2334_v58 = vadd.f32 %v4745_v22, %v2293_v44  ;;  %5046 = vmatprep.subr.bf16.mxu1 %v8715_v11  ;;  %v2554_v22 = vcombine.high %v2426_v7, %v2426_v7 }
 0x1f5   : > { %5025 = vmatpush3.bf16.msra.mxu0 %v8716_v26  ;;  %v8747_v26 = vld [vmem:[#allocation208_spill] sm:$0xff] }
 0x1f6   : > { %5047 = vmatpush3.bf16.msra.mxu1 %v8717_v46  ;;  %5054 = vmatprep.subr.bf16.mxu0 %v8718_v62  ;;  %v7628_v46 = vrot.slane %v2554_v22, %v7279_v25 }
 0x1f7   : > { %5076 = vmatprep.subr.bf16.mxu1 %v8719_v47  ;;  %v8749_v47 = vld [vmem:[#allocation210_spill] sm:$0xff] }
 0x1f8   : > { %3036 = vmatmul.mubr.bf16.vlgmr.msra.gmra.mrb[52].mxu0 %v7527_v35  ;;  %v8726_v35 = vld [vmem:[#allocation187_spill] sm:$0xff] }
 0x1f9   : > { %3076 = vmatmul.mubr.bf16.vlgmr.msra.gmra.mrb[52].mxu1 %v7530_v32  ;;  %5055 = vmatpush3.bf16.msra.mxu0 %v8720_v19  ;;  %v8729_v32 = vld [vmem:[#allocation190_spill] sm:$0xff] }
 0x1fa   : > { %5077 = vmatpush3.bf16.msra.mxu1 %v8721_v37  ;;  %5056 = vmatprep.subr.bf16.mxu0 %v8722_v8  ;;  %v8752_v37 = vld [vmem:[#allocation213_spill] sm:$0xff]  ;;  %v8753_v8 = vld [vmem:[#allocation214_spill] sm:$0xff] }
 0x1fb   : > { %5078 = vmatprep.subr.bf16.mxu1 %v8723_v17  ;;  %3115 = vmatprep.mubr.bf16.mxu0 %v2552_v52  ;;  %v8750_v52 = vld [vmem:[#allocation211_spill] sm:$0xff] }
 0x1fc   : > { %3155 = vmatprep.mubr.bf16.mxu1 %v2553_v61  ;;  %v8751_v61 = vld [vmem:[#allocation212_spill] sm:$0xff]  ;;  %v8754_v17 = vld [vmem:[#allocation215_spill] sm:$0xff] }
 0x1fd   : > { %5057 = vmatpush3.bf16.msra.mxu0 %v8724_v28  ;;  %v8755_v28 = vld [vmem:[#allocation216_spill] sm:$0xff] }
 0x1fe   : > { %5079 = vmatpush3.bf16.msra.mxu1 %v8725_v29  ;;  %5058 = vmatprep.subr.bf16.mxu0 %v8726_v35  ;;  %v8756_v29 = vld [vmem:[#allocation217_spill] sm:$0xff]  ;;  %v8757_v35 = vld [vmem:[#allocation218_spill] sm:$0xff] }
 0x1ff   : > { %5080 = vmatprep.subr.bf16.mxu1 %v8727_v21  ;;  %v8759_v21 = vld [vmem:[#allocation220_spill] sm:$0xff] }
 0x201   : > { %5059 = vmatpush3.bf16.msra.mxu0 %v8728_v33  ;;  %v8760_v33 = vld [vmem:[#allocation221_spill] sm:$0xff] }
 0x202   : > { %5081 = vmatpush3.bf16.msra.mxu1 %v8729_v32  ;;  %5060 = vmatprep.subr.bf16.mxu0 %v8730_v36  ;;  %v8762_v32 = vld [vmem:[#allocation223_spill] sm:$0xff]  ;;  %v8763_v36 = vld [vmem:[#allocation224_spill] sm:$0xff] }
 0x203   : > { %5082 = vmatprep.subr.bf16.mxu1 %v8731_v40  ;;  %v8764_v40 = vld [vmem:[#allocation225_spill] sm:$0xff] }
 0x205   : > { %5061 = vmatpush3.bf16.msra.mxu0 %v8732_v57  ;;  %v8765_v57 = vld [vmem:[#allocation226_spill] sm:$0xff] }
 0x206   : > { %5083 = vmatpush3.bf16.msra.mxu1 %v8733_v10  ;;  %5062 = vmatprep.subr.bf16.mxu0 %v8734_v50  ;;  %v8766_v10 = vld [vmem:[#allocation227_spill] sm:$0xff]  ;;  %v8767_v50 = vld [vmem:[#allocation228_spill] sm:$0xff] }
 0x207   : > { %5084 = vmatprep.subr.bf16.mxu1 %v8735_v30  ;;  %v8768_v30 = vld [vmem:[#allocation229_spill] sm:$0xff] }
 0x209   : > { %5063 = vmatpush3.bf16.msra.mxu0 %v8736_v39  ;;  %v8769_v39 = vld [vmem:[#allocation230_spill] sm:$0xff] }
 0x20a   : > { %5085 = vmatpush3.bf16.msra.mxu1 %v8737_v60  ;;  %5064 = vmatprep.subr.bf16.mxu0 %v8738_v20  ;;  %v8770_v60 = vld [vmem:[#allocation231_spill] sm:$0xff] }
 0x20b   : > { %v4762_v59 = vpop.f32.mrb[28].mxu0  ;;  %5086 = vmatprep.subr.bf16.mxu1 %v8739_v42 }
 0x20c   : > { %v4784_v4 = vpop.f32.mrb[28].mxu1  ;;  %v4763_v24 = vpop.f32.mrb[29].mxu0 }
 0x20d   : > { %v4764_v53 = vadd.f32 %v4763_v24, %v4762_v59  ;;  %v4785_v5 = vpop.f32.mrb[29].mxu1  ;;  %v4765_v38 = vpop.f32.mrb[30].mxu0  ;;  %5065 = vmatpush3.bf16.msra.mxu0 %v8740_v55  ;;  %v8771_v59 = vld [vmem:[#allocation232_spill] sm:$0xff] }
 0x20e   : > { %v4786_v12 = vadd.f32 %v4785_v5, %v4784_v4  ;;  %v4787_v16 = vpop.f32.mrb[30].mxu1  ;;  %5087 = vmatpush3.bf16.msra.mxu1 %v8741_v6  ;;  %v4766_v63 = vpop.f32.mrb[31].mxu0  ;;  %5066 = vmatprep.subr.bf16.mxu0 %v8742_v3 }
 0x20f   : > { %v2372_v34 = vadd.f32 %v4764_v53, %v2331_v27  ;;  %v4767_v9 = vadd.f32 %v4766_v63, %v4765_v38  ;;  %v4788_v13 = vpop.f32.mrb[31].mxu1  ;;  %5088 = vmatprep.subr.bf16.mxu1 %v8743_v14  ;;  %v7625_v27 = vrot.slane %v2426_v7, %v7279_v25  ;;  %v2570_v25 = vcombine.high %v7628_v46, %v7628_v46  ;;  %v8772_v38 = vld [vmem:[#allocation233_spill] sm:$0xff] }
 0x210   : > { %v4789_v18 = vadd.f32 %v4788_v13, %v4787_v16  ;;  %v5589_v63 = vmov 65535  }
 0x211   : > { %v7616_v23 = vadd.f32 %v4786_v12, %v2372_v34  ;;  %v2375_v44 = vadd.f32 %v4767_v9, %v2334_v58  ;;  %5067 = vmatpush3.bf16.msra.mxu0 %v8744_v45  ;;  %v8748_v58 = vld [vmem:[#allocation209_spill] sm:$0xff]  ;;  %v2569_v19 = vcombine.high %v7625_v27, %v7625_v27  ;;  %v8773_v12 = vld [vmem:[#allocation234_spill] sm:$0xff]  ;;  %v3258_v3 = vsel %vm3256_vm0, 4294967295, %v5589_v63  ;;  %v3243_v9 = vld [vmem:[%s8774_s8] sm:$0x3]  ;;  %s8779_s8 = sld [smem:[#allocation242_spill]] }
 0x212   : > { %5089 = vmatpush3.bf16.msra.mxu1 %v8745_v49  ;;  %5068 = vmatprep.subr.bf16.mxu0 %v8746_v56  ;;  %v3259_v13 = vsel %vm3257_vm1, %v3258_v3, 0 }
 0x213   : > { %v7621_v11 = vadd.f32 %v4789_v18, %v2375_v44  ;;  %5090 = vmatprep.subr.bf16.mxu1 %v8747_v26 }
 0x215   : > { %v3244_v62 = vpack.c.bf16 %v7621_v11, %v7616_v23  ;;  %5069 = vmatpush3.bf16.msra.mxu0 %v8748_v58 }
 0x216   : > { %5091 = vmatpush3.bf16.msra.mxu1 %v8749_v47  ;;  %5098 = vmatprep.subr.bf16.mxu0 %v8750_v52 }
 0x217   : > { %5120 = vmatprep.subr.bf16.mxu1 %v8751_v61 }
 0x218   : > { %3116 = vmatmul.mubr.bf16.vlgmr.msra.gmra.mrb[56].mxu0 %v7574_v43  ;;  %v8758_v43 = vld [vmem:[#allocation219_spill] sm:$0xff] }
 0x219   : > { %3156 = vmatmul.mubr.bf16.vlgmr.msra.gmra.mrb[56].mxu1 %v7577_v31  ;;  %5099 = vmatpush3.bf16.msra.mxu0 %v8752_v37  ;;  %v8761_v31 = vld [vmem:[#allocation222_spill] sm:$0xff] }
 0x21a   : > { %5121 = vmatpush3.bf16.msra.mxu1 %v8753_v8  ;;  %5100 = vmatprep.subr.bf16.mxu0 %v8754_v17 }
 0x21b   : > { %5122 = vmatprep.subr.bf16.mxu1 %v8755_v28  ;;  %3195 = vmatprep.mubr.bf16.mxu0 %v2569_v19 }
 0x21c   : > { %3235 = vmatprep.mubr.bf16.mxu1 %v2570_v25 }
 0x21d   : > { %5101 = vmatpush3.bf16.msra.mxu0 %v8756_v29 }
 0x21e   : > { %5123 = vmatpush3.bf16.msra.mxu1 %v8757_v35  ;;  %5102 = vmatprep.subr.bf16.mxu0 %v8758_v43 }
 0x21f   : > { %5124 = vmatprep.subr.bf16.mxu1 %v8759_v21 }
 0x221   : > { %5103 = vmatpush3.bf16.msra.mxu0 %v8760_v33 }
 0x222   : > { %5125 = vmatpush3.bf16.msra.mxu1 %v8761_v31  ;;  %5104 = vmatprep.subr.bf16.mxu0 %v8762_v32  ;;  %v3306_v32 = vld [vmem:[%s8775_s26] sm:$0x3] }
 0x223   : > { %5126 = vmatprep.subr.bf16.mxu1 %v8763_v36 }
 0x225   : > { %5105 = vmatpush3.bf16.msra.mxu0 %v8764_v40  ;;  %v3319_v40 = vand.u32 %v3306_v32, %v3259_v13 }
 0x226   : > { %5127 = vmatpush3.bf16.msra.mxu1 %v8765_v57  ;;  %5106 = vmatprep.subr.bf16.mxu0 %v8766_v10  ;;  %v5393_v57 = vld [vmem:[%s8776_s29] sm:$0xff]  }
 0x227   : > { %5128 = vmatprep.subr.bf16.mxu1 %v8767_v50 }
 0x229   : > { %5107 = vmatpush3.bf16.msra.mxu0 %v8768_v30 }
 0x22a   : > { %5129 = vmatpush3.bf16.msra.mxu1 %v8769_v39  ;;  %5108 = vmatprep.subr.bf16.mxu0 %v8770_v60 }
 0x22b   : > { %v4806_v20 = vpop.f32.mrb[32].mxu0  ;;  %5130 = vmatprep.subr.bf16.mxu1 %v8771_v59 }
 0x22c   : > { %v4828_v42 = vpop.f32.mrb[32].mxu1  ;;  %v4807_v4 = vpop.f32.mrb[33].mxu0 }
 0x22d   : > { %v4808_v24 = vadd.f32 %v4807_v4, %v4806_v20  ;;  %v4829_v53 = vpop.f32.mrb[33].mxu1  ;;  %v4809_v5 = vpop.f32.mrb[34].mxu0  ;;  %5109 = vmatpush3.bf16.msra.mxu0 %v8772_v38 }
 0x22e   : > { %v4830_v55 = vadd.f32 %v4829_v53, %v4828_v42  ;;  %v4831_v7 = vpop.f32.mrb[34].mxu1  ;;  %5131 = vmatpush3.bf16.msra.mxu1 %v8773_v12  ;;  %v4810_v16 = vpop.f32.mrb[35].mxu0  ;;  %5110 = vmatprep.subr.bf16.mxu0 %v7247_v54  ;;  %v5590_v54 = vmov 0.0  }
 0x22f   : > { %v4832_v6 = vpop.f32.mrb[35].mxu1  ;;  %5132 = vmatprep.subr.bf16.mxu1 %v7253_v48  ;;  %v3261_v48 = vand.u32 %v3259_v13, %v3243_v9 }
 0x230   : > { %v2678_v34 = vadd.f32 %v4830_v55, %v4808_v24 }
 0x231   : > { %5111 = vmatpush3.bf16.msra.mxu0 %v7261_v1 }
 0x232   : > { %5133 = vmatpush3.bf16.msra.mxu1 %v7268_v51  ;;  %5112 = vmatprep.subr.bf16.mxu0 %v7270_v2 }
 0x233   : > { %5134 = vmatprep.subr.bf16.mxu1 %v7275_v15 }
 0x235   : > { %5113 = vmatpush3.bf16.msra.mxu0 %v7282_v41 }
 0x236   : > { %5135 = vmatpush3.bf16.msra.mxu1 %v7286_v0  ;;  %5196 = vmatprep.subr.bf16.mxu0 %v5590_v54 }
 0x237   : > { %5202 = vmatprep.subr.bf16.mxu1 %v5590_v54 }
 0x238   : > { %3196 = vmatmul.mubr.bf16.vlgmr.msra.gmra.mrb[60].mxu0 %v7625_v27 }
 0x239   : > { %3236 = vmatmul.mubr.bf16.vlgmr.msra.gmra.mrb[60].mxu1 %v7628_v46  ;;  %5197 = vmatpush3.bf16.msra.mxu0 %v3261_v48 }
 0x23a   : > { %5198 = vmatprep.mubr.msk.bf16.mxu0 %vm5591_vm2, %v5590_v54  ;;  %5204 = vmatprep.mubr.msk.bf16.mxu1 %vm5591_vm2, %v5590_v54 }
 0x23b   : > { %5208 = vmatprep.subr.bf16.mxu0 %v5590_v54  ;;  %5203 = vmatpush3.bf16.msra.mxu1 %v3319_v40  ;;  %v4381_v40 = vld [vmem:[%s8779_s8] ss:$0 sm:$0xff]  ;;  %s8784_s8 = sld [smem:[#allocation238_spill]] }
 0x23c   : > { %5214 = vmatprep.subr.bf16.mxu1 %v5590_v54 }
 0x240   : > { %5199 = vmatmul.mubr.msk.bf16.vlgmr.msra.gmra.mrb[64].mxu0 %vm3252_vm3, %v3244_v62 }
 0x241   : > { %5210 = vmatprep.mubr.msk.bf16.mxu0 %vm5591_vm2, %v5590_v54  ;;  %5209 = vmatpush3.bf16.msra.mxu0 %v5393_v57 }
 0x242   : > { %5254 = vmatprep.subr.bf16.mxu0 %v5590_v54 }
 0x24b   : > { %v4850_v15 = vpop.f32.mrb[36].mxu0 }
 0x24c   : > { %v4872_v1 = vpop.f32.mrb[36].mxu1  ;;  %v4851_v51 = vpop.f32.mrb[37].mxu0 }
 0x24d   : > { %v4852_v2 = vadd.f32 %v4851_v51, %v4850_v15  ;;  %v4873_v41 = vpop.f32.mrb[37].mxu1  ;;  %v4853_v0 = vpop.f32.mrb[38].mxu0 }
 0x24e   : > { %v4874_v14 = vadd.f32 %v4873_v41, %v4872_v1  ;;  %v4875_v18 = vpop.f32.mrb[38].mxu1  ;;  %v4854_v22 = vpop.f32.mrb[39].mxu0 }
 0x24f   : > { %v2718_v44 = vadd.f32 %v4852_v2, %v2678_v34  ;;  %v4876_v45 = vpop.f32.mrb[39].mxu1 }
 0x251   : > { %v2758_v49 = vadd.f32 %v4874_v14, %v2718_v44 }
 0x26b   : > { %v4894_v56 = vpop.f32.mrb[40].mxu0 }
 0x26c   : > { %v4916_v26 = vpop.f32.mrb[40].mxu1  ;;  %v4895_v23 = vpop.f32.mrb[41].mxu0 }
 0x26d   : > { %v4896_v11 = vadd.f32 %v4895_v23, %v4894_v56  ;;  %v4917_v27 = vpop.f32.mrb[41].mxu1  ;;  %v4897_v46 = vpop.f32.mrb[42].mxu0 }
 0x26e   : > { %v4918_v62 = vadd.f32 %v4917_v27, %v4916_v26  ;;  %v4919_v58 = vpop.f32.mrb[42].mxu1  ;;  %v4898_v47 = vpop.f32.mrb[43].mxu0 }
 0x26f   : > { %v2798_v52 = vadd.f32 %v4896_v11, %v2758_v49  ;;  %v4920_v61 = vpop.f32.mrb[43].mxu1 }
 0x271   : > { %v2838_v19 = vadd.f32 %v4918_v62, %v2798_v52 }
 0x28b   : > { %v4938_v25 = vpop.f32.mrb[44].mxu0 }
 0x28c   : > { %v4960_v37 = vpop.f32.mrb[44].mxu1  ;;  %v4939_v8 = vpop.f32.mrb[45].mxu0 }
 0x28d   : > { %v4940_v17 = vadd.f32 %v4939_v8, %v4938_v25  ;;  %v4961_v28 = vpop.f32.mrb[45].mxu1  ;;  %v4941_v29 = vpop.f32.mrb[46].mxu0  ;;  %v4379_v25 = vld [vmem:[%s8777_s1] ss:$0 sm:$0xff]  ;;  %s7789_s1 = sand.u32 1, %s5578_s2  }
 0x28e   : > { %v4962_v35 = vadd.f32 %v4961_v28, %v4960_v37  ;;  %v4963_v43 = vpop.f32.mrb[46].mxu1  ;;  %v4942_v21 = vpop.f32.mrb[47].mxu0  ;;  %v5394_v37 = vld [vmem:[%s8778_s10] sm:$0xff]   ;;  %s4344_s6 = sshll.u32 %s7789_s1, 2 }
 0x28f   : > { %v2878_v33 = vadd.f32 %v4940_v17, %v2838_v19  ;;  %v4964_v31 = vpop.f32.mrb[47].mxu1 }
 0x291   : > { %v2918_v36 = vadd.f32 %v4962_v35, %v2878_v33 }
 0x2ab   : > { %v4982_v10 = vpop.f32.mrb[48].mxu0 }
 0x2ac   : > { %v5004_v50 = vpop.f32.mrb[48].mxu1  ;;  %v4983_v30 = vpop.f32.mrb[49].mxu0 }
 0x2ad   : > { %v4984_v39 = vadd.f32 %v4983_v30, %v4982_v10  ;;  %v5005_v60 = vpop.f32.mrb[49].mxu1  ;;  %v4985_v20 = vpop.f32.mrb[50].mxu0 }
 0x2ae   : > { %v5006_v59 = vadd.f32 %v5005_v60, %v5004_v50  ;;  %v5007_v42 = vpop.f32.mrb[50].mxu1  ;;  %v4986_v4 = vpop.f32.mrb[51].mxu0  ;;  %v5396_v20 = vld [vmem:[%s8780_s12] sm:$0xff]  }
 0x2af   : > { %v2958_v24 = vadd.f32 %v4984_v39, %v2918_v36  ;;  %v5008_v53 = vpop.f32.mrb[51].mxu1  ;;  %v5395_v36 = vld [vmem:[%s8778_s10 + $0x8] sm:$0xff]   ;;  %v4383_v42 = vld [vmem:[%s8781_s3] ss:$0 sm:$0xff]  ;;  %s7795_s3 = scalar_lea.vmem [#allocation2], %s4344_s6  ;;  %s8311_s6 = scalar_lea.vmem [#allocation4], %s7789_s1 }
 0x2b0   : > { %v5397_v53 = vld [vmem:[%s8780_s12 + $0x8] sm:$0xff]   ;;  %s8787_s10 = scalar_lea.vmem [#allocation4], %s7789_s1 }
 0x2b1   : > { %v2998_v5 = vadd.f32 %v5006_v59, %v2958_v24  ;;  %s4165_s26 = sshll.u32 %s8787_s10, 4  ;;  %s7918_s26 = int_to_ptr.vmem [resolvable:$true] %s4165_s26 }
 0x2cb   : > { %v5026_v38 = vpop.f32.mrb[52].mxu0 }
 0x2cc   : > { %v5048_v55 = vpop.f32.mrb[52].mxu1  ;;  %v5027_v7 = vpop.f32.mrb[53].mxu0 }
 0x2cd   : > { %v5028_v12 = vadd.f32 %v5027_v7, %v5026_v38  ;;  %v5049_v16 = vpop.f32.mrb[53].mxu1  ;;  %v5029_v6 = vpop.f32.mrb[54].mxu0 }
 0x2ce   : > { %v5050_v63 = vadd.f32 %v5049_v16, %v5048_v55  ;;  %v5051_v3 = vpop.f32.mrb[54].mxu1  ;;  %v5030_v34 = vpop.f32.mrb[55].mxu0  ;;  %v5398_v16 = vld [vmem:[%s8780_s12 + $0x10] sm:$0xff]   ;;  %v5399_v6 = vld [vmem:[%s8780_s12 + $0x18] sm:$0xff]   ;;  %s5592_s12 = smov [#allocation4]  }
 0x2cf   : > { %v3038_v9 = vadd.f32 %v5028_v12, %v2998_v5  ;;  %v5052_v13 = vpop.f32.mrb[55].mxu1  ;;  %v5401_v3 = vld [vmem:[%s8782_s13 + $0x8] sm:$0xff]   ;;  %v5402_v34 = vld [vmem:[%s8782_s13 + $0x10] sm:$0xff]  }
 0x2d0   : > { %v5404_v13 = vld [vmem:[%s8782_s13 + $0x20] sm:$0xff]  }
 0x2d1   : > { %v3078_v48 = vadd.f32 %v5050_v63, %v3038_v9  ;;  %v5400_v63 = vld [vmem:[%s8782_s13] sm:$0xff]   ;;  %v5403_v9 = vld [vmem:[%s8782_s13 + $0x18] sm:$0xff]  }
 0x2eb   : > { %v5070_v15 = vpop.f32.mrb[56].mxu0 }
 0x2ec   : > { %v5092_v1 = vpop.f32.mrb[56].mxu1  ;;  %v5071_v51 = vpop.f32.mrb[57].mxu0 }
 0x2ed   : > { %v5072_v2 = vadd.f32 %v5071_v51, %v5070_v15  ;;  %v5093_v41 = vpop.f32.mrb[57].mxu1  ;;  %v5073_v0 = vpop.f32.mrb[58].mxu0  ;;  %v5406_v15 = vld [vmem:[%s8782_s13 + $0x30] sm:$0xff]   ;;  %v4386_v51 = vld [vmem:[%s8783_s11] ss:$0 sm:$0xff]  ;;  %s5432_s11 = scalar_lea.vmem %s7918_s26, 16 }
 0x2ee   : > { %v5094_v14 = vadd.f32 %v5093_v41, %v5092_v1  ;;  %v5095_v18 = vpop.f32.mrb[58].mxu1  ;;  %v5074_v22 = vpop.f32.mrb[59].mxu0  ;;  %v5407_v1 = vld [vmem:[%s8782_s13 + $0x38] sm:$0xff]   ;;  %p5433_p11 = scmp.ne.s32.totalorder %s7918_s26, %s5432_s11 }
 0x2ef   : > { %v3118_v44 = vadd.f32 %v5072_v2, %v3078_v48  ;;  %v5096_v45 = vpop.f32.mrb[59].mxu1  ;;  %v5405_v48 = vld [vmem:[%s8782_s13 + $0x28] sm:$0xff]   ;;  %s5436_s13 = sshll.u32 %s5592_s12, 4  ;;  %s5437_s13 = int_to_ptr.vmem [resolvable:$false] %s5436_s13 }
 0x2f0   : > { %p5434_p12 = pnand %p5433_p11, %p5766_p5  ;;  %s5438_s29 = scalar_lea.vmem %s5437_s13, 32 }
 0x2f1   : > { %v3158_v49 = vadd.f32 %v5094_v14, %v3118_v44  ;;  %p5439_p0 = scmp.lt.s32.totalorder %s7918_s26, %s5437_s13  ;;  %p5440_p1 = scmp.lt.s32.totalorder %s5438_s29, %s5432_s11 }
 0x2f2   : > { %p5435_p13 = pneg %p5434_p12 }
 0x2f3   : > { %p5441_p2 = por %p5440_p1, %p5439_p0 }
 0x2f5   : > { %p5442_p3 = pnand %p5441_p2, %p5435_p13 }
 0x30b   : > { %v5114_v56 = vpop.f32.mrb[60].mxu0 }
 0x30c   : > { %v5136_v26 = vpop.f32.mrb[60].mxu1  ;;  %v5115_v23 = vpop.f32.mrb[61].mxu0 }
 0x30d   : > { %v5116_v11 = vadd.f32 %v5115_v23, %v5114_v56  ;;  %v5137_v27 = vpop.f32.mrb[61].mxu1  ;;  %v5117_v46 = vpop.f32.mrb[62].mxu0 }
 0x30e   : > { %v5138_v62 = vadd.f32 %v5137_v27, %v5136_v26  ;;  %v5139_v58 = vpop.f32.mrb[62].mxu1  ;;  %v5118_v47 = vpop.f32.mrb[63].mxu0  ;;  %v3677_v27 = vld [vmem:[%s8784_s8] sm:$0x3]  ;;  %s801_s8 = scalar_lea.vmem %s8076_s18, %s5800_s9 }
 0x30f   : > { %v3198_v52 = vadd.f32 %v5116_v11, %v3158_v49  ;;  %v5140_v61 = vpop.f32.mrb[63].mxu1 }
 0x311   : > { %v3238_v19 = vadd.f32 %v5138_v62, %v3198_v52 }
 0x313   : > { %v3307_v8 = vpack.c.bf16 %v3238_v19, %v3238_v19  ;;  %v3297_v17 = vpop.f32.mrb[64].mxu0 }
 0x314   : > { %v3298_v28 = vadd.f32 %v4379_v25, %v3297_v17  ;;  %v5200_v29 = vpop.f32.mrb[65].mxu0 }
 0x315   : > { %v3300_v35 = vpop.f32.mrb[66].mxu0  ;;  %5205 = vmatmul.mubr.msk.bf16.vlgmr.msra.gmra.mrb[64].mxu1 %vm3252_vm3, %v3307_v8 }
 0x316   : > { %v3301_v43 = vadd.f32 %v4379_v25, %v3300_v35  ;;  %v5201_v21 = vpop.f32.mrb[67].mxu0  ;;  %5215 = vmatpush3.bf16.msra.mxu1 %v5394_v37  ;;  %5218 = vmatprep.mubr.msk.bf16.mxu1 %vm5591_vm2, %v5590_v54  ;;  %v3304_v33 = vmax.f32 %v3298_v28, 0.0  ;;  %v4404_v25 = vld [vmem:[%s8785_s14] ss:$0 sm:$0xff] }
 0x317   : > { %5216 = vmatprep.subr.bf16.mxu1 %v5590_v54  ;;  %v5411_v21 = vld [vmem:[%s8078_s20 + $0x8] sm:$0xff]  }
 0x318   : > { %v3305_v31 = vmax.f32 %v3301_v43, 0.0  ;;  %v5409_v43 = vld [vmem:[%s8078_s20] sm:$0xff]  }
 0x31a   : > { %v3364_v32 = vpack.c.bf16 %v3305_v31, %v3304_v33  ;;  %5217 = vmatpush3.bf16.msra.mxu1 %v5395_v36  ;;  %v5413_v33 = vld [vmem:[%s8078_s20 + $0x10] sm:$0xff]   ;;  %v5415_v31 = vld [vmem:[%s8078_s20 + $0x18] sm:$0xff]   ;;  %v5419_v36 = vld [vmem:[%s8078_s20 + $0x28] sm:$0xff]  }
 0x31b   : > { %5222 = vmatprep.subr.bf16.mxu1 %v5590_v54 }
 0x31c   : > { %5211 = vmatmul.mubr.msk.bf16.vlgmr.msra.gmra.mrb[68].mxu0 %vm3378_vm4, %v3364_v32  ;;  %v5417_v32 = vld [vmem:[%s8078_s20 + $0x20] sm:$0xff]  }
 0x31d   : > { %5256 = vmatprep.mubr.msk.bf16.mxu0 %vm5591_vm2, %v5590_v54 }
 0x3e8   : > { %v3355_v57 = vpop.f32.mrb[64].mxu1 }
 0x3e9   : > { %v3356_v10 = vadd.f32 %v4381_v40, %v3355_v57  ;;  %v5206_v50 = vpop.f32.mrb[65].mxu1 }
 0x3ea   : > { %v3358_v30 = vpop.f32.mrb[66].mxu1 }
 0x3eb   : > { %v3361_v39 = vmax.f32 %v3356_v10, 0.0  ;;  %v5207_v60 = vpop.f32.mrb[67].mxu1  ;;  %v5408_v10 = vld [vmem:[%s8074_s16] sm:$0xff]   ;;  %v5410_v30 = vld [vmem:[%s8074_s16 + $0x8] sm:$0xff]  }
 0x3ec   : > { %v5414_v60 = vld [vmem:[%s8074_s16 + $0x18] sm:$0xff]  }
 0x3ed   : > { %v3427_v59 = vpack.c.bf16 %v3361_v39, %v3361_v39  ;;  %v5412_v39 = vld [vmem:[%s8074_s16 + $0x10] sm:$0xff]  }
 0x3ef   : > { %v3416_v4 = vpop.f32.mrb[68].mxu0  ;;  %5219 = vmatmul.mubr.msk.bf16.vlgmr.msra.gmra.mrb[68].mxu1 %vm3447_vm5, %v3427_v59  ;;  %v5418_v59 = vld [vmem:[%s8074_s16 + $0x28] sm:$0xff]  }
 0x3f0   : > { %5223 = vmatpush3.bf16.msra.mxu1 %v5396_v20  ;;  %v5212_v24 = vpop.f32.mrb[69].mxu0  ;;  %5230 = vmatprep.mubr.msk.bf16.mxu1 %vm5591_vm2, %v5590_v54  ;;  %v3417_v38 = vadd.f32 %v4383_v42, %v3416_v4  ;;  %v5416_v20 = vld [vmem:[%s8074_s16 + $0x20] sm:$0xff]   ;;  %v5421_v4 = vld [vmem:[%s8078_s20 + $0x30] sm:$0xff]  }
 0x3f1   : > { %v3419_v5 = vpop.f32.mrb[70].mxu0  ;;  %5224 = vmatprep.subr.bf16.mxu1 %v5590_v54  ;;  %v5422_v24 = vld [vmem:[%s8074_s16 + $0x38] sm:$0xff]  }
 0x3f2   : > { %v3420_v55 = vadd.f32 %v4383_v42, %v3419_v5  ;;  %v5213_v7 = vpop.f32.mrb[71].mxu0  ;;  %v5420_v42 = vld [vmem:[%s8074_s16 + $0x30] sm:$0xff]   ;;  %v3737_v5 = vld [vmem:[%s8786_s15] sm:$0x1] }
 0x3f4   : > { %v3499_v12 = vpack.c.bf16 %v3420_v55, %v3417_v38  ;;  %5225 = vmatpush3.bf16.msra.mxu1 %v5397_v53  ;;  %v5423_v53 = vld [vmem:[%s8078_s20 + $0x38] sm:$0xff]  }
 0x3f5   : > { %5226 = vmatprep.subr.bf16.mxu1 %v5590_v54 }
 0x3f8   : > { %5227 = vmatpush3.bf16.msra.mxu1 %v5398_v16 }
 0x3f9   : > { %5228 = vmatprep.subr.bf16.mxu1 %v5590_v54 }
 0x3fc   : > { %5229 = vmatpush3.bf16.msra.mxu1 %v5399_v6 }
 0x3fd   : > { %5234 = vmatprep.subr.bf16.mxu1 %v5590_v54 }
 0x3ff   : > { %5231 = vmatmul.mubr.msk.bf16.vlgmr.msra.gmra.mrb[72].mxu1 %vm3524_vm6, %v3499_v12 }
 0x400   : > { %5235 = vmatpush3.bf16.msra.mxu1 %v5400_v63  ;;  %5250 = vmatprep.mubr.msk.bf16.mxu1 %vm5591_vm2, %v5590_v54 }
 0x401   : > { %5236 = vmatprep.subr.bf16.mxu1 %v5590_v54 }
 0x404   : > { %5237 = vmatpush3.bf16.msra.mxu1 %v5401_v3  ;;  %v5424_v3 = vld [vmem:[%s8077_s19] sm:$0xff]  }
 0x405   : > { %5238 = vmatprep.subr.bf16.mxu1 %v5590_v54 }
 0x408   : > { %5239 = vmatpush3.bf16.msra.mxu1 %v5402_v34 }
 0x409   : > { %5240 = vmatprep.subr.bf16.mxu1 %v5590_v54 }
 0x40c   : > { %5241 = vmatpush3.bf16.msra.mxu1 %v5403_v9  ;;  %v5425_v9 = vld [vmem:[%s8077_s19 + $0x8] sm:$0xff]  }
 0x40d   : > { %5242 = vmatprep.subr.bf16.mxu1 %v5590_v54 }
 0x410   : > { %5243 = vmatpush3.bf16.msra.mxu1 %v5404_v13  ;;  %v5426_v13 = vld [vmem:[%s8077_s19 + $0x10] sm:$0xff]  }
 0x411   : > { %5244 = vmatprep.subr.bf16.mxu1 %v5590_v54 }
 0x414   : > { %5245 = vmatpush3.bf16.msra.mxu1 %v5405_v48  ;;  %v5427_v48 = vld [vmem:[%s8077_s19 + $0x18] sm:$0xff]  }
 0x415   : > { %5246 = vmatprep.subr.bf16.mxu1 %v5590_v54 }
 0x418   : > { %5247 = vmatpush3.bf16.msra.mxu1 %v5406_v15  ;;  %v5428_v15 = vld [vmem:[%s8077_s19 + $0x20] sm:$0xff]  }
 0x419   : > { %5248 = vmatprep.subr.bf16.mxu1 %v5590_v54 }
 0x41c   : > { %5249 = vmatpush3.bf16.msra.mxu1 %v5407_v1  ;;  %v5429_v1 = vld [vmem:[%s8077_s19 + $0x28] sm:$0xff]  }
 0x41d   : > { %5286 = vmatprep.subr.bf16.mxu1 %v5590_v54 }
 0x4c2   : > { %v3485_v2 = vpop.f32.mrb[68].mxu1 }
 0x4c3   : > { %v3486_v41 = vadd.f32 %v4386_v51, %v3485_v2  ;;  %v5220_v0 = vpop.f32.mrb[69].mxu1  ;;  %v3911_v51 = vld [vmem:[%s801_s8] sm:$0x1]  ;;  %s7914_s8 = scalar_lea.hbm %s8081_s23, %s7908_s5 }
 0x4c4   : > { %v3488_v14 = vpop.f32.mrb[70].mxu1  ;;  %v3912_v2 = vmul.f32 0.01, %v3911_v51 }
 0x4c5   : > { %v3587_v18 = vpack.c.bf16 %v3486_v41, %v3486_v41  ;;  %v5221_v22 = vpop.f32.mrb[71].mxu1  ;;  %v5430_v41 = vld [vmem:[%s8077_s19 + $0x30] sm:$0xff]   ;;  %v5431_v14 = vld [vmem:[%s8077_s19 + $0x38] sm:$0xff]  }
 0x4c6   : > { %v3913_v0 = vmax.f32 %v3911_v51, %v3912_v2 }
 0x4c7   : > { %5251 = vmatmul.mubr.bf16.vlgmr.msra.gmra.mrb[76].mxu1 %v3587_v18  ;;  %v3759_v46 = vsel %vm3257_vm1, %v3587_v18, 0 }
 0x4c8   : > { %5302 = vmatprep.mubr.msk.bf16.mxu1 %vm5591_vm2, %v5590_v54  ;;  %5287 = vmatpush3.bf16.msra.mxu1 %v5409_v43  ;;  %v3930_v18 = vpack.c.bf16 %v3913_v0, %v3913_v0 }
 0x4c9   : > { %5288 = vmatprep.subr.bf16.mxu1 %v5590_v54 }
 0x4cc   : > { %5289 = vmatpush3.bf16.msra.mxu1 %v5411_v21 }
 0x4cd   : > { %5290 = vmatprep.subr.bf16.mxu1 %v5590_v54 }
 0x4d0   : > { %5291 = vmatpush3.bf16.msra.mxu1 %v5413_v33 }
 0x4d1   : > { %5292 = vmatprep.subr.bf16.mxu1 %v5590_v54 }
 0x4d2   : > { %v3562_v44 = vpop.f32.mrb[72].mxu1 }
 0x4d3   : > { %v5232_v45 = vpop.f32.mrb[73].mxu1  ;;  %v3569_v56 = vmax.f32 %v3562_v44, 0.0 }
 0x4d4   : > { %v3565_v49 = vpop.f32.mrb[74].mxu1  ;;  %5293 = vmatpush3.bf16.msra.mxu1 %v5415_v31 }
 0x4d5   : > { %v3570_v26 = vmax.f32 %v3565_v49, 0.0  ;;  %v5233_v23 = vpop.f32.mrb[75].mxu1  ;;  %5294 = vmatprep.subr.bf16.mxu1 %v5590_v54 }
 0x4d7   : > { %v3678_v11 = vpack.c.bf16 %v3570_v26, %v3569_v56 }
 0x4d8   : > { %5295 = vmatpush3.bf16.msra.mxu1 %v5417_v32 }
 0x4d9   : > { %5255 = vmatpush3.bf16.msra.mxu0 %v3678_v11  ;;  %5296 = vmatprep.subr.bf16.mxu1 %v5590_v54 }
 0x4da   : > { %5260 = vmatprep.subr.bf16.mxu0 %v5590_v54 }
 0x4dc   : > { %5257 = vmatmul.mubr.msk.bf16.vlgmr.msra.gmra.mrb[72].mxu0 %vm3378_vm4, %v3677_v27  ;;  %5297 = vmatpush3.bf16.msra.mxu1 %v5419_v36 }
 0x4dd   : > { %5261 = vmatpush3.bf16.msra.mxu0 %v3759_v46  ;;  %5262 = vmatprep.mubr.msk.bf16.mxu0 %vm5591_vm2, %v5590_v54 }
 0x4de   : > { %5266 = vmatprep.subr.bf16.mxu0 %v5590_v54  ;;  %5298 = vmatprep.subr.bf16.mxu1 %v5590_v54 }
 0x4e0   : > { %5299 = vmatpush3.bf16.msra.mxu1 %v5421_v4 }
 0x4e1   : > { %5300 = vmatprep.subr.bf16.mxu1 %v5590_v54 }
 0x4e4   : > { %5301 = vmatpush3.bf16.msra.mxu1 %v5423_v53 }
 0x59a   : > { %v3670_v62 = vpop.f32.mrb[76].mxu1 }
 0x59b   : > { %v5252_v58 = vpop.f32.mrb[77].mxu1  ;;  %v3676_v61 = vmax.f32 %v3670_v62, 0.0 }
 0x59c   : > { %v3673_v47 = vpop.f32.mrb[78].mxu1 }
 0x59d   : > { %v5253_v52 = vpop.f32.mrb[79].mxu1 }
 0x5af   : > { %v3716_v19 = vpop.f32.mrb[72].mxu0 }
 0x5b0   : > { %v3722_v37 = vadd.f32 %v3716_v19, %v3676_v61  ;;  %v5258_v8 = vpop.f32.mrb[73].mxu0 }
 0x5b1   : > { %v3719_v17 = vpop.f32.mrb[74].mxu0 }
 0x5b2   : > { %3723 = vst [vmem:[%s7795_s3] sm:$0xf] %v3722_v37  ;;  %v5259_v28 = vpop.f32.mrb[75].mxu0  ;;  %v3731_v29 = vmul.f32 %v4404_v25, %v3722_v37 }
 0x5b4   : > { %v3733_v35 = vsel %vm3732_vm7, %v3731_v29, 0.0 }
 0x5b5   : > { %3734 = vadd.xlane.f32.xlu0 %v3733_v35 }
 0x642   : > { %v3735_v40 = vpop.xlane.xlu0 %3734 }
 0x643   : > { %v3736_v57 = vpack.c.bf16 %v3735_v40, %v3735_v40 }
 0x645   : > { %3738 = vxpose.xlu0.c.b16.start.end [1/1] (short) (narrow) %v3736_v57, 16 }
 0x6ab   : > { %v3746_v50 = vpop.trf.xlu0 }
 0x6ac   : > { %5263 = vmatmul.mubr.msk.bf16.vlgmr.msra.gmra.mrb[76].mxu0 %vm3754_vm8, %v3746_v50 }
 0x6ad   : > { %5267 = vmatpush3.bf16.msra.mxu0 %v5408_v10  ;;  %5282 = vmatprep.mubr.msk.bf16.mxu0 %vm5591_vm2, %v5590_v54 }
 0x6ae   : > { %5268 = vmatprep.subr.bf16.mxu0 %v5590_v54 }
 0x6b1   : > { %5269 = vmatpush3.bf16.msra.mxu0 %v5410_v30 }
 0x6b2   : > { %5270 = vmatprep.subr.bf16.mxu0 %v5590_v54 }
 0x6b5   : > { %5271 = vmatpush3.bf16.msra.mxu0 %v5412_v39 }
 0x6b6   : > { %5272 = vmatprep.subr.bf16.mxu0 %v5590_v54 }
 0x6b9   : > { %5273 = vmatpush3.bf16.msra.mxu0 %v5414_v60 }
 0x6ba   : > { %5274 = vmatprep.subr.bf16.mxu0 %v5590_v54 }
 0x6bd   : > { %5275 = vmatpush3.bf16.msra.mxu0 %v5416_v20 }
 0x6be   : > { %5276 = vmatprep.subr.bf16.mxu0 %v5590_v54 }
 0x6c1   : > { %5277 = vmatpush3.bf16.msra.mxu0 %v5418_v59 }
 0x6c2   : > { %5278 = vmatprep.subr.bf16.mxu0 %v5590_v54 }
 0x6c5   : > { %5279 = vmatpush3.bf16.msra.mxu0 %v5420_v42 }
 0x6c6   : > { %5280 = vmatprep.subr.bf16.mxu0 %v5590_v54 }
 0x6c9   : > { %5281 = vmatpush3.bf16.msra.mxu0 %v5422_v24 }
 0x6ca   : > { %5306 = vmatprep.subr.bf16.mxu0 %v5590_v54 }
 0x77f   : > { %v3795_v38 = vpop.f32.mrb[76].mxu0 }
 0x780   : > { %v3796_v55 = vadd.f32 %v3795_v38, %v3737_v5  ;;  %v5264_v7 = vpop.f32.mrb[77].mxu0 }
 0x781   : > { %v3798_v12 = vpop.f32.mrb[78].mxu0 }
 0x782   : > { %v3802_v16 = vmul.f32 0.01, %v3796_v55  ;;  %v5265_v6 = vpop.f32.mrb[79].mxu0  ;;  %3801 = vst [vmem:[%s8311_s6] sm:$0x1] %v3796_v55  ;;  %s4131_s6 = sand.u32 1, %s5747_s7  }
 0x783   : > { %s7921_s9 = scalar_lea.sflag [#allocation5], %s4131_s6 }
 0x784   : > { %v3803_v63 = vmax.f32 %v3796_v55, %v3802_v16 }
 0x786   : > { %v3820_v34 = vpack.c.bf16 %v3803_v63, %v3803_v63 }
 0x788   : > { %5283 = vmatmul.mubr.bf16.vlgmr.msra.gmra.mrb[80].mxu0 %v3820_v34  ;;  %5303 = vmatmul.mubr.bf16.vlgmr.msra.gmra.mrb[80].mxu1 %v3820_v34 }
 0x789   : > { %5307 = vmatpush3.bf16.msra.mxu0 %v5424_v3  ;;  %5322 = vmatprep.mubr.msk.bf16.mxu0 %vm5591_vm2, %v5590_v54 }
 0x78a   : > { %5308 = vmatprep.subr.bf16.mxu0 %v5590_v54 }
 0x78d   : > { %5309 = vmatpush3.bf16.msra.mxu0 %v5425_v9 }
 0x78e   : > { %5310 = vmatprep.subr.bf16.mxu0 %v5590_v54 }
 0x791   : > { %5311 = vmatpush3.bf16.msra.mxu0 %v5426_v13 }
 0x792   : > { %5312 = vmatprep.subr.bf16.mxu0 %v5590_v54 }
 0x795   : > { %5313 = vmatpush3.bf16.msra.mxu0 %v5427_v48 }
 0x796   : > { %5314 = vmatprep.subr.bf16.mxu0 %v5590_v54 }
 0x799   : > { %5315 = vmatpush3.bf16.msra.mxu0 %v5428_v15 }
 0x79a   : > { %5316 = vmatprep.subr.bf16.mxu0 %v5590_v54 }
 0x79d   : > { %5317 = vmatpush3.bf16.msra.mxu0 %v5429_v1 }
 0x79e   : > { %5318 = vmatprep.subr.bf16.mxu0 %v5590_v54 }
 0x7a1   : > { %5319 = vmatpush3.bf16.msra.mxu0 %v5430_v41 }
 0x7a2   : > { %5320 = vmatprep.subr.bf16.mxu0 %v5590_v54 }
 0x7a5   : > { %5321 = vmatpush3.bf16.msra.mxu0 %v5431_v14 }
 0x7a8   : > { %5323 = vmatmul.mubr.bf16.vlgmr.msra.gmra.mrb[84].mxu0 %v3930_v18 }
 0x7a9   : > { %5445 = shalt.err (!%p5442_p3)
}
 0x7aa   : > { %s5446_s6 = scalar_lea.hbm %s7914_s8, 16  ;;  %s5450_s12 = scalar_lea.hbm %s8081_s23, 32 }
 0x7ab   : > { %p5447_p4 = scmp.ne.s32.totalorder %s7914_s8, %s5446_s6  ;;  %p5451_p9 = scmp.lt.u32.totalorder %s7914_s8, %s8081_s23 }
 0x7ac   : > { %p5452_p10 = scmp.lt.u32.totalorder %s5450_s12, %s5446_s6  ;;  %p5454_p12 = scmp.lt.u32.totalorder %s5446_s6, %s7914_s8 }
 0x7ad   : > { %p5448_p7 = pnand %p5447_p4, %p5766_p5 }
 0x7ae   : > { %p5453_p11 = por %p5452_p10, %p5451_p9 }
 0x7af   : > { %p5449_p8 = pneg %p5448_p7 }
 0x7b0   : > { %p5455_p13 = por %p5454_p12, %p5453_p11 }
 0x7b2   : > { %p5456_p0 = pnand %p5455_p13, %p5449_p8 }
 0x7b4   : > { %5459 = shalt.err (!%p5456_p0)
}
 0x7b5   : > { %5327 = dma.vmem_to_hbm [thread:$0]  (%p5766_p5), %s7918_s26, 16, %s7914_s8, %s7921_s9  }
 0x7b6   : > { %s8788_s11 = sshll.u32 %s5747_s7, 6  ;;  %s4152_s6 = sshll.u32 %s7795_s3, 4  ;;  %s4153_s6 = int_to_ptr.vmem [resolvable:$true] %s4152_s6 }
 0x7b7   : > { %s7950_s28 = scalar_lea.hbm %s8080_s22, %s8788_s11  ;;  %s4127_s10 = scalar_lea.sflag [#allocation3], %s7789_s1 }
 0x7b8   : > { %s5460_s12 = scalar_lea.vmem %s4153_s6, 64  ;;  %s5593_s13 = smov [#allocation2]  }
 0x7b9   : > { %p5461_p1 = scmp.ne.s32.totalorder %s4153_s6, %s5460_s12  ;;  %s5464_s14 = sshll.u32 %s5593_s13, 4  ;;  %s5465_s14 = int_to_ptr.vmem [resolvable:$false] %s5464_s14 }
 0x7ba   : > { %s5466_s15 = scalar_lea.vmem %s5465_s14, 128  ;;  %p5467_p4 = scmp.lt.s32.totalorder %s4153_s6, %s5465_s14 }
 0x7bb   : > { %p5462_p2 = pnand %p5461_p1, %p5766_p5  ;;  %p5468_p7 = scmp.lt.s32.totalorder %s5466_s15, %s5460_s12 }
 0x7bd   : > { %p5463_p3 = pneg %p5462_p2  ;;  %p5469_p8 = por %p5468_p7, %p5467_p4 }
 0x7bf   : > { %p5470_p9 = pnand %p5469_p8, %p5463_p3 }
 0x7c1   : > { %5473 = shalt.err (!%p5470_p9)
}
 0x7c2   : > { %s5474_s7 = scalar_lea.hbm %s7950_s28, 64  ;;  %s5478_s26 = scalar_lea.hbm %s8080_s22, 128 }
 0x7c3   : > { %p5475_p10 = scmp.ne.s32.totalorder %s7950_s28, %s5474_s7  ;;  %p5479_p13 = scmp.lt.u32.totalorder %s7950_s28, %s8080_s22 }
 0x7c4   : > { %p5480_p0 = scmp.lt.u32.totalorder %s5478_s26, %s5474_s7  ;;  %p5482_p2 = scmp.lt.u32.totalorder %s5474_s7, %s7950_s28 }
 0x7c5   : > { %p5476_p11 = pnand %p5475_p10, %p5766_p5 }
 0x7c6   : > { %p5481_p1 = por %p5480_p0, %p5479_p13 }
 0x7c7   : > { %p5477_p12 = pneg %p5476_p11 }
 0x7c8   : > { %p5483_p3 = por %p5482_p2, %p5481_p1 }
 0x7ca   : > { %p5484_p4 = pnand %p5483_p3, %p5477_p12 }
 0x7cc   : > { %5487 = shalt.err (!%p5484_p4)
}
 0x7cd   : > { %5326 = dma.vmem_to_hbm [thread:$0]  (%p5766_p5), %s4153_s6, 64, %s7950_s28, %s4127_s10   ;;  %v3821_v54 = vld [vmem:[%s8075_s17] sm:$0x1] }
 0x7ce   : > { %s787_s0 = scalar_lea.vmem [#allocation6], %s7789_s1  ;;  %s7981_s28 = scalar_lea.hbm %s8082_s24, %s7908_s5 }
 0x7cf   : > { %s4178_s12 = sshll.u32 %s787_s0, 4  ;;  %s5594_s10 = smov [#allocation6]   ;;  %s7975_s12 = int_to_ptr.vmem [resolvable:$true] %s4178_s12 }
 0x7d0   : > { %s5488_s6 = scalar_lea.vmem %s7975_s12, 16  ;;  %s5492_s3 = sshll.u32 %s5594_s10, 4  ;;  %s5493_s3 = int_to_ptr.vmem [resolvable:$false] %s5492_s3 }
 0x7d1   : > { %p5489_p7 = scmp.ne.s32.totalorder %s7975_s12, %s5488_s6  ;;  %s5494_s8 = scalar_lea.vmem %s5493_s3, 32 }
 0x7d2   : > { %p5495_p10 = scmp.lt.s32.totalorder %s7975_s12, %s5493_s3  ;;  %p5496_p11 = scmp.lt.s32.totalorder %s5494_s8, %s5488_s6 }
 0x7d3   : > { %p5490_p8 = pnand %p5489_p7, %p5766_p5 }
 0x7d4   : > { %p5497_p12 = por %p5496_p11, %p5495_p10 }
 0x7d5   : > { %p5491_p9 = pneg %p5490_p8 }
 0x7d7   : > { %p5498_p13 = pnand %p5497_p12, %p5491_p9 }
 0x85b   : > { %v3904_v22 = vpop.f32.mrb[80].mxu0  ;;  %v4029_v44 = vpop.f32.mrb[80].mxu1 }
 0x85c   : > { %v3905_v45 = vadd.f32 %v3904_v22, %v3821_v54  ;;  %v5284_v49 = vpop.f32.mrb[81].mxu0  ;;  %v5304_v56 = vpop.f32.mrb[81].mxu1 }
 0x85d   : > { %v3907_v26 = vpop.f32.mrb[82].mxu0  ;;  %v4032_v23 = vpop.f32.mrb[82].mxu1 }
 0x85e   : > { %3910 = vst [vmem:[%s787_s0] sm:$0x1] %v3905_v45  ;;  %v5285_v11 = vpop.f32.mrb[83].mxu0  ;;  %v5305_v27 = vpop.f32.mrb[83].mxu1 }
 0x85f   : > { %5501 = shalt.err (!%p5498_p13)
}
 0x860   : > { %s5502_s26 = scalar_lea.hbm %s7981_s28, 16  ;;  %s5506_s15 = scalar_lea.hbm %s8082_s24, 32 }
 0x861   : > { %p5503_p0 = scmp.ne.s32.totalorder %s7981_s28, %s5502_s26  ;;  %p5507_p3 = scmp.lt.u32.totalorder %s7981_s28, %s8082_s24 }
 0x862   : > { %p5508_p4 = scmp.lt.u32.totalorder %s5506_s15, %s5502_s26  ;;  %p5510_p8 = scmp.lt.u32.totalorder %s5502_s26, %s7981_s28 }
 0x863   : > { %p5504_p1 = pnand %p5503_p0, %p5766_p5 }
 0x864   : > { %p5509_p7 = por %p5508_p4, %p5507_p3 }
 0x865   : > { %p5505_p2 = pneg %p5504_p1 }
 0x866   : > { %p5511_p9 = por %p5510_p8, %p5509_p7 }
 0x868   : > { %p5512_p10 = pnand %p5511_p9, %p5505_p2 }
 0x86a   : > { %5515 = shalt.err (!%p5512_p10)
}
 0x86b   : > { %5328 = dma.vmem_to_hbm [thread:$0]  (%p5766_p5), %s7975_s12, 16, %s7981_s28, %s7921_s9   ;;  %v4123_v62 = vld [vmem:[%s8079_s21] sm:$0x1] }
 0x86c   : > { %s793_s6 = scalar_lea.vmem [#allocation7], %s7789_s1  ;;  %s8013_s26 = scalar_lea.hbm %s8083_s25, %s7908_s5 }
 0x86d   : > { %s4191_s10 = sshll.u32 %s793_s6, 4  ;;  %s4140_s9 = scalar_lea.sflag [#allocation8], %s7789_s1  ;;  %s8015_s10 = int_to_ptr.vmem [resolvable:$true] %s4191_s10 }
 0x86e   : > { %s5516_s12 = scalar_lea.vmem %s8015_s10, 16  ;;  %s5595_s28 = smov [#allocation7]  }
 0x86f   : > { %p5517_p11 = scmp.ne.s32.totalorder %s8015_s10, %s5516_s12  ;;  %s5520_s11 = sshll.u32 %s5595_s28, 4  ;;  %s5521_s11 = int_to_ptr.vmem [resolvable:$false] %s5520_s11 }
 0x870   : > { %s5522_s14 = scalar_lea.vmem %s5521_s11, 32  ;;  %p5523_p0 = scmp.lt.s32.totalorder %s8015_s10, %s5521_s11 }
 0x871   : > { %p5518_p12 = pnand %p5517_p11, %p5766_p5  ;;  %p5524_p1 = scmp.lt.s32.totalorder %s5522_s14, %s5516_s12 }
 0x873   : > { %p5519_p13 = pneg %p5518_p12  ;;  %p5525_p2 = por %p5524_p1, %p5523_p0 }
 0x875   : > { %p5526_p3 = pnand %p5525_p2, %p5519_p13 }
 0x87b   : > { %v4117_v46 = vpop.f32.mrb[84].mxu0 }
 0x87c   : > { %v4118_v58 = vadd.f32 %v4117_v46, %v4029_v44  ;;  %v5324_v47 = vpop.f32.mrb[85].mxu0 }
 0x87d   : > { %v4120_v52 = vpop.f32.mrb[86].mxu0 }
 0x87e   : > { %v4124_v61 = vadd.f32 %v4123_v62, %v4118_v58  ;;  %v5325_v19 = vpop.f32.mrb[87].mxu0 }
 0x880   : > { %4125 = vst [vmem:[%s793_s6] sm:$0x1] %v4124_v61 }
 0x881   : > { %5529 = shalt.err (!%p5526_p3)
}
 0x882   : > { %s5530_s1 = scalar_lea.hbm %s8013_s26, 16  ;;  %s5534_s29 = scalar_lea.hbm %s8083_s25, 32 }
 0x883   : > { %p5531_p4 = scmp.ne.s32.totalorder %s8013_s26, %s5530_s1  ;;  %p5535_p9 = scmp.lt.u32.totalorder %s8013_s26, %s8083_s25 }
 0x884   : > { %p5536_p10 = scmp.lt.u32.totalorder %s5534_s29, %s5530_s1  ;;  %p5538_p12 = scmp.lt.u32.totalorder %s5530_s1, %s8013_s26 }
 0x885   : > { %p5532_p7 = pnand %p5531_p4, %p5766_p5 }
 0x886   : > { %p5537_p11 = por %p5536_p10, %p5535_p9 }
 0x887   : > { %p5533_p8 = pneg %p5532_p7 }
 0x888   : > { %p5539_p13 = por %p5538_p12, %p5537_p11 }
 0x88a   : > { %p5540_p0 = pnand %p5539_p13, %p5533_p8 }
 0x88c   : > { %5543 = shalt.err (!%p5540_p0)
}
 0x88d   : > { %5329 = dma.vmem_to_hbm [thread:$0]  (%p5766_p5), %s8015_s10, 16, %s8013_s26, %s4140_s9  }
 0x88e PF: > { %s8789_s7 = sld [smem:[#allocation12_spill]]  ;;  %p5347_p1 = scmp.ge.s32.totalorder %s5586_s30, 2 }
 0x890   : > { %p5335_p2 = pnand %p5347_p1, %p5770_p6 }
 0x894   : > { %s4203_s3 = sand.u32 1, %s8789_s7  }
 0x895   : > { %s4204_s8 = scalar_lea.sflag [#allocation3], %s4203_s3 }
 0x896   : > { %5561 = dma.done.wait (!%p5335_p2), %s4204_s8, 64  }
 0x897   : > { %5563 = vsyncadd (!%p5335_p2), %s4204_s8, 4294967232  ;;  %s8791_s12 = sadd.s32 4294967294, %s5586_s30  }
 0x898   : > { %s4212_s28 = sand.u32 1, %s8791_s12  }
 0x899   : > { %s4213_s11 = scalar_lea.sflag [#allocation5], %s4212_s28 }
 0x89a   : > { %5565 = dma.done.wait (!%p5335_p2), %s4213_s11, 32  }
 0x89b   : > { %5567 = vsyncadd (!%p5335_p2), %s4213_s11, 4294967264  ;;  %s4229_s4 = scalar_lea.sflag [#allocation8], %s4203_s3 }
 0x89c   : > { %5569 = dma.done.wait (!%p5335_p2), %s4229_s4, 16  }
 0x89d   : > { %5571 = vsyncadd (!%p5335_p2), %s4229_s4, 4294967280  ;;  %s8792_s30 = sld [smem:[#allocation14_spill]]  ;;  %s8793_s10 = sld [smem:[#allocation13_spill]] }
 0x89e   : > { %s8794_s6 = sld [smem:[#allocation15_spill]]  ;;  %s8795_s29 = smov %s5578_s2 }
 0x8a3   : > { %p42_p5 = scmp.ge.s32.totalorder %s8792_s30, 4   ;;  %s8796_s2 = smov %s8793_s10 }
 0x8a5   :  { %44 = sbr.rel (!%p42_p5) target bundleno = 24 (0x18), region = 195 }
 0x8ac   :  { %4233 = vsyncpa [#allocation3], 1 }
 0x8ad   :  { %4235 = vsyncpa [#allocation3 + $0x1], 1 }
 0x8ae   :  { %4236 = vsyncpa [#allocation5], 1 }
 0x8af   :  { %4238 = vsyncpa [#allocation5 + $0x1], 1 }
 0x8b0   :  { %4239 = vsyncpa [#allocation8], 1 }
 0x8b1   :  { %4241 = vsyncpa [#allocation8 + $0x1], 1 }

</bundles_post_ra>
